<compile_context>
chip_gen: v7x
topology: tpu7x:2x2x1
jax: 0.10.0
libtpu: 0.0.40
codegen_flags: <defaults>
</compile_context>

<pallas_src>
import math

import jax
import jax.numpy as jnp
from jax.experimental import pallas as pl
from jax.experimental.pallas import tpu as pltpu

LAYER_CHANNELS = [32, 64, 128, 256, 1]
KERNEL_SIZE = (4, 4, 1)                          # (kz, ky, kx) as in open3d ContinuousConv
K_CELLS = KERNEL_SIZE[0] * KERNEL_SIZE[1] * KERNEL_SIZE[2]
PARTICLE_RADIUS = 0.025
SCALE = 5
FILTER_EXTENT = 2.0 * PARTICLE_RADIUS * SCALE    # 0.25
BN_EPS = 1e-5

LANE = 128
OUT_PAD = 128                                    # pad final Cout=1 to a full lane register
CELLS_PER_CHUNK = 4                              # cells per A2@f MXU chunk


def _stride(cin):
    """128-lane-aligned column stride for a layer with Cin input channels."""
    return max(LANE, ((cin + LANE - 1) // LANE) * LANE)


# -----------------------------------------------------------------------------
# Geometry precompute (position-only glue, shared by all 5 continuous convs).
# Reproduces open3d ContinuousConv semantics:
#   coordinate_mapping='ball_to_cube_volume_preserving', interpolation='linear',
#   align_corners=True, normalize=False, window=poly6, ignore_query_points=True.
# A dense all-pairs mask replaces the fixed-radius hash-table search.
# Kept in plain JAX because the volume-preserving map needs arctan; all
# feature-dependent compute runs in the Pallas kernel.
# -----------------------------------------------------------------------------
def _map_sphere_to_cylinder(x, y, z):
    sq_norm = x * x + y * y + z * z
    norm = jnp.sqrt(sq_norm)
    cond = (5.0 / 4.0) * z * z > (x * x + y * y)
    denom_a = jnp.where(norm + jnp.abs(z) > 0.0, norm + jnp.abs(z), 1.0)
    s_a = jnp.sqrt(3.0 * norm / denom_a)
    xa, ya, za = x * s_a, y * s_a, jnp.sign(z) * norm
    norm_xy = jnp.sqrt(x * x + y * y)
    denom_b = jnp.where(norm_xy > 0.0, norm_xy, 1.0)
    s_b = norm / denom_b
    xb, yb, zb = x * s_b, y * s_b, 1.5 * z
    xo = jnp.where(cond, xa, xb)
    yo = jnp.where(cond, ya, yb)
    zo = jnp.where(cond, za, zb)
    zero = sq_norm < 1e-12
    zf = jnp.float32(0.0)
    return (jnp.where(zero, zf, xo), jnp.where(zero, zf, yo), jnp.where(zero, zf, zo))


def _map_cylinder_to_cube(x, y, z):
    sq_norm_xy = x * x + y * y
    norm_xy = jnp.sqrt(sq_norm_xy)
    cond = jnp.abs(y) <= jnp.abs(x)
    safe_x = jnp.where(jnp.abs(x) > 0.0, x, 1.0)
    safe_y = jnp.where(jnp.abs(y) > 0.0, y, 1.0)
    four_over_pi = 4.0 / math.pi
    tmp_a = jnp.sign(x) * norm_xy
    ya = tmp_a * four_over_pi * jnp.arctan(y / safe_x)
    xa = tmp_a
    tmp_b = jnp.sign(y) * norm_xy
    xb = tmp_b * four_over_pi * jnp.arctan(x / safe_y)
    yb = tmp_b
    xo = jnp.where(cond, xa, xb)
    yo = jnp.where(cond, ya, yb)
    zero = sq_norm_xy < 1e-12
    zf = jnp.float32(0.0)
    return jnp.where(zero, zf, xo), jnp.where(zero, zf, yo), z


def continuous_conv_geometry(pos, extent, kernel_size):
    """pos: (N,3). Returns A2: (K*N, N) bf16 with A2[k*N+i, j] = window_ij * w_k(ij).

    Built from separable per-axis tent (linear interpolation) weights; peak XLA
    temporaries are O(N^2) instead of the old 8-corner x K (K,N,N) compare/select.
    """
    kz, ky, kx = kernel_size
    n = pos.shape[0]
    rel = pos[None, :, :] - pos[:, None, :]          # rel[i, j] = pos[j] - pos[i]
    inv = 2.0 / extent                               # radius = extent / 2
    xn = rel[..., 0] * inv
    yn = rel[..., 1] * inv
    zn = rel[..., 2] * inv
    r_sqr = xn * xn + yn * yn + zn * zn
    mask = (r_sqr <= 1.0) & (r_sqr > 1e-20)          # radius cut + ignore query point
    win = jnp.clip((1.0 - r_sqr) ** 3, 0.0, 1.0)     # window_poly6
    imp = jnp.where(mask, win, 0.0)

    x, y, z = _map_sphere_to_cylinder(xn, yn, zn)
    x, y, z = _map_cylinder_to_cube(x, y, z)
    # align_corners=True: [-1,1] -> [0, size-1]
    fx = (x + 1.0) * 0.5 * (kx - 1)
    fy = (y + 1.0) * 0.5 * (ky - 1)
    fz = (z + 1.0) * 0.5 * (kz - 1)

    def axis_weights(f, size):
        # tent(f - node) == the clipped two-corner linear interp weight for
        # f in [0, size-1] (exact; O(eps) difference at the cube boundary).
        nodes = jnp.arange(size, dtype=jnp.float32)[:, None, None]
        return jnp.maximum(0.0, 1.0 - jnp.abs(f[None, :, :] - nodes))   # (size,N,N)

    wz = axis_weights(fz, kz)
    wy = axis_weights(fy, ky)
    wx = axis_weights(fx, kx)

    slabs = []
    for zi in range(kz):
        for yi in range(ky):
            wzy = imp * wz[zi] * wy[yi]
            for xi in range(kx):                      # cell k = (zi*ky + yi)*kx + xi
                slabs.append(wzy * wx[xi])
    a = jnp.stack(slabs, axis=0).reshape(kz * ky * kx * n, n)
    return a.astype(jnp.bfloat16)


# -----------------------------------------------------------------------------
# Fused Pallas kernel: entire [ContinuousConv + Linear] stack in one call.
# -----------------------------------------------------------------------------
def _fused_layer(a2_ref, h_ref, x, w, b, *, n, stride, relu):
    """One [ContinuousConv + Linear] layer.

    a2_ref: (K*N, N) bf16 resident in VMEM, x: (N, Cin) f32 value,
    w: ((K+1)*stride, Cout) bf16, b: (1, Cout) f32, h_ref: VMEM bf16 scratch.

    Neighbor aggregation runs as K/CELLS_PER_CHUNK large MXU contractions; each
    (chunk*N, stride) f32 result is cast to bf16 and stored as 128-lane-aligned
    slabs of the fused-feature matrix H, so the peak live set is one chunk, not
    the whole (K*N, Cin) G.  Conv filters + dense weight then ride a single
    (N, 17*stride) @ (17*stride, Cout) matmul (never 17 small contractions).
    """
    cin = x.shape[-1]
    f = jnp.maximum(x, 0.0) if relu else x
    fb = f.astype(jnp.bfloat16)
    if cin < stride:                                  # lane-pad -> full-tile H stores
        fb = jnp.concatenate(
            [fb, jnp.zeros((n, stride - cin), jnp.bfloat16)], axis=-1)

    for g0 in range(0, K_CELLS, CELLS_PER_CHUNK):
        cells = min(CELLS_PER_CHUNK, K_CELLS - g0)
        a_chunk = a2_ref[g0 * n:(g0 + cells) * n, :]                      # (cells*N, N) bf16
        g = jnp.dot(a_chunk, fb, preferred_element_type=jnp.float32)      # (cells*N, stride)
        gb = g.astype(jnp.bfloat16)
        for c in range(cells):
            k = g0 + c
            h_ref[:, k * stride:(k + 1) * stride] = gb[c * n:(c + 1) * n, :]

    h_ref[:, K_CELLS * stride:(K_CELLS + 1) * stride] = fb                # dense branch
    h = h_ref[:, :(K_CELLS + 1) * stride]                                 # (N, 17*stride)
    return jnp.dot(h, w, preferred_element_type=jnp.float32) + b          # (N, Cout) f32


def _make_kernel(layer_cfg, n):
    """layer_cfg: tuple of (relu, residual, stride) static flags per layer."""
    n_layers = len(layer_cfg)

    def kernel(*refs):
        a2_ref = refs[0]                          # (K*N, N) bf16, loaded to VMEM once
        x = refs[1][...]                          # (N, 128) f32 normalized, lane-padded feats
        out_ref = refs[2 + 2 * n_layers]
        h_ref = refs[3 + 2 * n_layers]            # (N, 17*256) bf16 fused-feature scratch
        for li, (relu, residual, stride) in enumerate(layer_cfg):
            w = refs[2 + 2 * li][...]
            b = refs[3 + 2 * li][...]
            y = _fused_layer(a2_ref, h_ref, x, w, b, n=n, stride=stride, relu=relu)
            x = x + y if residual else y
        # Final epilogue: tanh(super_paras) * 0.8 + 1, lane-dense (N, 128) store.
        out_ref[...] = (jnp.tanh(x) * 0.8 + 1.0).astype(out_ref.dtype)

    return kernel


# -----------------------------------------------------------------------------
# Parameter packing: fold [per-cell conv filters ; dense weight] into one
# ((K+1)*stride, Cout) matrix per layer, rows at 128-lane-aligned per-cell
# offsets so conv + dense is a single matmul over the aligned H layout.
# -----------------------------------------------------------------------------
def _pack_layer0(wc, bc, wd, bd, stride):
    """Layer 0 is a concat (not a sum): block-structured weight.
    wc: (K, 3, 32), wd: (3, 32)  ->  W: ((K+1)*stride, 64), b: (1, 64)."""
    K, cin, cout = wc.shape
    wc_p = jnp.pad(wc, ((0, 0), (0, stride - cin), (0, 0))).reshape(K * stride, cout)
    wd_p = jnp.pad(wd, ((0, stride - cin), (0, 0)))
    top = jnp.pad(wc_p, ((0, 0), (0, cout)))          # conv  -> cols [0, 32)
    bot = jnp.pad(wd_p, ((0, 0), (cout, 0)))          # dense -> cols [32, 64)
    w = jnp.concatenate([top, bot], axis=0)
    b = jnp.concatenate([bc, bd])[None, :]
    return w.astype(jnp.bfloat16), b.astype(jnp.float32)


def _pack_layer(wc, bc, wd, bd, stride, cout_pad=None):
    """wc: (K, Cin, Cout), wd: (Cin, Cout) -> W: ((K+1)*stride, Cout[_pad]), b = bc+bd."""
    K, cin, cout = wc.shape
    wc_p = jnp.pad(wc, ((0, 0), (0, stride - cin), (0, 0))).reshape(K * stride, cout)
    wd_p = jnp.pad(wd, ((0, stride - cin), (0, 0)))
    w = jnp.concatenate([wc_p, wd_p], axis=0)
    b = (bc + bd)[None, :]
    if cout_pad is not None and cout_pad > cout:
        w = jnp.pad(w, ((0, 0), (0, cout_pad - cout)))
        b = jnp.pad(b, ((0, 0), (0, cout_pad - cout)))
    return w.astype(jnp.bfloat16), b.astype(jnp.float32)


# -----------------------------------------------------------------------------
# VMEM budget + cost estimate.
# -----------------------------------------------------------------------------
def _vmem_capacity_bytes():
    try:
        info = pltpu.get_tpu_info()
        cap = getattr(info, "vmem_capacity_bytes", None)
        if cap:
            return int(cap)
    except Exception:
        pass
    return 64 * 1024 * 1024          # conservative per-core default (v7x)


def _vmem_limit_bytes(n, a2, f0, packed, h_width):
    # Real footprint: resident A2 + packed weights + H scratch + output +
    # live activation / G-chunk values, plus headroom for Mosaic scratch.
    footprint = a2.size * 2 + f0.size * 4 + n * OUT_PAD * 4
    footprint += n * h_width * 2                                      # H scratch
    for w, b in packed:
        footprint += w.size * 2 + b.size * 4
    max_c = 256
    footprint += n * max_c * 4 * 3                                    # x, y, f live
    footprint += CELLS_PER_CHUNK * n * max_c * (4 + 2)                # G chunk f32 + bf16
    want = int(footprint * 1.4) + (4 << 20)
    ceiling = int(_vmem_capacity_bytes() * 0.85)                      # Mosaic headroom
    return max(16 << 20, min(want, ceiling))


def _cost_estimate(n, f0, a2, packed, cfg):
    flops = 0
    bytes_accessed = a2.size * 2 + f0.size * 4 + n * OUT_PAD * 4
    for (w, b), (_, _, stride) in zip(packed, cfg):
        width, cout = w.shape
        flops += 2 * (K_CELLS * n) * n * stride       # chunked A2 @ f
        flops += 2 * n * width * cout                 # H @ W
        bytes_accessed += w.size * 2 + b.size * 4
    return pl.CostEstimate(flops=int(flops), transcendentals=int(n * OUT_PAD),
                           bytes_accessed=int(bytes_accessed))


# -----------------------------------------------------------------------------
# Deterministic parameter init (shapes from Parameter_Estimate.__init__).
# Linear weights ~ U(-0.05, 0.05), all biases zero (as in the module); conv
# filters use the same deterministic uniform init (synthetic, no checkpoint).
# -----------------------------------------------------------------------------
def init_params(key):
    def uni(k, shape):
        return jax.random.uniform(k, shape, jnp.float32, -0.05, 0.05)

    keys = jax.random.split(key, 16)
    params = {
        "conv0_w": uni(keys[0], (K_CELLS, 3, LAYER_CHANNELS[0])),
        "conv0_b": jnp.zeros((LAYER_CHANNELS[0],), jnp.float32),
        "dense0_w": uni(keys[1], (3, LAYER_CHANNELS[0])),
        "dense0_b": jnp.zeros((LAYER_CHANNELS[0],), jnp.float32),
    }
    kidx = 2
    for i in range(1, len(LAYER_CHANNELS)):
        in_ch = LAYER_CHANNELS[i - 1] * (2 if i == 1 else 1)
        out_ch = LAYER_CHANNELS[i]
        params[f"conv{i}_w"] = uni(keys[kidx], (K_CELLS, in_ch, out_ch)); kidx += 1
        params[f"conv{i}_b"] = jnp.zeros((out_ch,), jnp.float32)
        params[f"dense{i}_w"] = uni(keys[kidx], (in_ch, out_ch)); kidx += 1
        params[f"dense{i}_b"] = jnp.zeros((out_ch,), jnp.float32)
    return params


# -----------------------------------------------------------------------------
# Forward pass (Parameter_Estimate.forward).
# -----------------------------------------------------------------------------
def parameter_estimate_forward(params, pos2, vel2):
    n_raw = pos2.shape[0]
    n = max(16, ((n_raw + 15) // 16) * 16)           # sublane-align bf16 row slabs
    pos2 = pos2.astype(jnp.float32)
    vel2 = vel2.astype(jnp.float32)
    if n != n_raw:
        # Pad particles are parked far apart so they never fall inside any real
        # particle's search radius (A2 rows/cols stay clean); their outputs are
        # sliced off below.
        pad = n - n_raw
        far = 1e3 * (1.0 + jnp.arange(pad, dtype=jnp.float32))[:, None]
        pos2 = jnp.concatenate([pos2, jnp.concatenate([far, far], axis=-1)], axis=0)
        vel2 = jnp.concatenate([vel2, jnp.zeros((pad, 2), jnp.float32)], axis=0)

    zpad = jnp.zeros((n, 1), jnp.float32)
    pos = jnp.concatenate([pos2, zpad], axis=-1)     # new_pos
    vel = jnp.concatenate([vel2, zpad], axis=-1)     # new_vel

    # TODO(synk): BatchNorm1d(3) modeled in eval mode with freshly-initialized
    # running stats (mean=0, var=1, gamma=1, beta=0); training-mode batch stats
    # are not reproduced.
    feats = vel / jnp.sqrt(1.0 + BN_EPS)

    a2 = continuous_conv_geometry(pos, FILTER_EXTENT, KERNEL_SIZE)   # (K*N, N) bf16

    s0 = _stride(3)
    f0 = jnp.zeros((n, s0), jnp.float32).at[:, :3].set(feats)

    packed, cfg = [], []
    w0, b0 = _pack_layer0(params["conv0_w"], params["conv0_b"],
                          params["dense0_w"], params["dense0_b"], s0)
    packed.append((w0, b0))
    cfg.append((False, False, s0))                   # layer 0: no relu, no residual
    prev_dim = 2 * LAYER_CHANNELS[0]
    n_layers = len(LAYER_CHANNELS)
    for i in range(1, n_layers):
        out_ch = LAYER_CHANNELS[i]
        final = (i == n_layers - 1)
        si = _stride(prev_dim)
        wi, bi = _pack_layer(params[f"conv{i}_w"], params[f"conv{i}_b"],
                             params[f"dense{i}_w"], params[f"dense{i}_b"],
                             si, cout_pad=OUT_PAD if final else None)
        packed.append((wi, bi))
        cfg.append((True, out_ch == prev_dim, si))
        prev_dim = out_ch

    flat_args = [a2, f0]
    for w, b in packed:
        flat_args += [w, b]

    h_width = (K_CELLS + 1) * max(s for (_, _, s) in cfg)            # 17*256
    kern = _make_kernel(tuple(cfg), n)
    out_pad = pl.pallas_call(
        kern,
        out_shape=jax.ShapeDtypeStruct((n, OUT_PAD), jnp.float32),
        in_specs=[pl.BlockSpec(memory_space=pltpu.MemorySpace.VMEM)] * len(flat_args),
        out_specs=pl.BlockSpec(memory_space=pltpu.MemorySpace.VMEM),
        scratch_shapes=[pltpu.VMEM((n, h_width), jnp.bfloat16)],
        compiler_params=pltpu.CompilerParams(
            vmem_limit_bytes=_vmem_limit_bytes(n, a2, f0, packed, h_width)),
        cost_estimate=_cost_estimate(n, f0, a2, packed, cfg),
    )(*flat_args)
    return out_pad[:n_raw, :1]    # (N, 1) = tanh(super_paras) * 0.8 + 1


if __name__ == "__main__":
    key = jax.random.PRNGKey(0)
    kp, kv, kw = jax.random.split(key, 3)

    N = 64                                   # small particle count (multiple of 16)
    # positions in a small box so many pairs fall inside the 0.125 search radius
    pos2 = jax.random.uniform(kp, (N, 2), jnp.float32, -0.1, 0.1)
    vel2 = 0.05 * jax.random.normal(kv, (N, 2), jnp.float32)

    params = init_params(kw)

    fwd = jax.jit(parameter_estimate_forward)
    out = jax.block_until_ready(fwd(params, pos2, vel2))
    assert out.shape == (N, 1) and out.dtype == jnp.float32
    assert bool(jnp.all(jnp.isfinite(out)))
    print("KERNEL_OK")
</pallas_src>

<mosaic_0001>
module attributes {stable_mosaic.version = 11 : i64} {
  func.func @kernel(%arg0: memref<1024x64xbf16, #tpu.memory_space<vmem>>, %arg1: memref<64x128xf32, #tpu.memory_space<vmem>>, %arg2: memref<2176x64xbf16, #tpu.memory_space<vmem>>, %arg3: memref<1x64xf32, #tpu.memory_space<vmem>>, %arg4: memref<2176x64xbf16, #tpu.memory_space<vmem>>, %arg5: memref<1x64xf32, #tpu.memory_space<vmem>>, %arg6: memref<2176x128xbf16, #tpu.memory_space<vmem>>, %arg7: memref<1x128xf32, #tpu.memory_space<vmem>>, %arg8: memref<2176x256xbf16, #tpu.memory_space<vmem>>, %arg9: memref<1x256xf32, #tpu.memory_space<vmem>>, %arg10: memref<4352x128xbf16, #tpu.memory_space<vmem>>, %arg11: memref<1x128xf32, #tpu.memory_space<vmem>>, %arg12: memref<64x128xf32, #tpu.memory_space<vmem>>, %arg13: memref<64x4352xbf16, #tpu.memory_space<vmem>>) attributes {dimension_semantics = [], scalar_prefetch = 0 : i64, scratch_operands = 1 : i64, tpu.core_type = #tpu.core_type<tc>} {
    %c0 = arith.constant 0 : index
    %c0_0 = arith.constant 0 : index
    %0 = vector.load %arg1[%c0, %c0_0] : memref<64x128xf32, #tpu.memory_space<vmem>>, vector<64x128xf32>
    %c0_1 = arith.constant 0 : index
    %c0_2 = arith.constant 0 : index
    %1 = vector.load %arg2[%c0_1, %c0_2] : memref<2176x64xbf16, #tpu.memory_space<vmem>>, vector<2176x64xbf16>
    %c0_3 = arith.constant 0 : index
    %c0_4 = arith.constant 0 : index
    %2 = vector.load %arg3[%c0_3, %c0_4] : memref<1x64xf32, #tpu.memory_space<vmem>>, vector<1x64xf32>
    %3 = arith.truncf %0 : vector<64x128xf32> to vector<64x128xbf16>
    %c0_5 = arith.constant 0 : index
    %c0_6 = arith.constant 0 : index
    %4 = vector.load %arg0[%c0_5, %c0_6] : memref<1024x64xbf16, #tpu.memory_space<vmem>>, vector<256x64xbf16>
    %cst = arith.constant dense<0.000000e+00> : vector<256x128xf32>
    %5 = tpu.matmul %4, %3, %cst {dimension_numbers = #tpu.dot_dimension_numbers<[1], [0], [0], [1], [0, 0, 1, 1], [], []>} : vector<256x64xbf16>, vector<64x128xbf16>, vector<256x128xf32> -> vector<256x128xf32>
    %6 = arith.truncf %5 : vector<256x128xf32> to vector<256x128xbf16>
    %7 = vector.extract_strided_slice %6 {offsets = [0, 0], sizes = [64, 128], strides = [1, 1]} : vector<256x128xbf16> to vector<64x128xbf16>
    %c0_7 = arith.constant 0 : index
    %c0_8 = arith.constant 0 : index
    %8 = vector.load %arg13[%c0_7, %c0_8] : memref<64x4352xbf16, #tpu.memory_space<vmem>>, vector<64x128xbf16>
    tpu.vector_store %arg13[%c0_7, %c0_8], %7 {strides = array<i32>} : memref<64x4352xbf16, #tpu.memory_space<vmem>>, vector<64x128xbf16>,
    %9 = vector.extract_strided_slice %6 {offsets = [64, 0], sizes = [64, 128], strides = [1, 1]} : vector<256x128xbf16> to vector<64x128xbf16>
    %c0_9 = arith.constant 0 : index
    %c128 = arith.constant 128 : index
    %10 = vector.load %arg13[%c0_9, %c128] : memref<64x4352xbf16, #tpu.memory_space<vmem>>, vector<64x128xbf16>
    tpu.vector_store %arg13[%c0_9, %c128], %9 {strides = array<i32>} : memref<64x4352xbf16, #tpu.memory_space<vmem>>, vector<64x128xbf16>,
    %11 = vector.extract_strided_slice %6 {offsets = [128, 0], sizes = [64, 128], strides = [1, 1]} : vector<256x128xbf16> to vector<64x128xbf16>
    %c0_10 = arith.constant 0 : index
    %c256 = arith.constant 256 : index
    %12 = vector.load %arg13[%c0_10, %c256] : memref<64x4352xbf16, #tpu.memory_space<vmem>>, vector<64x128xbf16>
    tpu.vector_store %arg13[%c0_10, %c256], %11 {strides = array<i32>} : memref<64x4352xbf16, #tpu.memory_space<vmem>>, vector<64x128xbf16>,
    %13 = vector.extract_strided_slice %6 {offsets = [192, 0], sizes = [64, 128], strides = [1, 1]} : vector<256x128xbf16> to vector<64x128xbf16>
    %c0_11 = arith.constant 0 : index
    %c384 = arith.constant 384 : index
    %14 = vector.load %arg13[%c0_11, %c384] : memref<64x4352xbf16, #tpu.memory_space<vmem>>, vector<64x128xbf16>
    tpu.vector_store %arg13[%c0_11, %c384], %13 {strides = array<i32>} : memref<64x4352xbf16, #tpu.memory_space<vmem>>, vector<64x128xbf16>,
    %c256_12 = arith.constant 256 : index
    %c0_13 = arith.constant 0 : index
    %15 = vector.load %arg0[%c256_12, %c0_13] : memref<1024x64xbf16, #tpu.memory_space<vmem>>, vector<256x64xbf16>
    %cst_14 = arith.constant dense<0.000000e+00> : vector<256x128xf32>
    %16 = tpu.matmul %15, %3, %cst_14 {dimension_numbers = #tpu.dot_dimension_numbers<[1], [0], [0], [1], [0, 0, 1, 1], [], []>} : vector<256x64xbf16>, vector<64x128xbf16>, vector<256x128xf32> -> vector<256x128xf32>
    %17 = arith.truncf %16 : vector<256x128xf32> to vector<256x128xbf16>
    %18 = vector.extract_strided_slice %17 {offsets = [0, 0], sizes = [64, 128], strides = [1, 1]} : vector<256x128xbf16> to vector<64x128xbf16>
    %c0_15 = arith.constant 0 : index
    %c512 = arith.constant 512 : index
    %19 = vector.load %arg13[%c0_15, %c512] : memref<64x4352xbf16, #tpu.memory_space<vmem>>, vector<64x128xbf16>
    tpu.vector_store %arg13[%c0_15, %c512], %18 {strides = array<i32>} : memref<64x4352xbf16, #tpu.memory_space<vmem>>, vector<64x128xbf16>,
    %20 = vector.extract_strided_slice %17 {offsets = [64, 0], sizes = [64, 128], strides = [1, 1]} : vector<256x128xbf16> to vector<64x128xbf16>
    %c0_16 = arith.constant 0 : index
    %c640 = arith.constant 640 : index
    %21 = vector.load %arg13[%c0_16, %c640] : memref<64x4352xbf16, #tpu.memory_space<vmem>>, vector<64x128xbf16>
    tpu.vector_store %arg13[%c0_16, %c640], %20 {strides = array<i32>} : memref<64x4352xbf16, #tpu.memory_space<vmem>>, vector<64x128xbf16>,
    %22 = vector.extract_strided_slice %17 {offsets = [128, 0], sizes = [64, 128], strides = [1, 1]} : vector<256x128xbf16> to vector<64x128xbf16>
    %c0_17 = arith.constant 0 : index
    %c768 = arith.constant 768 : index
    %23 = vector.load %arg13[%c0_17, %c768] : memref<64x4352xbf16, #tpu.memory_space<vmem>>, vector<64x128xbf16>
    tpu.vector_store %arg13[%c0_17, %c768], %22 {strides = array<i32>} : memref<64x4352xbf16, #tpu.memory_space<vmem>>, vector<64x128xbf16>,
    %24 = vector.extract_strided_slice %17 {offsets = [192, 0], sizes = [64, 128], strides = [1, 1]} : vector<256x128xbf16> to vector<64x128xbf16>
    %c0_18 = arith.constant 0 : index
    %c896 = arith.constant 896 : index
    %25 = vector.load %arg13[%c0_18, %c896] : memref<64x4352xbf16, #tpu.memory_space<vmem>>, vector<64x128xbf16>
    tpu.vector_store %arg13[%c0_18, %c896], %24 {strides = array<i32>} : memref<64x4352xbf16, #tpu.memory_space<vmem>>, vector<64x128xbf16>,
    %c512_19 = arith.constant 512 : index
    %c0_20 = arith.constant 0 : index
    %26 = vector.load %arg0[%c512_19, %c0_20] : memref<1024x64xbf16, #tpu.memory_space<vmem>>, vector<256x64xbf16>
    %cst_21 = arith.constant dense<0.000000e+00> : vector<256x128xf32>
    %27 = tpu.matmul %26, %3, %cst_21 {dimension_numbers = #tpu.dot_dimension_numbers<[1], [0], [0], [1], [0, 0, 1, 1], [], []>} : vector<256x64xbf16>, vector<64x128xbf16>, vector<256x128xf32> -> vector<256x128xf32>
    %28 = arith.truncf %27 : vector<256x128xf32> to vector<256x128xbf16>
    %29 = vector.extract_strided_slice %28 {offsets = [0, 0], sizes = [64, 128], strides = [1, 1]} : vector<256x128xbf16> to vector<64x128xbf16>
    %c0_22 = arith.constant 0 : index
    %c1024 = arith.constant 1024 : index
    %30 = vector.load %arg13[%c0_22, %c1024] : memref<64x4352xbf16, #tpu.memory_space<vmem>>, vector<64x128xbf16>
    tpu.vector_store %arg13[%c0_22, %c1024], %29 {strides = array<i32>} : memref<64x4352xbf16, #tpu.memory_space<vmem>>, vector<64x128xbf16>,
    %31 = vector.extract_strided_slice %28 {offsets = [64, 0], sizes = [64, 128], strides = [1, 1]} : vector<256x128xbf16> to vector<64x128xbf16>
    %c0_23 = arith.constant 0 : index
    %c1152 = arith.constant 1152 : index
    %32 = vector.load %arg13[%c0_23, %c1152] : memref<64x4352xbf16, #tpu.memory_space<vmem>>, vector<64x128xbf16>
    tpu.vector_store %arg13[%c0_23, %c1152], %31 {strides = array<i32>} : memref<64x4352xbf16, #tpu.memory_space<vmem>>, vector<64x128xbf16>,
    %33 = vector.extract_strided_slice %28 {offsets = [128, 0], sizes = [64, 128], strides = [1, 1]} : vector<256x128xbf16> to vector<64x128xbf16>
    %c0_24 = arith.constant 0 : index
    %c1280 = arith.constant 1280 : index
    %34 = vector.load %arg13[%c0_24, %c1280] : memref<64x4352xbf16, #tpu.memory_space<vmem>>, vector<64x128xbf16>
    tpu.vector_store %arg13[%c0_24, %c1280], %33 {strides = array<i32>} : memref<64x4352xbf16, #tpu.memory_space<vmem>>, vector<64x128xbf16>,
    %35 = vector.extract_strided_slice %28 {offsets = [192, 0], sizes = [64, 128], strides = [1, 1]} : vector<256x128xbf16> to vector<64x128xbf16>
    %c0_25 = arith.constant 0 : index
    %c1408 = arith.constant 1408 : index
    %36 = vector.load %arg13[%c0_25, %c1408] : memref<64x4352xbf16, #tpu.memory_space<vmem>>, vector<64x128xbf16>
    tpu.vector_store %arg13[%c0_25, %c1408], %35 {strides = array<i32>} : memref<64x4352xbf16, #tpu.memory_space<vmem>>, vector<64x128xbf16>,
    %c768_26 = arith.constant 768 : index
    %c0_27 = arith.constant 0 : index
    %37 = vector.load %arg0[%c768_26, %c0_27] : memref<1024x64xbf16, #tpu.memory_space<vmem>>, vector<256x64xbf16>
    %cst_28 = arith.constant dense<0.000000e+00> : vector<256x128xf32>
    %38 = tpu.matmul %37, %3, %cst_28 {dimension_numbers = #tpu.dot_dimension_numbers<[1], [0], [0], [1], [0, 0, 1, 1], [], []>} : vector<256x64xbf16>, vector<64x128xbf16>, vector<256x128xf32> -> vector<256x128xf32>
    %39 = arith.truncf %38 : vector<256x128xf32> to vector<256x128xbf16>
    %40 = vector.extract_strided_slice %39 {offsets = [0, 0], sizes = [64, 128], strides = [1, 1]} : vector<256x128xbf16> to vector<64x128xbf16>
    %c0_29 = arith.constant 0 : index
    %c1536 = arith.constant 1536 : index
    %41 = vector.load %arg13[%c0_29, %c1536] : memref<64x4352xbf16, #tpu.memory_space<vmem>>, vector<64x128xbf16>
    tpu.vector_store %arg13[%c0_29, %c1536], %40 {strides = array<i32>} : memref<64x4352xbf16, #tpu.memory_space<vmem>>, vector<64x128xbf16>,
    %42 = vector.extract_strided_slice %39 {offsets = [64, 0], sizes = [64, 128], strides = [1, 1]} : vector<256x128xbf16> to vector<64x128xbf16>
    %c0_30 = arith.constant 0 : index
    %c1664 = arith.constant 1664 : index
    %43 = vector.load %arg13[%c0_30, %c1664] : memref<64x4352xbf16, #tpu.memory_space<vmem>>, vector<64x128xbf16>
    tpu.vector_store %arg13[%c0_30, %c1664], %42 {strides = array<i32>} : memref<64x4352xbf16, #tpu.memory_space<vmem>>, vector<64x128xbf16>,
    %44 = vector.extract_strided_slice %39 {offsets = [128, 0], sizes = [64, 128], strides = [1, 1]} : vector<256x128xbf16> to vector<64x128xbf16>
    %c0_31 = arith.constant 0 : index
    %c1792 = arith.constant 1792 : index
    %45 = vector.load %arg13[%c0_31, %c1792] : memref<64x4352xbf16, #tpu.memory_space<vmem>>, vector<64x128xbf16>
    tpu.vector_store %arg13[%c0_31, %c1792], %44 {strides = array<i32>} : memref<64x4352xbf16, #tpu.memory_space<vmem>>, vector<64x128xbf16>,
    %46 = vector.extract_strided_slice %39 {offsets = [192, 0], sizes = [64, 128], strides = [1, 1]} : vector<256x128xbf16> to vector<64x128xbf16>
    %c0_32 = arith.constant 0 : index
    %c1920 = arith.constant 1920 : index
    %47 = vector.load %arg13[%c0_32, %c1920] : memref<64x4352xbf16, #tpu.memory_space<vmem>>, vector<64x128xbf16>
    tpu.vector_store %arg13[%c0_32, %c1920], %46 {strides = array<i32>} : memref<64x4352xbf16, #tpu.memory_space<vmem>>, vector<64x128xbf16>,
    %c0_33 = arith.constant 0 : index
    %c2048 = arith.constant 2048 : index
    %48 = vector.load %arg13[%c0_33, %c2048] : memref<64x4352xbf16, #tpu.memory_space<vmem>>, vector<64x128xbf16>
    tpu.vector_store %arg13[%c0_33, %c2048], %3 {strides = array<i32>} : memref<64x4352xbf16, #tpu.memory_space<vmem>>, vector<64x128xbf16>,
    %c0_34 = arith.constant 0 : index
    %c0_35 = arith.constant 0 : index
    %49 = vector.load %arg13[%c0_34, %c0_35] : memref<64x4352xbf16, #tpu.memory_space<vmem>>, vector<64x2176xbf16>
    %cst_36 = arith.constant dense<0.000000e+00> : vector<64x64xf32>
    %50 = tpu.matmul %49, %1, %cst_36 {dimension_numbers = #tpu.dot_dimension_numbers<[1], [0], [0], [1], [0, 0, 1, 1], [], []>} : vector<64x2176xbf16>, vector<2176x64xbf16>, vector<64x64xf32> -> vector<64x64xf32>
    %51 = vector.broadcast %2 : vector<1x64xf32> to vector<64x64xf32>
    %52 = arith.addf %50, %51 : vector<64x64xf32>
    %c0_37 = arith.constant 0 : index
    %c0_38 = arith.constant 0 : index
    %53 = vector.load %arg4[%c0_37, %c0_38] : memref<2176x64xbf16, #tpu.memory_space<vmem>>, vector<2176x64xbf16>
    %c0_39 = arith.constant 0 : index
    %c0_40 = arith.constant 0 : index
    %54 = vector.load %arg5[%c0_39, %c0_40] : memref<1x64xf32, #tpu.memory_space<vmem>>, vector<1x64xf32>
    %cst_41 = arith.constant 0.000000e+00 : f32
    %55 = vector.broadcast %cst_41 : f32 to vector<64x64xf32>
    %56 = arith.maximumf %52, %55 : vector<64x64xf32>
    %57 = arith.truncf %56 : vector<64x64xf32> to vector<64x64xbf16>
    %cst_42 = arith.constant 0.000000e+00 : bf16
    %58 = vector.broadcast %cst_42 : bf16 to vector<64x64xbf16>
    %59 = tpu.concatenate %57, %58 in 1 : vector<64x64xbf16>, vector<64x64xbf16> -> vector<64x128xbf16>
    %c0_43 = arith.constant 0 : index
    %c0_44 = arith.constant 0 : index
    %60 = vector.load %arg0[%c0_43, %c0_44] : memref<1024x64xbf16, #tpu.memory_space<vmem>>, vector<256x64xbf16>
    %cst_45 = arith.constant dense<0.000000e+00> : vector<256x128xf32>
    %61 = tpu.matmul %60, %59, %cst_45 {dimension_numbers = #tpu.dot_dimension_numbers<[1], [0], [0], [1], [0, 0, 1, 1], [], []>} : vector<256x64xbf16>, vector<64x128xbf16>, vector<256x128xf32> -> vector<256x128xf32>
    %62 = arith.truncf %61 : vector<256x128xf32> to vector<256x128xbf16>
    %63 = vector.extract_strided_slice %62 {offsets = [0, 0], sizes = [64, 128], strides = [1, 1]} : vector<256x128xbf16> to vector<64x128xbf16>
    %c0_46 = arith.constant 0 : index
    %c0_47 = arith.constant 0 : index
    %64 = vector.load %arg13[%c0_46, %c0_47] : memref<64x4352xbf16, #tpu.memory_space<vmem>>, vector<64x128xbf16>
    tpu.vector_store %arg13[%c0_46, %c0_47], %63 {strides = array<i32>} : memref<64x4352xbf16, #tpu.memory_space<vmem>>, vector<64x128xbf16>,
    %65 = vector.extract_strided_slice %62 {offsets = [64, 0], sizes = [64, 128], strides = [1, 1]} : vector<256x128xbf16> to vector<64x128xbf16>
    %c0_48 = arith.constant 0 : index
    %c128_49 = arith.constant 128 : index
    %66 = vector.load %arg13[%c0_48, %c128_49] : memref<64x4352xbf16, #tpu.memory_space<vmem>>, vector<64x128xbf16>
    tpu.vector_store %arg13[%c0_48, %c128_49], %65 {strides = array<i32>} : memref<64x4352xbf16, #tpu.memory_space<vmem>>, vector<64x128xbf16>,
    %67 = vector.extract_strided_slice %62 {offsets = [128, 0], sizes = [64, 128], strides = [1, 1]} : vector<256x128xbf16> to vector<64x128xbf16>
    %c0_50 = arith.constant 0 : index
    %c256_51 = arith.constant 256 : index
    %68 = vector.load %arg13[%c0_50, %c256_51] : memref<64x4352xbf16, #tpu.memory_space<vmem>>, vector<64x128xbf16>
    tpu.vector_store %arg13[%c0_50, %c256_51], %67 {strides = array<i32>} : memref<64x4352xbf16, #tpu.memory_space<vmem>>, vector<64x128xbf16>,
    %69 = vector.extract_strided_slice %62 {offsets = [192, 0], sizes = [64, 128], strides = [1, 1]} : vector<256x128xbf16> to vector<64x128xbf16>
    %c0_52 = arith.constant 0 : index
    %c384_53 = arith.constant 384 : index
    %70 = vector.load %arg13[%c0_52, %c384_53] : memref<64x4352xbf16, #tpu.memory_space<vmem>>, vector<64x128xbf16>
    tpu.vector_store %arg13[%c0_52, %c384_53], %69 {strides = array<i32>} : memref<64x4352xbf16, #tpu.memory_space<vmem>>, vector<64x128xbf16>,
    %c256_54 = arith.constant 256 : index
    %c0_55 = arith.constant 0 : index
    %71 = vector.load %arg0[%c256_54, %c0_55] : memref<1024x64xbf16, #tpu.memory_space<vmem>>, vector<256x64xbf16>
    %cst_56 = arith.constant dense<0.000000e+00> : vector<256x128xf32>
    %72 = tpu.matmul %71, %59, %cst_56 {dimension_numbers = #tpu.dot_dimension_numbers<[1], [0], [0], [1], [0, 0, 1, 1], [], []>} : vector<256x64xbf16>, vector<64x128xbf16>, vector<256x128xf32> -> vector<256x128xf32>
    %73 = arith.truncf %72 : vector<256x128xf32> to vector<256x128xbf16>
    %74 = vector.extract_strided_slice %73 {offsets = [0, 0], sizes = [64, 128], strides = [1, 1]} : vector<256x128xbf16> to vector<64x128xbf16>
    %c0_57 = arith.constant 0 : index
    %c512_58 = arith.constant 512 : index
    %75 = vector.load %arg13[%c0_57, %c512_58] : memref<64x4352xbf16, #tpu.memory_space<vmem>>, vector<64x128xbf16>
    tpu.vector_store %arg13[%c0_57, %c512_58], %74 {strides = array<i32>} : memref<64x4352xbf16, #tpu.memory_space<vmem>>, vector<64x128xbf16>,
    %76 = vector.extract_strided_slice %73 {offsets = [64, 0], sizes = [64, 128], strides = [1, 1]} : vector<256x128xbf16> to vector<64x128xbf16>
    %c0_59 = arith.constant 0 : index
    %c640_60 = arith.constant 640 : index
    %77 = vector.load %arg13[%c0_59, %c640_60] : memref<64x4352xbf16, #tpu.memory_space<vmem>>, vector<64x128xbf16>
    tpu.vector_store %arg13[%c0_59, %c640_60], %76 {strides = array<i32>} : memref<64x4352xbf16, #tpu.memory_space<vmem>>, vector<64x128xbf16>,
    %78 = vector.extract_strided_slice %73 {offsets = [128, 0], sizes = [64, 128], strides = [1, 1]} : vector<256x128xbf16> to vector<64x128xbf16>
    %c0_61 = arith.constant 0 : index
    %c768_62 = arith.constant 768 : index
    %79 = vector.load %arg13[%c0_61, %c768_62] : memref<64x4352xbf16, #tpu.memory_space<vmem>>, vector<64x128xbf16>
    tpu.vector_store %arg13[%c0_61, %c768_62], %78 {strides = array<i32>} : memref<64x4352xbf16, #tpu.memory_space<vmem>>, vector<64x128xbf16>,
    %80 = vector.extract_strided_slice %73 {offsets = [192, 0], sizes = [64, 128], strides = [1, 1]} : vector<256x128xbf16> to vector<64x128xbf16>
    %c0_63 = arith.constant 0 : index
    %c896_64 = arith.constant 896 : index
    %81 = vector.load %arg13[%c0_63, %c896_64] : memref<64x4352xbf16, #tpu.memory_space<vmem>>, vector<64x128xbf16>
    tpu.vector_store %arg13[%c0_63, %c896_64], %80 {strides = array<i32>} : memref<64x4352xbf16, #tpu.memory_space<vmem>>, vector<64x128xbf16>,
    %c512_65 = arith.constant 512 : index
    %c0_66 = arith.constant 0 : index
    %82 = vector.load %arg0[%c512_65, %c0_66] : memref<1024x64xbf16, #tpu.memory_space<vmem>>, vector<256x64xbf16>
    %cst_67 = arith.constant dense<0.000000e+00> : vector<256x128xf32>
    %83 = tpu.matmul %82, %59, %cst_67 {dimension_numbers = #tpu.dot_dimension_numbers<[1], [0], [0], [1], [0, 0, 1, 1], [], []>} : vector<256x64xbf16>, vector<64x128xbf16>, vector<256x128xf32> -> vector<256x128xf32>
    %84 = arith.truncf %83 : vector<256x128xf32> to vector<256x128xbf16>
    %85 = vector.extract_strided_slice %84 {offsets = [0, 0], sizes = [64, 128], strides = [1, 1]} : vector<256x128xbf16> to vector<64x128xbf16>
    %c0_68 = arith.constant 0 : index
    %c1024_69 = arith.constant 1024 : index
    %86 = vector.load %arg13[%c0_68, %c1024_69] : memref<64x4352xbf16, #tpu.memory_space<vmem>>, vector<64x128xbf16>
    tpu.vector_store %arg13[%c0_68, %c1024_69], %85 {strides = array<i32>} : memref<64x4352xbf16, #tpu.memory_space<vmem>>, vector<64x128xbf16>,
    %87 = vector.extract_strided_slice %84 {offsets = [64, 0], sizes = [64, 128], strides = [1, 1]} : vector<256x128xbf16> to vector<64x128xbf16>
    %c0_70 = arith.constant 0 : index
    %c1152_71 = arith.constant 1152 : index
    %88 = vector.load %arg13[%c0_70, %c1152_71] : memref<64x4352xbf16, #tpu.memory_space<vmem>>, vector<64x128xbf16>
    tpu.vector_store %arg13[%c0_70, %c1152_71], %87 {strides = array<i32>} : memref<64x4352xbf16, #tpu.memory_space<vmem>>, vector<64x128xbf16>,
    %89 = vector.extract_strided_slice %84 {offsets = [128, 0], sizes = [64, 128], strides = [1, 1]} : vector<256x128xbf16> to vector<64x128xbf16>
    %c0_72 = arith.constant 0 : index
    %c1280_73 = arith.constant 1280 : index
    %90 = vector.load %arg13[%c0_72, %c1280_73] : memref<64x4352xbf16, #tpu.memory_space<vmem>>, vector<64x128xbf16>
    tpu.vector_store %arg13[%c0_72, %c1280_73], %89 {strides = array<i32>} : memref<64x4352xbf16, #tpu.memory_space<vmem>>, vector<64x128xbf16>,
    %91 = vector.extract_strided_slice %84 {offsets = [192, 0], sizes = [64, 128], strides = [1, 1]} : vector<256x128xbf16> to vector<64x128xbf16>
    %c0_74 = arith.constant 0 : index
    %c1408_75 = arith.constant 1408 : index
    %92 = vector.load %arg13[%c0_74, %c1408_75] : memref<64x4352xbf16, #tpu.memory_space<vmem>>, vector<64x128xbf16>
    tpu.vector_store %arg13[%c0_74, %c1408_75], %91 {strides = array<i32>} : memref<64x4352xbf16, #tpu.memory_space<vmem>>, vector<64x128xbf16>,
    %c768_76 = arith.constant 768 : index
    %c0_77 = arith.constant 0 : index
    %93 = vector.load %arg0[%c768_76, %c0_77] : memref<1024x64xbf16, #tpu.memory_space<vmem>>, vector<256x64xbf16>
    %cst_78 = arith.constant dense<0.000000e+00> : vector<256x128xf32>
    %94 = tpu.matmul %93, %59, %cst_78 {dimension_numbers = #tpu.dot_dimension_numbers<[1], [0], [0], [1], [0, 0, 1, 1], [], []>} : vector<256x64xbf16>, vector<64x128xbf16>, vector<256x128xf32> -> vector<256x128xf32>
    %95 = arith.truncf %94 : vector<256x128xf32> to vector<256x128xbf16>
    %96 = vector.extract_strided_slice %95 {offsets = [0, 0], sizes = [64, 128], strides = [1, 1]} : vector<256x128xbf16> to vector<64x128xbf16>
    %c0_79 = arith.constant 0 : index
    %c1536_80 = arith.constant 1536 : index
    %97 = vector.load %arg13[%c0_79, %c1536_80] : memref<64x4352xbf16, #tpu.memory_space<vmem>>, vector<64x128xbf16>
    tpu.vector_store %arg13[%c0_79, %c1536_80], %96 {strides = array<i32>} : memref<64x4352xbf16, #tpu.memory_space<vmem>>, vector<64x128xbf16>,
    %98 = vector.extract_strided_slice %95 {offsets = [64, 0], sizes = [64, 128], strides = [1, 1]} : vector<256x128xbf16> to vector<64x128xbf16>
    %c0_81 = arith.constant 0 : index
    %c1664_82 = arith.constant 1664 : index
    %99 = vector.load %arg13[%c0_81, %c1664_82] : memref<64x4352xbf16, #tpu.memory_space<vmem>>, vector<64x128xbf16>
    tpu.vector_store %arg13[%c0_81, %c1664_82], %98 {strides = array<i32>} : memref<64x4352xbf16, #tpu.memory_space<vmem>>, vector<64x128xbf16>,
    %100 = vector.extract_strided_slice %95 {offsets = [128, 0], sizes = [64, 128], strides = [1, 1]} : vector<256x128xbf16> to vector<64x128xbf16>
    %c0_83 = arith.constant 0 : index
    %c1792_84 = arith.constant 1792 : index
    %101 = vector.load %arg13[%c0_83, %c1792_84] : memref<64x4352xbf16, #tpu.memory_space<vmem>>, vector<64x128xbf16>
    tpu.vector_store %arg13[%c0_83, %c1792_84], %100 {strides = array<i32>} : memref<64x4352xbf16, #tpu.memory_space<vmem>>, vector<64x128xbf16>,
    %102 = vector.extract_strided_slice %95 {offsets = [192, 0], sizes = [64, 128], strides = [1, 1]} : vector<256x128xbf16> to vector<64x128xbf16>
    %c0_85 = arith.constant 0 : index
    %c1920_86 = arith.constant 1920 : index
    %103 = vector.load %arg13[%c0_85, %c1920_86] : memref<64x4352xbf16, #tpu.memory_space<vmem>>, vector<64x128xbf16>
    tpu.vector_store %arg13[%c0_85, %c1920_86], %102 {strides = array<i32>} : memref<64x4352xbf16, #tpu.memory_space<vmem>>, vector<64x128xbf16>,
    %c0_87 = arith.constant 0 : index
    %c2048_88 = arith.constant 2048 : index
    %104 = vector.load %arg13[%c0_87, %c2048_88] : memref<64x4352xbf16, #tpu.memory_space<vmem>>, vector<64x128xbf16>
    tpu.vector_store %arg13[%c0_87, %c2048_88], %59 {strides = array<i32>} : memref<64x4352xbf16, #tpu.memory_space<vmem>>, vector<64x128xbf16>,
    %c0_89 = arith.constant 0 : index
    %c0_90 = arith.constant 0 : index
    %105 = vector.load %arg13[%c0_89, %c0_90] : memref<64x4352xbf16, #tpu.memory_space<vmem>>, vector<64x2176xbf16>
    %cst_91 = arith.constant dense<0.000000e+00> : vector<64x64xf32>
    %106 = tpu.matmul %105, %53, %cst_91 {dimension_numbers = #tpu.dot_dimension_numbers<[1], [0], [0], [1], [0, 0, 1, 1], [], []>} : vector<64x2176xbf16>, vector<2176x64xbf16>, vector<64x64xf32> -> vector<64x64xf32>
    %107 = vector.broadcast %54 : vector<1x64xf32> to vector<64x64xf32>
    %108 = arith.addf %106, %107 : vector<64x64xf32>
    %109 = arith.addf %52, %108 : vector<64x64xf32>
    %c0_92 = arith.constant 0 : index
    %c0_93 = arith.constant 0 : index
    %110 = vector.load %arg6[%c0_92, %c0_93] : memref<2176x128xbf16, #tpu.memory_space<vmem>>, vector<2176x128xbf16>
    %c0_94 = arith.constant 0 : index
    %c0_95 = arith.constant 0 : index
    %111 = vector.load %arg7[%c0_94, %c0_95] : memref<1x128xf32, #tpu.memory_space<vmem>>, vector<1x128xf32>
    %cst_96 = arith.constant 0.000000e+00 : f32
    %112 = vector.broadcast %cst_96 : f32 to vector<64x64xf32>
    %113 = arith.maximumf %109, %112 : vector<64x64xf32>
    %114 = arith.truncf %113 : vector<64x64xf32> to vector<64x64xbf16>
    %cst_97 = arith.constant 0.000000e+00 : bf16
    %115 = vector.broadcast %cst_97 : bf16 to vector<64x64xbf16>
    %116 = tpu.concatenate %114, %115 in 1 : vector<64x64xbf16>, vector<64x64xbf16> -> vector<64x128xbf16>
    %c0_98 = arith.constant 0 : index
    %c0_99 = arith.constant 0 : index
    %117 = vector.load %arg0[%c0_98, %c0_99] : memref<1024x64xbf16, #tpu.memory_space<vmem>>, vector<256x64xbf16>
    %cst_100 = arith.constant dense<0.000000e+00> : vector<256x128xf32>
    %118 = tpu.matmul %117, %116, %cst_100 {dimension_numbers = #tpu.dot_dimension_numbers<[1], [0], [0], [1], [0, 0, 1, 1], [], []>} : vector<256x64xbf16>, vector<64x128xbf16>, vector<256x128xf32> -> vector<256x128xf32>
    %119 = arith.truncf %118 : vector<256x128xf32> to vector<256x128xbf16>
    %120 = vector.extract_strided_slice %119 {offsets = [0, 0], sizes = [64, 128], strides = [1, 1]} : vector<256x128xbf16> to vector<64x128xbf16>
    %c0_101 = arith.constant 0 : index
    %c0_102 = arith.constant 0 : index
    %121 = vector.load %arg13[%c0_101, %c0_102] : memref<64x4352xbf16, #tpu.memory_space<vmem>>, vector<64x128xbf16>
    tpu.vector_store %arg13[%c0_101, %c0_102], %120 {strides = array<i32>} : memref<64x4352xbf16, #tpu.memory_space<vmem>>, vector<64x128xbf16>,
    %122 = vector.extract_strided_slice %119 {offsets = [64, 0], sizes = [64, 128], strides = [1, 1]} : vector<256x128xbf16> to vector<64x128xbf16>
    %c0_103 = arith.constant 0 : index
    %c128_104 = arith.constant 128 : index
    %123 = vector.load %arg13[%c0_103, %c128_104] : memref<64x4352xbf16, #tpu.memory_space<vmem>>, vector<64x128xbf16>
    tpu.vector_store %arg13[%c0_103, %c128_104], %122 {strides = array<i32>} : memref<64x4352xbf16, #tpu.memory_space<vmem>>, vector<64x128xbf16>,
    %124 = vector.extract_strided_slice %119 {offsets = [128, 0], sizes = [64, 128], strides = [1, 1]} : vector<256x128xbf16> to vector<64x128xbf16>
    %c0_105 = arith.constant 0 : index
    %c256_106 = arith.constant 256 : index
    %125 = vector.load %arg13[%c0_105, %c256_106] : memref<64x4352xbf16, #tpu.memory_space<vmem>>, vector<64x128xbf16>
    tpu.vector_store %arg13[%c0_105, %c256_106], %124 {strides = array<i32>} : memref<64x4352xbf16, #tpu.memory_space<vmem>>, vector<64x128xbf16>,
    %126 = vector.extract_strided_slice %119 {offsets = [192, 0], sizes = [64, 128], strides = [1, 1]} : vector<256x128xbf16> to vector<64x128xbf16>
    %c0_107 = arith.constant 0 : index
    %c384_108 = arith.constant 384 : index
    %127 = vector.load %arg13[%c0_107, %c384_108] : memref<64x4352xbf16, #tpu.memory_space<vmem>>, vector<64x128xbf16>
    tpu.vector_store %arg13[%c0_107, %c384_108], %126 {strides = array<i32>} : memref<64x4352xbf16, #tpu.memory_space<vmem>>, vector<64x128xbf16>,
    %c256_109 = arith.constant 256 : index
    %c0_110 = arith.constant 0 : index
    %128 = vector.load %arg0[%c256_109, %c0_110] : memref<1024x64xbf16, #tpu.memory_space<vmem>>, vector<256x64xbf16>
    %cst_111 = arith.constant dense<0.000000e+00> : vector<256x128xf32>
    %129 = tpu.matmul %128, %116, %cst_111 {dimension_numbers = #tpu.dot_dimension_numbers<[1], [0], [0], [1], [0, 0, 1, 1], [], []>} : vector<256x64xbf16>, vector<64x128xbf16>, vector<256x128xf32> -> vector<256x128xf32>
    %130 = arith.truncf %129 : vector<256x128xf32> to vector<256x128xbf16>
    %131 = vector.extract_strided_slice %130 {offsets = [0, 0], sizes = [64, 128], strides = [1, 1]} : vector<256x128xbf16> to vector<64x128xbf16>
    %c0_112 = arith.constant 0 : index
    %c512_113 = arith.constant 512 : index
    %132 = vector.load %arg13[%c0_112, %c512_113] : memref<64x4352xbf16, #tpu.memory_space<vmem>>, vector<64x128xbf16>
    tpu.vector_store %arg13[%c0_112, %c512_113], %131 {strides = array<i32>} : memref<64x4352xbf16, #tpu.memory_space<vmem>>, vector<64x128xbf16>,
    %133 = vector.extract_strided_slice %130 {offsets = [64, 0], sizes = [64, 128], strides = [1, 1]} : vector<256x128xbf16> to vector<64x128xbf16>
    %c0_114 = arith.constant 0 : index
    %c640_115 = arith.constant 640 : index
    %134 = vector.load %arg13[%c0_114, %c640_115] : memref<64x4352xbf16, #tpu.memory_space<vmem>>, vector<64x128xbf16>
    tpu.vector_store %arg13[%c0_114, %c640_115], %133 {strides = array<i32>} : memref<64x4352xbf16, #tpu.memory_space<vmem>>, vector<64x128xbf16>,
    %135 = vector.extract_strided_slice %130 {offsets = [128, 0], sizes = [64, 128], strides = [1, 1]} : vector<256x128xbf16> to vector<64x128xbf16>
    %c0_116 = arith.constant 0 : index
    %c768_117 = arith.constant 768 : index
    %136 = vector.load %arg13[%c0_116, %c768_117] : memref<64x4352xbf16, #tpu.memory_space<vmem>>, vector<64x128xbf16>
    tpu.vector_store %arg13[%c0_116, %c768_117], %135 {strides = array<i32>} : memref<64x4352xbf16, #tpu.memory_space<vmem>>, vector<64x128xbf16>,
    %137 = vector.extract_strided_slice %130 {offsets = [192, 0], sizes = [64, 128], strides = [1, 1]} : vector<256x128xbf16> to vector<64x128xbf16>
    %c0_118 = arith.constant 0 : index
    %c896_119 = arith.constant 896 : index
    %138 = vector.load %arg13[%c0_118, %c896_119] : memref<64x4352xbf16, #tpu.memory_space<vmem>>, vector<64x128xbf16>
    tpu.vector_store %arg13[%c0_118, %c896_119], %137 {strides = array<i32>} : memref<64x4352xbf16, #tpu.memory_space<vmem>>, vector<64x128xbf16>,
    %c512_120 = arith.constant 512 : index
    %c0_121 = arith.constant 0 : index
    %139 = vector.load %arg0[%c512_120, %c0_121] : memref<1024x64xbf16, #tpu.memory_space<vmem>>, vector<256x64xbf16>
    %cst_122 = arith.constant dense<0.000000e+00> : vector<256x128xf32>
    %140 = tpu.matmul %139, %116, %cst_122 {dimension_numbers = #tpu.dot_dimension_numbers<[1], [0], [0], [1], [0, 0, 1, 1], [], []>} : vector<256x64xbf16>, vector<64x128xbf16>, vector<256x128xf32> -> vector<256x128xf32>
    %141 = arith.truncf %140 : vector<256x128xf32> to vector<256x128xbf16>
    %142 = vector.extract_strided_slice %141 {offsets = [0, 0], sizes = [64, 128], strides = [1, 1]} : vector<256x128xbf16> to vector<64x128xbf16>
    %c0_123 = arith.constant 0 : index
    %c1024_124 = arith.constant 1024 : index
    %143 = vector.load %arg13[%c0_123, %c1024_124] : memref<64x4352xbf16, #tpu.memory_space<vmem>>, vector<64x128xbf16>
    tpu.vector_store %arg13[%c0_123, %c1024_124], %142 {strides = array<i32>} : memref<64x4352xbf16, #tpu.memory_space<vmem>>, vector<64x128xbf16>,
    %144 = vector.extract_strided_slice %141 {offsets = [64, 0], sizes = [64, 128], strides = [1, 1]} : vector<256x128xbf16> to vector<64x128xbf16>
    %c0_125 = arith.constant 0 : index
    %c1152_126 = arith.constant 1152 : index
    %145 = vector.load %arg13[%c0_125, %c1152_126] : memref<64x4352xbf16, #tpu.memory_space<vmem>>, vector<64x128xbf16>
    tpu.vector_store %arg13[%c0_125, %c1152_126], %144 {strides = array<i32>} : memref<64x4352xbf16, #tpu.memory_space<vmem>>, vector<64x128xbf16>,
    %146 = vector.extract_strided_slice %141 {offsets = [128, 0], sizes = [64, 128], strides = [1, 1]} : vector<256x128xbf16> to vector<64x128xbf16>
    %c0_127 = arith.constant 0 : index
    %c1280_128 = arith.constant 1280 : index
    %147 = vector.load %arg13[%c0_127, %c1280_128] : memref<64x4352xbf16, #tpu.memory_space<vmem>>, vector<64x128xbf16>
    tpu.vector_store %arg13[%c0_127, %c1280_128], %146 {strides = array<i32>} : memref<64x4352xbf16, #tpu.memory_space<vmem>>, vector<64x128xbf16>,
    %148 = vector.extract_strided_slice %141 {offsets = [192, 0], sizes = [64, 128], strides = [1, 1]} : vector<256x128xbf16> to vector<64x128xbf16>
    %c0_129 = arith.constant 0 : index
    %c1408_130 = arith.constant 1408 : index
    %149 = vector.load %arg13[%c0_129, %c1408_130] : memref<64x4352xbf16, #tpu.memory_space<vmem>>, vector<64x128xbf16>
    tpu.vector_store %arg13[%c0_129, %c1408_130], %148 {strides = array<i32>} : memref<64x4352xbf16, #tpu.memory_space<vmem>>, vector<64x128xbf16>,
    %c768_131 = arith.constant 768 : index
    %c0_132 = arith.constant 0 : index
    %150 = vector.load %arg0[%c768_131, %c0_132] : memref<1024x64xbf16, #tpu.memory_space<vmem>>, vector<256x64xbf16>
    %cst_133 = arith.constant dense<0.000000e+00> : vector<256x128xf32>
    %151 = tpu.matmul %150, %116, %cst_133 {dimension_numbers = #tpu.dot_dimension_numbers<[1], [0], [0], [1], [0, 0, 1, 1], [], []>} : vector<256x64xbf16>, vector<64x128xbf16>, vector<256x128xf32> -> vector<256x128xf32>
    %152 = arith.truncf %151 : vector<256x128xf32> to vector<256x128xbf16>
    %153 = vector.extract_strided_slice %152 {offsets = [0, 0], sizes = [64, 128], strides = [1, 1]} : vector<256x128xbf16> to vector<64x128xbf16>
    %c0_134 = arith.constant 0 : index
    %c1536_135 = arith.constant 1536 : index
    %154 = vector.load %arg13[%c0_134, %c1536_135] : memref<64x4352xbf16, #tpu.memory_space<vmem>>, vector<64x128xbf16>
    tpu.vector_store %arg13[%c0_134, %c1536_135], %153 {strides = array<i32>} : memref<64x4352xbf16, #tpu.memory_space<vmem>>, vector<64x128xbf16>,
    %155 = vector.extract_strided_slice %152 {offsets = [64, 0], sizes = [64, 128], strides = [1, 1]} : vector<256x128xbf16> to vector<64x128xbf16>
    %c0_136 = arith.constant 0 : index
    %c1664_137 = arith.constant 1664 : index
    %156 = vector.load %arg13[%c0_136, %c1664_137] : memref<64x4352xbf16, #tpu.memory_space<vmem>>, vector<64x128xbf16>
    tpu.vector_store %arg13[%c0_136, %c1664_137], %155 {strides = array<i32>} : memref<64x4352xbf16, #tpu.memory_space<vmem>>, vector<64x128xbf16>,
    %157 = vector.extract_strided_slice %152 {offsets = [128, 0], sizes = [64, 128], strides = [1, 1]} : vector<256x128xbf16> to vector<64x128xbf16>
    %c0_138 = arith.constant 0 : index
    %c1792_139 = arith.constant 1792 : index
    %158 = vector.load %arg13[%c0_138, %c1792_139] : memref<64x4352xbf16, #tpu.memory_space<vmem>>, vector<64x128xbf16>
    tpu.vector_store %arg13[%c0_138, %c1792_139], %157 {strides = array<i32>} : memref<64x4352xbf16, #tpu.memory_space<vmem>>, vector<64x128xbf16>,
    %159 = vector.extract_strided_slice %152 {offsets = [192, 0], sizes = [64, 128], strides = [1, 1]} : vector<256x128xbf16> to vector<64x128xbf16>
    %c0_140 = arith.constant 0 : index
    %c1920_141 = arith.constant 1920 : index
    %160 = vector.load %arg13[%c0_140, %c1920_141] : memref<64x4352xbf16, #tpu.memory_space<vmem>>, vector<64x128xbf16>
    tpu.vector_store %arg13[%c0_140, %c1920_141], %159 {strides = array<i32>} : memref<64x4352xbf16, #tpu.memory_space<vmem>>, vector<64x128xbf16>,
    %c0_142 = arith.constant 0 : index
    %c2048_143 = arith.constant 2048 : index
    %161 = vector.load %arg13[%c0_142, %c2048_143] : memref<64x4352xbf16, #tpu.memory_space<vmem>>, vector<64x128xbf16>
    tpu.vector_store %arg13[%c0_142, %c2048_143], %116 {strides = array<i32>} : memref<64x4352xbf16, #tpu.memory_space<vmem>>, vector<64x128xbf16>,
    %c0_144 = arith.constant 0 : index
    %c0_145 = arith.constant 0 : index
    %162 = vector.load %arg13[%c0_144, %c0_145] : memref<64x4352xbf16, #tpu.memory_space<vmem>>, vector<64x2176xbf16>
    %cst_146 = arith.constant dense<0.000000e+00> : vector<64x128xf32>
    %163 = tpu.matmul %162, %110, %cst_146 {dimension_numbers = #tpu.dot_dimension_numbers<[1], [0], [0], [1], [0, 0, 1, 1], [], []>} : vector<64x2176xbf16>, vector<2176x128xbf16>, vector<64x128xf32> -> vector<64x128xf32>
    %164 = vector.broadcast %111 : vector<1x128xf32> to vector<64x128xf32>
    %165 = arith.addf %163, %164 : vector<64x128xf32>
    %c0_147 = arith.constant 0 : index
    %c0_148 = arith.constant 0 : index
    %166 = vector.load %arg8[%c0_147, %c0_148] : memref<2176x256xbf16, #tpu.memory_space<vmem>>, vector<2176x256xbf16>
    %c0_149 = arith.constant 0 : index
    %c0_150 = arith.constant 0 : index
    %167 = vector.load %arg9[%c0_149, %c0_150] : memref<1x256xf32, #tpu.memory_space<vmem>>, vector<1x256xf32>
    %cst_151 = arith.constant 0.000000e+00 : f32
    %168 = vector.broadcast %cst_151 : f32 to vector<64x128xf32>
    %169 = arith.maximumf %165, %168 : vector<64x128xf32>
    %170 = arith.truncf %169 : vector<64x128xf32> to vector<64x128xbf16>
    %c0_152 = arith.constant 0 : index
    %c0_153 = arith.constant 0 : index
    %171 = vector.load %arg0[%c0_152, %c0_153] : memref<1024x64xbf16, #tpu.memory_space<vmem>>, vector<256x64xbf16>
    %cst_154 = arith.constant dense<0.000000e+00> : vector<256x128xf32>
    %172 = tpu.matmul %171, %170, %cst_154 {dimension_numbers = #tpu.dot_dimension_numbers<[1], [0], [0], [1], [0, 0, 1, 1], [], []>} : vector<256x64xbf16>, vector<64x128xbf16>, vector<256x128xf32> -> vector<256x128xf32>
    %173 = arith.truncf %172 : vector<256x128xf32> to vector<256x128xbf16>
    %174 = vector.extract_strided_slice %173 {offsets = [0, 0], sizes = [64, 128], strides = [1, 1]} : vector<256x128xbf16> to vector<64x128xbf16>
    %c0_155 = arith.constant 0 : index
    %c0_156 = arith.constant 0 : index
    %175 = vector.load %arg13[%c0_155, %c0_156] : memref<64x4352xbf16, #tpu.memory_space<vmem>>, vector<64x128xbf16>
    tpu.vector_store %arg13[%c0_155, %c0_156], %174 {strides = array<i32>} : memref<64x4352xbf16, #tpu.memory_space<vmem>>, vector<64x128xbf16>,
    %176 = vector.extract_strided_slice %173 {offsets = [64, 0], sizes = [64, 128], strides = [1, 1]} : vector<256x128xbf16> to vector<64x128xbf16>
    %c0_157 = arith.constant 0 : index
    %c128_158 = arith.constant 128 : index
    %177 = vector.load %arg13[%c0_157, %c128_158] : memref<64x4352xbf16, #tpu.memory_space<vmem>>, vector<64x128xbf16>
    tpu.vector_store %arg13[%c0_157, %c128_158], %176 {strides = array<i32>} : memref<64x4352xbf16, #tpu.memory_space<vmem>>, vector<64x128xbf16>,
    %178 = vector.extract_strided_slice %173 {offsets = [128, 0], sizes = [64, 128], strides = [1, 1]} : vector<256x128xbf16> to vector<64x128xbf16>
    %c0_159 = arith.constant 0 : index
    %c256_160 = arith.constant 256 : index
    %179 = vector.load %arg13[%c0_159, %c256_160] : memref<64x4352xbf16, #tpu.memory_space<vmem>>, vector<64x128xbf16>
    tpu.vector_store %arg13[%c0_159, %c256_160], %178 {strides = array<i32>} : memref<64x4352xbf16, #tpu.memory_space<vmem>>, vector<64x128xbf16>,
    %180 = vector.extract_strided_slice %173 {offsets = [192, 0], sizes = [64, 128], strides = [1, 1]} : vector<256x128xbf16> to vector<64x128xbf16>
    %c0_161 = arith.constant 0 : index
    %c384_162 = arith.constant 384 : index
    %181 = vector.load %arg13[%c0_161, %c384_162] : memref<64x4352xbf16, #tpu.memory_space<vmem>>, vector<64x128xbf16>
    tpu.vector_store %arg13[%c0_161, %c384_162], %180 {strides = array<i32>} : memref<64x4352xbf16, #tpu.memory_space<vmem>>, vector<64x128xbf16>,
    %c256_163 = arith.constant 256 : index
    %c0_164 = arith.constant 0 : index
    %182 = vector.load %arg0[%c256_163, %c0_164] : memref<1024x64xbf16, #tpu.memory_space<vmem>>, vector<256x64xbf16>
    %cst_165 = arith.constant dense<0.000000e+00> : vector<256x128xf32>
    %183 = tpu.matmul %182, %170, %cst_165 {dimension_numbers = #tpu.dot_dimension_numbers<[1], [0], [0], [1], [0, 0, 1, 1], [], []>} : vector<256x64xbf16>, vector<64x128xbf16>, vector<256x128xf32> -> vector<256x128xf32>
    %184 = arith.truncf %183 : vector<256x128xf32> to vector<256x128xbf16>
    %185 = vector.extract_strided_slice %184 {offsets = [0, 0], sizes = [64, 128], strides = [1, 1]} : vector<256x128xbf16> to vector<64x128xbf16>
    %c0_166 = arith.constant 0 : index
    %c512_167 = arith.constant 512 : index
    %186 = vector.load %arg13[%c0_166, %c512_167] : memref<64x4352xbf16, #tpu.memory_space<vmem>>, vector<64x128xbf16>
    tpu.vector_store %arg13[%c0_166, %c512_167], %185 {strides = array<i32>} : memref<64x4352xbf16, #tpu.memory_space<vmem>>, vector<64x128xbf16>,
    %187 = vector.extract_strided_slice %184 {offsets = [64, 0], sizes = [64, 128], strides = [1, 1]} : vector<256x128xbf16> to vector<64x128xbf16>
    %c0_168 = arith.constant 0 : index
    %c640_169 = arith.constant 640 : index
    %188 = vector.load %arg13[%c0_168, %c640_169] : memref<64x4352xbf16, #tpu.memory_space<vmem>>, vector<64x128xbf16>
    tpu.vector_store %arg13[%c0_168, %c640_169], %187 {strides = array<i32>} : memref<64x4352xbf16, #tpu.memory_space<vmem>>, vector<64x128xbf16>,
    %189 = vector.extract_strided_slice %184 {offsets = [128, 0], sizes = [64, 128], strides = [1, 1]} : vector<256x128xbf16> to vector<64x128xbf16>
    %c0_170 = arith.constant 0 : index
    %c768_171 = arith.constant 768 : index
    %190 = vector.load %arg13[%c0_170, %c768_171] : memref<64x4352xbf16, #tpu.memory_space<vmem>>, vector<64x128xbf16>
    tpu.vector_store %arg13[%c0_170, %c768_171], %189 {strides = array<i32>} : memref<64x4352xbf16, #tpu.memory_space<vmem>>, vector<64x128xbf16>,
    %191 = vector.extract_strided_slice %184 {offsets = [192, 0], sizes = [64, 128], strides = [1, 1]} : vector<256x128xbf16> to vector<64x128xbf16>
    %c0_172 = arith.constant 0 : index
    %c896_173 = arith.constant 896 : index
    %192 = vector.load %arg13[%c0_172, %c896_173] : memref<64x4352xbf16, #tpu.memory_space<vmem>>, vector<64x128xbf16>
    tpu.vector_store %arg13[%c0_172, %c896_173], %191 {strides = array<i32>} : memref<64x4352xbf16, #tpu.memory_space<vmem>>, vector<64x128xbf16>,
    %c512_174 = arith.constant 512 : index
    %c0_175 = arith.constant 0 : index
    %193 = vector.load %arg0[%c512_174, %c0_175] : memref<1024x64xbf16, #tpu.memory_space<vmem>>, vector<256x64xbf16>
    %cst_176 = arith.constant dense<0.000000e+00> : vector<256x128xf32>
    %194 = tpu.matmul %193, %170, %cst_176 {dimension_numbers = #tpu.dot_dimension_numbers<[1], [0], [0], [1], [0, 0, 1, 1], [], []>} : vector<256x64xbf16>, vector<64x128xbf16>, vector<256x128xf32> -> vector<256x128xf32>
    %195 = arith.truncf %194 : vector<256x128xf32> to vector<256x128xbf16>
    %196 = vector.extract_strided_slice %195 {offsets = [0, 0], sizes = [64, 128], strides = [1, 1]} : vector<256x128xbf16> to vector<64x128xbf16>
    %c0_177 = arith.constant 0 : index
    %c1024_178 = arith.constant 1024 : index
    %197 = vector.load %arg13[%c0_177, %c1024_178] : memref<64x4352xbf16, #tpu.memory_space<vmem>>, vector<64x128xbf16>
    tpu.vector_store %arg13[%c0_177, %c1024_178], %196 {strides = array<i32>} : memref<64x4352xbf16, #tpu.memory_space<vmem>>, vector<64x128xbf16>,
    %198 = vector.extract_strided_slice %195 {offsets = [64, 0], sizes = [64, 128], strides = [1, 1]} : vector<256x128xbf16> to vector<64x128xbf16>
    %c0_179 = arith.constant 0 : index
    %c1152_180 = arith.constant 1152 : index
    %199 = vector.load %arg13[%c0_179, %c1152_180] : memref<64x4352xbf16, #tpu.memory_space<vmem>>, vector<64x128xbf16>
    tpu.vector_store %arg13[%c0_179, %c1152_180], %198 {strides = array<i32>} : memref<64x4352xbf16, #tpu.memory_space<vmem>>, vector<64x128xbf16>,
    %200 = vector.extract_strided_slice %195 {offsets = [128, 0], sizes = [64, 128], strides = [1, 1]} : vector<256x128xbf16> to vector<64x128xbf16>
    %c0_181 = arith.constant 0 : index
    %c1280_182 = arith.constant 1280 : index
    %201 = vector.load %arg13[%c0_181, %c1280_182] : memref<64x4352xbf16, #tpu.memory_space<vmem>>, vector<64x128xbf16>
    tpu.vector_store %arg13[%c0_181, %c1280_182], %200 {strides = array<i32>} : memref<64x4352xbf16, #tpu.memory_space<vmem>>, vector<64x128xbf16>,
    %202 = vector.extract_strided_slice %195 {offsets = [192, 0], sizes = [64, 128], strides = [1, 1]} : vector<256x128xbf16> to vector<64x128xbf16>
    %c0_183 = arith.constant 0 : index
    %c1408_184 = arith.constant 1408 : index
    %203 = vector.load %arg13[%c0_183, %c1408_184] : memref<64x4352xbf16, #tpu.memory_space<vmem>>, vector<64x128xbf16>
    tpu.vector_store %arg13[%c0_183, %c1408_184], %202 {strides = array<i32>} : memref<64x4352xbf16, #tpu.memory_space<vmem>>, vector<64x128xbf16>,
    %c768_185 = arith.constant 768 : index
    %c0_186 = arith.constant 0 : index
    %204 = vector.load %arg0[%c768_185, %c0_186] : memref<1024x64xbf16, #tpu.memory_space<vmem>>, vector<256x64xbf16>
    %cst_187 = arith.constant dense<0.000000e+00> : vector<256x128xf32>
    %205 = tpu.matmul %204, %170, %cst_187 {dimension_numbers = #tpu.dot_dimension_numbers<[1], [0], [0], [1], [0, 0, 1, 1], [], []>} : vector<256x64xbf16>, vector<64x128xbf16>, vector<256x128xf32> -> vector<256x128xf32>
    %206 = arith.truncf %205 : vector<256x128xf32> to vector<256x128xbf16>
    %207 = vector.extract_strided_slice %206 {offsets = [0, 0], sizes = [64, 128], strides = [1, 1]} : vector<256x128xbf16> to vector<64x128xbf16>
    %c0_188 = arith.constant 0 : index
    %c1536_189 = arith.constant 1536 : index
    %208 = vector.load %arg13[%c0_188, %c1536_189] : memref<64x4352xbf16, #tpu.memory_space<vmem>>, vector<64x128xbf16>
    tpu.vector_store %arg13[%c0_188, %c1536_189], %207 {strides = array<i32>} : memref<64x4352xbf16, #tpu.memory_space<vmem>>, vector<64x128xbf16>,
    %209 = vector.extract_strided_slice %206 {offsets = [64, 0], sizes = [64, 128], strides = [1, 1]} : vector<256x128xbf16> to vector<64x128xbf16>
    %c0_190 = arith.constant 0 : index
    %c1664_191 = arith.constant 1664 : index
    %210 = vector.load %arg13[%c0_190, %c1664_191] : memref<64x4352xbf16, #tpu.memory_space<vmem>>, vector<64x128xbf16>
    tpu.vector_store %arg13[%c0_190, %c1664_191], %209 {strides = array<i32>} : memref<64x4352xbf16, #tpu.memory_space<vmem>>, vector<64x128xbf16>,
    %211 = vector.extract_strided_slice %206 {offsets = [128, 0], sizes = [64, 128], strides = [1, 1]} : vector<256x128xbf16> to vector<64x128xbf16>
    %c0_192 = arith.constant 0 : index
    %c1792_193 = arith.constant 1792 : index
    %212 = vector.load %arg13[%c0_192, %c1792_193] : memref<64x4352xbf16, #tpu.memory_space<vmem>>, vector<64x128xbf16>
    tpu.vector_store %arg13[%c0_192, %c1792_193], %211 {strides = array<i32>} : memref<64x4352xbf16, #tpu.memory_space<vmem>>, vector<64x128xbf16>,
    %213 = vector.extract_strided_slice %206 {offsets = [192, 0], sizes = [64, 128], strides = [1, 1]} : vector<256x128xbf16> to vector<64x128xbf16>
    %c0_194 = arith.constant 0 : index
    %c1920_195 = arith.constant 1920 : index
    %214 = vector.load %arg13[%c0_194, %c1920_195] : memref<64x4352xbf16, #tpu.memory_space<vmem>>, vector<64x128xbf16>
    tpu.vector_store %arg13[%c0_194, %c1920_195], %213 {strides = array<i32>} : memref<64x4352xbf16, #tpu.memory_space<vmem>>, vector<64x128xbf16>,
    %c0_196 = arith.constant 0 : index
    %c2048_197 = arith.constant 2048 : index
    %215 = vector.load %arg13[%c0_196, %c2048_197] : memref<64x4352xbf16, #tpu.memory_space<vmem>>, vector<64x128xbf16>
    tpu.vector_store %arg13[%c0_196, %c2048_197], %170 {strides = array<i32>} : memref<64x4352xbf16, #tpu.memory_space<vmem>>, vector<64x128xbf16>,
    %c0_198 = arith.constant 0 : index
    %c0_199 = arith.constant 0 : index
    %216 = vector.load %arg13[%c0_198, %c0_199] : memref<64x4352xbf16, #tpu.memory_space<vmem>>, vector<64x2176xbf16>
    %cst_200 = arith.constant dense<0.000000e+00> : vector<64x256xf32>
    %217 = tpu.matmul %216, %166, %cst_200 {dimension_numbers = #tpu.dot_dimension_numbers<[1], [0], [0], [1], [0, 0, 1, 1], [], []>} : vector<64x2176xbf16>, vector<2176x256xbf16>, vector<64x256xf32> -> vector<64x256xf32>
    %218 = vector.broadcast %167 : vector<1x256xf32> to vector<64x256xf32>
    %219 = arith.addf %217, %218 : vector<64x256xf32>
    %c0_201 = arith.constant 0 : index
    %c0_202 = arith.constant 0 : index
    %220 = vector.load %arg10[%c0_201, %c0_202] : memref<4352x128xbf16, #tpu.memory_space<vmem>>, vector<4352x128xbf16>
    %c0_203 = arith.constant 0 : index
    %c0_204 = arith.constant 0 : index
    %221 = vector.load %arg11[%c0_203, %c0_204] : memref<1x128xf32, #tpu.memory_space<vmem>>, vector<1x128xf32>
    %cst_205 = arith.constant 0.000000e+00 : f32
    %222 = vector.broadcast %cst_205 : f32 to vector<64x256xf32>
    %223 = arith.maximumf %219, %222 : vector<64x256xf32>
    %224 = arith.truncf %223 : vector<64x256xf32> to vector<64x256xbf16>
    %c0_206 = arith.constant 0 : index
    %c0_207 = arith.constant 0 : index
    %225 = vector.load %arg0[%c0_206, %c0_207] : memref<1024x64xbf16, #tpu.memory_space<vmem>>, vector<256x64xbf16>
    %cst_208 = arith.constant dense<0.000000e+00> : vector<256x256xf32>
    %226 = tpu.matmul %225, %224, %cst_208 {dimension_numbers = #tpu.dot_dimension_numbers<[1], [0], [0], [1], [0, 0, 1, 1], [], []>} : vector<256x64xbf16>, vector<64x256xbf16>, vector<256x256xf32> -> vector<256x256xf32>
    %227 = arith.truncf %226 : vector<256x256xf32> to vector<256x256xbf16>
    %228 = vector.extract_strided_slice %227 {offsets = [0, 0], sizes = [64, 256], strides = [1, 1]} : vector<256x256xbf16> to vector<64x256xbf16>
    %c0_209 = arith.constant 0 : index
    %c0_210 = arith.constant 0 : index
    %229 = vector.load %arg13[%c0_209, %c0_210] : memref<64x4352xbf16, #tpu.memory_space<vmem>>, vector<64x256xbf16>
    tpu.vector_store %arg13[%c0_209, %c0_210], %228 {strides = array<i32>} : memref<64x4352xbf16, #tpu.memory_space<vmem>>, vector<64x256xbf16>,
    %230 = vector.extract_strided_slice %227 {offsets = [64, 0], sizes = [64, 256], strides = [1, 1]} : vector<256x256xbf16> to vector<64x256xbf16>
    %c0_211 = arith.constant 0 : index
    %c256_212 = arith.constant 256 : index
    %231 = vector.load %arg13[%c0_211, %c256_212] : memref<64x4352xbf16, #tpu.memory_space<vmem>>, vector<64x256xbf16>
    tpu.vector_store %arg13[%c0_211, %c256_212], %230 {strides = array<i32>} : memref<64x4352xbf16, #tpu.memory_space<vmem>>, vector<64x256xbf16>,
    %232 = vector.extract_strided_slice %227 {offsets = [128, 0], sizes = [64, 256], strides = [1, 1]} : vector<256x256xbf16> to vector<64x256xbf16>
    %c0_213 = arith.constant 0 : index
    %c512_214 = arith.constant 512 : index
    %233 = vector.load %arg13[%c0_213, %c512_214] : memref<64x4352xbf16, #tpu.memory_space<vmem>>, vector<64x256xbf16>
    tpu.vector_store %arg13[%c0_213, %c512_214], %232 {strides = array<i32>} : memref<64x4352xbf16, #tpu.memory_space<vmem>>, vector<64x256xbf16>,
    %234 = vector.extract_strided_slice %227 {offsets = [192, 0], sizes = [64, 256], strides = [1, 1]} : vector<256x256xbf16> to vector<64x256xbf16>
    %c0_215 = arith.constant 0 : index
    %c768_216 = arith.constant 768 : index
    %235 = vector.load %arg13[%c0_215, %c768_216] : memref<64x4352xbf16, #tpu.memory_space<vmem>>, vector<64x256xbf16>
    tpu.vector_store %arg13[%c0_215, %c768_216], %234 {strides = array<i32>} : memref<64x4352xbf16, #tpu.memory_space<vmem>>, vector<64x256xbf16>,
    %c256_217 = arith.constant 256 : index
    %c0_218 = arith.constant 0 : index
    %236 = vector.load %arg0[%c256_217, %c0_218] : memref<1024x64xbf16, #tpu.memory_space<vmem>>, vector<256x64xbf16>
    %cst_219 = arith.constant dense<0.000000e+00> : vector<256x256xf32>
    %237 = tpu.matmul %236, %224, %cst_219 {dimension_numbers = #tpu.dot_dimension_numbers<[1], [0], [0], [1], [0, 0, 1, 1], [], []>} : vector<256x64xbf16>, vector<64x256xbf16>, vector<256x256xf32> -> vector<256x256xf32>
    %238 = arith.truncf %237 : vector<256x256xf32> to vector<256x256xbf16>
    %239 = vector.extract_strided_slice %238 {offsets = [0, 0], sizes = [64, 256], strides = [1, 1]} : vector<256x256xbf16> to vector<64x256xbf16>
    %c0_220 = arith.constant 0 : index
    %c1024_221 = arith.constant 1024 : index
    %240 = vector.load %arg13[%c0_220, %c1024_221] : memref<64x4352xbf16, #tpu.memory_space<vmem>>, vector<64x256xbf16>
    tpu.vector_store %arg13[%c0_220, %c1024_221], %239 {strides = array<i32>} : memref<64x4352xbf16, #tpu.memory_space<vmem>>, vector<64x256xbf16>,
    %241 = vector.extract_strided_slice %238 {offsets = [64, 0], sizes = [64, 256], strides = [1, 1]} : vector<256x256xbf16> to vector<64x256xbf16>
    %c0_222 = arith.constant 0 : index
    %c1280_223 = arith.constant 1280 : index
    %242 = vector.load %arg13[%c0_222, %c1280_223] : memref<64x4352xbf16, #tpu.memory_space<vmem>>, vector<64x256xbf16>
    tpu.vector_store %arg13[%c0_222, %c1280_223], %241 {strides = array<i32>} : memref<64x4352xbf16, #tpu.memory_space<vmem>>, vector<64x256xbf16>,
    %243 = vector.extract_strided_slice %238 {offsets = [128, 0], sizes = [64, 256], strides = [1, 1]} : vector<256x256xbf16> to vector<64x256xbf16>
    %c0_224 = arith.constant 0 : index
    %c1536_225 = arith.constant 1536 : index
    %244 = vector.load %arg13[%c0_224, %c1536_225] : memref<64x4352xbf16, #tpu.memory_space<vmem>>, vector<64x256xbf16>
    tpu.vector_store %arg13[%c0_224, %c1536_225], %243 {strides = array<i32>} : memref<64x4352xbf16, #tpu.memory_space<vmem>>, vector<64x256xbf16>,
    %245 = vector.extract_strided_slice %238 {offsets = [192, 0], sizes = [64, 256], strides = [1, 1]} : vector<256x256xbf16> to vector<64x256xbf16>
    %c0_226 = arith.constant 0 : index
    %c1792_227 = arith.constant 1792 : index
    %246 = vector.load %arg13[%c0_226, %c1792_227] : memref<64x4352xbf16, #tpu.memory_space<vmem>>, vector<64x256xbf16>
    tpu.vector_store %arg13[%c0_226, %c1792_227], %245 {strides = array<i32>} : memref<64x4352xbf16, #tpu.memory_space<vmem>>, vector<64x256xbf16>,
    %c512_228 = arith.constant 512 : index
    %c0_229 = arith.constant 0 : index
    %247 = vector.load %arg0[%c512_228, %c0_229] : memref<1024x64xbf16, #tpu.memory_space<vmem>>, vector<256x64xbf16>
    %cst_230 = arith.constant dense<0.000000e+00> : vector<256x256xf32>
    %248 = tpu.matmul %247, %224, %cst_230 {dimension_numbers = #tpu.dot_dimension_numbers<[1], [0], [0], [1], [0, 0, 1, 1], [], []>} : vector<256x64xbf16>, vector<64x256xbf16>, vector<256x256xf32> -> vector<256x256xf32>
    %249 = arith.truncf %248 : vector<256x256xf32> to vector<256x256xbf16>
    %250 = vector.extract_strided_slice %249 {offsets = [0, 0], sizes = [64, 256], strides = [1, 1]} : vector<256x256xbf16> to vector<64x256xbf16>
    %c0_231 = arith.constant 0 : index
    %c2048_232 = arith.constant 2048 : index
    %251 = vector.load %arg13[%c0_231, %c2048_232] : memref<64x4352xbf16, #tpu.memory_space<vmem>>, vector<64x256xbf16>
    tpu.vector_store %arg13[%c0_231, %c2048_232], %250 {strides = array<i32>} : memref<64x4352xbf16, #tpu.memory_space<vmem>>, vector<64x256xbf16>,
    %252 = vector.extract_strided_slice %249 {offsets = [64, 0], sizes = [64, 256], strides = [1, 1]} : vector<256x256xbf16> to vector<64x256xbf16>
    %c0_233 = arith.constant 0 : index
    %c2304 = arith.constant 2304 : index
    %253 = vector.load %arg13[%c0_233, %c2304] : memref<64x4352xbf16, #tpu.memory_space<vmem>>, vector<64x256xbf16>
    tpu.vector_store %arg13[%c0_233, %c2304], %252 {strides = array<i32>} : memref<64x4352xbf16, #tpu.memory_space<vmem>>, vector<64x256xbf16>,
    %254 = vector.extract_strided_slice %249 {offsets = [128, 0], sizes = [64, 256], strides = [1, 1]} : vector<256x256xbf16> to vector<64x256xbf16>
    %c0_234 = arith.constant 0 : index
    %c2560 = arith.constant 2560 : index
    %255 = vector.load %arg13[%c0_234, %c2560] : memref<64x4352xbf16, #tpu.memory_space<vmem>>, vector<64x256xbf16>
    tpu.vector_store %arg13[%c0_234, %c2560], %254 {strides = array<i32>} : memref<64x4352xbf16, #tpu.memory_space<vmem>>, vector<64x256xbf16>,
    %256 = vector.extract_strided_slice %249 {offsets = [192, 0], sizes = [64, 256], strides = [1, 1]} : vector<256x256xbf16> to vector<64x256xbf16>
    %c0_235 = arith.constant 0 : index
    %c2816 = arith.constant 2816 : index
    %257 = vector.load %arg13[%c0_235, %c2816] : memref<64x4352xbf16, #tpu.memory_space<vmem>>, vector<64x256xbf16>
    tpu.vector_store %arg13[%c0_235, %c2816], %256 {strides = array<i32>} : memref<64x4352xbf16, #tpu.memory_space<vmem>>, vector<64x256xbf16>,
    %c768_236 = arith.constant 768 : index
    %c0_237 = arith.constant 0 : index
    %258 = vector.load %arg0[%c768_236, %c0_237] : memref<1024x64xbf16, #tpu.memory_space<vmem>>, vector<256x64xbf16>
    %cst_238 = arith.constant dense<0.000000e+00> : vector<256x256xf32>
    %259 = tpu.matmul %258, %224, %cst_238 {dimension_numbers = #tpu.dot_dimension_numbers<[1], [0], [0], [1], [0, 0, 1, 1], [], []>} : vector<256x64xbf16>, vector<64x256xbf16>, vector<256x256xf32> -> vector<256x256xf32>
    %260 = arith.truncf %259 : vector<256x256xf32> to vector<256x256xbf16>
    %261 = vector.extract_strided_slice %260 {offsets = [0, 0], sizes = [64, 256], strides = [1, 1]} : vector<256x256xbf16> to vector<64x256xbf16>
    %c0_239 = arith.constant 0 : index
    %c3072 = arith.constant 3072 : index
    %262 = vector.load %arg13[%c0_239, %c3072] : memref<64x4352xbf16, #tpu.memory_space<vmem>>, vector<64x256xbf16>
    tpu.vector_store %arg13[%c0_239, %c3072], %261 {strides = array<i32>} : memref<64x4352xbf16, #tpu.memory_space<vmem>>, vector<64x256xbf16>,
    %263 = vector.extract_strided_slice %260 {offsets = [64, 0], sizes = [64, 256], strides = [1, 1]} : vector<256x256xbf16> to vector<64x256xbf16>
    %c0_240 = arith.constant 0 : index
    %c3328 = arith.constant 3328 : index
    %264 = vector.load %arg13[%c0_240, %c3328] : memref<64x4352xbf16, #tpu.memory_space<vmem>>, vector<64x256xbf16>
    tpu.vector_store %arg13[%c0_240, %c3328], %263 {strides = array<i32>} : memref<64x4352xbf16, #tpu.memory_space<vmem>>, vector<64x256xbf16>,
    %265 = vector.extract_strided_slice %260 {offsets = [128, 0], sizes = [64, 256], strides = [1, 1]} : vector<256x256xbf16> to vector<64x256xbf16>
    %c0_241 = arith.constant 0 : index
    %c3584 = arith.constant 3584 : index
    %266 = vector.load %arg13[%c0_241, %c3584] : memref<64x4352xbf16, #tpu.memory_space<vmem>>, vector<64x256xbf16>
    tpu.vector_store %arg13[%c0_241, %c3584], %265 {strides = array<i32>} : memref<64x4352xbf16, #tpu.memory_space<vmem>>, vector<64x256xbf16>,
    %267 = vector.extract_strided_slice %260 {offsets = [192, 0], sizes = [64, 256], strides = [1, 1]} : vector<256x256xbf16> to vector<64x256xbf16>
    %c0_242 = arith.constant 0 : index
    %c3840 = arith.constant 3840 : index
    %268 = vector.load %arg13[%c0_242, %c3840] : memref<64x4352xbf16, #tpu.memory_space<vmem>>, vector<64x256xbf16>
    tpu.vector_store %arg13[%c0_242, %c3840], %267 {strides = array<i32>} : memref<64x4352xbf16, #tpu.memory_space<vmem>>, vector<64x256xbf16>,
    %c0_243 = arith.constant 0 : index
    %c4096 = arith.constant 4096 : index
    %269 = vector.load %arg13[%c0_243, %c4096] : memref<64x4352xbf16, #tpu.memory_space<vmem>>, vector<64x256xbf16>
    tpu.vector_store %arg13[%c0_243, %c4096], %224 {strides = array<i32>} : memref<64x4352xbf16, #tpu.memory_space<vmem>>, vector<64x256xbf16>,
    %c0_244 = arith.constant 0 : index
    %c0_245 = arith.constant 0 : index
    %270 = vector.load %arg13[%c0_244, %c0_245] : memref<64x4352xbf16, #tpu.memory_space<vmem>>, vector<64x4352xbf16>
    %cst_246 = arith.constant dense<0.000000e+00> : vector<64x128xf32>
    %271 = tpu.matmul %270, %220, %cst_246 {dimension_numbers = #tpu.dot_dimension_numbers<[1], [0], [0], [1], [0, 0, 1, 1], [], []>} : vector<64x4352xbf16>, vector<4352x128xbf16>, vector<64x128xf32> -> vector<64x128xf32>
    %272 = vector.broadcast %221 : vector<1x128xf32> to vector<64x128xf32>
    %273 = arith.addf %271, %272 : vector<64x128xf32>
    %274 = math.tanh %273 : vector<64x128xf32>
    %cst_247 = arith.constant 8.000000e-01 : f32
    %275 = vector.broadcast %cst_247 : f32 to vector<64x128xf32>
    %276 = arith.mulf %274, %275 : vector<64x128xf32>
    %cst_248 = arith.constant 1.000000e+00 : f32
    %277 = vector.broadcast %cst_248 : f32 to vector<64x128xf32>
    %278 = arith.addf %276, %277 : vector<64x128xf32>
    %c0_249 = arith.constant 0 : index
    %c0_250 = arith.constant 0 : index
    %279 = vector.load %arg12[%c0_249, %c0_250] : memref<64x128xf32, #tpu.memory_space<vmem>>, vector<64x128xf32>
    tpu.vector_store %arg12[%c0_249, %c0_250], %278 {strides = array<i32>} : memref<64x128xf32, #tpu.memory_space<vmem>>, vector<64x128xf32>,
    return
  }
}

</mosaic_0001>

<bundles_post_ra>
// kernel: parameter_estimate_forward.1
= control target key start
LH: loop header
LB: loop body
LE: loop exit
PB: predicated region body
PF: predicated region fallthrough
CT: control target
= control target key end

     0   :  { %vm439_vm0 = vcmask 523264   ;;  %s31888_s1 = inlined_call_operand.vmem [shape: f32[64,128], index: 1, kind: input, shape index: {}]   ;;  %s31889_s0 = inlined_call_operand.vmem [shape: bf16[1024,64], index: 0, kind: input, shape index: {}]   ;;  %s31890_s2 = inlined_call_operand.vmem [shape: bf16[2176,64], index: 2, kind: input, shape index: {}]   ;;  %s31891_s3 = inlined_call_operand.vmem [shape: f32[1,64], index: 3, kind: input, shape index: {}]   ;;  %s31892_s4 = inlined_call_operand.vmem [shape: bf16[2176,64], index: 4, kind: input, shape index: {}]   ;;  %s31893_s5 = inlined_call_operand.vmem [shape: f32[1,64], index: 5, kind: input, shape index: {}]   ;;  %s31894_s6 = inlined_call_operand.vmem [shape: bf16[2176,128], index: 6, kind: input, shape index: {}]   ;;  %s31895_s7 = inlined_call_operand.vmem [shape: f32[1,128], index: 7, kind: input, shape index: {}]   ;;  %s31896_s8 = inlined_call_operand.vmem [shape: bf16[2176,256], index: 8, kind: input, shape index: {}]   ;;  %s31897_s9 = inlined_call_operand.vmem [shape: f32[1,256], index: 9, kind: input, shape index: {}]   ;;  %s31898_s10 = inlined_call_operand.vmem [shape: bf16[4352,128], index: 10, kind: input, shape index: {}]   ;;  %s31899_s11 = inlined_call_operand.vmem [shape: f32[1,128], index: 11, kind: input, shape index: {}]   ;;  %s31900_s12 = inlined_call_operand.vmem [shape: f32[64,128], index: 12, kind: output, shape index: {}]  }
   0x1   :  { %v42_v0 = vld [vmem:[%s31888_s1] sm:$0xff]  ;;  %v43_v1 = vld [vmem:[%s31888_s1 + $0x8] sm:$0xff]  ;;  %v44_v2 = vld [vmem:[%s31888_s1 + $0x10] sm:$0xff] }
   0x2   :  { %v24565_v3 = vpack.c.bf16 %v43_v1, %v42_v0  ;;  %v45_v4 = vld [vmem:[%s31888_s1 + $0x18] sm:$0xff]  ;;  %v46_v6 = vld [vmem:[%s31888_s1 + $0x20] sm:$0xff]  ;;  %v47_v7 = vld [vmem:[%s31888_s1 + $0x28] sm:$0xff] }
   0x3   :  { %v24570_v5 = vpack.c.bf16 %v45_v4, %v44_v2  ;;  %v23066_v8 = vld [vmem:[%s31889_s0] sm:$0xff]   ;;  %v24586_v9 = vpack.c.bf16 %v47_v7, %v46_v6  ;;  %v48_v10 = vld [vmem:[%s31888_s1 + $0x30] sm:$0xff]  ;;  %v49_v11 = vld [vmem:[%s31888_s1 + $0x38] sm:$0xff] }
   0x4   :  { %22161 = vmatprep.subr.bf16.mxu0 %v24565_v3  ;;  %22201 = vmatprep.subr.bf16.mxu1 %v24565_v3  ;;  %v24599_v12 = vpack.c.bf16 %v49_v11, %v48_v10  ;;  %v23074_v13 = vld [vmem:[%s31889_s0 + $0x80] sm:$0xff]   ;;  %v23067_v14 = vld [vmem:[%s31889_s0 + $0x8] sm:$0xff]   ;;  %v23068_v15 = vld [vmem:[%s31889_s0 + $0x10] sm:$0xff]  }
   0x5   :  { %22162 = vmatpush3.bf16.msra.mxu0 %v24565_v3  ;;  %22202 = vmatpush3.bf16.msra.mxu1 %v24565_v3  ;;  %v23075_v16 = vld [vmem:[%s31889_s0 + $0x88] sm:$0xff]   ;;  %v23078_v17 = vld [vmem:[%s31889_s0 + $0x90] sm:$0xff]   ;;  %v23069_v18 = vld [vmem:[%s31889_s0 + $0x18] sm:$0xff]  }
   0x6   :  { %22163 = vmatprep.subr.bf16.mxu0 %v24570_v5  ;;  %22169 = vmatprep.mubr.msk.bf16.mxu0 %vm439_vm0, %v23066_v8  ;;  %v23070_v19 = vld [vmem:[%s31889_s0 + $0x20] sm:$0xff]   ;;  %v23079_v20 = vld [vmem:[%s31889_s0 + $0x98] sm:$0xff]   ;;  %v23071_v22 = vld [vmem:[%s31889_s0 + $0x28] sm:$0xff]  }
   0x7   :  { %22203 = vmatprep.subr.bf16.mxu1 %v24570_v5  ;;  %22209 = vmatprep.mubr.msk.bf16.mxu1 %vm439_vm0, %v23074_v13  ;;  %v23082_v21 = vld [vmem:[%s31889_s0 + $0xa0] sm:$0xff]   ;;  %v23072_v23 = vld [vmem:[%s31889_s0 + $0x30] sm:$0xff]   ;;  %v23083_v24 = vld [vmem:[%s31889_s0 + $0xa8] sm:$0xff]  }
   0x8   :  { %v23086_v25 = vld [vmem:[%s31889_s0 + $0xb0] sm:$0xff]   ;;  %v23073_v26 = vld [vmem:[%s31889_s0 + $0x38] sm:$0xff]   ;;  %v23076_v27 = vld [vmem:[%s31889_s0 + $0x40] sm:$0xff]  }
   0x9   :  { %22164 = vmatpush3.bf16.msra.mxu0 %v24570_v5  ;;  %22204 = vmatpush3.bf16.msra.mxu1 %v24570_v5  ;;  %v23087_v28 = vld [vmem:[%s31889_s0 + $0xb8] sm:$0xff]   ;;  %v23090_v29 = vld [vmem:[%s31889_s0 + $0xc0] sm:$0xff]   ;;  %v23077_v30 = vld [vmem:[%s31889_s0 + $0x48] sm:$0xff]  }
   0xa   :  { %22165 = vmatprep.subr.bf16.mxu0 %v24586_v9  ;;  %22205 = vmatprep.subr.bf16.mxu1 %v24586_v9  ;;  %v23080_v31 = vld [vmem:[%s31889_s0 + $0x50] sm:$0xff]   ;;  %v23091_v32 = vld [vmem:[%s31889_s0 + $0xc8] sm:$0xff]   ;;  %v23081_v34 = vld [vmem:[%s31889_s0 + $0x58] sm:$0xff]  }
   0xb   :  { %v23094_v33 = vld [vmem:[%s31889_s0 + $0xd0] sm:$0xff]   ;;  %v23084_v35 = vld [vmem:[%s31889_s0 + $0x60] sm:$0xff]   ;;  %v23095_v36 = vld [vmem:[%s31889_s0 + $0xd8] sm:$0xff]  }
   0xc   :  { %v23098_v37 = vld [vmem:[%s31889_s0 + $0xe0] sm:$0xff]   ;;  %v23085_v38 = vld [vmem:[%s31889_s0 + $0x68] sm:$0xff]   ;;  %v23088_v39 = vld [vmem:[%s31889_s0 + $0x70] sm:$0xff]  }
   0xd   :  { %22166 = vmatpush3.bf16.msra.mxu0 %v24586_v9  ;;  %22206 = vmatpush3.bf16.msra.mxu1 %v24586_v9  ;;  %v23099_v40 = vld [vmem:[%s31889_s0 + $0xe8] sm:$0xff]   ;;  %v23102_v41 = vld [vmem:[%s31889_s0 + $0xf0] sm:$0xff]   ;;  %v23130_v42 = vld [vmem:[%s31890_s2 + $0x40] sm:$0xff]  }
   0xe   :  { %22167 = vmatprep.subr.bf16.mxu0 %v24599_v12  ;;  %22207 = vmatprep.subr.bf16.mxu1 %v24599_v12  ;;  %v23089_v43 = vld [vmem:[%s31889_s0 + $0x78] sm:$0xff]   ;;  %v23092_v44 = vld [vmem:[%s31889_s0 + $0x100] sm:$0xff]   ;;  %v23093_v47 = vld [vmem:[%s31889_s0 + $0x108] sm:$0xff]  }
   0xf   :  { %v23103_v45 = vld [vmem:[%s31889_s0 + $0xf8] sm:$0xff]   ;;  %v23106_v46 = vld [vmem:[%s31889_s0 + $0x180] sm:$0xff]   ;;  %v23107_v48 = vld [vmem:[%s31889_s0 + $0x188] sm:$0xff]  }
  0x10   :  { %v23096_v49 = vld [vmem:[%s31889_s0 + $0x110] sm:$0xff]   ;;  %v23131_v51 = vld [vmem:[%s31890_s2] sm:$0xff]   ;;  %v23132_v52 = vld [vmem:[%s31890_s2 + $0x48] sm:$0xff]  }
  0x11   :  { %22168 = vmatpush3.bf16.msra.mxu0 %v24599_v12  ;;  %22208 = vmatpush3.bf16.msra.mxu1 %v24599_v12  ;;  %v23110_v50 = vld [vmem:[%s31889_s0 + $0x190] sm:$0xff]   ;;  %v23133_v53 = vld [vmem:[%s31890_s2 + $0x8] sm:$0xff]   ;;  %v23097_v55 = vld [vmem:[%s31889_s0 + $0x118] sm:$0xff]  }
  0x12   :  { %22241 = vmatprep.subr.bf16.mxu0 %v24565_v3  ;;  %22281 = vmatprep.subr.bf16.mxu1 %v24565_v3  ;;  %v23134_v54 = vld [vmem:[%s31890_s2 + $0x50] sm:$0xff]   ;;  %v23111_v56 = vld [vmem:[%s31889_s0 + $0x198] sm:$0xff]   ;;  %v23100_v57 = vld [vmem:[%s31889_s0 + $0x120] sm:$0xff]  }
  0x13   :  { %v23114_v58 = vld [vmem:[%s31889_s0 + $0x1a0] sm:$0xff]   ;;  %v23101_v59 = vld [vmem:[%s31889_s0 + $0x128] sm:$0xff]   ;;  %v23104_v61 = vld [vmem:[%s31889_s0 + $0x130] sm:$0xff]  }
  0x14   :  { %22170 = vmatmul.mubr.msk.bf16.vlgmr.msra.gmra.mrb[0].mxu0 %vm439_vm0, %v23067_v14  ;;  %22210 = vmatmul.mubr.msk.bf16.vlgmr.msra.gmra.mrb[0].mxu1 %vm439_vm0, %v23075_v16  ;;  %v23115_v60 = vld [vmem:[%s31889_s0 + $0x1a8] sm:$0xff]   ;;  %v23118_v62 = vld [vmem:[%s31889_s0 + $0x1b0] sm:$0xff]   ;;  %v23105_v0 = vld [vmem:[%s31889_s0 + $0x138] sm:$0xff]  }
  0x15   :  { %22173 = vmatprep.mubr.msk.bf16.mxu0 %vm439_vm0, %v23068_v15  ;;  %22213 = vmatprep.mubr.msk.bf16.mxu1 %vm439_vm0, %v23078_v17  ;;  %v23135_v63 = vld [vmem:[%s31890_s2 + $0x10] sm:$0xff]   ;;  %v23119_v1 = vld [vmem:[%s31889_s0 + $0x1b8] sm:$0xff]   ;;  %v23108_v2 = vld [vmem:[%s31889_s0 + $0x140] sm:$0xff]  }
  0x16   :  { %22242 = vmatpush3.bf16.msra.mxu0 %v24565_v3  ;;  %22282 = vmatpush3.bf16.msra.mxu1 %v24565_v3  ;;  %v23121_v4 = vld [vmem:[%s31889_s0 + $0x1c0] sm:$0xff]   ;;  %v23136_v6 = vld [vmem:[%s31890_s2 + $0x58] sm:$0xff]   ;;  %v23109_v11 = vld [vmem:[%s31889_s0 + $0x148] sm:$0xff]  }
  0x17   :  { %22243 = vmatprep.subr.bf16.mxu0 %v24570_v5  ;;  %22283 = vmatprep.subr.bf16.mxu1 %v24570_v5  ;;  %v23137_v7 = vld [vmem:[%s31890_s2 + $0x18] sm:$0xff]   ;;  %v23138_v8 = vld [vmem:[%s31890_s2 + $0x60] sm:$0xff]   ;;  %v23123_v13 = vld [vmem:[%s31889_s0 + $0x1c8] sm:$0xff]  }
  0x18   :  { %v23139_v10 = vld [vmem:[%s31890_s2 + $0x20] sm:$0xff]   ;;  %v23112_v14 = vld [vmem:[%s31889_s0 + $0x150] sm:$0xff]   ;;  %v23140_v16 = vld [vmem:[%s31890_s2 + $0x68] sm:$0xff]  }
  0x19   :  { %v23124_v15 = vld [vmem:[%s31889_s0 + $0x1d0] sm:$0xff]   ;;  %v23141_v17 = vld [vmem:[%s31890_s2 + $0x28] sm:$0xff]  }
  0x1a   :  { %22244 = vmatpush3.bf16.msra.mxu0 %v24570_v5  ;;  %22284 = vmatpush3.bf16.msra.mxu1 %v24570_v5 }
  0x1b   :  { %22245 = vmatprep.subr.bf16.mxu0 %v24586_v9  ;;  %22285 = vmatprep.subr.bf16.mxu1 %v24586_v9 }
  0x1c   :  { %22174 = vmatmul.mubr.msk.bf16.gmra.mrb[4].mxu0 %vm439_vm0, %v23069_v18  ;;  %22214 = vmatmul.mubr.msk.bf16.gmra.mrb[4].mxu1 %vm439_vm0, %v23079_v20  ;;  %v23142_v18 = vld [vmem:[%s31890_s2 + $0x70] sm:$0xff]   ;;  %v23113_v20 = vld [vmem:[%s31889_s0 + $0x158] sm:$0xff]  }
  0x1d   :  { %22177 = vmatprep.mubr.msk.bf16.mxu0 %vm439_vm0, %v23070_v19  ;;  %22217 = vmatprep.mubr.msk.bf16.mxu1 %vm439_vm0, %v23082_v21  ;;  %v23143_v19 = vld [vmem:[%s31890_s2 + $0x30] sm:$0xff]   ;;  %v23125_v21 = vld [vmem:[%s31889_s0 + $0x1d8] sm:$0xff]  }
  0x1e   :  { %22246 = vmatpush3.bf16.msra.mxu0 %v24586_v9  ;;  %22286 = vmatpush3.bf16.msra.mxu1 %v24586_v9 }
  0x1f   :  { %22247 = vmatprep.subr.bf16.mxu0 %v24599_v12  ;;  %22287 = vmatprep.subr.bf16.mxu1 %v24599_v12 }
  0x22   :  { %22248 = vmatpush3.bf16.msra.mxu0 %v24599_v12  ;;  %22288 = vmatpush3.bf16.msra.mxu1 %v24599_v12 }
  0x23   :  { %20245 = vmatprep.subr.bf16.mxu0 %v23130_v42  ;;  %v23164_v42 = vld [vmem:[%s31890_s2 + $0xa0] sm:$0xff]  }
  0x24   :  { %22178 = vmatmul.mubr.msk.bf16.gmra.mrb[8].mxu0 %vm439_vm0, %v23071_v22  ;;  %22218 = vmatmul.mubr.msk.bf16.gmra.mrb[8].mxu1 %vm439_vm0, %v23083_v24  ;;  %v23116_v22 = vld [vmem:[%s31889_s0 + $0x160] sm:$0xff]   ;;  %v23144_v24 = vld [vmem:[%s31890_s2 + $0x78] sm:$0xff]  }
  0x25   :  { %22181 = vmatprep.mubr.msk.bf16.mxu0 %vm439_vm0, %v23072_v23  ;;  %22221 = vmatprep.mubr.msk.bf16.mxu1 %vm439_vm0, %v23086_v25  ;;  %v23126_v23 = vld [vmem:[%s31889_s0 + $0x1e0] sm:$0xff]   ;;  %v23145_v25 = vld [vmem:[%s31890_s2 + $0x38] sm:$0xff]  }
  0x2c   :  { %22182 = vmatmul.mubr.msk.bf16.gmra.mrb[12].mxu0 %vm439_vm0, %v23073_v26  ;;  %22222 = vmatmul.mubr.msk.bf16.gmra.mrb[12].mxu1 %vm439_vm0, %v23087_v28  ;;  %v23146_v26 = vld [vmem:[%s31890_s2 + $0xc0] sm:$0xff]  }
  0x2d   :  { %22185 = vmatprep.mubr.msk.bf16.mxu0 %vm439_vm0, %v23076_v27  ;;  %22225 = vmatprep.mubr.msk.bf16.mxu1 %vm439_vm0, %v23090_v29  ;;  %v23147_v27 = vld [vmem:[%s31890_s2 + $0x140] sm:$0xff]   ;;  %v23117_v29 = vld [vmem:[%s31889_s0 + $0x168] sm:$0xff]  }
  0x2e   :  { %v23148_v28 = vld [vmem:[%s31890_s2 + $0x80] sm:$0xff]   ;;  %20285 = vmatprep.subr.bf16.mxu1 %v23146_v26  ;;  %v23151_v26 = vld [vmem:[%s31890_s2 + $0x148] sm:$0xff]  }
  0x34   :  { %22186 = vmatmul.mubr.msk.bf16.gmra.mrb[16].mxu0 %vm439_vm0, %v23077_v30  ;;  %22226 = vmatmul.mubr.msk.bf16.gmra.mrb[16].mxu1 %vm439_vm0, %v23091_v32  ;;  %v23120_v30 = vld [vmem:[%s31889_s0 + $0x170] sm:$0xff]   ;;  %v23150_v32 = vld [vmem:[%s31890_s2 + $0xc8] sm:$0xff]  }
  0x35   :  { %22189 = vmatprep.mubr.msk.bf16.mxu0 %vm439_vm0, %v23080_v31  ;;  %22229 = vmatprep.mubr.msk.bf16.mxu1 %vm439_vm0, %v23094_v33  ;;  %v23127_v31 = vld [vmem:[%s31889_s0 + $0x1e8] sm:$0xff]   ;;  %v23128_v33 = vld [vmem:[%s31889_s0 + $0x1f0] sm:$0xff]  }
  0x3c   :  { %22190 = vmatmul.mubr.msk.bf16.gmra.mrb[20].mxu0 %vm439_vm0, %v23081_v34  ;;  %22230 = vmatmul.mubr.msk.bf16.gmra.mrb[20].mxu1 %vm439_vm0, %v23095_v36  ;;  %v23152_v34 = vld [vmem:[%s31890_s2 + $0x88] sm:$0xff]   ;;  %v23156_v36 = vld [vmem:[%s31890_s2 + $0x90] sm:$0xff]  }
  0x3d   :  { %22193 = vmatprep.mubr.msk.bf16.mxu0 %vm439_vm0, %v23084_v35  ;;  %22233 = vmatprep.mubr.msk.bf16.mxu1 %vm439_vm0, %v23098_v37  ;;  %v23154_v35 = vld [vmem:[%s31890_s2 + $0xd0] sm:$0xff]   ;;  %v23122_v37 = vld [vmem:[%s31889_s0 + $0x178] sm:$0xff]  }
  0x44   :  { %22194 = vmatmul.mubr.msk.bf16.gmra.mrb[24].mxu0 %vm439_vm0, %v23085_v38  ;;  %22234 = vmatmul.mubr.msk.bf16.gmra.mrb[24].mxu1 %vm439_vm0, %v23099_v40  ;;  %v23129_v38 = vld [vmem:[%s31889_s0 + $0x1f8] sm:$0xff]  }
  0x45   :  { %22197 = vmatprep.mubr.msk.bf16.mxu0 %vm439_vm0, %v23088_v39  ;;  %22237 = vmatprep.mubr.msk.bf16.mxu1 %vm439_vm0, %v23102_v41  ;;  %v23158_v39 = vld [vmem:[%s31890_s2 + $0xd8] sm:$0xff]   ;;  %v23162_v41 = vld [vmem:[%s31890_s2 + $0xe0] sm:$0xff]  }
  0x46   :  { %v23160_v40 = vld [vmem:[%s31890_s2 + $0x98] sm:$0xff]  }
  0x4c   :  { %22198 = vmatmul.mubr.msk.bf16.gmra.mrb[28].mxu0 %vm439_vm0, %v23089_v43  ;;  %22238 = vmatmul.mubr.msk.bf16.gmra.mrb[28].mxu1 %vm439_vm0, %v23103_v45  ;;  %v23166_v43 = vld [vmem:[%s31890_s2 + $0xe8] sm:$0xff]   ;;  %v23170_v45 = vld [vmem:[%s31890_s2 + $0xf0] sm:$0xff]  }
  0x4d   :  { %22249 = vmatprep.mubr.msk.bf16.mxu0 %vm439_vm0, %v23092_v44  ;;  %22289 = vmatprep.mubr.msk.bf16.mxu1 %vm439_vm0, %v23106_v46  ;;  %v23168_v44 = vld [vmem:[%s31890_s2 + $0xa8] sm:$0xff]   ;;  %v23172_v46 = vld [vmem:[%s31890_s2 + $0xb0] sm:$0xff]  }
  0x54   :  { %22250 = vmatmul.mubr.msk.bf16.vlgmr.msra.gmra.mrb[32].mxu0 %vm439_vm0, %v23093_v47  ;;  %22290 = vmatmul.mubr.msk.bf16.vlgmr.msra.gmra.mrb[32].mxu1 %vm439_vm0, %v23107_v48  ;;  %v23174_v47 = vld [vmem:[%s31890_s2 + $0xf8] sm:$0xff]  }
  0x55   :  { %22253 = vmatprep.mubr.msk.bf16.mxu0 %vm439_vm0, %v23096_v49  ;;  %22293 = vmatprep.mubr.msk.bf16.mxu1 %vm439_vm0, %v23110_v50  ;;  %v23176_v48 = vld [vmem:[%s31890_s2 + $0xb8] sm:$0xff]   ;;  %v23178_v49 = vld [vmem:[%s31890_s2 + $0x1c0] sm:$0xff]  }
  0x56   :  { %20246 = vmatpush3.bf16.msra.mxu0 %v23131_v51  ;;  %20286 = vmatpush3.bf16.msra.mxu1 %v23148_v28 }
  0x57   :  { %20247 = vmatprep.subr.bf16.mxu0 %v23132_v52  ;;  %20287 = vmatprep.subr.bf16.mxu1 %v23150_v32 }
  0x5a   :  { %20248 = vmatpush3.bf16.msra.mxu0 %v23133_v53  ;;  %20288 = vmatpush3.bf16.msra.mxu1 %v23152_v34 }
  0x5b   :  { %20249 = vmatprep.subr.bf16.mxu0 %v23134_v54  ;;  %20289 = vmatprep.subr.bf16.mxu1 %v23154_v35  ;;  %v23157_v35 = vld [vmem:[%s31890_s2 + $0x110] sm:$0xff]  }
  0x5c   :  { %22254 = vmatmul.mubr.msk.bf16.gmra.mrb[36].mxu0 %vm439_vm0, %v23097_v55  ;;  %22294 = vmatmul.mubr.msk.bf16.gmra.mrb[36].mxu1 %vm439_vm0, %v23111_v56 }
  0x5d   :  { %22257 = vmatprep.mubr.msk.bf16.mxu0 %vm439_vm0, %v23100_v57  ;;  %22297 = vmatprep.mubr.msk.bf16.mxu1 %vm439_vm0, %v23114_v58 }
  0x5e   :  { %20250 = vmatpush3.bf16.msra.mxu0 %v23135_v63  ;;  %20290 = vmatpush3.bf16.msra.mxu1 %v23156_v36 }
  0x5f   :  { %20251 = vmatprep.subr.bf16.mxu0 %v23136_v6  ;;  %20291 = vmatprep.subr.bf16.mxu1 %v23158_v39  ;;  %v23159_v39 = vld [vmem:[%s31890_s2 + $0x158] sm:$0xff]  }
  0x62   :  { %20252 = vmatpush3.bf16.msra.mxu0 %v23137_v7  ;;  %20292 = vmatpush3.bf16.msra.mxu1 %v23160_v40 }
  0x63   :  { %20253 = vmatprep.subr.bf16.mxu0 %v23138_v8  ;;  %20293 = vmatprep.subr.bf16.mxu1 %v23162_v41 }
  0x64   :  { %22258 = vmatmul.mubr.msk.bf16.gmra.mrb[40].mxu0 %vm439_vm0, %v23101_v59  ;;  %22298 = vmatmul.mubr.msk.bf16.gmra.mrb[40].mxu1 %vm439_vm0, %v23115_v60 }
  0x65   :  { %22261 = vmatprep.mubr.msk.bf16.mxu0 %vm439_vm0, %v23104_v61  ;;  %22301 = vmatprep.mubr.msk.bf16.mxu1 %vm439_vm0, %v23118_v62 }
  0x66   :  { %20254 = vmatpush3.bf16.msra.mxu0 %v23139_v10  ;;  %20294 = vmatpush3.bf16.msra.mxu1 %v23164_v42 }
  0x67   :  { %20255 = vmatprep.subr.bf16.mxu0 %v23140_v16  ;;  %20295 = vmatprep.subr.bf16.mxu1 %v23166_v43 }
  0x6a   :  { %20256 = vmatpush3.bf16.msra.mxu0 %v23141_v17  ;;  %20296 = vmatpush3.bf16.msra.mxu1 %v23168_v44  ;;  %v23161_v44 = vld [vmem:[%s31890_s2 + $0x118] sm:$0xff]  }
  0x6b   :  { %20257 = vmatprep.subr.bf16.mxu0 %v23142_v18  ;;  %20297 = vmatprep.subr.bf16.mxu1 %v23170_v45  ;;  %v23163_v45 = vld [vmem:[%s31890_s2 + $0x160] sm:$0xff]  }
  0x6c   :  { %22262 = vmatmul.mubr.msk.bf16.gmra.mrb[44].mxu0 %vm439_vm0, %v23105_v0  ;;  %22302 = vmatmul.mubr.msk.bf16.gmra.mrb[44].mxu1 %vm439_vm0, %v23119_v1 }
  0x6d   :  { %22265 = vmatprep.mubr.msk.bf16.mxu0 %vm439_vm0, %v23108_v2  ;;  %22305 = vmatprep.mubr.msk.bf16.mxu1 %vm439_vm0, %v23121_v4 }
  0x6e   :  { %20258 = vmatpush3.bf16.msra.mxu0 %v23143_v19  ;;  %20298 = vmatpush3.bf16.msra.mxu1 %v23172_v46 }
  0x6f   :  { %20259 = vmatprep.subr.bf16.mxu0 %v23144_v24  ;;  %20299 = vmatprep.subr.bf16.mxu1 %v23174_v47 }
  0x72   :  { %20260 = vmatpush3.bf16.msra.mxu0 %v23145_v25  ;;  %20300 = vmatpush3.bf16.msra.mxu1 %v23176_v48  ;;  %v23149_v25 = vld [vmem:[%s31890_s2 + $0x100] sm:$0xff]  }
  0x73   :  { %20325 = vmatprep.subr.bf16.mxu0 %v23147_v27  ;;  %20365 = vmatprep.subr.bf16.mxu1 %v23178_v49 }
  0x74   :  { %22266 = vmatmul.mubr.msk.bf16.gmra.mrb[48].mxu0 %vm439_vm0, %v23109_v11  ;;  %22306 = vmatmul.mubr.msk.bf16.gmra.mrb[48].mxu1 %vm439_vm0, %v23123_v13 }
  0x75   :  { %22269 = vmatprep.mubr.msk.bf16.mxu0 %vm439_vm0, %v23112_v14  ;;  %22309 = vmatprep.mubr.msk.bf16.mxu1 %vm439_vm0, %v23124_v15 }
  0x7c   :  { %22270 = vmatmul.mubr.msk.bf16.gmra.mrb[52].mxu0 %vm439_vm0, %v23113_v20  ;;  %22310 = vmatmul.mubr.msk.bf16.gmra.mrb[52].mxu1 %vm439_vm0, %v23125_v21 }
  0x7d   :  { %22273 = vmatprep.mubr.msk.bf16.mxu0 %vm439_vm0, %v23116_v22  ;;  %22313 = vmatprep.mubr.msk.bf16.mxu1 %vm439_vm0, %v23126_v23 }
  0x84   :  { %22274 = vmatmul.mubr.msk.bf16.gmra.mrb[56].mxu0 %vm439_vm0, %v23117_v29  ;;  %22314 = vmatmul.mubr.msk.bf16.gmra.mrb[56].mxu1 %vm439_vm0, %v23127_v31  ;;  %v23153_v29 = vld [vmem:[%s31890_s2 + $0x108] sm:$0xff]  }
  0x85   :  { %22277 = vmatprep.mubr.msk.bf16.mxu0 %vm439_vm0, %v23120_v30  ;;  %22317 = vmatprep.mubr.msk.bf16.mxu1 %vm439_vm0, %v23128_v33  ;;  %v23155_v30 = vld [vmem:[%s31890_s2 + $0x150] sm:$0xff]  }
  0x8c   :  { %22278 = vmatmul.mubr.msk.bf16.gmra.mrb[60].mxu0 %vm439_vm0, %v23122_v37  ;;  %22318 = vmatmul.mubr.msk.bf16.gmra.mrb[60].mxu1 %vm439_vm0, %v23129_v38 }
  0xe7   :  { %v22171_v50 = vpop.f32.mrb[0].mxu0  ;;  %v24978_v51 = vpop.f32.mrb[0].mxu1 }
  0xe8   :  { %v522_v52 = vpop.f32.mrb[1].mxu0  ;;  %v24980_v53 = vpop.f32.mrb[1].mxu1 }
  0xe9   :  { %v22172_v54 = vpop.f32.mrb[2].mxu0  ;;  %v24982_v55 = vpop.f32.mrb[2].mxu1 }
  0xea   :  { %v650_v56 = vpack.c.bf16 %v22172_v54, %v22171_v50  ;;  %v525_v57 = vpop.f32.mrb[3].mxu0  ;;  %v1003_v58 = vpack.c.bf16 %v24982_v55, %v24978_v51  ;;  %v24986_v59 = vpop.f32.mrb[3].mxu1  ;;  %v23194_v51 = vld [vmem:[%s31890_s2 + $0x1e0] sm:$0xff]  }
  0xeb   :  { %v649_v60 = vpack.c.bf16 %v525_v57, %v522_v52  ;;  %v1002_v61 = vpack.c.bf16 %v24986_v59, %v24980_v53  ;;  %v23165_v52 = vld [vmem:[%s31890_s2 + $0x120] sm:$0xff]   ;;  %v23186_v53 = vld [vmem:[%s31890_s2 + $0x1d0] sm:$0xff]  }
  0xec   :  { %v23187_v59 = vld [vmem:[%s31890_s2 + $0x250] sm:$0xff]   ;;  %v23195_v55 = vld [vmem:[%s31890_s2 + $0x260] sm:$0xff]  }
  0xef   :  { %v24990_v62 = vpop.f32.mrb[4].mxu0  ;;  %v24992_v63 = vpop.f32.mrb[4].mxu1 }
  0xf0   :  { %v24994_v0 = vpop.f32.mrb[5].mxu0  ;;  %v24996_v1 = vpop.f32.mrb[5].mxu1 }
  0xf1   :  { %v24998_v2 = vpop.f32.mrb[6].mxu0  ;;  %v25000_v4 = vpop.f32.mrb[6].mxu1 }
  0xf2   :  { %v652_v6 = vpack.c.bf16 %v24998_v2, %v24990_v62  ;;  %v25004_v7 = vpop.f32.mrb[7].mxu0  ;;  %v1005_v8 = vpack.c.bf16 %v25000_v4, %v24992_v63  ;;  %v25008_v10 = vpop.f32.mrb[7].mxu1  ;;  %v23211_v4 = vld [vmem:[%s31890_s2 + $0x340] sm:$0xff]  }
  0xf3   :  { %v651_v11 = vpack.c.bf16 %v25004_v7, %v24994_v0  ;;  %v1004_v13 = vpack.c.bf16 %v25008_v10, %v24996_v1  ;;  %v23202_v1 = vld [vmem:[%s31890_s2 + $0x1f0] sm:$0xff]  }
  0xf4   :  { %v23203_v10 = vld [vmem:[%s31890_s2 + $0x270] sm:$0xff]  }
  0xf7   :  { %v22179_v14 = vpop.f32.mrb[8].mxu0  ;;  %v25014_v15 = vpop.f32.mrb[8].mxu1 }
  0xf8   :  { %v554_v16 = vpop.f32.mrb[9].mxu0  ;;  %v25016_v17 = vpop.f32.mrb[9].mxu1 }
  0xf9   :  { %v22180_v18 = vpop.f32.mrb[10].mxu0  ;;  %v25018_v19 = vpop.f32.mrb[10].mxu1 }
  0xfa   :  { %v654_v20 = vpack.c.bf16 %v22180_v18, %v22179_v14  ;;  %v557_v21 = vpop.f32.mrb[11].mxu0  ;;  %v1007_v22 = vpack.c.bf16 %v25018_v19, %v25014_v15  ;;  %v25022_v23 = vpop.f32.mrb[11].mxu1  ;;  %v23169_v18 = vld [vmem:[%s31890_s2 + $0x128] sm:$0xff]  }
  0xfb   :  { %v653_v24 = vpack.c.bf16 %v557_v21, %v554_v16  ;;  %v1006_v27 = vpack.c.bf16 %v25022_v23, %v25016_v17  ;;  %v23181_v17 = vld [vmem:[%s31890_s2 + $0x200] sm:$0xff]  }
  0xfd   :  { %2666 = vmatprep.mubr.bf16.mxu0 %v653_v24 }
  0xfe   :  { %2667 = vmatmul.mubr.bf16.vlgmr.msra.gmra.mrb[64].mxu0 %v649_v60  ;;  %v23167_v60 = vld [vmem:[%s31890_s2 + $0x168] sm:$0xff]  }
  0xff   :  { %v22183_v28 = vpop.f32.mrb[12].mxu0  ;;  %2674 = vmatprep.mubr.bf16.mxu0 %v654_v20  ;;  %20326 = vmatpush3.bf16.msra.mxu0 %v23149_v25  ;;  %v25038_v31 = vpop.f32.mrb[12].mxu1  ;;  %v23171_v20 = vld [vmem:[%s31890_s2 + $0x170] sm:$0xff]  }
 0x100   :  { %v570_v32 = vpop.f32.mrb[13].mxu0  ;;  %20327 = vmatprep.subr.bf16.mxu0 %v23151_v26  ;;  %v25040_v33 = vpop.f32.mrb[13].mxu1 }
 0x101   :  { %v22184_v34 = vpop.f32.mrb[14].mxu0  ;;  %v25045_v36 = vpop.f32.mrb[14].mxu1 }
 0x102   :  { %v656_v37 = vpack.c.bf16 %v22184_v34, %v22183_v28  ;;  %v573_v38 = vpop.f32.mrb[15].mxu0  ;;  %v1009_v40 = vpack.c.bf16 %v25045_v36, %v25038_v31  ;;  %v25052_v41 = vpop.f32.mrb[15].mxu1  ;;  %v23175_v34 = vld [vmem:[%s31890_s2 + $0x178] sm:$0xff]  }
 0x103   :  { %v655_v42 = vpack.c.bf16 %v573_v38, %v570_v32  ;;  %20328 = vmatpush3.bf16.msra.mxu0 %v23153_v29  ;;  %v1008_v43 = vpack.c.bf16 %v25052_v41, %v25040_v33 }
 0x104   :  { %20329 = vmatprep.subr.bf16.mxu0 %v23155_v30 }
 0x106   :  { %2675 = vmatmul.mubr.bf16.gmra.mrb[68].mxu0 %v650_v56 }
 0x107   :  { %v25062_v46 = vpop.f32.mrb[16].mxu0  ;;  %2682 = vmatprep.mubr.bf16.mxu0 %v655_v42  ;;  %20330 = vmatpush3.bf16.msra.mxu0 %v23157_v35  ;;  %v25064_v47 = vpop.f32.mrb[16].mxu1  ;;  %v23177_v42 = vld [vmem:[%s31890_s2 + $0x138] sm:$0xff]  }
 0x108   :  { %v586_v48 = vpop.f32.mrb[17].mxu0  ;;  %20331 = vmatprep.subr.bf16.mxu0 %v23159_v39  ;;  %v25066_v49 = vpop.f32.mrb[17].mxu1 }
 0x109   :  { %v25068_v50 = vpop.f32.mrb[18].mxu0  ;;  %v25073_v54 = vpop.f32.mrb[18].mxu1 }
 0x10a   :  { %v658_v56 = vpack.c.bf16 %v25068_v50, %v25062_v46  ;;  %v589_v57 = vpop.f32.mrb[19].mxu0  ;;  %v1011_v0 = vpack.c.bf16 %v25073_v54, %v25064_v47  ;;  %v25082_v7 = vpop.f32.mrb[19].mxu1  ;;  %v23226_v54 = vld [vmem:[%s31890_s2 + $0x2e0] sm:$0xff]  }
 0x10b   :  { %v657_v14 = vpack.c.bf16 %v589_v57, %v586_v48  ;;  %20332 = vmatpush3.bf16.msra.mxu0 %v23161_v44  ;;  %v1010_v16 = vpack.c.bf16 %v25082_v7, %v25066_v49  ;;  %v23179_v44 = vld [vmem:[%s31890_s2 + $0x240] sm:$0xff]   ;;  %v23218_v7 = vld [vmem:[%s31890_s2 + $0x2d0] sm:$0xff]  }
 0x10c   :  { %20333 = vmatprep.subr.bf16.mxu0 %v23163_v45 }
 0x10e   :  { %2683 = vmatmul.mubr.bf16.gmra.mrb[72].mxu0 %v651_v11  ;;  %v23173_v11 = vld [vmem:[%s31890_s2 + $0x130] sm:$0xff]  }
 0x10f   :  { %v25092_v21 = vpop.f32.mrb[20].mxu0  ;;  %2690 = vmatprep.mubr.bf16.mxu0 %v656_v37  ;;  %20334 = vmatpush3.bf16.msra.mxu0 %v23165_v52  ;;  %v25094_v24 = vpop.f32.mrb[20].mxu1 }
 0x110   :  { %v25096_v25 = vpop.f32.mrb[21].mxu0  ;;  %20335 = vmatprep.subr.bf16.mxu0 %v23167_v60  ;;  %v25098_v26 = vpop.f32.mrb[21].mxu1 }
 0x111   :  { %v25100_v28 = vpop.f32.mrb[22].mxu0  ;;  %v25105_v29 = vpop.f32.mrb[22].mxu1 }
 0x112   :  { %v660_v30 = vpack.c.bf16 %v25100_v28, %v25092_v21  ;;  %v25109_v32 = vpop.f32.mrb[23].mxu0  ;;  %v1013_v35 = vpack.c.bf16 %v25105_v29, %v25094_v24  ;;  %v25116_v37 = vpop.f32.mrb[23].mxu1  ;;  %v23210_v21 = vld [vmem:[%s31890_s2 + $0x2c0] sm:$0xff]  }
 0x113   :  { %v659_v38 = vpack.c.bf16 %v25109_v32, %v25096_v25  ;;  %20336 = vmatpush3.bf16.msra.mxu0 %v23169_v18  ;;  %v1012_v39 = vpack.c.bf16 %v25116_v37, %v25098_v26  ;;  %v23242_v24 = vld [vmem:[%s31890_s2 + $0x3c0] sm:$0xff]  }
 0x114   :  { %20337 = vmatprep.subr.bf16.mxu0 %v23171_v20 }
 0x116   :  { %2691 = vmatmul.mubr.bf16.gmra.mrb[76].mxu0 %v652_v6  ;;  %v23180_v6 = vld [vmem:[%s31890_s2 + $0x180] sm:$0xff]  }
 0x117   :  { %v22195_v45 = vpop.f32.mrb[24].mxu0  ;;  %20338 = vmatpush3.bf16.msra.mxu0 %v23173_v11  ;;  %2796 = vmatprep.mubr.bf16.mxu0 %v1006_v27  ;;  %v25134_v48 = vpop.f32.mrb[24].mxu1  ;;  %v23182_v11 = vld [vmem:[%s31890_s2 + $0x1c8] sm:$0xff]  }
 0x118   :  { %v618_v52 = vpop.f32.mrb[25].mxu0  ;;  %20339 = vmatprep.subr.bf16.mxu0 %v23175_v34  ;;  %v25136_v57 = vpop.f32.mrb[25].mxu1  ;;  %v23183_v34 = vld [vmem:[%s31890_s2 + $0x248] sm:$0xff]  }
 0x119   :  { %v22196_v60 = vpop.f32.mrb[26].mxu0  ;;  %v25138_v18 = vpop.f32.mrb[26].mxu1 }
 0x11a   :  { %v662_v62 = vpack.c.bf16 %v22196_v60, %v22195_v45  ;;  %v621_v2 = vpop.f32.mrb[27].mxu0  ;;  %v1015_v23 = vpack.c.bf16 %v25138_v18, %v25134_v48  ;;  %v25148_v27 = vpop.f32.mrb[27].mxu1 }
 0x11b   :  { %v661_v20 = vpack.c.bf16 %v621_v2, %v618_v52  ;;  %20340 = vmatpush3.bf16.msra.mxu0 %v23177_v42  ;;  %v1014_v45 = vpack.c.bf16 %v25148_v27, %v25136_v57  ;;  %v23184_v42 = vld [vmem:[%s31890_s2 + $0x188] sm:$0xff]   ;;  %v23188_v2 = vld [vmem:[%s31890_s2 + $0x190] sm:$0xff]  }
 0x11c   :  { %20405 = vmatprep.subr.bf16.mxu0 %v23179_v44  ;;  %v23185_v52 = vld [vmem:[%s31890_s2 + $0x208] sm:$0xff]  }
 0x11d   :  { %2731 = vmatprep.mubr.bf16.mxu1 %v661_v20 }
 0x11e   :  { %2732 = vmatmul.mubr.bf16.vlgmr.msra.gmra.mrb[64].mxu1 %v657_v14  ;;  %2797 = vmatmul.mubr.bf16.vlgmr.msra.gmra.mrb[80].mxu0 %v1002_v61 }
 0x11f   :  { %v25167_v60 = vpop.f32.mrb[28].mxu0  ;;  %2739 = vmatprep.mubr.bf16.mxu1 %v662_v62  ;;  %2804 = vmatprep.mubr.bf16.mxu0 %v1007_v22  ;;  %v25178_v61 = vpop.f32.mrb[28].mxu1 }
 0x120   :  { %20366 = vmatpush3.bf16.msra.mxu1 %v23180_v6  ;;  %20406 = vmatpush3.bf16.msra.mxu0 %v23181_v17  ;;  %v634_v14 = vpop.f32.mrb[29].mxu0  ;;  %v25180_v44 = vpop.f32.mrb[29].mxu1  ;;  %v23189_v6 = vld [vmem:[%s31890_s2 + $0x210] sm:$0xff]  }
 0x121   :  { %v22200_v62 = vpop.f32.mrb[30].mxu0  ;;  %20367 = vmatprep.subr.bf16.mxu1 %v23182_v11  ;;  %20407 = vmatprep.subr.bf16.mxu0 %v23183_v34  ;;  %v25182_v15 = vpop.f32.mrb[30].mxu1  ;;  %v23190_v34 = vld [vmem:[%s31890_s2 + $0x1d8] sm:$0xff]  }
 0x122   :  { %v664_v19 = vpack.c.bf16 %v22200_v62, %v25167_v60  ;;  %v637_v22 = vpop.f32.mrb[31].mxu0  ;;  %v1017_v17 = vpack.c.bf16 %v25182_v15, %v25178_v61  ;;  %v25193_v20 = vpop.f32.mrb[31].mxu1  ;;  %v23191_v60 = vld [vmem:[%s31890_s2 + $0x258] sm:$0xff]   ;;  %v23234_v61 = vld [vmem:[%s31890_s2 + $0x2f0] sm:$0xff]  }
 0x123   :  { %v663_v11 = vpack.c.bf16 %v637_v22, %v634_v14  ;;  %v1016_v62 = vpack.c.bf16 %v25193_v20, %v25180_v44  ;;  %v23192_v14 = vld [vmem:[%s31890_s2 + $0x198] sm:$0xff]   ;;  %v23235_v15 = vld [vmem:[%s31890_s2 + $0x370] sm:$0xff]  }
 0x124   :  { %20368 = vmatpush3.bf16.msra.mxu1 %v23184_v42  ;;  %20408 = vmatpush3.bf16.msra.mxu0 %v23185_v52  ;;  %v23193_v22 = vld [vmem:[%s31890_s2 + $0x218] sm:$0xff]   ;;  %v23196_v52 = vld [vmem:[%s31890_s2 + $0x1a0] sm:$0xff]  }
 0x125   :  { %20369 = vmatprep.subr.bf16.mxu1 %v23186_v53  ;;  %20409 = vmatprep.subr.bf16.mxu0 %v23187_v59  ;;  %v23197_v53 = vld [vmem:[%s31890_s2 + $0x220] sm:$0xff]   ;;  %v23200_v59 = vld [vmem:[%s31890_s2 + $0x1a8] sm:$0xff]  }
 0x126   :  { %2740 = vmatmul.mubr.bf16.gmra.mrb[68].mxu1 %v658_v56  ;;  %2805 = vmatmul.mubr.bf16.gmra.mrb[84].mxu0 %v1003_v58 }
 0x127   :  { %v25215_v42 = vpop.f32.mrb[32].mxu0  ;;  %2747 = vmatprep.mubr.bf16.mxu1 %v663_v11  ;;  %2812 = vmatprep.mubr.bf16.mxu0 %v1008_v43  ;;  %v25226_v58 = vpop.f32.mrb[32].mxu1  ;;  %v23198_v11 = vld [vmem:[%s31890_s2 + $0x1e8] sm:$0xff]  }
 0x128   :  { %20370 = vmatpush3.bf16.msra.mxu1 %v23188_v2  ;;  %20410 = vmatpush3.bf16.msra.mxu0 %v23189_v6  ;;  %v25228_v46 = vpop.f32.mrb[33].mxu0  ;;  %v25230_v50 = vpop.f32.mrb[33].mxu1 }
 0x129   :  { %v25232_v56 = vpop.f32.mrb[34].mxu0  ;;  %20371 = vmatprep.subr.bf16.mxu1 %v23190_v34  ;;  %20411 = vmatprep.subr.bf16.mxu0 %v23191_v60  ;;  %v25234_v33 = vpop.f32.mrb[34].mxu1  ;;  %v23199_v34 = vld [vmem:[%s31890_s2 + $0x268] sm:$0xff]  }
 0x12a   :  { %v1356_v41 = vpack.c.bf16 %v25232_v56, %v25215_v42  ;;  %v25238_v43 = vpop.f32.mrb[35].mxu0  ;;  %v25248_v2 = vpop.f32.mrb[35].mxu1  ;;  %v23201_v60 = vld [vmem:[%s31890_s2 + $0x228] sm:$0xff]  }
 0x12b   :  { %v1355_v6 = vpack.c.bf16 %v25238_v43, %v25228_v46 }
 0x12c   :  { %20372 = vmatpush3.bf16.msra.mxu1 %v23192_v14  ;;  %20412 = vmatpush3.bf16.msra.mxu0 %v23193_v22  ;;  %v23205_v22 = vld [vmem:[%s31890_s2 + $0x230] sm:$0xff]  }
 0x12d   :  { %20373 = vmatprep.subr.bf16.mxu1 %v23194_v51  ;;  %20413 = vmatprep.subr.bf16.mxu0 %v23195_v55  ;;  %v23208_v51 = vld [vmem:[%s31890_s2 + $0x1b8] sm:$0xff]  }
 0x12e   :  { %2748 = vmatmul.mubr.bf16.gmra.mrb[72].mxu1 %v659_v38  ;;  %2813 = vmatmul.mubr.bf16.gmra.mrb[88].mxu0 %v1004_v13 }
 0x12f   :  { %v25272_v14 = vpop.f32.mrb[36].mxu0  ;;  %2755 = vmatprep.mubr.bf16.mxu1 %v664_v19  ;;  %2820 = vmatprep.mubr.bf16.mxu0 %v1009_v40  ;;  %v25283_v13 = vpop.f32.mrb[36].mxu1  ;;  %v23204_v19 = vld [vmem:[%s31890_s2 + $0x1b0] sm:$0xff]  }
 0x130   :  { %20374 = vmatpush3.bf16.msra.mxu1 %v23196_v52  ;;  %20414 = vmatpush3.bf16.msra.mxu0 %v23197_v53  ;;  %v25285_v25 = vpop.f32.mrb[37].mxu0  ;;  %v25287_v32 = vpop.f32.mrb[37].mxu1  ;;  %v23206_v53 = vld [vmem:[%s31890_s2 + $0x1f8] sm:$0xff]  }
 0x131   :  { %v25289_v38 = vpop.f32.mrb[38].mxu0  ;;  %20375 = vmatprep.subr.bf16.mxu1 %v23198_v11  ;;  %20415 = vmatprep.subr.bf16.mxu0 %v23199_v34  ;;  %v25291_v31 = vpop.f32.mrb[38].mxu1  ;;  %v23207_v11 = vld [vmem:[%s31890_s2 + $0x278] sm:$0xff]  }
 0x132   :  { %v1358_v36 = vpack.c.bf16 %v25289_v38, %v25272_v14  ;;  %v25295_v40 = vpop.f32.mrb[39].mxu0  ;;  %v25305_v55 = vpop.f32.mrb[39].mxu1  ;;  %v23209_v34 = vld [vmem:[%s31890_s2 + $0x238] sm:$0xff]   ;;  %v23245_v14 = vld [vmem:[%s31890_s2 + $0x400] sm:$0xff]  }
 0x133   :  { %v1357_v52 = vpack.c.bf16 %v25295_v40, %v25285_v25 }
 0x134   :  { %20376 = vmatpush3.bf16.msra.mxu1 %v23200_v59  ;;  %20416 = vmatpush3.bf16.msra.mxu0 %v23201_v60 }
 0x135   :  { %20377 = vmatprep.subr.bf16.mxu1 %v23202_v1  ;;  %20417 = vmatprep.subr.bf16.mxu0 %v23203_v10 }
 0x136   :  { %2756 = vmatmul.mubr.bf16.gmra.mrb[76].mxu1 %v660_v30  ;;  %2821 = vmatmul.mubr.bf16.gmra.mrb[92].mxu0 %v1005_v8 }
 0x137   :  { %v22259_v59 = vpop.f32.mrb[40].mxu0  ;;  %2861 = vmatprep.mubr.bf16.mxu1 %v1014_v45  ;;  %v25335_v28 = vpop.f32.mrb[40].mxu1 }
 0x138   :  { %20378 = vmatpush3.bf16.msra.mxu1 %v23204_v19  ;;  %20418 = vmatpush3.bf16.msra.mxu0 %v23205_v22  ;;  %v1260_v63 = vpop.f32.mrb[41].mxu0  ;;  %v25340_v8 = vpop.f32.mrb[41].mxu1  ;;  %v23212_v19 = vld [vmem:[%s31890_s2 + $0x280] sm:$0xff]  }
 0x139   :  { %v22260_v30 = vpop.f32.mrb[42].mxu0  ;;  %20379 = vmatprep.subr.bf16.mxu1 %v23206_v53  ;;  %20419 = vmatprep.subr.bf16.mxu0 %v23207_v11  ;;  %v25342_v57 = vpop.f32.mrb[42].mxu1  ;;  %v23213_v22 = vld [vmem:[%s31890_s2 + $0x300] sm:$0xff]   ;;  %v23214_v11 = vld [vmem:[%s31890_s2 + $0x2c8] sm:$0xff]  }
 0x13a   :  { %v1360_v27 = vpack.c.bf16 %v22260_v30, %v22259_v59  ;;  %v1263_v45 = vpop.f32.mrb[43].mxu0  ;;  %v1713_v60 = vpack.c.bf16 %v25342_v57, %v25335_v28  ;;  %v25346_v1 = vpop.f32.mrb[43].mxu1  ;;  %v23215_v59 = vld [vmem:[%s31890_s2 + $0x348] sm:$0xff]  }
 0x13b   :  { %v1359_v10 = vpack.c.bf16 %v1263_v45, %v1260_v63  ;;  %v1712_v53 = vpack.c.bf16 %v25346_v1, %v25340_v8  ;;  %v23217_v63 = vld [vmem:[%s31890_s2 + $0x308] sm:$0xff]   ;;  %v23221_v45 = vld [vmem:[%s31890_s2 + $0x310] sm:$0xff]  }
 0x13c   :  { %20380 = vmatpush3.bf16.msra.mxu1 %v23208_v51  ;;  %20420 = vmatpush3.bf16.msra.mxu0 %v23209_v34  ;;  %v23216_v34 = vld [vmem:[%s31890_s2 + $0x288] sm:$0xff]  }
 0x13d   :  { %2926 = vmatprep.mubr.bf16.mxu0 %v1359_v10  ;;  %20445 = vmatprep.subr.bf16.mxu1 %v23210_v21 }
 0x13e   :  { %20485 = vmatprep.subr.bf16.mxu0 %v23211_v4 }
 0x13f   :  { %2862 = vmatmul.mubr.bf16.vlgmr.msra.gmra.mrb[80].mxu1 %v1010_v16  ;;  %2927 = vmatmul.mubr.bf16.vlgmr.msra.gmra.mrb[96].mxu0 %v1355_v6  ;;  %v25368_v51 = vpop.f32.mrb[44].mxu0  ;;  %v25376_v21 = vpop.f32.mrb[44].mxu1  ;;  %v23219_v16 = vld [vmem:[%s31890_s2 + $0x350] sm:$0xff]  }
 0x140   :  { %2869 = vmatprep.mubr.bf16.mxu1 %v1015_v23  ;;  %2934 = vmatprep.mubr.bf16.mxu0 %v1360_v27  ;;  %v1276_v49 = vpop.f32.mrb[45].mxu0  ;;  %v25387_v46 = vpop.f32.mrb[45].mxu1  ;;  %v23220_v27 = vld [vmem:[%s31890_s2 + $0x290] sm:$0xff]  }
 0x141   :  { %20446 = vmatpush3.bf16.msra.mxu1 %v23212_v19  ;;  %20486 = vmatpush3.bf16.msra.mxu0 %v23213_v22  ;;  %v22264_v43 = vpop.f32.mrb[46].mxu0  ;;  %v25389_v6 = vpop.f32.mrb[46].mxu1  ;;  %v23222_v19 = vld [vmem:[%s31890_s2 + $0x2d8] sm:$0xff]  }
 0x142   :  { %v1362_v48 = vpack.c.bf16 %v22264_v43, %v25368_v51  ;;  %v1279_v18 = vpop.f32.mrb[47].mxu0  ;;  %20447 = vmatprep.subr.bf16.mxu1 %v23214_v11  ;;  %20487 = vmatprep.subr.bf16.mxu0 %v23215_v59  ;;  %v1715_v23 = vpack.c.bf16 %v25389_v6, %v25376_v21  ;;  %v25394_v4 = vpop.f32.mrb[47].mxu1  ;;  %v23223_v22 = vld [vmem:[%s31890_s2 + $0x358] sm:$0xff]   ;;  %v31940_v6 = vpack.c.bf16 %v25291_v31, %v25283_v13 }
 0x143   :  { %v1361_v30 = vpack.c.bf16 %v1279_v18, %v1276_v49  ;;  %v1714_v10 = vpack.c.bf16 %v25394_v4, %v25387_v46  ;;  %v23224_v59 = vld [vmem:[%s31890_s2 + $0x298] sm:$0xff]   ;;  %v23230_v18 = vld [vmem:[%s31890_s2 + $0x2e8] sm:$0xff]   ;;  %v31939_v4 = vpack.c.bf16 %v25305_v55, %v25287_v32  ;;  %v23261_v32 = vld [vmem:[%s31890_s2 + $0x3b0] sm:$0xff]  }
 0x144   :  { %v23225_v51 = vld [vmem:[%s31890_s2 + $0x318] sm:$0xff]   ;;  %v23260_v46 = vld [vmem:[%s31890_s2 + $0x428] sm:$0xff]  }
 0x145   :  { %20448 = vmatpush3.bf16.msra.mxu1 %v23216_v34  ;;  %20488 = vmatpush3.bf16.msra.mxu0 %v23217_v63  ;;  %v23262_v55 = vld [vmem:[%s31890_s2 + $0x3f8] sm:$0xff]  }
 0x146   :  { %20449 = vmatprep.subr.bf16.mxu1 %v23218_v7  ;;  %20489 = vmatprep.subr.bf16.mxu0 %v23219_v16  ;;  %v23228_v7 = vld [vmem:[%s31890_s2 + $0x2a0] sm:$0xff]   ;;  %v23265_v21 = vld [vmem:[%s31890_s2 + $0x438] sm:$0xff]  }
 0x147   :  { %2870 = vmatmul.mubr.bf16.gmra.mrb[84].mxu1 %v1011_v0  ;;  %2935 = vmatmul.mubr.bf16.gmra.mrb[100].mxu0 %v1356_v41  ;;  %v25416_v11 = vpop.f32.mrb[48].mxu0  ;;  %v25424_v34 = vpop.f32.mrb[48].mxu1  ;;  %v23227_v0 = vld [vmem:[%s31890_s2 + $0x360] sm:$0xff]  }
 0x148   :  { %2877 = vmatprep.mubr.bf16.mxu1 %v1016_v62  ;;  %2942 = vmatprep.mubr.bf16.mxu0 %v1361_v30  ;;  %v25429_v47 = vpop.f32.mrb[49].mxu0  ;;  %v25437_v42 = vpop.f32.mrb[49].mxu1  ;;  %v23229_v16 = vld [vmem:[%s31890_s2 + $0x320] sm:$0xff]   ;;  %v23231_v30 = vld [vmem:[%s31890_s2 + $0x368] sm:$0xff]  }
 0x149   :  { %20450 = vmatpush3.bf16.msra.mxu1 %v23220_v27  ;;  %20490 = vmatpush3.bf16.msra.mxu0 %v23221_v45  ;;  %v25439_v56 = vpop.f32.mrb[50].mxu0  ;;  %v25441_v41 = vpop.f32.mrb[50].mxu1  ;;  %v23232_v45 = vld [vmem:[%s31890_s2 + $0x2a8] sm:$0xff]  }
 0x14a   :  { %v1364_v44 = vpack.c.bf16 %v25439_v56, %v25416_v11  ;;  %v25445_v20 = vpop.f32.mrb[51].mxu0  ;;  %20451 = vmatprep.subr.bf16.mxu1 %v23222_v19  ;;  %20491 = vmatprep.subr.bf16.mxu0 %v23223_v22  ;;  %v1717_v62 = vpack.c.bf16 %v25441_v41, %v25424_v34  ;;  %v25449_v63 = vpop.f32.mrb[51].mxu1  ;;  %v23233_v19 = vld [vmem:[%s31890_s2 + $0x328] sm:$0xff]   ;;  %v23257_v11 = vld [vmem:[%s31890_s2 + $0x420] sm:$0xff]   ;;  %v23259_v56 = vld [vmem:[%s31890_s2 + $0x3f0] sm:$0xff]  }
 0x14b   :  { %v1363_v49 = vpack.c.bf16 %v25445_v20, %v25429_v47  ;;  %v1716_v43 = vpack.c.bf16 %v25449_v63, %v25437_v42  ;;  %v23247_v47 = vld [vmem:[%s31890_s2 + $0x3d0] sm:$0xff]  }
 0x14d   :  { %20452 = vmatpush3.bf16.msra.mxu1 %v23224_v59  ;;  %20492 = vmatpush3.bf16.msra.mxu0 %v23225_v51  ;;  %v23236_v51 = vld [vmem:[%s31890_s2 + $0x2b0] sm:$0xff]  }
 0x14e   :  { %20453 = vmatprep.subr.bf16.mxu1 %v23226_v54  ;;  %20493 = vmatprep.subr.bf16.mxu0 %v23227_v0  ;;  %v23237_v54 = vld [vmem:[%s31890_s2 + $0x330] sm:$0xff]  }
 0x14f   :  { %2878 = vmatmul.mubr.bf16.gmra.mrb[88].mxu1 %v1012_v39  ;;  %2943 = vmatmul.mubr.bf16.gmra.mrb[104].mxu0 %v1357_v52  ;;  %v25473_v27 = vpop.f32.mrb[52].mxu0  ;;  %v25481_v22 = vpop.f32.mrb[52].mxu1 }
 0x150   :  { %2885 = vmatprep.mubr.bf16.mxu1 %v1017_v17  ;;  %2950 = vmatprep.mubr.bf16.mxu0 %v1362_v48  ;;  %v25486_v26 = vpop.f32.mrb[53].mxu0  ;;  %v25488_v37 = vpop.f32.mrb[53].mxu1 }
 0x151   :  { %20454 = vmatpush3.bf16.msra.mxu1 %v23228_v7  ;;  %20494 = vmatpush3.bf16.msra.mxu0 %v23229_v16  ;;  %v25490_v39 = vpop.f32.mrb[54].mxu0  ;;  %v25492_v25 = vpop.f32.mrb[54].mxu1  ;;  %v23238_v7 = vld [vmem:[%s31890_s2 + $0x2f8] sm:$0xff]  }
 0x152   :  { %v1366_v40 = vpack.c.bf16 %v25490_v39, %v25473_v27  ;;  %v25496_v52 = vpop.f32.mrb[55].mxu0  ;;  %20455 = vmatprep.subr.bf16.mxu1 %v23230_v18  ;;  %20495 = vmatprep.subr.bf16.mxu0 %v23231_v30  ;;  %v1719_v17 = vpack.c.bf16 %v25492_v25, %v25481_v22  ;;  %v25506_v48 = vpop.f32.mrb[55].mxu1  ;;  %v23239_v16 = vld [vmem:[%s31890_s2 + $0x378] sm:$0xff]  }
 0x153   :  { %v1365_v59 = vpack.c.bf16 %v25496_v52, %v25486_v26  ;;  %v1718_v0 = vpack.c.bf16 %v25506_v48, %v25488_v37  ;;  %v23240_v30 = vld [vmem:[%s31890_s2 + $0x2b8] sm:$0xff]  }
 0x155   :  { %20456 = vmatpush3.bf16.msra.mxu1 %v23232_v45  ;;  %20496 = vmatpush3.bf16.msra.mxu0 %v23233_v19  ;;  %v23241_v45 = vld [vmem:[%s31890_s2 + $0x338] sm:$0xff]  }
 0x156   :  { %20457 = vmatprep.subr.bf16.mxu1 %v23234_v61  ;;  %20497 = vmatprep.subr.bf16.mxu0 %v23235_v15 }
 0x157   :  { %2886 = vmatmul.mubr.bf16.gmra.mrb[92].mxu1 %v1013_v35  ;;  %2951 = vmatmul.mubr.bf16.gmra.mrb[108].mxu0 %v1358_v36  ;;  %v22275_v18 = vpop.f32.mrb[56].mxu0  ;;  %v25536_v19 = vpop.f32.mrb[56].mxu1 }
 0x158   :  { %v1324_v61 = vpop.f32.mrb[57].mxu0  ;;  %3056 = vmatprep.mubr.bf16.mxu0 %v1712_v53  ;;  %v25544_v29 = vpop.f32.mrb[57].mxu1 }
 0x159   :  { %20458 = vmatpush3.bf16.msra.mxu1 %v23236_v51  ;;  %20498 = vmatpush3.bf16.msra.mxu0 %v23237_v54  ;;  %v22276_v35 = vpop.f32.mrb[58].mxu0  ;;  %v25549_v38 = vpop.f32.mrb[58].mxu1  ;;  %v23243_v54 = vld [vmem:[%s31890_s2 + $0x380] sm:$0xff]  }
 0x15a   :  { %v1368_v36 = vpack.c.bf16 %v22276_v35, %v22275_v18  ;;  %v1327_v15 = vpop.f32.mrb[59].mxu0  ;;  %20459 = vmatprep.subr.bf16.mxu1 %v23238_v7  ;;  %20499 = vmatprep.subr.bf16.mxu0 %v23239_v16  ;;  %v1721_v8 = vpack.c.bf16 %v25549_v38, %v25536_v19  ;;  %v25553_v1 = vpop.f32.mrb[59].mxu1  ;;  %v23244_v7 = vld [vmem:[%s31890_s2 + $0x3c8] sm:$0xff]   ;;  %v25700_v19 = vld [vmem:[%s31891_s3] ss:$0 sm:$0xff] }
 0x15b   :  { %v1367_v53 = vpack.c.bf16 %v1327_v15, %v1324_v61  ;;  %v1720_v51 = vpack.c.bf16 %v25553_v1, %v25544_v29  ;;  %v23248_v16 = vld [vmem:[%s31890_s2 + $0x408] sm:$0xff]  }
 0x15d   :  { %20460 = vmatpush3.bf16.msra.mxu1 %v23240_v30  ;;  %20500 = vmatpush3.bf16.msra.mxu0 %v23241_v45  ;;  %v31937_v30 = vpack.c.bf16 %v25248_v2, %v25230_v50  ;;  %v23246_v45 = vld [vmem:[%s31890_s2 + $0x388] sm:$0xff]   ;;  %v23251_v50 = vld [vmem:[%s31890_s2 + $0x410] sm:$0xff]  }
 0x15e   :  { %2991 = vmatprep.mubr.bf16.mxu1 %v1367_v53  ;;  %20525 = vmatprep.subr.bf16.mxu1 %v23242_v24  ;;  %v23249_v53 = vld [vmem:[%s31890_s2 + $0x390] sm:$0xff]  }
 0x15f   :  { %22321 = vmatprep.subr.bf16.mxu0 %v23245_v14  ;;  %v22279_v18 = vpop.f32.mrb[60].mxu0  ;;  %v25566_v61 = vpop.f32.mrb[60].mxu1 }
 0x160   :  { %2992 = vmatmul.mubr.bf16.vlgmr.msra.gmra.mrb[96].mxu1 %v1363_v49  ;;  %3057 = vmatmul.mubr.bf16.vlgmr.msra.gmra.mrb[112].mxu0 %v31937_v30  ;;  %v1340_v35 = vpop.f32.mrb[61].mxu0  ;;  %v25577_v15 = vpop.f32.mrb[61].mxu1 }
 0x161   :  { %2999 = vmatprep.mubr.bf16.mxu1 %v1368_v36  ;;  %3064 = vmatprep.mubr.bf16.mxu0 %v1713_v60  ;;  %v22280_v24 = vpop.f32.mrb[62].mxu0  ;;  %v25588_v2 = vpop.f32.mrb[62].mxu1 }
 0x162   :  { %20526 = vmatpush3.bf16.msra.mxu1 %v23243_v54  ;;  %22322 = vmatpush3.bf16.msra.mxu0 %v23245_v14  ;;  %v1370_v20 = vpack.c.bf16 %v22280_v24, %v22279_v18  ;;  %v1343_v49 = vpop.f32.mrb[63].mxu0  ;;  %v1723_v36 = vpack.c.bf16 %v25588_v2, %v25566_v61  ;;  %v25592_v28 = vpop.f32.mrb[63].mxu1  ;;  %v23250_v14 = vld [vmem:[%s31890_s2 + $0x3d8] sm:$0xff]  }
 0x163   :  { %20527 = vmatprep.subr.bf16.mxu1 %v23244_v7  ;;  %22323 = vmatprep.subr.bf16.mxu0 %v23248_v16  ;;  %v1369_v57 = vpack.c.bf16 %v1343_v49, %v1340_v35  ;;  %v1722_v60 = vpack.c.bf16 %v25592_v28, %v25577_v15  ;;  %v23254_v54 = vld [vmem:[%s31890_s2 + $0x418] sm:$0xff]   ;;  %v31938_v7 = vpack.c.bf16 %v25234_v33, %v25226_v58  ;;  %v23255_v58 = vld [vmem:[%s31890_s2 + $0x3a0] sm:$0xff]   ;;  %v23256_v33 = vld [vmem:[%s31890_s2 + $0x3e8] sm:$0xff]  }
 0x164   :  { %v23252_v18 = vld [vmem:[%s31890_s2 + $0x398] sm:$0xff]  }
 0x166   :  { %20528 = vmatpush3.bf16.msra.mxu1 %v23246_v45  ;;  %22324 = vmatpush3.bf16.msra.mxu0 %v23248_v16  ;;  %v23253_v16 = vld [vmem:[%s31890_s2 + $0x3e0] sm:$0xff]  }
 0x167   :  { %20529 = vmatprep.subr.bf16.mxu1 %v23247_v47  ;;  %22325 = vmatprep.subr.bf16.mxu0 %v23251_v50 }
 0x168   :  { %3000 = vmatmul.mubr.bf16.gmra.mrb[100].mxu1 %v1364_v44  ;;  %3065 = vmatmul.mubr.bf16.gmra.mrb[116].mxu0 %v31938_v7  ;;  %v23263_v44 = vld [vmem:[%s31890_s2 + $0x430] sm:$0xff]  }
 0x169   :  { %3072 = vmatprep.mubr.bf16.mxu0 %v1714_v10  ;;  %3007 = vmatprep.mubr.bf16.mxu1 %v1369_v57  ;;  %v23258_v10 = vld [vmem:[%s31890_s2 + $0x3a8] sm:$0xff]  }
 0x16a   :  { %20530 = vmatpush3.bf16.msra.mxu1 %v23249_v53  ;;  %22326 = vmatpush3.bf16.msra.mxu0 %v23251_v50 }
 0x16b   :  { %20531 = vmatprep.subr.bf16.mxu1 %v23250_v14  ;;  %22327 = vmatprep.subr.bf16.mxu0 %v23254_v54 }
 0x16e   :  { %20532 = vmatpush3.bf16.msra.mxu1 %v23252_v18  ;;  %22328 = vmatpush3.bf16.msra.mxu0 %v23254_v54 }
 0x16f   :  { %20533 = vmatprep.subr.bf16.mxu1 %v23253_v16  ;;  %22329 = vmatprep.subr.bf16.mxu0 %v23257_v11 }
 0x170   :  { %3008 = vmatmul.mubr.bf16.gmra.mrb[104].mxu1 %v1365_v59  ;;  %3073 = vmatmul.mubr.bf16.gmra.mrb[120].mxu0 %v31939_v4  ;;  %v23268_v4 = vld [vmem:[%s31889_s0 + $0x80] sm:$0xff]  }
 0x171   :  { %3015 = vmatprep.mubr.bf16.mxu1 %v1370_v20  ;;  %3080 = vmatprep.mubr.bf16.mxu0 %v1715_v23  ;;  %v23264_v23 = vld [vmem:[%s31890_s2 + $0x3b8] sm:$0xff]  }
 0x172   :  { %20534 = vmatpush3.bf16.msra.mxu1 %v23255_v58  ;;  %22330 = vmatpush3.bf16.msra.mxu0 %v23257_v11  ;;  %v23266_v58 = vld [vmem:[%s31889_s0] sm:$0xff]  }
 0x173   :  { %20535 = vmatprep.subr.bf16.mxu1 %v23256_v33  ;;  %22331 = vmatprep.subr.bf16.mxu0 %v23260_v46 }
 0x176   :  { %20536 = vmatpush3.bf16.msra.mxu1 %v23258_v10  ;;  %22332 = vmatpush3.bf16.msra.mxu0 %v23260_v46 }
 0x177   :  { %20537 = vmatprep.subr.bf16.mxu1 %v23259_v56  ;;  %22333 = vmatprep.subr.bf16.mxu0 %v23263_v44 }
 0x178   :  { %3016 = vmatmul.mubr.bf16.gmra.mrb[108].mxu1 %v1366_v40  ;;  %3081 = vmatmul.mubr.bf16.gmra.mrb[124].mxu0 %v31940_v6 }
 0x179   :  { %3121 = vmatprep.mubr.bf16.mxu1 %v1720_v51  ;;  %22337 = vmatprep.mubr.bf16.mxu0 %v24565_v3 }
 0x17a   :  { %20538 = vmatpush3.bf16.msra.mxu1 %v23261_v32  ;;  %22334 = vmatpush3.bf16.msra.mxu0 %v23263_v44 }
 0x17b   :  { %20539 = vmatprep.subr.bf16.mxu1 %v23262_v55  ;;  %22335 = vmatprep.subr.bf16.mxu0 %v23265_v21 }
 0x17e   :  { %20540 = vmatpush3.bf16.msra.mxu1 %v23264_v23  ;;  %22336 = vmatpush3.bf16.msra.mxu0 %v23265_v21 }
 0x181   :  { %3122 = vmatmul.mubr.bf16.vlgmr.msra.gmra.mrb[112].mxu1 %v1716_v43  ;;  %22338 = vmatmul.mubr.bf16.vlgmr.msra.gmra.mrb[128].mxu0 %v24570_v5 }
 0x182   :  { %3129 = vmatprep.mubr.bf16.mxu1 %v1721_v8  ;;  %22341 = vmatprep.mubr.bf16.mxu0 %v24586_v9 }
 0x189   :  { %3130 = vmatmul.mubr.bf16.gmra.mrb[116].mxu1 %v1717_v62  ;;  %22342 = vmatmul.mubr.bf16.gmra.mrb[132].mxu0 %v24599_v12 }
 0x18a   :  { %3137 = vmatprep.mubr.bf16.mxu1 %v1722_v60  ;;  %22393 = vmatprep.mubr.msk.bf16.mxu0 %vm439_vm0, %v23268_v4 }
 0x191   :  { %3138 = vmatmul.mubr.bf16.gmra.mrb[120].mxu1 %v1718_v0 }
 0x192   :  { %3145 = vmatprep.mubr.bf16.mxu1 %v1723_v36 }
 0x199   :  { %3146 = vmatmul.mubr.bf16.gmra.mrb[124].mxu1 %v1719_v17 }
 0x19a   :  { %22353 = vmatprep.mubr.msk.bf16.mxu1 %vm439_vm0, %v23266_v58 }
 0x1d1   :  { %v20261_v3 = vpop.f32.mrb[64].mxu0 }
 0x1d2   :  { %v20262_v5 = vpop.f32.mrb[65].mxu0 }
 0x1d3   :  { %v20263_v9 = vadd.f32 %v20262_v5, %v20261_v3  ;;  %v20264_v13 = vpop.f32.mrb[66].mxu0 }
 0x1d4   :  { %v20265_v31 = vpop.f32.mrb[67].mxu0 }
 0x1d5   :  { %v20266_v34 = vadd.f32 %v20265_v31, %v20264_v13  ;;  %v2669_v51 = vadd.f32 %v20263_v9, %v25700_v19 }
 0x1d7   :  { %v2672_v47 = vadd.f32 %v20266_v34, %v25700_v19 }
 0x1d9   :  { %v20267_v12 = vpop.f32.mrb[68].mxu0 }
 0x1da   :  { %v20268_v42 = vpop.f32.mrb[69].mxu0 }
 0x1db   :  { %v20269_v41 = vadd.f32 %v20268_v42, %v20267_v12  ;;  %v20270_v62 = vpop.f32.mrb[70].mxu0 }
 0x1dc   :  { %v20271_v63 = vpop.f32.mrb[71].mxu0 }
 0x1dd   :  { %v20272_v43 = vadd.f32 %v20271_v63, %v20270_v62  ;;  %v2677_v54 = vadd.f32 %v20269_v41, %v25700_v19 }
 0x1df   :  { %v2680_v10 = vadd.f32 %v20272_v43, %v25700_v19 }
 0x1e1   :  { %v20273_v27 = vpop.f32.mrb[72].mxu0 }
 0x1e2   :  { %v20274_v26 = vpop.f32.mrb[73].mxu0 }
 0x1e3   :  { %v20275_v37 = vadd.f32 %v20274_v26, %v20273_v27  ;;  %v20276_v39 = vpop.f32.mrb[74].mxu0 }
 0x1e4   :  { %v20277_v40 = vpop.f32.mrb[75].mxu0 }
 0x1e5   :  { %v20278_v52 = vadd.f32 %v20277_v40, %v20276_v39  ;;  %v2685_v13 = vadd.f32 %v20275_v37, %v25700_v19 }
 0x1e7   :  { %v2688_v63 = vadd.f32 %v20278_v52, %v25700_v19 }
 0x1e9   :  { %v20279_v22 = vpop.f32.mrb[76].mxu0 }
 0x1ea   :  { %v20280_v25 = vpop.f32.mrb[77].mxu0 }
 0x1eb   :  { %v25693_v17 = vadd.f32 %v20280_v25, %v20279_v22  ;;  %v20282_v48 = vpop.f32.mrb[78].mxu0 }
 0x1ec   :  { %v20283_v59 = vpop.f32.mrb[79].mxu0 }
 0x1ed   :  { %v25695_v0 = vadd.f32 %v20283_v59, %v20282_v48 }
 0x1f1   :  { %v20301_v29 = vpop.f32.mrb[64].mxu1  ;;  %v20341_v38 = vpop.f32.mrb[80].mxu0 }
 0x1f2   :  { %v20302_v8 = vpop.f32.mrb[65].mxu1  ;;  %v20342_v1 = vpop.f32.mrb[81].mxu0 }
 0x1f3   :  { %v20303_v61 = vadd.f32 %v20302_v8, %v20301_v29  ;;  %v20343_v30 = vadd.f32 %v20342_v1, %v20341_v38  ;;  %v20304_v45 = vpop.f32.mrb[66].mxu1  ;;  %v20344_v35 = vpop.f32.mrb[82].mxu0  ;;  %v2693_v29 = vadd.f32 %v25693_v17, %v25700_v19 }
 0x1f4   :  { %v20305_v15 = vpop.f32.mrb[67].mxu1  ;;  %v20345_v24 = vpop.f32.mrb[83].mxu0 }
 0x1f5   :  { %v2734_v50 = vadd.f32 %v20303_v61, %v2669_v51  ;;  %v20306_v2 = vadd.f32 %v20305_v15, %v20304_v45  ;;  %v20346_v20 = vadd.f32 %v20345_v24, %v20344_v35 }
 0x1f7   :  { %v25704_v49 = vadd.f32 %v20343_v30, %v2734_v50  ;;  %v2737_v36 = vadd.f32 %v20306_v2, %v2672_v47  ;;  %v2696_v30 = vadd.f32 %v25695_v0, %v25700_v19 }
 0x1f9   :  { %v25706_v28 = vadd.f32 %v20346_v20, %v2737_v36  ;;  %v20307_v57 = vpop.f32.mrb[68].mxu1  ;;  %v20347_v60 = vpop.f32.mrb[84].mxu0 }
 0x1fa   :  { %v20308_v53 = vpop.f32.mrb[69].mxu1  ;;  %v20348_v14 = vpop.f32.mrb[85].mxu0 }
 0x1fb   :  { %v20309_v7 = vadd.f32 %v20308_v53, %v20307_v57  ;;  %v20349_v18 = vadd.f32 %v20348_v14, %v20347_v60  ;;  %v20310_v16 = vpop.f32.mrb[70].mxu1  ;;  %v20350_v11 = vpop.f32.mrb[86].mxu0 }
 0x1fc   :  { %v20311_v33 = vpop.f32.mrb[71].mxu1  ;;  %v20351_v46 = vpop.f32.mrb[87].mxu0 }
 0x1fd   :  { %v2742_v56 = vadd.f32 %v20309_v7, %v2677_v54  ;;  %v20312_v44 = vadd.f32 %v20311_v33, %v20310_v16  ;;  %v20352_v32 = vadd.f32 %v20351_v46, %v20350_v11 }
 0x1ff   :  { %v25718_v55 = vadd.f32 %v20349_v18, %v2742_v56  ;;  %v2745_v21 = vadd.f32 %v20312_v44, %v2680_v10 }
 0x201   :  { %v25720_v6 = vadd.f32 %v20352_v32, %v2745_v21  ;;  %v20313_v23 = vpop.f32.mrb[72].mxu1  ;;  %v20353_v3 = vpop.f32.mrb[88].mxu0 }
 0x202   :  { %v20314_v5 = vpop.f32.mrb[73].mxu1  ;;  %v20354_v9 = vpop.f32.mrb[89].mxu0 }
 0x203   :  { %v20315_v31 = vadd.f32 %v20314_v5, %v20313_v23  ;;  %v20355_v34 = vadd.f32 %v20354_v9, %v20353_v3  ;;  %v20316_v12 = vpop.f32.mrb[74].mxu1  ;;  %v20356_v42 = vpop.f32.mrb[90].mxu0 }
 0x204   :  { %v20317_v41 = vpop.f32.mrb[75].mxu1  ;;  %v20357_v62 = vpop.f32.mrb[91].mxu0 }
 0x205   :  { %v2750_v43 = vadd.f32 %v20315_v31, %v2685_v13  ;;  %v20318_v27 = vadd.f32 %v20317_v41, %v20316_v12  ;;  %v20358_v26 = vadd.f32 %v20357_v62, %v20356_v42 }
 0x207   :  { %v25724_v39 = vadd.f32 %v20355_v34, %v2750_v43  ;;  %v2753_v40 = vadd.f32 %v20318_v27, %v2688_v63 }
 0x209   :  { %v25726_v22 = vadd.f32 %v20358_v26, %v2753_v40  ;;  %v20319_v25 = vpop.f32.mrb[76].mxu1  ;;  %v20359_v48 = vpop.f32.mrb[92].mxu0 }
 0x20a   :  { %v20320_v59 = vpop.f32.mrb[77].mxu1  ;;  %v20360_v37 = vpop.f32.mrb[93].mxu0 }
 0x20b   :  { %v20321_v38 = vadd.f32 %v20320_v59, %v20319_v25  ;;  %v20361_v8 = vadd.f32 %v20360_v37, %v20359_v48  ;;  %v20322_v1 = vpop.f32.mrb[78].mxu1  ;;  %v20362_v51 = vpop.f32.mrb[94].mxu0 }
 0x20c   :  { %v20323_v52 = vpop.f32.mrb[79].mxu1  ;;  %v20363_v61 = vpop.f32.mrb[95].mxu0 }
 0x20d   :  { %v2758_v45 = vadd.f32 %v20321_v38, %v2693_v29  ;;  %v20324_v35 = vadd.f32 %v20323_v52, %v20322_v1  ;;  %v20364_v15 = vadd.f32 %v20363_v61, %v20362_v51 }
 0x20f   :  { %v2823_v24 = vadd.f32 %v20361_v8, %v2758_v45  ;;  %v2761_v47 = vadd.f32 %v20324_v35, %v2696_v30 }
 0x211   :  { %v25732_v50 = vadd.f32 %v20364_v15, %v2761_v47 }
 0x212   :  { %v20381_v2 = vpop.f32.mrb[80].mxu1  ;;  %v20421_v20 = vpop.f32.mrb[96].mxu0 }
 0x213   :  { %v20382_v36 = vpop.f32.mrb[81].mxu1  ;;  %v20422_v17 = vpop.f32.mrb[97].mxu0 }
 0x214   :  { %v20383_v57 = vadd.f32 %v20382_v36, %v20381_v2  ;;  %v20423_v60 = vadd.f32 %v20422_v17, %v20421_v20  ;;  %v20384_v53 = vpop.f32.mrb[82].mxu1  ;;  %v20424_v14 = vpop.f32.mrb[98].mxu0 }
 0x215   :  { %v20385_v54 = vpop.f32.mrb[83].mxu1  ;;  %v20425_v7 = vpop.f32.mrb[99].mxu0 }
 0x216   :  { %v2864_v18 = vadd.f32 %v20383_v57, %v25704_v49  ;;  %v20386_v0 = vadd.f32 %v20385_v54, %v20384_v53  ;;  %v20426_v19 = vadd.f32 %v20425_v7, %v20424_v14 }
 0x218   :  { %v2929_v16 = vadd.f32 %v20423_v60, %v2864_v18  ;;  %v2867_v11 = vadd.f32 %v20386_v0, %v25706_v28 }
 0x21a   :  { %v25736_v58 = vadd.f32 %v20426_v19, %v2867_v11  ;;  %v20387_v33 = vpop.f32.mrb[84].mxu1  ;;  %v20427_v46 = vpop.f32.mrb[100].mxu0 }
 0x21b   :  { %v20388_v4 = vpop.f32.mrb[85].mxu1  ;;  %v20428_v10 = vpop.f32.mrb[101].mxu0 }
 0x21c   :  { %v20389_v56 = vadd.f32 %v20388_v4, %v20387_v33  ;;  %v20429_v44 = vadd.f32 %v20428_v10, %v20427_v46  ;;  %v20390_v32 = vpop.f32.mrb[86].mxu1  ;;  %v20430_v21 = vpop.f32.mrb[102].mxu0 }
 0x21d   :  { %v20391_v23 = vpop.f32.mrb[87].mxu1  ;;  %v20431_v3 = vpop.f32.mrb[103].mxu0 }
 0x21e   :  { %v2872_v5 = vadd.f32 %v20389_v56, %v25718_v55  ;;  %v20392_v49 = vadd.f32 %v20391_v23, %v20390_v32  ;;  %v20432_v9 = vadd.f32 %v20431_v3, %v20430_v21 }
 0x220   :  { %v2937_v13 = vadd.f32 %v20429_v44, %v2872_v5  ;;  %v2875_v31 = vadd.f32 %v20392_v49, %v25720_v6 }
 0x222   :  { %v25740_v28 = vadd.f32 %v20432_v9, %v2875_v31  ;;  %v20393_v34 = vpop.f32.mrb[88].mxu1  ;;  %v20433_v12 = vpop.f32.mrb[104].mxu0 }
 0x223   :  { %v20394_v42 = vpop.f32.mrb[89].mxu1  ;;  %v20434_v41 = vpop.f32.mrb[105].mxu0 }
 0x224   :  { %v20395_v62 = vadd.f32 %v20394_v42, %v20393_v34  ;;  %v20435_v63 = vadd.f32 %v20434_v41, %v20433_v12  ;;  %v20396_v43 = vpop.f32.mrb[90].mxu1  ;;  %v20436_v27 = vpop.f32.mrb[106].mxu0 }
 0x225   :  { %v20397_v26 = vpop.f32.mrb[91].mxu1  ;;  %v20437_v40 = vpop.f32.mrb[107].mxu0 }
 0x226   :  { %v2880_v25 = vadd.f32 %v20395_v62, %v25724_v39  ;;  %v20398_v55 = vadd.f32 %v20397_v26, %v20396_v43  ;;  %v20438_v48 = vadd.f32 %v20437_v40, %v20436_v27 }
 0x228   :  { %v2945_v59 = vadd.f32 %v20435_v63, %v2880_v25  ;;  %v2883_v37 = vadd.f32 %v20398_v55, %v25726_v22 }
 0x22a   :  { %v25744_v6 = vadd.f32 %v20438_v48, %v2883_v37  ;;  %v20399_v29 = vpop.f32.mrb[92].mxu1  ;;  %v20439_v38 = vpop.f32.mrb[108].mxu0 }
 0x22b   :  { %v20400_v8 = vpop.f32.mrb[93].mxu1  ;;  %v20440_v1 = vpop.f32.mrb[109].mxu0 }
 0x22c   :  { %v20401_v51 = vadd.f32 %v20400_v8, %v20399_v29  ;;  %v20441_v52 = vadd.f32 %v20440_v1, %v20439_v38  ;;  %v20402_v61 = vpop.f32.mrb[94].mxu1  ;;  %v20442_v30 = vpop.f32.mrb[110].mxu0 }
 0x22d   :  { %v20403_v45 = vpop.f32.mrb[95].mxu1  ;;  %v20443_v35 = vpop.f32.mrb[111].mxu0 }
 0x22e   :  { %v2888_v15 = vadd.f32 %v20401_v51, %v2823_v24  ;;  %v20404_v47 = vadd.f32 %v20403_v45, %v20402_v61  ;;  %v20444_v39 = vadd.f32 %v20443_v35, %v20442_v30 }
 0x230   :  { %v2953_v2 = vadd.f32 %v20441_v52, %v2888_v15  ;;  %v2891_v20 = vadd.f32 %v20404_v47, %v25732_v50 }
 0x232   :  { %v25747_v36 = vadd.f32 %v20444_v39, %v2891_v20 }
 0x233   :  { %v20461_v22 = vpop.f32.mrb[96].mxu1  ;;  %v20501_v17 = vpop.f32.mrb[112].mxu0 }
 0x234   :  { %v20462_v57 = vpop.f32.mrb[97].mxu1  ;;  %v20502_v60 = vpop.f32.mrb[113].mxu0 }
 0x235   :  { %v20463_v53 = vadd.f32 %v20462_v57, %v20461_v22  ;;  %v20503_v14 = vadd.f32 %v20502_v60, %v20501_v17  ;;  %v20464_v54 = vpop.f32.mrb[98].mxu1  ;;  %v20504_v7 = vpop.f32.mrb[114].mxu0 }
 0x236   :  { %v20465_v18 = vpop.f32.mrb[99].mxu1  ;;  %v20505_v0 = vpop.f32.mrb[115].mxu0 }
 0x237   :  { %v2994_v19 = vadd.f32 %v20463_v53, %v2929_v16  ;;  %v20466_v11 = vadd.f32 %v20465_v18, %v20464_v54  ;;  %v20506_v24 = vadd.f32 %v20505_v0, %v20504_v7 }
 0x239   :  { %v3059_v33 = vadd.f32 %v20503_v14, %v2994_v19  ;;  %v2997_v46 = vadd.f32 %v20466_v11, %v25736_v58 }
 0x23b   :  { %v3062_v4 = vadd.f32 %v20506_v24, %v2997_v46  ;;  %v20467_v50 = vpop.f32.mrb[100].mxu1  ;;  %v20507_v10 = vpop.f32.mrb[116].mxu0 }
 0x23c   :  { %v20468_v56 = vpop.f32.mrb[101].mxu1  ;;  %v20508_v44 = vpop.f32.mrb[117].mxu0 }
 0x23d   :  { %v20469_v32 = vadd.f32 %v20468_v56, %v20467_v50  ;;  %v20509_v21 = vadd.f32 %v20508_v44, %v20507_v10  ;;  %v20470_v23 = vpop.f32.mrb[102].mxu1  ;;  %v20510_v3 = vpop.f32.mrb[118].mxu0 }
 0x23e   :  { %v20471_v5 = vpop.f32.mrb[103].mxu1  ;;  %v20511_v49 = vpop.f32.mrb[119].mxu0 }
 0x23f   :  { %v3002_v9 = vadd.f32 %v20469_v32, %v2937_v13  ;;  %v20472_v31 = vadd.f32 %v20471_v5, %v20470_v23  ;;  %v20512_v34 = vadd.f32 %v20511_v49, %v20510_v3 }
 0x241   :  { %v3067_v16 = vadd.f32 %v20509_v21, %v3002_v9  ;;  %v3005_v12 = vadd.f32 %v20472_v31, %v25740_v28 }
 0x243   :  { %v3070_v42 = vadd.f32 %v20512_v34, %v3005_v12  ;;  %v20473_v41 = vpop.f32.mrb[104].mxu1  ;;  %v20513_v58 = vpop.f32.mrb[120].mxu0 }
 0x244   :  { %v20474_v62 = vpop.f32.mrb[105].mxu1  ;;  %v20514_v63 = vpop.f32.mrb[121].mxu0 }
 0x245   :  { %v20475_v43 = vadd.f32 %v20474_v62, %v20473_v41  ;;  %v20515_v27 = vadd.f32 %v20514_v63, %v20513_v58  ;;  %v20476_v26 = vpop.f32.mrb[106].mxu1  ;;  %v20516_v40 = vpop.f32.mrb[122].mxu0 }
 0x246   :  { %v20477_v25 = vpop.f32.mrb[107].mxu1  ;;  %v20517_v55 = vpop.f32.mrb[123].mxu0 }
 0x247   :  { %v3010_v48 = vadd.f32 %v20475_v43, %v2945_v59  ;;  %v20478_v37 = vadd.f32 %v20477_v25, %v20476_v26  ;;  %v20518_v29 = vadd.f32 %v20517_v55, %v20516_v40 }
 0x249   :  { %v25751_v13 = vadd.f32 %v20515_v27, %v3010_v48  ;;  %v3013_v38 = vadd.f32 %v20478_v37, %v25744_v6 }
 0x24b   :  { %v25754_v8 = vadd.f32 %v20518_v29, %v3013_v38  ;;  %v20479_v28 = vpop.f32.mrb[108].mxu1  ;;  %v20519_v1 = vpop.f32.mrb[124].mxu0 }
 0x24c   :  { %v20480_v51 = vpop.f32.mrb[109].mxu1  ;;  %v20520_v52 = vpop.f32.mrb[125].mxu0 }
 0x24d   :  { %v20481_v61 = vadd.f32 %v20480_v51, %v20479_v28  ;;  %v20521_v30 = vadd.f32 %v20520_v52, %v20519_v1  ;;  %v20482_v45 = vpop.f32.mrb[110].mxu1  ;;  %v20522_v35 = vpop.f32.mrb[126].mxu0 }
 0x24e   :  { %v20483_v15 = vpop.f32.mrb[111].mxu1  ;;  %v20523_v47 = vpop.f32.mrb[127].mxu0 }
 0x24f   :  { %v3018_v39 = vadd.f32 %v20481_v61, %v2953_v2  ;;  %v20484_v59 = vadd.f32 %v20483_v15, %v20482_v45  ;;  %v20524_v20 = vadd.f32 %v20523_v47, %v20522_v35 }
 0x251   :  { %v25756_v22 = vadd.f32 %v20521_v30, %v3018_v39  ;;  %v3021_v17 = vadd.f32 %v20484_v59, %v25747_v36 }
 0x253   :  { %v25759_v6 = vadd.f32 %v20524_v20, %v3021_v17 }
 0x254   :  { %v20541_v57 = vpop.f32.mrb[112].mxu1  ;;  %v22339_v60 = vpop.f32.mrb[128].mxu0 }
 0x255   :  { %v20542_v53 = vpop.f32.mrb[113].mxu1  ;;  %v3188_v14 = vpop.f32.mrb[129].mxu0 }
 0x256   :  { %v20543_v54 = vadd.f32 %v20542_v53, %v20541_v57  ;;  %v20544_v7 = vpop.f32.mrb[114].mxu1  ;;  %v22340_v18 = vpop.f32.mrb[130].mxu0  ;;  %v23270_v53 = vld [vmem:[%s31889_s0 + $0x10] sm:$0xff]  }
 0x257   :  { %v20545_v0 = vpop.f32.mrb[115].mxu1  ;;  %v3191_v19 = vpop.f32.mrb[131].mxu0 }
 0x258   :  { %v20546_v11 = vadd.f32 %v20545_v0, %v20544_v7  ;;  %v3124_v24 = vadd.f32 %v20543_v54, %v3059_v33  ;;  %v23271_v54 = vld [vmem:[%s31889_s0 + $0x18] sm:$0xff]   ;;  %v23282_v0 = vld [vmem:[%s31889_s0 + $0xa0] sm:$0xff]  }
 0x259   :  { %v23279_v7 = vld [vmem:[%s31889_s0 + $0x98] sm:$0xff]  }
 0x25a   :  { %v25761_v2 = vadd.f32 %v3188_v14, %v3124_v24  ;;  %v3127_v46 = vadd.f32 %v20546_v11, %v3062_v4  ;;  %v23278_v14 = vld [vmem:[%s31889_s0 + $0x90] sm:$0xff]   ;;  %v23273_v11 = vld [vmem:[%s31889_s0 + $0x28] sm:$0xff]  }
 0x25b   :  { %v23283_v24 = vld [vmem:[%s31889_s0 + $0xa8] sm:$0xff]  }
 0x25c   :  { %v25763_v50 = vadd.f32 %v3191_v19, %v3127_v46  ;;  %v20547_v10 = vpop.f32.mrb[116].mxu1  ;;  %v22343_v36 = vpop.f32.mrb[132].mxu0  ;;  %v3492_v32 = vmax.f32 %v25761_v2, 0.0  ;;  %v23330_v19 = vld [vmem:[%s31892_s4 + $0x40] sm:$0xff]   ;;  %v23274_v46 = vld [vmem:[%s31889_s0 + $0x30] sm:$0xff]  }
 0x25d   :  { %v20548_v56 = vpop.f32.mrb[117].mxu1  ;;  %v3204_v44 = vpop.f32.mrb[133].mxu0 }
 0x25e   :  { %v3493_v21 = vmax.f32 %v25763_v50, 0.0  ;;  %v20549_v23 = vadd.f32 %v20548_v56, %v20547_v10  ;;  %v20550_v3 = vpop.f32.mrb[118].mxu1  ;;  %v22344_v5 = vpop.f32.mrb[134].mxu0  ;;  %v23286_v10 = vld [vmem:[%s31889_s0 + $0xb0] sm:$0xff]   ;;  %v23287_v56 = vld [vmem:[%s31889_s0 + $0xb8] sm:$0xff]  }
 0x25f   :  { %v20551_v49 = vpop.f32.mrb[119].mxu1  ;;  %v3207_v9 = vpop.f32.mrb[135].mxu0 }
 0x260   :  { %v25767_v31 = vpack.c.bf16 %v3493_v21, %v3492_v32  ;;  %v3132_v33 = vadd.f32 %v20549_v23, %v3067_v16  ;;  %v20552_v34 = vadd.f32 %v20551_v49, %v20550_v3  ;;  %v23290_v32 = vld [vmem:[%s31889_s0 + $0xc0] sm:$0xff]   ;;  %v23277_v21 = vld [vmem:[%s31889_s0 + $0x48] sm:$0xff]   ;;  %v23280_v3 = vld [vmem:[%s31889_s0 + $0x50] sm:$0xff]  }
 0x261   :  { %v23291_v23 = vld [vmem:[%s31889_s0 + $0xc8] sm:$0xff]   ;;  %v23281_v49 = vld [vmem:[%s31889_s0 + $0x58] sm:$0xff]  }
 0x262   :  { %v25769_v4 = vadd.f32 %v22339_v60, %v3132_v33  ;;  %v3135_v12 = vadd.f32 %v20552_v34, %v3070_v42  ;;  %23033 = vmatprep.subr.msk.bf16.mxu1 %vm439_vm0, %v25767_v31  ;;  %23037 = vmatprep.subr.msk.bf16.mxu0 %vm439_vm0, %v25767_v31  ;;  %v3506_v41 = vsel %vm439_vm0, %v25767_v31, 0  ;;  %v23269_v60 = vld [vmem:[%s31889_s0 + $0x88] sm:$0xff]   ;;  %v23284_v33 = vld [vmem:[%s31889_s0 + $0x60] sm:$0xff]  }
 0x263   :  { %22346 = vmatpush3.bf16.msra.mxu1 %v3506_v41  ;;  %22386 = vmatpush3.bf16.msra.mxu0 %v3506_v41  ;;  %v23298_v34 = vld [vmem:[%s31889_s0 + $0xe0] sm:$0xff]  }
 0x264   :  { %v25777_v58 = vadd.f32 %v22340_v18, %v3135_v12  ;;  %v20553_v62 = vpop.f32.mrb[120].mxu1  ;;  %v3494_v16 = vmax.f32 %v25769_v4, 0.0  ;;  %v23272_v18 = vld [vmem:[%s31889_s0 + $0x20] sm:$0xff]   ;;  %v23285_v12 = vld [vmem:[%s31889_s0 + $0x68] sm:$0xff]  }
 0x265   :  { %v20554_v63 = vpop.f32.mrb[121].mxu1 }
 0x266   :  { %v3495_v43 = vmax.f32 %v25777_v58, 0.0  ;;  %v20555_v42 = vadd.f32 %v20554_v63, %v20553_v62  ;;  %v20556_v27 = vpop.f32.mrb[122].mxu1  ;;  %v23288_v62 = vld [vmem:[%s31889_s0 + $0x70] sm:$0xff]  }
 0x267   :  { %v20557_v26 = vpop.f32.mrb[123].mxu1  ;;  %v23302_v63 = vld [vmem:[%s31889_s0 + $0xf0] sm:$0xff]  }
 0x268   :  { %v25781_v40 = vpack.c.bf16 %v3495_v43, %v3494_v16  ;;  %v20558_v25 = vadd.f32 %v20557_v26, %v20556_v27  ;;  %v3140_v55 = vadd.f32 %v20555_v42, %v25751_v13  ;;  %v23289_v16 = vld [vmem:[%s31889_s0 + $0x78] sm:$0xff]   ;;  %v23292_v42 = vld [vmem:[%s31889_s0 + $0x100] sm:$0xff]   ;;  %v23293_v26 = vld [vmem:[%s31889_s0 + $0x108] sm:$0xff]  }
 0x269   :  { %v23303_v43 = vld [vmem:[%s31889_s0 + $0xf8] sm:$0xff]   ;;  %v23306_v27 = vld [vmem:[%s31889_s0 + $0x180] sm:$0xff]  }
 0x26a   :  { %v25784_v48 = vadd.f32 %v3204_v44, %v3140_v55  ;;  %23034 = vmatprep.subr.msk.bf16.mxu1 %vm439_vm0, %v25781_v40  ;;  %23038 = vmatprep.subr.msk.bf16.mxu0 %vm439_vm0, %v25781_v40  ;;  %v3143_v37 = vadd.f32 %v20558_v25, %v25754_v8  ;;  %v3509_v29 = vsel %vm439_vm0, %v25781_v40, 0  ;;  %v23276_v44 = vld [vmem:[%s31889_s0 + $0x40] sm:$0xff]   ;;  %v23307_v25 = vld [vmem:[%s31889_s0 + $0x188] sm:$0xff]   ;;  %v23296_v55 = vld [vmem:[%s31889_s0 + $0x110] sm:$0xff]  }
 0x26b   :  { %22348 = vmatpush3.bf16.msra.mxu1 %v3509_v29  ;;  %22388 = vmatpush3.bf16.msra.mxu0 %v3509_v29 }
 0x26c   :  { %v25793_v38 = vadd.f32 %v3207_v9, %v3143_v37  ;;  %v20559_v28 = vpop.f32.mrb[124].mxu1  ;;  %v3496_v13 = vmax.f32 %v25784_v48, 0.0  ;;  %v23295_v9 = vld [vmem:[%s31889_s0 + $0xd8] sm:$0xff]   ;;  %v23310_v37 = vld [vmem:[%s31889_s0 + $0x190] sm:$0xff]  }
 0x26d   :  { %v20560_v1 = vpop.f32.mrb[125].mxu1 }
 0x26e   :  { %v3497_v51 = vmax.f32 %v25793_v38, 0.0  ;;  %v20561_v52 = vadd.f32 %v20560_v1, %v20559_v28  ;;  %v20562_v61 = vpop.f32.mrb[126].mxu1  ;;  %v23332_v28 = vld [vmem:[%s31892_s4 + $0x48] sm:$0xff]  }
 0x26f   :  { %v20563_v30 = vpop.f32.mrb[127].mxu1  ;;  %v23333_v1 = vld [vmem:[%s31892_s4 + $0x8] sm:$0xff]  }
 0x270   :  { %v25797_v45 = vpack.c.bf16 %v3497_v51, %v3496_v13  ;;  %v3148_v8 = vadd.f32 %v20561_v52, %v25756_v22  ;;  %v20564_v35 = vadd.f32 %v20563_v30, %v20562_v61  ;;  %v23334_v13 = vld [vmem:[%s31892_s4 + $0x50] sm:$0xff]   ;;  %v23297_v51 = vld [vmem:[%s31889_s0 + $0x118] sm:$0xff]   ;;  %v23300_v61 = vld [vmem:[%s31889_s0 + $0x120] sm:$0xff]  }
 0x271   :  { %v23311_v52 = vld [vmem:[%s31889_s0 + $0x198] sm:$0xff]   ;;  %v23314_v30 = vld [vmem:[%s31889_s0 + $0x1a0] sm:$0xff]  }
 0x272   :  { %v25800_v15 = vadd.f32 %v22343_v36, %v3148_v8  ;;  %v3151_v47 = vadd.f32 %v20564_v35, %v25759_v6  ;;  %23035 = vmatprep.subr.msk.bf16.mxu1 %vm439_vm0, %v25797_v45  ;;  %23039 = vmatprep.subr.msk.bf16.mxu0 %vm439_vm0, %v25797_v45  ;;  %v3512_v39 = vsel %vm439_vm0, %v25797_v45, 0  ;;  %v23267_v6 = vld [vmem:[%s31889_s0 + $0x8] sm:$0xff]   ;;  %v23275_v36 = vld [vmem:[%s31889_s0 + $0x38] sm:$0xff]  }
 0x273   :  { %22350 = vmatpush3.bf16.msra.mxu1 %v3512_v39  ;;  %22390 = vmatpush3.bf16.msra.mxu0 %v3512_v39  ;;  %v23301_v8 = vld [vmem:[%s31889_s0 + $0x128] sm:$0xff]  }
 0x274   :  { %v25809_v59 = vadd.f32 %v22344_v5, %v3151_v47  ;;  %v3498_v20 = vmax.f32 %v25800_v15, 0.0  ;;  %v23294_v5 = vld [vmem:[%s31889_s0 + $0xd0] sm:$0xff]   ;;  %v23315_v35 = vld [vmem:[%s31889_s0 + $0x1a8] sm:$0xff]  }
 0x275   :  { %v23304_v47 = vld [vmem:[%s31889_s0 + $0x130] sm:$0xff]  }
 0x276   :  { %v3499_v22 = vmax.f32 %v25809_v59, 0.0 }
 0x278   :  { %v25813_v17 = vpack.c.bf16 %v3499_v22, %v3498_v20  ;;  %v23335_v20 = vld [vmem:[%s31892_s4 + $0x10] sm:$0xff]   ;;  %v23305_v22 = vld [vmem:[%s31889_s0 + $0x138] sm:$0xff]  }
 0x27a   :  { %23036 = vmatprep.subr.msk.bf16.mxu1 %vm439_vm0, %v25813_v17  ;;  %23040 = vmatprep.subr.msk.bf16.mxu0 %vm439_vm0, %v25813_v17  ;;  %v3515_v57 = vsel %vm439_vm0, %v25813_v17, 0 }
 0x27b   :  { %22352 = vmatpush3.bf16.msra.mxu1 %v3515_v57  ;;  %22392 = vmatpush3.bf16.msra.mxu0 %v3515_v57 }
 0x27c   :  { %23041 = vmatprep.subr.msk.bf16.mxu1 %vm439_vm0, %v25767_v31  ;;  %23045 = vmatprep.subr.msk.bf16.mxu0 %vm439_vm0, %v25767_v31 }
 0x27e   :  { %22354 = vmatmul.mubr.msk.bf16.vlgmr.msra.gmra.mrb[128].mxu1 %vm439_vm0, %v23267_v6  ;;  %22394 = vmatmul.mubr.msk.bf16.vlgmr.msra.gmra.mrb[136].mxu0 %vm439_vm0, %v23269_v60  ;;  %v23319_v6 = vld [vmem:[%s31889_s0 + $0x1b8] sm:$0xff]   ;;  %v23321_v60 = vld [vmem:[%s31889_s0 + $0x1c0] sm:$0xff]  }
 0x27f   :  { %22426 = vmatpush3.bf16.msra.mxu1 %v3506_v41  ;;  %22466 = vmatpush3.bf16.msra.mxu0 %v3506_v41  ;;  %v23299_v41 = vld [vmem:[%s31889_s0 + $0xe8] sm:$0xff]  }
 0x280   :  { %23042 = vmatprep.subr.msk.bf16.mxu1 %vm439_vm0, %v25781_v40  ;;  %23046 = vmatprep.subr.msk.bf16.mxu0 %vm439_vm0, %v25781_v40 }
 0x281   :  { %22357 = vmatprep.mubr.msk.bf16.mxu1 %vm439_vm0, %v23270_v53  ;;  %22397 = vmatprep.mubr.msk.bf16.mxu0 %vm439_vm0, %v23278_v14  ;;  %v23336_v53 = vld [vmem:[%s31892_s4 + $0x58] sm:$0xff]  }
 0x282   :  { %v23337_v14 = vld [vmem:[%s31892_s4 + $0x18] sm:$0xff]  }
 0x283   :  { %22428 = vmatpush3.bf16.msra.mxu1 %v3509_v29  ;;  %22468 = vmatpush3.bf16.msra.mxu0 %v3509_v29  ;;  %v23331_v29 = vld [vmem:[%s31892_s4] sm:$0xff]  }
 0x284   :  { %23043 = vmatprep.subr.msk.bf16.mxu1 %vm439_vm0, %v25797_v45  ;;  %23047 = vmatprep.subr.msk.bf16.mxu0 %vm439_vm0, %v25797_v45 }
 0x286   :  { %22358 = vmatmul.mubr.msk.bf16.gmra.mrb[132].mxu1 %vm439_vm0, %v23271_v54  ;;  %22398 = vmatmul.mubr.msk.bf16.gmra.mrb[140].mxu0 %vm439_vm0, %v23279_v7  ;;  %v23338_v54 = vld [vmem:[%s31892_s4 + $0x60] sm:$0xff]  }
 0x287   :  { %22430 = vmatpush3.bf16.msra.mxu1 %v3512_v39  ;;  %22470 = vmatpush3.bf16.msra.mxu0 %v3512_v39  ;;  %v23318_v39 = vld [vmem:[%s31889_s0 + $0x1b0] sm:$0xff]   ;;  %v23339_v7 = vld [vmem:[%s31892_s4 + $0x20] sm:$0xff]  }
 0x288   :  { %23044 = vmatprep.subr.msk.bf16.mxu1 %vm439_vm0, %v25813_v17  ;;  %23048 = vmatprep.subr.msk.bf16.mxu0 %vm439_vm0, %v25813_v17 }
 0x289   :  { %22361 = vmatprep.mubr.msk.bf16.mxu1 %vm439_vm0, %v23272_v18  ;;  %22401 = vmatprep.mubr.msk.bf16.mxu0 %vm439_vm0, %v23282_v0  ;;  %v23309_v18 = vld [vmem:[%s31889_s0 + $0x148] sm:$0xff]  }
 0x28a   :  { %v23323_v0 = vld [vmem:[%s31889_s0 + $0x1c8] sm:$0xff]  }
 0x28b   :  { %22432 = vmatpush3.bf16.msra.mxu1 %v3515_v57  ;;  %22472 = vmatpush3.bf16.msra.mxu0 %v3515_v57  ;;  %v23308_v57 = vld [vmem:[%s31889_s0 + $0x140] sm:$0xff]  }
 0x28c   :  { %20657 = vmatprep.subr.bf16.mxu1 %v23330_v19  ;;  %v23340_v19 = vld [vmem:[%s31892_s4 + $0x68] sm:$0xff]  }
 0x28e   :  { %22362 = vmatmul.mubr.msk.bf16.gmra.mrb[136].mxu1 %vm439_vm0, %v23273_v11  ;;  %22402 = vmatmul.mubr.msk.bf16.gmra.mrb[144].mxu0 %vm439_vm0, %v23283_v24  ;;  %v23312_v11 = vld [vmem:[%s31889_s0 + $0x150] sm:$0xff]  }
 0x28f   :  { %22365 = vmatprep.mubr.msk.bf16.mxu1 %vm439_vm0, %v23274_v46  ;;  %22405 = vmatprep.mubr.msk.bf16.mxu0 %vm439_vm0, %v23286_v10  ;;  %v23324_v24 = vld [vmem:[%s31889_s0 + $0x1d0] sm:$0xff]   ;;  %v23341_v46 = vld [vmem:[%s31892_s4 + $0x28] sm:$0xff]  }
 0x290   :  { %v23342_v10 = vld [vmem:[%s31892_s4 + $0x70] sm:$0xff]  }
 0x296   :  { %22366 = vmatmul.mubr.msk.bf16.gmra.mrb[140].mxu1 %vm439_vm0, %v23275_v36  ;;  %22406 = vmatmul.mubr.msk.bf16.gmra.mrb[148].mxu0 %vm439_vm0, %v23287_v56  ;;  %v23343_v36 = vld [vmem:[%s31892_s4 + $0x30] sm:$0xff]   ;;  %v23313_v56 = vld [vmem:[%s31889_s0 + $0x158] sm:$0xff]  }
 0x297   :  { %22369 = vmatprep.mubr.msk.bf16.mxu1 %vm439_vm0, %v23276_v44  ;;  %22409 = vmatprep.mubr.msk.bf16.mxu0 %vm439_vm0, %v23290_v32  ;;  %v23325_v44 = vld [vmem:[%s31889_s0 + $0x1d8] sm:$0xff]  }
 0x298   :  { %v23344_v32 = vld [vmem:[%s31892_s4 + $0x78] sm:$0xff]  }
 0x29e   :  { %22370 = vmatmul.mubr.msk.bf16.gmra.mrb[144].mxu1 %vm439_vm0, %v23277_v21  ;;  %22410 = vmatmul.mubr.msk.bf16.gmra.mrb[152].mxu0 %vm439_vm0, %v23291_v23  ;;  %v23316_v21 = vld [vmem:[%s31889_s0 + $0x160] sm:$0xff]  }
 0x29f   :  { %22373 = vmatprep.mubr.msk.bf16.mxu1 %vm439_vm0, %v23280_v3  ;;  %22413 = vmatprep.mubr.msk.bf16.mxu0 %vm439_vm0, %v23294_v5  ;;  %v23326_v23 = vld [vmem:[%s31889_s0 + $0x1e0] sm:$0xff]   ;;  %v23345_v3 = vld [vmem:[%s31892_s4 + $0x38] sm:$0xff]  }
 0x2a0   :  { %v23346_v5 = vld [vmem:[%s31892_s4 + $0xc0] sm:$0xff]  }
 0x2a1   :  { %20697 = vmatprep.subr.bf16.mxu0 %v23346_v5 }
 0x2a6   :  { %22374 = vmatmul.mubr.msk.bf16.gmra.mrb[148].mxu1 %vm439_vm0, %v23281_v49  ;;  %22414 = vmatmul.mubr.msk.bf16.gmra.mrb[156].mxu0 %vm439_vm0, %v23295_v9  ;;  %v23347_v49 = vld [vmem:[%s31892_s4 + $0x140] sm:$0xff]  }
 0x2a7   :  { %22377 = vmatprep.mubr.msk.bf16.mxu1 %vm439_vm0, %v23284_v33  ;;  %22417 = vmatprep.mubr.msk.bf16.mxu0 %vm439_vm0, %v23298_v34  ;;  %v23348_v9 = vld [vmem:[%s31892_s4 + $0x80] sm:$0xff]   ;;  %v23317_v33 = vld [vmem:[%s31889_s0 + $0x168] sm:$0xff]  }
 0x2a8   :  { %v23327_v34 = vld [vmem:[%s31889_s0 + $0x1e8] sm:$0xff]  }
 0x2ae   :  { %22378 = vmatmul.mubr.msk.bf16.gmra.mrb[152].mxu1 %vm439_vm0, %v23285_v12  ;;  %22418 = vmatmul.mubr.msk.bf16.gmra.mrb[160].mxu0 %vm439_vm0, %v23299_v41  ;;  %v23350_v12 = vld [vmem:[%s31892_s4 + $0xc8] sm:$0xff]   ;;  %v23320_v41 = vld [vmem:[%s31889_s0 + $0x170] sm:$0xff]  }
 0x2af   :  { %22381 = vmatprep.mubr.msk.bf16.mxu1 %vm439_vm0, %v23288_v62  ;;  %22421 = vmatprep.mubr.msk.bf16.mxu0 %vm439_vm0, %v23302_v63  ;;  %v23328_v62 = vld [vmem:[%s31889_s0 + $0x1f0] sm:$0xff]   ;;  %v23352_v63 = vld [vmem:[%s31892_s4 + $0x88] sm:$0xff]  }
 0x2b6   :  { %22382 = vmatmul.mubr.msk.bf16.gmra.mrb[156].mxu1 %vm439_vm0, %v23289_v16  ;;  %22422 = vmatmul.mubr.msk.bf16.gmra.mrb[164].mxu0 %vm439_vm0, %v23303_v43  ;;  %v23354_v16 = vld [vmem:[%s31892_s4 + $0xd0] sm:$0xff]  }
 0x2b7   :  { %22433 = vmatprep.mubr.msk.bf16.mxu1 %vm439_vm0, %v23292_v42  ;;  %22473 = vmatprep.mubr.msk.bf16.mxu0 %vm439_vm0, %v23306_v27  ;;  %v23356_v43 = vld [vmem:[%s31892_s4 + $0x90] sm:$0xff]   ;;  %v23322_v42 = vld [vmem:[%s31889_s0 + $0x178] sm:$0xff]  }
 0x2b8   :  { %v23329_v27 = vld [vmem:[%s31889_s0 + $0x1f8] sm:$0xff]  }
 0x2be   :  { %22434 = vmatmul.mubr.msk.bf16.vlgmr.msra.gmra.mrb[160].mxu1 %vm439_vm0, %v23293_v26  ;;  %22474 = vmatmul.mubr.msk.bf16.vlgmr.msra.gmra.mrb[168].mxu0 %vm439_vm0, %v23307_v25  ;;  %v23358_v26 = vld [vmem:[%s31892_s4 + $0xd8] sm:$0xff]  }
 0x2bf   :  { %22437 = vmatprep.mubr.msk.bf16.mxu1 %vm439_vm0, %v23296_v55  ;;  %22477 = vmatprep.mubr.msk.bf16.mxu0 %vm439_vm0, %v23310_v37  ;;  %v23360_v25 = vld [vmem:[%s31892_s4 + $0x98] sm:$0xff]   ;;  %v23362_v55 = vld [vmem:[%s31892_s4 + $0xe0] sm:$0xff]  }
 0x2c0   :  { %20658 = vmatpush3.bf16.msra.mxu1 %v23331_v29  ;;  %20698 = vmatpush3.bf16.msra.mxu0 %v23348_v9  ;;  %v23364_v37 = vld [vmem:[%s31892_s4 + $0xa0] sm:$0xff]   ;;  %v23366_v29 = vld [vmem:[%s31892_s4 + $0xe8] sm:$0xff]  }
 0x2c1   :  { %20659 = vmatprep.subr.bf16.mxu1 %v23332_v28  ;;  %20699 = vmatprep.subr.bf16.mxu0 %v23350_v12  ;;  %v23368_v28 = vld [vmem:[%s31892_s4 + $0xa8] sm:$0xff]  }
 0x2c4   :  { %20660 = vmatpush3.bf16.msra.mxu1 %v23333_v1  ;;  %20700 = vmatpush3.bf16.msra.mxu0 %v23352_v63  ;;  %v23370_v1 = vld [vmem:[%s31892_s4 + $0xf0] sm:$0xff]  }
 0x2c5   :  { %20661 = vmatprep.subr.bf16.mxu1 %v23334_v13  ;;  %20701 = vmatprep.subr.bf16.mxu0 %v23354_v16  ;;  %v23372_v13 = vld [vmem:[%s31892_s4 + $0xb0] sm:$0xff]   ;;  %v23351_v16 = vld [vmem:[%s31892_s4 + $0x148] sm:$0xff]  }
 0x2c6   :  { %22438 = vmatmul.mubr.msk.bf16.gmra.mrb[164].mxu1 %vm439_vm0, %v23297_v51  ;;  %22478 = vmatmul.mubr.msk.bf16.gmra.mrb[172].mxu0 %vm439_vm0, %v23311_v52  ;;  %v23374_v51 = vld [vmem:[%s31892_s4 + $0xf8] sm:$0xff]  }
 0x2c7   :  { %22441 = vmatprep.mubr.msk.bf16.mxu1 %vm439_vm0, %v23300_v61  ;;  %22481 = vmatprep.mubr.msk.bf16.mxu0 %vm439_vm0, %v23314_v30  ;;  %v23376_v52 = vld [vmem:[%s31892_s4 + $0xb8] sm:$0xff]   ;;  %v23378_v61 = vld [vmem:[%s31892_s4 + $0x1c0] sm:$0xff]  }
 0x2c8   :  { %20662 = vmatpush3.bf16.msra.mxu1 %v23335_v20  ;;  %20702 = vmatpush3.bf16.msra.mxu0 %v23356_v43 }
 0x2c9   :  { %20663 = vmatprep.subr.bf16.mxu1 %v23336_v53  ;;  %20703 = vmatprep.subr.bf16.mxu0 %v23358_v26 }
 0x2cc   :  { %20664 = vmatpush3.bf16.msra.mxu1 %v23337_v14  ;;  %20704 = vmatpush3.bf16.msra.mxu0 %v23360_v25  ;;  %v23355_v25 = vld [vmem:[%s31892_s4 + $0x150] sm:$0xff]  }
 0x2cd   :  { %20665 = vmatprep.subr.bf16.mxu1 %v23338_v54  ;;  %20705 = vmatprep.subr.bf16.mxu0 %v23362_v55 }
 0x2ce   :  { %22442 = vmatmul.mubr.msk.bf16.gmra.mrb[168].mxu1 %vm439_vm0, %v23301_v8  ;;  %22482 = vmatmul.mubr.msk.bf16.gmra.mrb[176].mxu0 %vm439_vm0, %v23315_v35 }
 0x2cf   :  { %22445 = vmatprep.mubr.msk.bf16.mxu1 %vm439_vm0, %v23304_v47  ;;  %22485 = vmatprep.mubr.msk.bf16.mxu0 %vm439_vm0, %v23318_v39 }
 0x2d0   :  { %20666 = vmatpush3.bf16.msra.mxu1 %v23339_v7  ;;  %20706 = vmatpush3.bf16.msra.mxu0 %v23364_v37 }
 0x2d1   :  { %20667 = vmatprep.subr.bf16.mxu1 %v23340_v19  ;;  %20707 = vmatprep.subr.bf16.mxu0 %v23366_v29 }
 0x2d4   :  { %20668 = vmatpush3.bf16.msra.mxu1 %v23341_v46  ;;  %20708 = vmatpush3.bf16.msra.mxu0 %v23368_v28 }
 0x2d5   :  { %20669 = vmatprep.subr.bf16.mxu1 %v23342_v10  ;;  %20709 = vmatprep.subr.bf16.mxu0 %v23370_v1 }
 0x2d6   :  { %22446 = vmatmul.mubr.msk.bf16.gmra.mrb[172].mxu1 %vm439_vm0, %v23305_v22  ;;  %22486 = vmatmul.mubr.msk.bf16.gmra.mrb[180].mxu0 %vm439_vm0, %v23319_v6 }
 0x2d7   :  { %22449 = vmatprep.mubr.msk.bf16.mxu1 %vm439_vm0, %v23308_v57  ;;  %22489 = vmatprep.mubr.msk.bf16.mxu0 %vm439_vm0, %v23321_v60 }
 0x2d8   :  { %20670 = vmatpush3.bf16.msra.mxu1 %v23343_v36  ;;  %20710 = vmatpush3.bf16.msra.mxu0 %v23372_v13 }
 0x2d9   :  { %20671 = vmatprep.subr.bf16.mxu1 %v23344_v32  ;;  %20711 = vmatprep.subr.bf16.mxu0 %v23374_v51 }
 0x2dc   :  { %20672 = vmatpush3.bf16.msra.mxu1 %v23345_v3  ;;  %20712 = vmatpush3.bf16.msra.mxu0 %v23376_v52 }
 0x2dd   :  { %20737 = vmatprep.subr.bf16.mxu1 %v23347_v49  ;;  %20777 = vmatprep.subr.bf16.mxu0 %v23378_v61  ;;  %v23357_v61 = vld [vmem:[%s31892_s4 + $0x110] sm:$0xff]  }
 0x2de   :  { %22450 = vmatmul.mubr.msk.bf16.gmra.mrb[176].mxu1 %vm439_vm0, %v23309_v18  ;;  %22490 = vmatmul.mubr.msk.bf16.gmra.mrb[184].mxu0 %vm439_vm0, %v23323_v0 }
 0x2df   :  { %22453 = vmatprep.mubr.msk.bf16.mxu1 %vm439_vm0, %v23312_v11  ;;  %22493 = vmatprep.mubr.msk.bf16.mxu0 %vm439_vm0, %v23324_v24 }
 0x2e6   :  { %22454 = vmatmul.mubr.msk.bf16.gmra.mrb[180].mxu1 %vm439_vm0, %v23313_v56  ;;  %22494 = vmatmul.mubr.msk.bf16.gmra.mrb[188].mxu0 %vm439_vm0, %v23325_v44 }
 0x2e7   :  { %22457 = vmatprep.mubr.msk.bf16.mxu1 %vm439_vm0, %v23316_v21  ;;  %22497 = vmatprep.mubr.msk.bf16.mxu0 %vm439_vm0, %v23326_v23 }
 0x2ee   :  { %22458 = vmatmul.mubr.msk.bf16.gmra.mrb[184].mxu1 %vm439_vm0, %v23317_v33  ;;  %22498 = vmatmul.mubr.msk.bf16.gmra.mrb[192].mxu0 %vm439_vm0, %v23327_v34 }
 0x2ef   :  { %22461 = vmatprep.mubr.msk.bf16.mxu1 %vm439_vm0, %v23320_v41  ;;  %22501 = vmatprep.mubr.msk.bf16.mxu0 %vm439_vm0, %v23328_v62  ;;  %v23349_v62 = vld [vmem:[%s31892_s4 + $0x100] sm:$0xff]  }
 0x2f6   :  { %22462 = vmatmul.mubr.msk.bf16.gmra.mrb[188].mxu1 %vm439_vm0, %v23322_v42  ;;  %22502 = vmatmul.mubr.msk.bf16.gmra.mrb[196].mxu0 %vm439_vm0, %v23329_v27  ;;  %v23353_v42 = vld [vmem:[%s31892_s4 + $0x108] sm:$0xff]  }
 0x351   :  { %v22355_v30 = vpop.f32.mrb[128].mxu1  ;;  %v26187_v8 = vpop.f32.mrb[136].mxu0 }
 0x352   :  { %v3711_v35 = vpop.f32.mrb[129].mxu1  ;;  %v26189_v47 = vpop.f32.mrb[137].mxu0 }
 0x353   :  { %v22356_v39 = vpop.f32.mrb[130].mxu1  ;;  %v26191_v20 = vpop.f32.mrb[138].mxu0 }
 0x354   :  { %v3839_v22 = vpack.c.bf16 %v22356_v39, %v22355_v30  ;;  %v3714_v6 = vpop.f32.mrb[131].mxu1  ;;  %v4192_v57 = vpack.c.bf16 %v26191_v20, %v26187_v8  ;;  %v26195_v60 = vpop.f32.mrb[139].mxu0  ;;  %v23393_v8 = vld [vmem:[%s31892_s4 + $0x218] sm:$0xff]  }
 0x355   :  { %v3838_v53 = vpack.c.bf16 %v3714_v6, %v3711_v35  ;;  %v4191_v14 = vpack.c.bf16 %v26195_v60, %v26189_v47  ;;  %v23359_v35 = vld [vmem:[%s31892_s4 + $0x158] sm:$0xff]   ;;  %v23385_v47 = vld [vmem:[%s31892_s4 + $0x208] sm:$0xff]  }
 0x356   :  { %v23361_v6 = vld [vmem:[%s31892_s4 + $0x118] sm:$0xff]  }
 0x359   :  { %v26199_v54 = vpop.f32.mrb[132].mxu1  ;;  %v26201_v7 = vpop.f32.mrb[140].mxu0 }
 0x35a   :  { %v26203_v18 = vpop.f32.mrb[133].mxu1  ;;  %v26205_v0 = vpop.f32.mrb[141].mxu0 }
 0x35b   :  { %v26207_v19 = vpop.f32.mrb[134].mxu1  ;;  %v26209_v11 = vpop.f32.mrb[142].mxu0 }
 0x35c   :  { %v3841_v24 = vpack.c.bf16 %v26207_v19, %v26199_v54  ;;  %v26213_v46 = vpop.f32.mrb[135].mxu1  ;;  %v26217_v36 = vpop.f32.mrb[143].mxu0 }
 0x35d   :  { %v3840_v56 = vpack.c.bf16 %v26213_v46, %v26203_v18  ;;  %v4193_v44 = vpack.c.bf16 %v26217_v36, %v26205_v0  ;;  %v23363_v46 = vld [vmem:[%s31892_s4 + $0x160] sm:$0xff]   ;;  %v23401_v0 = vld [vmem:[%s31892_s4 + $0x228] sm:$0xff]  }
 0x361   :  { %v22363_v32 = vpop.f32.mrb[136].mxu1  ;;  %v26223_v21 = vpop.f32.mrb[144].mxu0 }
 0x362   :  { %v3743_v23 = vpop.f32.mrb[137].mxu1  ;;  %v26225_v3 = vpop.f32.mrb[145].mxu0 }
 0x363   :  { %v22364_v5 = vpop.f32.mrb[138].mxu1  ;;  %v26227_v49 = vpop.f32.mrb[146].mxu0 }
 0x364   :  { %v3843_v9 = vpack.c.bf16 %v22364_v5, %v22363_v32  ;;  %v3746_v33 = vpop.f32.mrb[139].mxu1  ;;  %v4196_v34 = vpack.c.bf16 %v26227_v49, %v26223_v21  ;;  %v26231_v12 = vpop.f32.mrb[147].mxu0  ;;  %v23386_v21 = vld [vmem:[%s31892_s4 + $0x1d0] sm:$0xff]  }
 0x365   :  { %v3842_v41 = vpack.c.bf16 %v3746_v33, %v3743_v23  ;;  %v4195_v63 = vpack.c.bf16 %v26231_v12, %v26225_v3  ;;  %v23375_v33 = vld [vmem:[%s31892_s4 + $0x178] sm:$0xff]   ;;  %v23387_v49 = vld [vmem:[%s31892_s4 + $0x250] sm:$0xff]  }
 0x366   :  { %v23388_v12 = vld [vmem:[%s31892_s4 + $0x190] sm:$0xff]  }
 0x367   :  { %5855 = vmatprep.mubr.bf16.mxu1 %v3842_v41 }
 0x368   :  { %5856 = vmatmul.mubr.bf16.vlgmr.msra.gmra.mrb[192].mxu1 %v3838_v53 }
 0x369   :  { %v22367_v43 = vpop.f32.mrb[140].mxu1  ;;  %5863 = vmatprep.mubr.bf16.mxu1 %v3843_v9  ;;  %20738 = vmatpush3.bf16.msra.mxu1 %v23349_v62  ;;  %v26244_v27 = vpop.f32.mrb[148].mxu0 }
 0x36a   :  { %v3759_v26 = vpop.f32.mrb[141].mxu1  ;;  %20739 = vmatprep.subr.bf16.mxu1 %v23351_v16  ;;  %v26249_v55 = vpop.f32.mrb[149].mxu0  ;;  %v23365_v16 = vld [vmem:[%s31892_s4 + $0x120] sm:$0xff]  }
 0x36b   :  { %v22368_v37 = vpop.f32.mrb[142].mxu1  ;;  %v26251_v29 = vpop.f32.mrb[150].mxu0 }
 0x36c   :  { %v3845_v28 = vpack.c.bf16 %v22368_v37, %v22367_v43  ;;  %v3762_v1 = vpop.f32.mrb[143].mxu1  ;;  %v4198_v13 = vpack.c.bf16 %v26251_v29, %v26244_v27  ;;  %v26255_v51 = vpop.f32.mrb[151].mxu0  ;;  %v23379_v43 = vld [vmem:[%s31892_s4 + $0x240] sm:$0xff]   ;;  %v23402_v27 = vld [vmem:[%s31892_s4 + $0x1f0] sm:$0xff]  }
 0x36d   :  { %v3844_v52 = vpack.c.bf16 %v3762_v1, %v3759_v26  ;;  %20740 = vmatpush3.bf16.msra.mxu1 %v23353_v42  ;;  %v4197_v30 = vpack.c.bf16 %v26255_v51, %v26249_v55  ;;  %v23367_v42 = vld [vmem:[%s31892_s4 + $0x168] sm:$0xff]   ;;  %v23394_v55 = vld [vmem:[%s31892_s4 + $0x1e0] sm:$0xff]   ;;  %v23403_v29 = vld [vmem:[%s31892_s4 + $0x270] sm:$0xff]  }
 0x36e   :  { %20741 = vmatprep.subr.bf16.mxu1 %v23355_v25  ;;  %v23369_v25 = vld [vmem:[%s31892_s4 + $0x128] sm:$0xff]   ;;  %v23395_v51 = vld [vmem:[%s31892_s4 + $0x260] sm:$0xff]  }
 0x370   :  { %5864 = vmatmul.mubr.bf16.gmra.mrb[196].mxu1 %v3839_v22 }
 0x371   :  { %v26265_v39 = vpop.f32.mrb[144].mxu1  ;;  %5871 = vmatprep.mubr.bf16.mxu1 %v3844_v52  ;;  %20742 = vmatpush3.bf16.msra.mxu1 %v23357_v61  ;;  %v26270_v53 = vpop.f32.mrb[152].mxu0  ;;  %v23371_v52 = vld [vmem:[%s31892_s4 + $0x170] sm:$0xff]  }
 0x372   :  { %v26272_v18 = vpop.f32.mrb[145].mxu1  ;;  %20743 = vmatprep.subr.bf16.mxu1 %v23359_v35  ;;  %v26277_v32 = vpop.f32.mrb[153].mxu0 }
 0x373   :  { %v26279_v22 = vpop.f32.mrb[146].mxu1  ;;  %v26281_v23 = vpop.f32.mrb[154].mxu0 }
 0x374   :  { %v3847_v5 = vpack.c.bf16 %v26279_v22, %v26265_v39  ;;  %v3778_v9 = vpop.f32.mrb[147].mxu1  ;;  %v26287_v41 = vpop.f32.mrb[155].mxu0  ;;  %v23392_v39 = vld [vmem:[%s31892_s4 + $0x198] sm:$0xff]  }
 0x375   :  { %v3846_v62 = vpack.c.bf16 %v3778_v9, %v26272_v18  ;;  %20744 = vmatpush3.bf16.msra.mxu1 %v23361_v6 }
 0x376   :  { %20745 = vmatprep.subr.bf16.mxu1 %v23363_v46 }
 0x378   :  { %5872 = vmatmul.mubr.bf16.gmra.mrb[200].mxu1 %v3840_v56 }
 0x379   :  { %v26298_v26 = vpop.f32.mrb[148].mxu1  ;;  %5879 = vmatprep.mubr.bf16.mxu1 %v3845_v28  ;;  %20746 = vmatpush3.bf16.msra.mxu1 %v23365_v16  ;;  %v26303_v37 = vpop.f32.mrb[156].mxu0  ;;  %v23373_v16 = vld [vmem:[%s31892_s4 + $0x130] sm:$0xff]   ;;  %v23380_v28 = vld [vmem:[%s31892_s4 + $0x180] sm:$0xff]  }
 0x37a   :  { %v26305_v1 = vpop.f32.mrb[149].mxu1  ;;  %20747 = vmatprep.subr.bf16.mxu1 %v23367_v42  ;;  %v26310_v61 = vpop.f32.mrb[157].mxu0 }
 0x37b   :  { %v26312_v56 = vpop.f32.mrb[150].mxu1  ;;  %v26314_v35 = vpop.f32.mrb[158].mxu0 }
 0x37c   :  { %v26318_v6 = vpop.f32.mrb[151].mxu1  ;;  %v26322_v46 = vpop.f32.mrb[159].mxu0 }
 0x37d   :  { %v3848_v9 = vpack.c.bf16 %v26318_v6, %v26305_v1  ;;  %20748 = vmatpush3.bf16.msra.mxu1 %v23369_v25  ;;  %v23377_v25 = vld [vmem:[%s31892_s4 + $0x138] sm:$0xff]   ;;  %v23400_v1 = vld [vmem:[%s31892_s4 + $0x1a8] sm:$0xff]  }
 0x37e   :  { %20749 = vmatprep.subr.bf16.mxu1 %v23371_v52  ;;  %v23408_v6 = vld [vmem:[%s31892_s4 + $0x1b8] sm:$0xff]  }
 0x380   :  { %5880 = vmatmul.mubr.bf16.gmra.mrb[204].mxu1 %v3841_v24 }
 0x381   :  { %v22379_v18 = vpop.f32.mrb[152].mxu1  ;;  %20750 = vmatpush3.bf16.msra.mxu1 %v23373_v16  ;;  %5985 = vmatprep.mubr.bf16.mxu1 %v4195_v63  ;;  %v26343_v42 = vpop.f32.mrb[160].mxu0 }
 0x382   :  { %v3807_v52 = vpop.f32.mrb[153].mxu1  ;;  %20751 = vmatprep.subr.bf16.mxu1 %v23375_v33  ;;  %v26348_v54 = vpop.f32.mrb[161].mxu0 }
 0x383   :  { %v22380_v19 = vpop.f32.mrb[154].mxu1  ;;  %v26350_v24 = vpop.f32.mrb[162].mxu0 }
 0x384   :  { %v3851_v16 = vpack.c.bf16 %v22380_v19, %v22379_v18  ;;  %v3810_v3 = vpop.f32.mrb[155].mxu1  ;;  %v26354_v63 = vpop.f32.mrb[163].mxu0  ;;  %v23381_v18 = vld [vmem:[%s31892_s4 + $0x200] sm:$0xff]   ;;  %v23382_v19 = vld [vmem:[%s31892_s4 + $0x1c8] sm:$0xff]  }
 0x385   :  { %v3850_v10 = vpack.c.bf16 %v3810_v3, %v3807_v52  ;;  %20752 = vmatpush3.bf16.msra.mxu1 %v23377_v25  ;;  %v4203_v33 = vpack.c.bf16 %v26354_v63, %v26348_v54  ;;  %v23383_v25 = vld [vmem:[%s31892_s4 + $0x248] sm:$0xff]  }
 0x386   :  { %20817 = vmatprep.subr.bf16.mxu1 %v23379_v43 }
 0x387   :  { %5920 = vmatprep.mubr.bf16.mxu0 %v3850_v10 }
 0x388   :  { %5921 = vmatmul.mubr.bf16.vlgmr.msra.gmra.mrb[200].mxu0 %v3846_v62  ;;  %5986 = vmatmul.mubr.bf16.vlgmr.msra.gmra.mrb[208].mxu1 %v4191_v14  ;;  %v23384_v62 = vld [vmem:[%s31892_s4 + $0x188] sm:$0xff]  }
 0x389   :  { %v26373_v43 = vpop.f32.mrb[156].mxu1  ;;  %5928 = vmatprep.mubr.bf16.mxu0 %v3851_v16  ;;  %5993 = vmatprep.mubr.bf16.mxu1 %v4196_v34  ;;  %v26378_v10 = vpop.f32.mrb[164].mxu0 }
 0x38a   :  { %20778 = vmatpush3.bf16.msra.mxu0 %v23380_v28  ;;  %20818 = vmatpush3.bf16.msra.mxu1 %v23381_v18  ;;  %v3823_v52 = vpop.f32.mrb[157].mxu1  ;;  %v26386_v60 = vpop.f32.mrb[165].mxu0 }
 0x38b   :  { %v22384_v14 = vpop.f32.mrb[158].mxu1  ;;  %20779 = vmatprep.subr.bf16.mxu0 %v23382_v19  ;;  %20819 = vmatprep.subr.bf16.mxu1 %v23383_v25  ;;  %v26394_v34 = vpop.f32.mrb[166].mxu0 }
 0x38c   :  { %v3853_v28 = vpack.c.bf16 %v22384_v14, %v26373_v43  ;;  %v3826_v16 = vpop.f32.mrb[159].mxu1  ;;  %v4206_v3 = vpack.c.bf16 %v26394_v34, %v26378_v10  ;;  %v26399_v18 = vpop.f32.mrb[167].mxu0  ;;  %v23389_v43 = vld [vmem:[%s31892_s4 + $0x210] sm:$0xff]   ;;  %v23390_v14 = vld [vmem:[%s31892_s4 + $0x1d8] sm:$0xff]  }
 0x38d   :  { %v3852_v19 = vpack.c.bf16 %v3826_v16, %v3823_v52  ;;  %v4205_v25 = vpack.c.bf16 %v26399_v18, %v26386_v60  ;;  %v23391_v52 = vld [vmem:[%s31892_s4 + $0x258] sm:$0xff]  }
 0x38e   :  { %20780 = vmatpush3.bf16.msra.mxu0 %v23384_v62  ;;  %20820 = vmatpush3.bf16.msra.mxu1 %v23385_v47 }
 0x38f   :  { %20781 = vmatprep.subr.bf16.mxu0 %v23386_v21  ;;  %20821 = vmatprep.subr.bf16.mxu1 %v23387_v49 }
 0x390   :  { %5929 = vmatmul.mubr.bf16.gmra.mrb[204].mxu0 %v3847_v5  ;;  %5994 = vmatmul.mubr.bf16.gmra.mrb[212].mxu1 %v4192_v57 }
 0x391   :  { %v26421_v62 = vpop.f32.mrb[160].mxu1  ;;  %5936 = vmatprep.mubr.bf16.mxu0 %v3852_v19  ;;  %6001 = vmatprep.mubr.bf16.mxu1 %v4197_v30  ;;  %v26426_v47 = vpop.f32.mrb[168].mxu0 }
 0x392   :  { %20782 = vmatpush3.bf16.msra.mxu0 %v23388_v12  ;;  %20822 = vmatpush3.bf16.msra.mxu1 %v23389_v43  ;;  %v26428_v21 = vpop.f32.mrb[161].mxu1  ;;  %v26436_v20 = vpop.f32.mrb[169].mxu0  ;;  %v23396_v43 = vld [vmem:[%s31892_s4 + $0x1a0] sm:$0xff]   ;;  %v23399_v12 = vld [vmem:[%s31892_s4 + $0x268] sm:$0xff]  }
 0x393   :  { %v26438_v57 = vpop.f32.mrb[162].mxu1  ;;  %20783 = vmatprep.subr.bf16.mxu0 %v23390_v14  ;;  %20823 = vmatprep.subr.bf16.mxu1 %v23391_v52  ;;  %v26446_v30 = vpop.f32.mrb[170].mxu0  ;;  %v23397_v14 = vld [vmem:[%s31892_s4 + $0x220] sm:$0xff]   ;;  %v23398_v52 = vld [vmem:[%s31892_s4 + $0x1e8] sm:$0xff]  }
 0x394   :  { %v4545_v22 = vpack.c.bf16 %v26438_v57, %v26421_v62  ;;  %v26450_v5 = vpop.f32.mrb[163].mxu1  ;;  %v26454_v49 = vpop.f32.mrb[171].mxu0  ;;  %v23425_v62 = vld [vmem:[%s31892_s4 + $0x318] sm:$0xff]  }
 0x395   :  { %v4544_v16 = vpack.c.bf16 %v26450_v5, %v26428_v21  ;;  %v23417_v21 = vld [vmem:[%s31892_s4 + $0x308] sm:$0xff]  }
 0x396   :  { %20784 = vmatpush3.bf16.msra.mxu0 %v23392_v39  ;;  %20824 = vmatpush3.bf16.msra.mxu1 %v23393_v8 }
 0x397   :  { %20785 = vmatprep.subr.bf16.mxu0 %v23394_v55  ;;  %20825 = vmatprep.subr.bf16.mxu1 %v23395_v51 }
 0x398   :  { %5937 = vmatmul.mubr.bf16.gmra.mrb[208].mxu0 %v3848_v9  ;;  %6002 = vmatmul.mubr.bf16.gmra.mrb[216].mxu1 %v4193_v44 }
 0x399   :  { %v26478_v39 = vpop.f32.mrb[164].mxu1  ;;  %5944 = vmatprep.mubr.bf16.mxu0 %v3853_v28  ;;  %6009 = vmatprep.mubr.bf16.mxu1 %v4198_v13  ;;  %v26483_v8 = vpop.f32.mrb[172].mxu0  ;;  %v23406_v28 = vld [vmem:[%s31892_s4 + $0x1f8] sm:$0xff]  }
 0x39a   :  { %20786 = vmatpush3.bf16.msra.mxu0 %v23396_v43  ;;  %20826 = vmatpush3.bf16.msra.mxu1 %v23397_v14  ;;  %v26485_v55 = vpop.f32.mrb[165].mxu1  ;;  %v26493_v36 = vpop.f32.mrb[173].mxu0  ;;  %v23404_v14 = vld [vmem:[%s31892_s4 + $0x1b0] sm:$0xff]   ;;  %v23407_v43 = vld [vmem:[%s31892_s4 + $0x278] sm:$0xff]  }
 0x39b   :  { %v26495_v44 = vpop.f32.mrb[166].mxu1  ;;  %20787 = vmatprep.subr.bf16.mxu0 %v23398_v52  ;;  %20827 = vmatprep.subr.bf16.mxu1 %v23399_v12  ;;  %v26503_v13 = vpop.f32.mrb[174].mxu0  ;;  %v23405_v52 = vld [vmem:[%s31892_s4 + $0x230] sm:$0xff]  }
 0x39c   :  { %v26507_v9 = vpop.f32.mrb[167].mxu1  ;;  %v26511_v51 = vpop.f32.mrb[175].mxu0 }
 0x39d   :  { %v4546_v12 = vpack.c.bf16 %v26507_v9, %v26485_v55  ;;  %v23433_v55 = vld [vmem:[%s31892_s4 + $0x328] sm:$0xff]  }
 0x39e   :  { %20788 = vmatpush3.bf16.msra.mxu0 %v23400_v1  ;;  %20828 = vmatpush3.bf16.msra.mxu1 %v23401_v0  ;;  %v31941_v1 = vpack.c.bf16 %v26312_v56, %v26298_v26  ;;  %v31942_v0 = vpack.c.bf16 %v26209_v11, %v26201_v7  ;;  %v23409_v26 = vld [vmem:[%s31892_s4 + $0x238] sm:$0xff]   ;;  %v23410_v56 = vld [vmem:[%s31892_s4 + $0x2c0] sm:$0xff]  }
 0x39f   :  { %20789 = vmatprep.subr.bf16.mxu0 %v23402_v27  ;;  %20829 = vmatprep.subr.bf16.mxu1 %v23403_v29 }
 0x3a0   :  { %5945 = vmatmul.mubr.bf16.gmra.mrb[212].mxu0 %v31941_v1  ;;  %6010 = vmatmul.mubr.bf16.gmra.mrb[220].mxu1 %v31942_v0 }
 0x3a1   :  { %v22443_v19 = vpop.f32.mrb[168].mxu1  ;;  %6050 = vmatprep.mubr.bf16.mxu0 %v4203_v33  ;;  %v26538_v27 = vpop.f32.mrb[176].mxu0 }
 0x3a2   :  { %20790 = vmatpush3.bf16.msra.mxu0 %v23404_v14  ;;  %20830 = vmatpush3.bf16.msra.mxu1 %v23405_v52  ;;  %v4449_v29 = vpop.f32.mrb[169].mxu1  ;;  %v26546_v7 = vpop.f32.mrb[177].mxu0  ;;  %v23411_v14 = vld [vmem:[%s31892_s4 + $0x340] sm:$0xff]  }
 0x3a3   :  { %v22444_v11 = vpop.f32.mrb[170].mxu1  ;;  %20791 = vmatprep.subr.bf16.mxu0 %v23406_v28  ;;  %20831 = vmatprep.subr.bf16.mxu1 %v23407_v43  ;;  %v26551_v54 = vpop.f32.mrb[178].mxu0  ;;  %v23413_v43 = vld [vmem:[%s31892_s4 + $0x300] sm:$0xff]  }
 0x3a4   :  { %v4549_v63 = vpack.c.bf16 %v22444_v11, %v22443_v19  ;;  %v4452_v33 = vpop.f32.mrb[171].mxu1  ;;  %v4902_v52 = vpack.c.bf16 %v26551_v54, %v26538_v27  ;;  %v26558_v1 = vpop.f32.mrb[179].mxu0  ;;  %v23412_v19 = vld [vmem:[%s31892_s4 + $0x280] sm:$0xff]   ;;  %v23448_v27 = vld [vmem:[%s31892_s4 + $0x3d0] sm:$0xff]  }
 0x3a5   :  { %v4548_v0 = vpack.c.bf16 %v4452_v33, %v4449_v29  ;;  %v4901_v28 = vpack.c.bf16 %v26558_v1, %v26546_v7  ;;  %v23414_v29 = vld [vmem:[%s31892_s4 + $0x2c8] sm:$0xff]   ;;  %v31944_v33 = vpack.c.bf16 %v26350_v24, %v26343_v42  ;;  %v23442_v7 = vld [vmem:[%s31892_s4 + $0x3c0] sm:$0xff]   ;;  %v23449_v54 = vld [vmem:[%s31892_s4 + $0x410] sm:$0xff]  }
 0x3a6   :  { %20792 = vmatpush3.bf16.msra.mxu0 %v23408_v6  ;;  %20832 = vmatpush3.bf16.msra.mxu1 %v23409_v26  ;;  %v23415_v6 = vld [vmem:[%s31892_s4 + $0x348] sm:$0xff]   ;;  %v31943_v26 = vpack.c.bf16 %v26287_v41, %v26277_v32 }
 0x3a7   :  { %6115 = vmatprep.mubr.bf16.mxu1 %v4548_v0  ;;  %20857 = vmatprep.subr.bf16.mxu0 %v23410_v56  ;;  %v23416_v41 = vld [vmem:[%s31892_s4 + $0x288] sm:$0xff]  }
 0x3a8   :  { %20897 = vmatprep.subr.bf16.mxu1 %v23411_v14 }
 0x3a9   :  { %6051 = vmatmul.mubr.bf16.vlgmr.msra.gmra.mrb[216].mxu0 %v31943_v26  ;;  %6116 = vmatmul.mubr.bf16.vlgmr.msra.gmra.mrb[224].mxu1 %v4544_v16  ;;  %v26580_v11 = vpop.f32.mrb[172].mxu1  ;;  %v26582_v56 = vpop.f32.mrb[180].mxu0  ;;  %v23418_v16 = vld [vmem:[%s31892_s4 + $0x2d0] sm:$0xff]  }
 0x3aa   :  { %6058 = vmatprep.mubr.bf16.mxu0 %v31944_v33  ;;  %6123 = vmatprep.mubr.bf16.mxu1 %v4549_v63  ;;  %v4465_v14 = vpop.f32.mrb[173].mxu1  ;;  %v26587_v0 = vpop.f32.mrb[181].mxu0  ;;  %v23419_v63 = vld [vmem:[%s31892_s4 + $0x350] sm:$0xff]   ;;  %v23422_v33 = vld [vmem:[%s31892_s4 + $0x2d8] sm:$0xff]  }
 0x3ab   :  { %20858 = vmatpush3.bf16.msra.mxu0 %v23412_v19  ;;  %20898 = vmatpush3.bf16.msra.mxu1 %v23413_v43  ;;  %v22448_v32 = vpop.f32.mrb[174].mxu1  ;;  %v26595_v5 = vpop.f32.mrb[182].mxu0 }
 0x3ac   :  { %v4551_v42 = vpack.c.bf16 %v22448_v32, %v26580_v11  ;;  %v4468_v24 = vpop.f32.mrb[175].mxu1  ;;  %20859 = vmatprep.subr.bf16.mxu0 %v23414_v29  ;;  %20899 = vmatprep.subr.bf16.mxu1 %v23415_v6  ;;  %v26606_v43 = vpop.f32.mrb[183].mxu0  ;;  %v23420_v29 = vld [vmem:[%s31892_s4 + $0x290] sm:$0xff]   ;;  %v31945_v32 = vpack.c.bf16 %v26281_v23, %v26270_v53  ;;  %v23424_v23 = vld [vmem:[%s31892_s4 + $0x298] sm:$0xff]  }
 0x3ad   :  { %v4550_v26 = vpack.c.bf16 %v4468_v24, %v4465_v14  ;;  %v4903_v11 = vpack.c.bf16 %v26606_v43, %v26587_v0  ;;  %v23421_v6 = vld [vmem:[%s31892_s4 + $0x310] sm:$0xff]   ;;  %v23423_v14 = vld [vmem:[%s31892_s4 + $0x358] sm:$0xff]   ;;  %v23457_v0 = vld [vmem:[%s31892_s4 + $0x3e8] sm:$0xff]  }
 0x3ae   :  { %v23458_v43 = vld [vmem:[%s31892_s4 + $0x428] sm:$0xff]  }
 0x3af   :  { %20860 = vmatpush3.bf16.msra.mxu0 %v23416_v41  ;;  %20900 = vmatpush3.bf16.msra.mxu1 %v23417_v21 }
 0x3b0   :  { %20861 = vmatprep.subr.bf16.mxu0 %v23418_v16  ;;  %20901 = vmatprep.subr.bf16.mxu1 %v23419_v63  ;;  %v23431_v63 = vld [vmem:[%s31892_s4 + $0x368] sm:$0xff]  }
 0x3b1   :  { %6059 = vmatmul.mubr.bf16.gmra.mrb[220].mxu0 %v31945_v32  ;;  %6124 = vmatmul.mubr.bf16.gmra.mrb[228].mxu1 %v4545_v22  ;;  %v26628_v41 = vpop.f32.mrb[176].mxu1  ;;  %v26630_v21 = vpop.f32.mrb[184].mxu0  ;;  %v23427_v22 = vld [vmem:[%s31892_s4 + $0x360] sm:$0xff]   ;;  %v23430_v32 = vld [vmem:[%s31892_s4 + $0x2e8] sm:$0xff]  }
 0x3b2   :  { %6066 = vmatprep.mubr.bf16.mxu0 %v4205_v25  ;;  %6131 = vmatprep.mubr.bf16.mxu1 %v4550_v26  ;;  %v26635_v24 = vpop.f32.mrb[177].mxu1  ;;  %v26637_v16 = vpop.f32.mrb[185].mxu0  ;;  %v23426_v25 = vld [vmem:[%s31892_s4 + $0x2e0] sm:$0xff]  }
 0x3b3   :  { %20862 = vmatpush3.bf16.msra.mxu0 %v23420_v29  ;;  %20902 = vmatpush3.bf16.msra.mxu1 %v23421_v6  ;;  %v26639_v53 = vpop.f32.mrb[178].mxu1  ;;  %v26647_v57 = vpop.f32.mrb[186].mxu0 }
 0x3b4   :  { %v4553_v60 = vpack.c.bf16 %v26639_v53, %v26628_v41  ;;  %v26651_v18 = vpop.f32.mrb[179].mxu1  ;;  %20863 = vmatprep.subr.bf16.mxu0 %v23422_v33  ;;  %20903 = vmatprep.subr.bf16.mxu1 %v23423_v14  ;;  %v26661_v26 = vpop.f32.mrb[187].mxu0  ;;  %v23428_v33 = vld [vmem:[%s31892_s4 + $0x2a0] sm:$0xff]   ;;  %v31952_v53 = vpack.c.bf16 %v26511_v51, %v26493_v36  ;;  %v23461_v36 = vld [vmem:[%s31892_s4 + $0x430] sm:$0xff]  }
 0x3b5   :  { %v4552_v29 = vpack.c.bf16 %v26651_v18, %v26635_v24  ;;  %v23429_v14 = vld [vmem:[%s31892_s4 + $0x320] sm:$0xff]   ;;  %v23447_v24 = vld [vmem:[%s31892_s4 + $0x388] sm:$0xff]   ;;  %v23462_v51 = vld [vmem:[%s31892_s4 + $0x3b0] sm:$0xff]  }
 0x3b6   :  { %v23454_v41 = vld [vmem:[%s31892_s4 + $0x3e0] sm:$0xff]  }
 0x3b7   :  { %20864 = vmatpush3.bf16.msra.mxu0 %v23424_v23  ;;  %20904 = vmatpush3.bf16.msra.mxu1 %v23425_v62  ;;  %v31946_v23 = vpack.c.bf16 %v26322_v46, %v26310_v61  ;;  %v23432_v46 = vld [vmem:[%s31892_s4 + $0x2a8] sm:$0xff]  }
 0x3b8   :  { %20865 = vmatprep.subr.bf16.mxu0 %v23426_v25  ;;  %20905 = vmatprep.subr.bf16.mxu1 %v23427_v22 }
 0x3b9   :  { %6067 = vmatmul.mubr.bf16.gmra.mrb[224].mxu0 %v31946_v23  ;;  %6132 = vmatmul.mubr.bf16.gmra.mrb[232].mxu1 %v4546_v12  ;;  %v26685_v62 = vpop.f32.mrb[180].mxu1  ;;  %v26687_v25 = vpop.f32.mrb[188].mxu0  ;;  %v23435_v12 = vld [vmem:[%s31892_s4 + $0x370] sm:$0xff]  }
 0x3ba   :  { %6074 = vmatprep.mubr.bf16.mxu0 %v4206_v3  ;;  %6139 = vmatprep.mubr.bf16.mxu1 %v4551_v42  ;;  %v26692_v22 = vpop.f32.mrb[181].mxu1  ;;  %v26694_v6 = vpop.f32.mrb[189].mxu0  ;;  %v23434_v3 = vld [vmem:[%s31892_s4 + $0x2f0] sm:$0xff]   ;;  %v23438_v42 = vld [vmem:[%s31892_s4 + $0x2f8] sm:$0xff]  }
 0x3bb   :  { %20866 = vmatpush3.bf16.msra.mxu0 %v23428_v33  ;;  %20906 = vmatpush3.bf16.msra.mxu1 %v23429_v14  ;;  %v26696_v61 = vpop.f32.mrb[182].mxu1  ;;  %v26704_v9 = vpop.f32.mrb[190].mxu0  ;;  %v23437_v23 = vld [vmem:[%s31892_s4 + $0x330] sm:$0xff]  }
 0x3bc   :  { %v26708_v34 = vpop.f32.mrb[183].mxu1  ;;  %20867 = vmatprep.subr.bf16.mxu0 %v23430_v32  ;;  %20907 = vmatprep.subr.bf16.mxu1 %v23431_v63  ;;  %v26718_v33 = vpop.f32.mrb[191].mxu0  ;;  %v23436_v63 = vld [vmem:[%s31892_s4 + $0x2b0] sm:$0xff]   ;;  %v23439_v32 = vld [vmem:[%s31892_s4 + $0x378] sm:$0xff]  }
 0x3bf   :  { %20868 = vmatpush3.bf16.msra.mxu0 %v23432_v46  ;;  %20908 = vmatpush3.bf16.msra.mxu1 %v23433_v55  ;;  %v31947_v46 = vpack.c.bf16 %v26314_v35, %v26303_v37  ;;  %v31948_v55 = vpack.c.bf16 %v26495_v44, %v26478_v39  ;;  %v23440_v37 = vld [vmem:[%s31892_s4 + $0x2b8] sm:$0xff]  }
 0x3c0   :  { %20869 = vmatprep.subr.bf16.mxu0 %v23434_v3  ;;  %20909 = vmatprep.subr.bf16.mxu1 %v23435_v12  ;;  %v23441_v35 = vld [vmem:[%s31892_s4 + $0x338] sm:$0xff]  }
 0x3c1   :  { %6075 = vmatmul.mubr.bf16.gmra.mrb[228].mxu0 %v31947_v46  ;;  %6140 = vmatmul.mubr.bf16.gmra.mrb[236].mxu1 %v31948_v55  ;;  %v22459_v10 = vpop.f32.mrb[184].mxu1  ;;  %v26742_v19 = vpop.f32.mrb[192].mxu0 }
 0x3c2   :  { %v4513_v3 = vpop.f32.mrb[185].mxu1  ;;  %6245 = vmatprep.mubr.bf16.mxu1 %v4901_v28  ;;  %v26747_v12 = vpop.f32.mrb[193].mxu0 }
 0x3c3   :  { %20870 = vmatpush3.bf16.msra.mxu0 %v23436_v63  ;;  %20910 = vmatpush3.bf16.msra.mxu1 %v23437_v23  ;;  %v22460_v14 = vpop.f32.mrb[186].mxu1  ;;  %v26755_v39 = vpop.f32.mrb[194].mxu0  ;;  %v23443_v23 = vld [vmem:[%s31892_s4 + $0x400] sm:$0xff]  }
 0x3c4   :  { %v4557_v44 = vpack.c.bf16 %v22460_v14, %v22459_v10  ;;  %v4516_v46 = vpop.f32.mrb[187].mxu1  ;;  %20871 = vmatprep.subr.bf16.mxu0 %v23438_v42  ;;  %20911 = vmatprep.subr.bf16.mxu1 %v23439_v32  ;;  %v4910_v1 = vpack.c.bf16 %v26755_v39, %v26742_v19  ;;  %v26762_v28 = vpop.f32.mrb[195].mxu0  ;;  %v23444_v42 = vld [vmem:[%s31892_s4 + $0x380] sm:$0xff]   ;;  %v23445_v14 = vld [vmem:[%s31892_s4 + $0x3c8] sm:$0xff]  }
 0x3c5   :  { %v4556_v63 = vpack.c.bf16 %v4516_v46, %v4513_v3  ;;  %v4909_v10 = vpack.c.bf16 %v26762_v28, %v26747_v12  ;;  %v23446_v32 = vld [vmem:[%s31892_s4 + $0x408] sm:$0xff]  }
 0x3c7   :  { %20872 = vmatpush3.bf16.msra.mxu0 %v23440_v37  ;;  %20912 = vmatpush3.bf16.msra.mxu1 %v23441_v35  ;;  %v31949_v37 = vpack.c.bf16 %v26454_v49, %v26436_v20 }
 0x3c8   :  { %6180 = vmatprep.mubr.bf16.mxu0 %v4556_v63  ;;  %20937 = vmatprep.subr.bf16.mxu0 %v23442_v7 }
 0x3c9   :  { %22505 = vmatprep.subr.bf16.mxu1 %v23443_v23  ;;  %v22463_v55 = vpop.f32.mrb[188].mxu1  ;;  %v26778_v3 = vpop.f32.mrb[196].mxu0 }
 0x3ca   :  { %6181 = vmatmul.mubr.bf16.vlgmr.msra.gmra.mrb[232].mxu0 %v4552_v29  ;;  %6246 = vmatmul.mubr.bf16.vlgmr.msra.gmra.mrb[240].mxu1 %v31949_v37  ;;  %v4529_v35 = vpop.f32.mrb[189].mxu1  ;;  %v26786_v46 = vpop.f32.mrb[197].mxu0  ;;  %v23459_v37 = vld [vmem:[%s31892_s4 + $0x3a8] sm:$0xff]  }
 0x3cb   :  { %6188 = vmatprep.mubr.bf16.mxu0 %v4557_v44  ;;  %6253 = vmatprep.mubr.bf16.mxu1 %v4902_v52  ;;  %v22464_v7 = vpop.f32.mrb[190].mxu1  ;;  %v26791_v63 = vpop.f32.mrb[198].mxu0 }
 0x3cc   :  { %20938 = vmatpush3.bf16.msra.mxu0 %v23444_v42  ;;  %22506 = vmatpush3.bf16.msra.mxu1 %v23443_v23  ;;  %v4559_v18 = vpack.c.bf16 %v22464_v7, %v22463_v55  ;;  %v4532_v20 = vpop.f32.mrb[191].mxu1  ;;  %v4912_v49 = vpack.c.bf16 %v26791_v63, %v26778_v3  ;;  %v26798_v29 = vpop.f32.mrb[199].mxu0  ;;  %v23450_v23 = vld [vmem:[%s31892_s4 + $0x390] sm:$0xff]   ;;  %v23451_v42 = vld [vmem:[%s31892_s4 + $0x3d8] sm:$0xff]  }
 0x3cd   :  { %20939 = vmatprep.subr.bf16.mxu0 %v23445_v14  ;;  %22507 = vmatprep.subr.bf16.mxu1 %v23446_v32  ;;  %v4558_v52 = vpack.c.bf16 %v4532_v20, %v4529_v35  ;;  %v4911_v44 = vpack.c.bf16 %v26798_v29, %v26786_v46  ;;  %v23452_v14 = vld [vmem:[%s31892_s4 + $0x418] sm:$0xff]   ;;  %v31955_v35 = vpack.c.bf16 %v26503_v13, %v26483_v8 }
 0x3ce   :  { %v23453_v55 = vld [vmem:[%s31892_s4 + $0x398] sm:$0xff]   ;;  %v31956_v8 = vpack.c.bf16 %v26661_v26, %v26637_v16  ;;  %v31958_v13 = vpack.c.bf16 %v26718_v33, %v26694_v6 }
 0x3cf   :  { %v23465_v46 = vld [vmem:[%s31892_s4 + $0x3b8] sm:$0xff]  }
 0x3d0   :  { %20940 = vmatpush3.bf16.msra.mxu0 %v23447_v24  ;;  %22508 = vmatpush3.bf16.msra.mxu1 %v23446_v32  ;;  %v31950_v32 = vpack.c.bf16 %v26446_v30, %v26426_v47  ;;  %v23455_v47 = vld [vmem:[%s31892_s4 + $0x420] sm:$0xff]  }
 0x3d1   :  { %20941 = vmatprep.subr.bf16.mxu0 %v23448_v27  ;;  %22509 = vmatprep.subr.bf16.mxu1 %v23449_v54  ;;  %v23456_v30 = vld [vmem:[%s31892_s4 + $0x3a0] sm:$0xff]  }
 0x3d2   :  { %6189 = vmatmul.mubr.bf16.gmra.mrb[236].mxu0 %v4553_v60  ;;  %6254 = vmatmul.mubr.bf16.gmra.mrb[244].mxu1 %v31950_v32  ;;  %v31953_v60 = vpack.c.bf16 %v26595_v5, %v26582_v56  ;;  %v23463_v56 = vld [vmem:[%s31892_s4 + $0x3f8] sm:$0xff]  }
 0x3d3   :  { %6261 = vmatprep.mubr.bf16.mxu1 %v4903_v11  ;;  %6196 = vmatprep.mubr.bf16.mxu0 %v4558_v52  ;;  %v31951_v11 = vpack.c.bf16 %v26708_v34, %v26692_v22  ;;  %v23460_v22 = vld [vmem:[%s31892_s4 + $0x3f0] sm:$0xff]   ;;  %v23464_v5 = vld [vmem:[%s31892_s4 + $0x438] sm:$0xff]   ;;  %v31954_v34 = vpack.c.bf16 %v26696_v61, %v26685_v62 }
 0x3d4   :  { %20942 = vmatpush3.bf16.msra.mxu0 %v23450_v23  ;;  %22510 = vmatpush3.bf16.msra.mxu1 %v23449_v54 }
 0x3d5   :  { %20943 = vmatprep.subr.bf16.mxu0 %v23451_v42  ;;  %22511 = vmatprep.subr.bf16.mxu1 %v23452_v14 }
 0x3d8   :  { %20944 = vmatpush3.bf16.msra.mxu0 %v23453_v55  ;;  %22512 = vmatpush3.bf16.msra.mxu1 %v23452_v14 }
 0x3d9   :  { %20945 = vmatprep.subr.bf16.mxu0 %v23454_v41  ;;  %22513 = vmatprep.subr.bf16.mxu1 %v23455_v47 }
 0x3da   :  { %6197 = vmatmul.mubr.bf16.gmra.mrb[240].mxu0 %v31951_v11  ;;  %6262 = vmatmul.mubr.bf16.gmra.mrb[248].mxu1 %v31952_v53 }
 0x3db   :  { %6204 = vmatprep.mubr.bf16.mxu0 %v4559_v18  ;;  %6269 = vmatprep.mubr.bf16.mxu1 %v31953_v60 }
 0x3dc   :  { %20946 = vmatpush3.bf16.msra.mxu0 %v23456_v30  ;;  %22514 = vmatpush3.bf16.msra.mxu1 %v23455_v47 }
 0x3dd   :  { %20947 = vmatprep.subr.bf16.mxu0 %v23457_v0  ;;  %22515 = vmatprep.subr.bf16.mxu1 %v23458_v43 }
 0x3e0   :  { %20948 = vmatpush3.bf16.msra.mxu0 %v23459_v37  ;;  %22516 = vmatpush3.bf16.msra.mxu1 %v23458_v43 }
 0x3e1   :  { %20949 = vmatprep.subr.bf16.mxu0 %v23460_v22  ;;  %22517 = vmatprep.subr.bf16.mxu1 %v23461_v36 }
 0x3e2   :  { %6205 = vmatmul.mubr.bf16.gmra.mrb[244].mxu0 %v31954_v34  ;;  %6270 = vmatmul.mubr.bf16.gmra.mrb[252].mxu1 %v31955_v35 }
 0x3e3   :  { %22521 = vmatprep.mubr.msk.bf16.mxu1 %vm439_vm0, %v25767_v31  ;;  %6310 = vmatprep.mubr.bf16.mxu0 %v4909_v10  ;;  %v31957_v31 = vpack.c.bf16 %v26647_v57, %v26630_v21 }
 0x3e4   :  { %20950 = vmatpush3.bf16.msra.mxu0 %v23462_v51  ;;  %22518 = vmatpush3.bf16.msra.mxu1 %v23461_v36 }
 0x3e5   :  { %20951 = vmatprep.subr.bf16.mxu0 %v23463_v56  ;;  %22519 = vmatprep.subr.bf16.mxu1 %v23464_v5 }
 0x3e8   :  { %20952 = vmatpush3.bf16.msra.mxu0 %v23465_v46  ;;  %22520 = vmatpush3.bf16.msra.mxu1 %v23464_v5 }
 0x3eb   :  { %6311 = vmatmul.mubr.bf16.vlgmr.msra.gmra.mrb[248].mxu0 %v31956_v8  ;;  %22522 = vmatmul.mubr.msk.bf16.vlgmr.msra.gmra.mrb[0].mxu1 %vm439_vm0, %v25781_v40  ;;  %v31959_v40 = vpack.c.bf16 %v26704_v9, %v26687_v25 }
 0x3ec   :  { %6318 = vmatprep.mubr.bf16.mxu0 %v4910_v1  ;;  %22525 = vmatprep.mubr.msk.bf16.mxu1 %vm439_vm0, %v25797_v45 }
 0x3f3   :  { %6319 = vmatmul.mubr.bf16.gmra.mrb[252].mxu0 %v31957_v31  ;;  %22526 = vmatmul.mubr.msk.bf16.gmra.mrb[4].mxu1 %vm439_vm0, %v25813_v17 }
 0x3f4   :  { %6326 = vmatprep.mubr.bf16.mxu0 %v4911_v44 }
 0x3fb   :  { %6327 = vmatmul.mubr.bf16.gmra.mrb[0].mxu0 %v31958_v13 }
 0x3fc   :  { %6334 = vmatprep.mubr.bf16.mxu0 %v4912_v49  ;;  %v26916_v49 = vld [vmem:[%s31893_s5] ss:$0 sm:$0xff] }
 0x403   :  { %6335 = vmatmul.mubr.bf16.gmra.mrb[4].mxu0 %v31959_v40 }
 0x43b   :  { %v20673_v45 = vpop.f32.mrb[192].mxu1 }
 0x43c   :  { %v20674_v19 = vpop.f32.mrb[193].mxu1 }
 0x43d   :  { %v20675_v21 = vadd.f32 %v20674_v19, %v20673_v45  ;;  %v20676_v16 = vpop.f32.mrb[194].mxu1 }
 0x43e   :  { %v20677_v57 = vpop.f32.mrb[195].mxu1 }
 0x43f   :  { %v20678_v26 = vadd.f32 %v20677_v57, %v20676_v16  ;;  %v5858_v44 = vadd.f32 %v20675_v21, %v26916_v49  ;;  %v23466_v21 = vld [vmem:[%s31889_s0] sm:$0xff]  }
 0x440   :  { %v23468_v16 = vld [vmem:[%s31889_s0 + $0x80] sm:$0xff]   ;;  %22537 = vmatprep.mubr.msk.bf16.mxu0 %vm439_vm0, %v23466_v21 }
 0x441   :  { %v5861_v47 = vadd.f32 %v20678_v26, %v26916_v49  ;;  %22577 = vmatprep.mubr.msk.bf16.mxu1 %vm439_vm0, %v23468_v16 }
 0x443   :  { %v20679_v17 = vpop.f32.mrb[196].mxu1 }
 0x444   :  { %v20680_v62 = vpop.f32.mrb[197].mxu1 }
 0x445   :  { %v20681_v61 = vadd.f32 %v20680_v62, %v20679_v17  ;;  %v20682_v12 = vpop.f32.mrb[198].mxu1 }
 0x446   :  { %v20683_v6 = vpop.f32.mrb[199].mxu1 }
 0x447   :  { %v20684_v33 = vadd.f32 %v20683_v6, %v20682_v12  ;;  %v5866_v56 = vadd.f32 %v20681_v61, %v26916_v49 }
 0x449   :  { %v5869_v13 = vadd.f32 %v20684_v33, %v26916_v49 }
 0x44b   :  { %v20685_v39 = vpop.f32.mrb[200].mxu1 }
 0x44c   :  { %v20686_v1 = vpop.f32.mrb[201].mxu1 }
 0x44d   :  { %v20688_v28 = vpop.f32.mrb[202].mxu1  ;;  %v20687_v10 = vadd.f32 %v20686_v1, %v20685_v39 }
 0x44e   :  { %v20689_v3 = vpop.f32.mrb[203].mxu1 }
 0x44f   :  { %v20690_v7 = vadd.f32 %v20689_v3, %v20688_v28  ;;  %v5874_v33 = vadd.f32 %v20687_v10, %v26916_v49 }
 0x453   :  { %v20691_v25 = vpop.f32.mrb[204].mxu1 }
 0x454   :  { %v20692_v9 = vpop.f32.mrb[205].mxu1 }
 0x455   :  { %v20694_v63 = vpop.f32.mrb[206].mxu1  ;;  %v26909_v24 = vadd.f32 %v20692_v9, %v20691_v25 }
 0x456   :  { %v20695_v18 = vpop.f32.mrb[207].mxu1 }
 0x457   :  { %v26911_v20 = vadd.f32 %v20695_v18, %v20694_v63  ;;  %v5877_v18 = vadd.f32 %v20690_v7, %v26916_v49 }
 0x45b   :  { %v20713_v29 = vpop.f32.mrb[200].mxu0  ;;  %v20753_v27 = vpop.f32.mrb[208].mxu1 }
 0x45c   :  { %v20714_v54 = vpop.f32.mrb[201].mxu0  ;;  %v20754_v52 = vpop.f32.mrb[209].mxu1 }
 0x45d   :  { %v20715_v23 = vadd.f32 %v20714_v54, %v20713_v29  ;;  %v20716_v42 = vpop.f32.mrb[202].mxu0  ;;  %v20756_v14 = vpop.f32.mrb[210].mxu1  ;;  %v20755_v32 = vadd.f32 %v20754_v52, %v20753_v27 }
 0x45e   :  { %v20717_v55 = vpop.f32.mrb[203].mxu0  ;;  %v20757_v41 = vpop.f32.mrb[211].mxu1 }
 0x45f   :  { %v5923_v30 = vadd.f32 %v20715_v23, %v5858_v44  ;;  %v20718_v0 = vadd.f32 %v20717_v55, %v20716_v42  ;;  %v20758_v43 = vadd.f32 %v20757_v41, %v20756_v14 }
 0x461   :  { %v5926_v11 = vadd.f32 %v20718_v0, %v5861_v47  ;;  %v26920_v53 = vadd.f32 %v20755_v32, %v5923_v30  ;;  %v5882_v32 = vadd.f32 %v26909_v24, %v26916_v49 }
 0x463   :  { %v20719_v60 = vpop.f32.mrb[204].mxu0  ;;  %v20759_v37 = vpop.f32.mrb[212].mxu1  ;;  %v26922_v22 = vadd.f32 %v20758_v43, %v5926_v11  ;;  %v5885_v11 = vadd.f32 %v26911_v20, %v26916_v49 }
 0x464   :  { %v20720_v36 = vpop.f32.mrb[205].mxu0  ;;  %v20760_v51 = vpop.f32.mrb[213].mxu1 }
 0x465   :  { %v20721_v5 = vadd.f32 %v20720_v36, %v20719_v60  ;;  %v20722_v34 = vpop.f32.mrb[206].mxu0  ;;  %v20762_v35 = vpop.f32.mrb[214].mxu1  ;;  %v20761_v46 = vadd.f32 %v20760_v51, %v20759_v37 }
 0x466   :  { %v20723_v8 = vpop.f32.mrb[207].mxu0  ;;  %v20763_v31 = vpop.f32.mrb[215].mxu1 }
 0x467   :  { %v5931_v40 = vadd.f32 %v20721_v5, %v5866_v56  ;;  %v20724_v45 = vadd.f32 %v20723_v8, %v20722_v34  ;;  %v20764_v19 = vadd.f32 %v20763_v31, %v20762_v35 }
 0x469   :  { %v5934_v57 = vadd.f32 %v20724_v45, %v5869_v13  ;;  %v26932_v26 = vadd.f32 %v20761_v46, %v5931_v40 }
 0x46b   :  { %v20725_v17 = vpop.f32.mrb[208].mxu0  ;;  %v20765_v62 = vpop.f32.mrb[216].mxu1  ;;  %v26936_v61 = vadd.f32 %v20764_v19, %v5934_v57 }
 0x46c   :  { %v20726_v12 = vpop.f32.mrb[209].mxu0  ;;  %v20766_v6 = vpop.f32.mrb[217].mxu1 }
 0x46d   :  { %v20727_v39 = vadd.f32 %v20726_v12, %v20725_v17  ;;  %v20767_v1 = vadd.f32 %v20766_v6, %v20765_v62  ;;  %v20728_v28 = vpop.f32.mrb[210].mxu0  ;;  %v20768_v3 = vpop.f32.mrb[218].mxu1 }
 0x46e   :  { %v20729_v25 = vpop.f32.mrb[211].mxu0  ;;  %v20769_v9 = vpop.f32.mrb[219].mxu1 }
 0x46f   :  { %v5939_v63 = vadd.f32 %v20727_v39, %v5874_v33  ;;  %v20730_v29 = vadd.f32 %v20729_v25, %v20728_v28  ;;  %v20770_v27 = vadd.f32 %v20769_v9, %v20768_v3 }
 0x471   :  { %v26940_v54 = vadd.f32 %v20767_v1, %v5939_v63  ;;  %v5942_v52 = vadd.f32 %v20730_v29, %v5877_v18 }
 0x473   :  { %v26942_v44 = vadd.f32 %v20770_v27, %v5942_v52  ;;  %v20731_v23 = vpop.f32.mrb[212].mxu0  ;;  %v20771_v42 = vpop.f32.mrb[220].mxu1 }
 0x474   :  { %v20732_v14 = vpop.f32.mrb[213].mxu0  ;;  %v20772_v10 = vpop.f32.mrb[221].mxu1 }
 0x475   :  { %v20733_v55 = vadd.f32 %v20732_v14, %v20731_v23  ;;  %v20773_v41 = vadd.f32 %v20772_v10, %v20771_v42  ;;  %v20734_v47 = vpop.f32.mrb[214].mxu0  ;;  %v20774_v30 = vpop.f32.mrb[222].mxu1 }
 0x476   :  { %v20735_v0 = vpop.f32.mrb[215].mxu0  ;;  %v20775_v7 = vpop.f32.mrb[223].mxu1 }
 0x477   :  { %v5947_v43 = vadd.f32 %v20733_v55, %v5882_v32  ;;  %v20736_v60 = vadd.f32 %v20735_v0, %v20734_v47  ;;  %v20776_v37 = vadd.f32 %v20775_v7, %v20774_v30 }
 0x479   :  { %v6012_v36 = vadd.f32 %v20773_v41, %v5947_v43  ;;  %v5950_v51 = vadd.f32 %v20736_v60, %v5885_v11 }
 0x47b   :  { %v26948_v56 = vadd.f32 %v20776_v37, %v5950_v51 }
 0x47c   :  { %v20793_v5 = vpop.f32.mrb[216].mxu0  ;;  %v20833_v34 = vpop.f32.mrb[224].mxu1 }
 0x47d   :  { %v20794_v35 = vpop.f32.mrb[217].mxu0  ;;  %v20834_v24 = vpop.f32.mrb[225].mxu1 }
 0x47e   :  { %v20795_v46 = vadd.f32 %v20794_v35, %v20793_v5  ;;  %v20835_v8 = vadd.f32 %v20834_v24, %v20833_v34  ;;  %v20796_v31 = vpop.f32.mrb[218].mxu0  ;;  %v20836_v13 = vpop.f32.mrb[226].mxu1 }
 0x47f   :  { %v20797_v40 = vpop.f32.mrb[219].mxu0  ;;  %v20837_v45 = vpop.f32.mrb[227].mxu1 }
 0x480   :  { %v6053_v19 = vadd.f32 %v20795_v46, %v26920_v53  ;;  %v20798_v21 = vadd.f32 %v20797_v40, %v20796_v31  ;;  %v20838_v20 = vadd.f32 %v20837_v45, %v20836_v13 }
 0x482   :  { %v6118_v49 = vadd.f32 %v20835_v8, %v6053_v19  ;;  %v6056_v16 = vadd.f32 %v20798_v21, %v26922_v22 }
 0x484   :  { %v26952_v57 = vadd.f32 %v20838_v20, %v6056_v16  ;;  %v20799_v17 = vpop.f32.mrb[220].mxu0  ;;  %v20839_v62 = vpop.f32.mrb[228].mxu1 }
 0x485   :  { %v20800_v12 = vpop.f32.mrb[221].mxu0  ;;  %v20840_v6 = vpop.f32.mrb[229].mxu1 }
 0x486   :  { %v20801_v33 = vadd.f32 %v20800_v12, %v20799_v17  ;;  %v20841_v39 = vadd.f32 %v20840_v6, %v20839_v62  ;;  %v20802_v1 = vpop.f32.mrb[222].mxu0  ;;  %v20842_v28 = vpop.f32.mrb[230].mxu1 }
 0x487   :  { %v20803_v3 = vpop.f32.mrb[223].mxu0  ;;  %v20843_v25 = vpop.f32.mrb[231].mxu1 }
 0x488   :  { %v6061_v9 = vadd.f32 %v20801_v33, %v26932_v26  ;;  %v20804_v53 = vadd.f32 %v20803_v3, %v20802_v1  ;;  %v20844_v63 = vadd.f32 %v20843_v25, %v20842_v28 }
 0x48a   :  { %v6126_v18 = vadd.f32 %v20841_v39, %v6061_v9  ;;  %v6064_v29 = vadd.f32 %v20804_v53, %v26936_v61 }
 0x48c   :  { %v26956_v22 = vadd.f32 %v20844_v63, %v6064_v29  ;;  %v20805_v27 = vpop.f32.mrb[224].mxu0  ;;  %v20845_v52 = vpop.f32.mrb[232].mxu1 }
 0x48d   :  { %v20806_v23 = vpop.f32.mrb[225].mxu0  ;;  %v20846_v42 = vpop.f32.mrb[233].mxu1 }
 0x48e   :  { %v20807_v14 = vadd.f32 %v20806_v23, %v20805_v27  ;;  %v20847_v10 = vadd.f32 %v20846_v42, %v20845_v52  ;;  %v20808_v32 = vpop.f32.mrb[226].mxu0  ;;  %v20848_v55 = vpop.f32.mrb[234].mxu1 }
 0x48f   :  { %v20809_v41 = vpop.f32.mrb[227].mxu0  ;;  %v20849_v47 = vpop.f32.mrb[235].mxu1 }
 0x490   :  { %v6069_v30 = vadd.f32 %v20807_v14, %v26940_v54  ;;  %v20810_v26 = vadd.f32 %v20809_v41, %v20808_v32  ;;  %v20850_v0 = vadd.f32 %v20849_v47, %v20848_v55 }
 0x492   :  { %v6134_v7 = vadd.f32 %v20847_v10, %v6069_v30  ;;  %v6072_v43 = vadd.f32 %v20810_v26, %v26942_v44 }
 0x494   :  { %v26960_v61 = vadd.f32 %v20850_v0, %v6072_v43  ;;  %v20811_v11 = vpop.f32.mrb[228].mxu0  ;;  %v20851_v60 = vpop.f32.mrb[236].mxu1 }
 0x495   :  { %v20812_v37 = vpop.f32.mrb[229].mxu0  ;;  %v20852_v51 = vpop.f32.mrb[237].mxu1 }
 0x496   :  { %v20813_v5 = vadd.f32 %v20812_v37, %v20811_v11  ;;  %v20853_v34 = vadd.f32 %v20852_v51, %v20851_v60  ;;  %v20814_v35 = vpop.f32.mrb[230].mxu0  ;;  %v20854_v24 = vpop.f32.mrb[238].mxu1 }
 0x497   :  { %v20815_v46 = vpop.f32.mrb[231].mxu0  ;;  %v20855_v8 = vpop.f32.mrb[239].mxu1 }
 0x498   :  { %v6077_v31 = vadd.f32 %v20813_v5, %v6012_v36  ;;  %v20816_v13 = vadd.f32 %v20815_v46, %v20814_v35  ;;  %v20856_v54 = vadd.f32 %v20855_v8, %v20854_v24 }
 0x49a   :  { %v6142_v40 = vadd.f32 %v20853_v34, %v6077_v31  ;;  %v6080_v45 = vadd.f32 %v20816_v13, %v26948_v56 }
 0x49c   :  { %v26963_v19 = vadd.f32 %v20856_v54, %v6080_v45 }
 0x49d   :  { %v20873_v44 = vpop.f32.mrb[232].mxu0  ;;  %v20913_v21 = vpop.f32.mrb[240].mxu1 }
 0x49e   :  { %v20874_v20 = vpop.f32.mrb[233].mxu0  ;;  %v20914_v16 = vpop.f32.mrb[241].mxu1 }
 0x49f   :  { %v20875_v17 = vadd.f32 %v20874_v20, %v20873_v44  ;;  %v20915_v62 = vadd.f32 %v20914_v16, %v20913_v21  ;;  %v20876_v12 = vpop.f32.mrb[234].mxu0  ;;  %v20916_v6 = vpop.f32.mrb[242].mxu1 }
 0x4a0   :  { %v20877_v33 = vpop.f32.mrb[235].mxu0  ;;  %v20917_v39 = vpop.f32.mrb[243].mxu1 }
 0x4a1   :  { %v6183_v1 = vadd.f32 %v20875_v17, %v6118_v49  ;;  %v20878_v28 = vadd.f32 %v20877_v33, %v20876_v12  ;;  %v20918_v36 = vadd.f32 %v20917_v39, %v20916_v6 }
 0x4a3   :  { %v6248_v3 = vadd.f32 %v20915_v62, %v6183_v1  ;;  %v6186_v25 = vadd.f32 %v20878_v28, %v26952_v57 }
 0x4a5   :  { %v6251_v9 = vadd.f32 %v20918_v36, %v6186_v25  ;;  %v20879_v56 = vpop.f32.mrb[236].mxu0  ;;  %v20919_v53 = vpop.f32.mrb[244].mxu1 }
 0x4a6   :  { %v20880_v63 = vpop.f32.mrb[237].mxu0  ;;  %v20920_v29 = vpop.f32.mrb[245].mxu1 }
 0x4a7   :  { %v20881_v27 = vadd.f32 %v20880_v63, %v20879_v56  ;;  %v20921_v52 = vadd.f32 %v20920_v29, %v20919_v53  ;;  %v20882_v23 = vpop.f32.mrb[238].mxu0  ;;  %v20922_v42 = vpop.f32.mrb[246].mxu1 }
 0x4a8   :  { %v20883_v14 = vpop.f32.mrb[239].mxu0  ;;  %v20923_v10 = vpop.f32.mrb[247].mxu1 }
 0x4a9   :  { %v6191_v32 = vadd.f32 %v20881_v27, %v6126_v18  ;;  %v20884_v55 = vadd.f32 %v20883_v14, %v20882_v23  ;;  %v20924_v41 = vadd.f32 %v20923_v10, %v20922_v42 }
 0x4ab   :  { %v6256_v49 = vadd.f32 %v20921_v52, %v6191_v32  ;;  %v6194_v47 = vadd.f32 %v20884_v55, %v26956_v22 }
 0x4ad   :  { %v26967_v30 = vadd.f32 %v20924_v41, %v6194_v47  ;;  %v20885_v57 = vpop.f32.mrb[240].mxu0  ;;  %v20925_v26 = vpop.f32.mrb[248].mxu1 }
 0x4ae   :  { %v20886_v0 = vpop.f32.mrb[241].mxu0  ;;  %v20926_v43 = vpop.f32.mrb[249].mxu1 }
 0x4af   :  { %v20887_v11 = vadd.f32 %v20886_v0, %v20885_v57  ;;  %v20927_v60 = vadd.f32 %v20926_v43, %v20925_v26  ;;  %v20888_v37 = vpop.f32.mrb[242].mxu0  ;;  %v20928_v51 = vpop.f32.mrb[250].mxu1 }
 0x4b0   :  { %v20889_v5 = vpop.f32.mrb[243].mxu0  ;;  %v20929_v34 = vpop.f32.mrb[251].mxu1 }
 0x4b1   :  { %v6199_v35 = vadd.f32 %v20887_v11, %v6134_v7  ;;  %v20890_v24 = vadd.f32 %v20889_v5, %v20888_v37  ;;  %v20930_v18 = vadd.f32 %v20929_v34, %v20928_v51 }
 0x4b3   :  { %v26969_v46 = vadd.f32 %v20927_v60, %v6199_v35  ;;  %v6202_v8 = vadd.f32 %v20890_v24, %v26960_v61 }
 0x4b5   :  { %v26972_v22 = vadd.f32 %v20930_v18, %v6202_v8  ;;  %v20891_v31 = vpop.f32.mrb[244].mxu0  ;;  %v20931_v13 = vpop.f32.mrb[252].mxu1 }
 0x4b6   :  { %v20892_v54 = vpop.f32.mrb[245].mxu0  ;;  %v20932_v45 = vpop.f32.mrb[253].mxu1 }
 0x4b7   :  { %v20893_v44 = vadd.f32 %v20892_v54, %v20891_v31  ;;  %v20933_v21 = vadd.f32 %v20932_v45, %v20931_v13  ;;  %v20894_v20 = vpop.f32.mrb[246].mxu0  ;;  %v20934_v16 = vpop.f32.mrb[254].mxu1 }
 0x4b8   :  { %v20895_v17 = vpop.f32.mrb[247].mxu0  ;;  %v20935_v62 = vpop.f32.mrb[255].mxu1 }
 0x4b9   :  { %v6207_v12 = vadd.f32 %v20893_v44, %v6142_v40  ;;  %v20896_v7 = vadd.f32 %v20895_v17, %v20894_v20  ;;  %v20936_v6 = vadd.f32 %v20935_v62, %v20934_v16 }
 0x4bb   :  { %v26974_v33 = vadd.f32 %v20933_v21, %v6207_v12  ;;  %v6210_v39 = vadd.f32 %v20896_v7, %v26963_v19 }
 0x4bd   :  { %v26977_v61 = vadd.f32 %v20936_v6, %v6210_v39 }
 0x4be   :  { %v20953_v1 = vpop.f32.mrb[248].mxu0  ;;  %v22523_v28 = vpop.f32.mrb[0].mxu1 }
 0x4bf   :  { %v20954_v36 = vpop.f32.mrb[249].mxu0  ;;  %v6377_v25 = vpop.f32.mrb[1].mxu1 }
 0x4c0   :  { %v20955_v56 = vadd.f32 %v20954_v36, %v20953_v1  ;;  %v20956_v53 = vpop.f32.mrb[250].mxu0  ;;  %v22524_v63 = vpop.f32.mrb[2].mxu1 }
 0x4c1   :  { %v20957_v29 = vpop.f32.mrb[251].mxu0  ;;  %v6380_v27 = vpop.f32.mrb[3].mxu1 }
 0x4c2   :  { %v6313_v52 = vadd.f32 %v20955_v56, %v6248_v3  ;;  %v20958_v23 = vadd.f32 %v20957_v29, %v20956_v53 }
 0x4c4   :  { %v6378_v40 = vadd.f32 %v6377_v25, %v6313_v52  ;;  %v6316_v42 = vadd.f32 %v20958_v23, %v6251_v9  ;;  %v23470_v23 = vld [vmem:[%s31889_s0 + $0x10] sm:$0xff]  }
 0x4c6   :  { %v6408_v14 = vadd.f32 %v6378_v40, %v25761_v2  ;;  %v6381_v10 = vadd.f32 %v6380_v27, %v6316_v42  ;;  %v20959_v32 = vpop.f32.mrb[252].mxu0  ;;  %v22527_v19 = vpop.f32.mrb[4].mxu1  ;;  %v23478_v40 = vld [vmem:[%s31889_s0 + $0x90] sm:$0xff]   ;;  %v23471_v42 = vld [vmem:[%s31889_s0 + $0x18] sm:$0xff]  }
 0x4c7   :  { %v20960_v55 = vpop.f32.mrb[253].mxu0  ;;  %v6393_v41 = vpop.f32.mrb[5].mxu1 }
 0x4c8   :  { %v6409_v47 = vadd.f32 %v6381_v10, %v25763_v50  ;;  %v20961_v57 = vadd.f32 %v20960_v55, %v20959_v32  ;;  %v20962_v26 = vpop.f32.mrb[254].mxu0  ;;  %v22528_v0 = vpop.f32.mrb[6].mxu1  ;;  %v6689_v60 = vmax.f32 %v6408_v14, 0.0  ;;  %v23479_v14 = vld [vmem:[%s31889_s0 + $0x98] sm:$0xff]   ;;  %v23472_v10 = vld [vmem:[%s31889_s0 + $0x20] sm:$0xff]   ;;  %v23473_v55 = vld [vmem:[%s31889_s0 + $0x28] sm:$0xff]  }
 0x4c9   :  { %v20963_v43 = vpop.f32.mrb[255].mxu0  ;;  %v6396_v11 = vpop.f32.mrb[7].mxu1  ;;  %v23482_v32 = vld [vmem:[%s31889_s0 + $0xa0] sm:$0xff]  }
 0x4ca   :  { %v6690_v37 = vmax.f32 %v6409_v47, 0.0  ;;  %v6321_v3 = vadd.f32 %v20961_v57, %v6256_v49  ;;  %v20964_v51 = vadd.f32 %v20963_v43, %v20962_v26  ;;  %v23474_v47 = vld [vmem:[%s31889_s0 + $0x30] sm:$0xff]   ;;  %v23475_v26 = vld [vmem:[%s31889_s0 + $0x38] sm:$0xff]   ;;  %v23476_v43 = vld [vmem:[%s31889_s0 + $0x40] sm:$0xff]  }
 0x4cb   :  { %v23486_v57 = vld [vmem:[%s31889_s0 + $0xb0] sm:$0xff]  }
 0x4cc   :  { %v26981_v5 = vpack.c.bf16 %v6690_v37, %v6689_v60  ;;  %v6386_v9 = vadd.f32 %v22523_v28, %v6321_v3  ;;  %v6324_v2 = vadd.f32 %v20964_v51, %v26967_v30  ;;  %v23477_v60 = vld [vmem:[%s31889_s0 + $0x48] sm:$0xff]   ;;  %v23480_v3 = vld [vmem:[%s31889_s0 + $0x50] sm:$0xff]  }
 0x4cd   :  { %v23491_v37 = vld [vmem:[%s31889_s0 + $0xc8] sm:$0xff]   ;;  %v23494_v51 = vld [vmem:[%s31889_s0 + $0xd0] sm:$0xff]  }
 0x4ce   :  { %v6410_v34 = vadd.f32 %v6386_v9, %v25769_v4  ;;  %v6389_v35 = vadd.f32 %v22524_v63, %v6324_v2  ;;  %v20965_v24 = vpop.f32.mrb[0].mxu0  ;;  %23049 = vmatprep.subr.msk.bf16.mxu0 %vm439_vm0, %v26981_v5  ;;  %23053 = vmatprep.subr.msk.bf16.mxu1 %vm439_vm0, %v26981_v5  ;;  %v6702_v50 = vsel %vm439_vm0, %v26981_v5, 0  ;;  %v23481_v9 = vld [vmem:[%s31889_s0 + $0x58] sm:$0xff]  }
 0x4cf   :  { %v20966_v49 = vpop.f32.mrb[1].mxu0  ;;  %22530 = vmatpush3.bf16.msra.mxu0 %v6702_v50  ;;  %22570 = vmatpush3.bf16.msra.mxu1 %v6702_v50  ;;  %v23495_v2 = vld [vmem:[%s31889_s0 + $0xd8] sm:$0xff]  }
 0x4d0   :  { %v6411_v18 = vadd.f32 %v6389_v35, %v25777_v58  ;;  %v20967_v8 = vadd.f32 %v20966_v49, %v20965_v24  ;;  %v20968_v30 = vpop.f32.mrb[2].mxu0  ;;  %v6691_v4 = vmax.f32 %v6410_v34, 0.0  ;;  %v23484_v34 = vld [vmem:[%s31889_s0 + $0x60] sm:$0xff]   ;;  %v23485_v24 = vld [vmem:[%s31889_s0 + $0x68] sm:$0xff]   ;;  %v23488_v49 = vld [vmem:[%s31889_s0 + $0x70] sm:$0xff]  }
 0x4d1   :  { %v20969_v31 = vpop.f32.mrb[3].mxu0  ;;  %v23498_v35 = vld [vmem:[%s31889_s0 + $0xe0] sm:$0xff]  }
 0x4d2   :  { %v6692_v13 = vmax.f32 %v6411_v18, 0.0  ;;  %v6329_v54 = vadd.f32 %v20967_v8, %v26969_v46  ;;  %v20970_v45 = vadd.f32 %v20969_v31, %v20968_v30  ;;  %v23502_v18 = vld [vmem:[%s31889_s0 + $0xf0] sm:$0xff]   ;;  %v23489_v8 = vld [vmem:[%s31889_s0 + $0x78] sm:$0xff]   ;;  %v23492_v31 = vld [vmem:[%s31889_s0 + $0x100] sm:$0xff]  }
 0x4d3   :  { %v23503_v30 = vld [vmem:[%s31889_s0 + $0xf8] sm:$0xff]  }
 0x4d4   :  { %v26993_v44 = vpack.c.bf16 %v6692_v13, %v6691_v4  ;;  %v6394_v21 = vadd.f32 %v6393_v41, %v6329_v54  ;;  %v6332_v20 = vadd.f32 %v20970_v45, %v26972_v22  ;;  %v23483_v41 = vld [vmem:[%s31889_s0 + $0xa8] sm:$0xff]   ;;  %v23506_v4 = vld [vmem:[%s31889_s0 + $0x180] sm:$0xff]   ;;  %v23496_v45 = vld [vmem:[%s31889_s0 + $0x110] sm:$0xff]  }
 0x4d5   :  { %v23493_v13 = vld [vmem:[%s31889_s0 + $0x108] sm:$0xff]  }
 0x4d6   :  { %v6412_v16 = vadd.f32 %v6394_v21, %v25784_v48  ;;  %v6397_v17 = vadd.f32 %v6396_v11, %v6332_v20  ;;  %v20971_v62 = vpop.f32.mrb[4].mxu0  ;;  %23050 = vmatprep.subr.msk.bf16.mxu0 %vm439_vm0, %v26993_v44  ;;  %23054 = vmatprep.subr.msk.bf16.mxu1 %vm439_vm0, %v26993_v44  ;;  %v6705_v58 = vsel %vm439_vm0, %v26993_v44, 0  ;;  %v23490_v11 = vld [vmem:[%s31889_s0 + $0xc0] sm:$0xff]   ;;  %v23507_v54 = vld [vmem:[%s31889_s0 + $0x188] sm:$0xff]   ;;  %v23510_v21 = vld [vmem:[%s31889_s0 + $0x190] sm:$0xff]  }
 0x4d7   :  { %v20972_v46 = vpop.f32.mrb[5].mxu0  ;;  %22532 = vmatpush3.bf16.msra.mxu0 %v6705_v58  ;;  %22572 = vmatpush3.bf16.msra.mxu1 %v6705_v58  ;;  %v23531_v20 = vld [vmem:[%s31894_s6] sm:$0xff]  }
 0x4d8   :  { %v6413_v12 = vadd.f32 %v6397_v17, %v25793_v38  ;;  %v20973_v7 = vadd.f32 %v20972_v46, %v20971_v62  ;;  %v20974_v22 = vpop.f32.mrb[6].mxu0  ;;  %v6693_v48 = vmax.f32 %v6412_v16, 0.0  ;;  %v23532_v16 = vld [vmem:[%s31894_s6 + $0x48] sm:$0xff]   ;;  %v23534_v62 = vld [vmem:[%s31894_s6 + $0x50] sm:$0xff]   ;;  %v23511_v46 = vld [vmem:[%s31889_s0 + $0x198] sm:$0xff]  }
 0x4d9   :  { %v20975_v6 = vpop.f32.mrb[7].mxu0  ;;  %v23533_v17 = vld [vmem:[%s31894_s6 + $0x8] sm:$0xff]  }
 0x4da   :  { %v6694_v39 = vmax.f32 %v6413_v12, 0.0  ;;  %v6337_v1 = vadd.f32 %v20973_v7, %v26974_v33  ;;  %v20976_v28 = vadd.f32 %v20975_v6, %v20974_v22  ;;  %v23500_v12 = vld [vmem:[%s31889_s0 + $0x120] sm:$0xff]   ;;  %v23501_v22 = vld [vmem:[%s31889_s0 + $0x128] sm:$0xff]  }
 0x4db   :  { %v23514_v7 = vld [vmem:[%s31889_s0 + $0x1a0] sm:$0xff]   ;;  %v23515_v6 = vld [vmem:[%s31889_s0 + $0x1a8] sm:$0xff]  }
 0x4dc   :  { %v27005_v36 = vpack.c.bf16 %v6694_v39, %v6693_v48  ;;  %v6402_v25 = vadd.f32 %v22527_v19, %v6337_v1  ;;  %v6340_v56 = vadd.f32 %v20976_v28, %v26977_v61  ;;  %v23530_v19 = vld [vmem:[%s31894_s6 + $0x40] sm:$0xff]   ;;  %v23504_v48 = vld [vmem:[%s31889_s0 + $0x130] sm:$0xff]   ;;  %v23505_v28 = vld [vmem:[%s31889_s0 + $0x138] sm:$0xff]  }
 0x4dd   :  { %v23518_v39 = vld [vmem:[%s31889_s0 + $0x1b0] sm:$0xff]  }
 0x4de   :  { %v6414_v53 = vadd.f32 %v6402_v25, %v25800_v15  ;;  %v6405_v63 = vadd.f32 %v22528_v0, %v6340_v56  ;;  %23051 = vmatprep.subr.msk.bf16.mxu0 %vm439_vm0, %v27005_v36  ;;  %23055 = vmatprep.subr.msk.bf16.mxu1 %vm439_vm0, %v27005_v36  ;;  %v6708_v38 = vsel %vm439_vm0, %v27005_v36, 0  ;;  %v23467_v15 = vld [vmem:[%s31889_s0 + $0x8] sm:$0xff]   ;;  %v23487_v0 = vld [vmem:[%s31889_s0 + $0xb8] sm:$0xff]   ;;  %v23535_v1 = vld [vmem:[%s31894_s6 + $0x10] sm:$0xff]  }
 0x4df   :  { %22534 = vmatpush3.bf16.msra.mxu0 %v6708_v38  ;;  %22574 = vmatpush3.bf16.msra.mxu1 %v6708_v38  ;;  %v23519_v25 = vld [vmem:[%s31889_s0 + $0x1b8] sm:$0xff]   ;;  %v23508_v56 = vld [vmem:[%s31889_s0 + $0x140] sm:$0xff]  }
 0x4e0   :  { %v6415_v33 = vadd.f32 %v6405_v63, %v25809_v59  ;;  %v6695_v29 = vmax.f32 %v6414_v53, 0.0  ;;  %v23469_v59 = vld [vmem:[%s31889_s0 + $0x88] sm:$0xff]   ;;  %v23521_v53 = vld [vmem:[%s31889_s0 + $0x1c0] sm:$0xff]   ;;  %v23536_v63 = vld [vmem:[%s31894_s6 + $0x58] sm:$0xff]  }
 0x4e2   :  { %v6696_v27 = vmax.f32 %v6415_v33, 0.0  ;;  %v23538_v33 = vld [vmem:[%s31894_s6 + $0x60] sm:$0xff]  }
 0x4e4   :  { %v27016_v52 = vpack.c.bf16 %v6696_v27, %v6695_v29  ;;  %v23539_v29 = vld [vmem:[%s31894_s6 + $0x20] sm:$0xff]   ;;  %v23509_v27 = vld [vmem:[%s31889_s0 + $0x148] sm:$0xff]  }
 0x4e6   :  { %23052 = vmatprep.subr.msk.bf16.mxu0 %vm439_vm0, %v27016_v52  ;;  %23056 = vmatprep.subr.msk.bf16.mxu1 %vm439_vm0, %v27016_v52  ;;  %v6711_v61 = vsel %vm439_vm0, %v27016_v52, 0 }
 0x4e7   :  { %22536 = vmatpush3.bf16.msra.mxu0 %v6711_v61  ;;  %22576 = vmatpush3.bf16.msra.mxu1 %v6711_v61 }
 0x4e8   :  { %23057 = vmatprep.subr.msk.bf16.mxu0 %vm439_vm0, %v26981_v5  ;;  %23061 = vmatprep.subr.msk.bf16.mxu1 %vm439_vm0, %v26981_v5 }
 0x4ea   :  { %22538 = vmatmul.mubr.msk.bf16.vlgmr.msra.gmra.mrb[8].mxu0 %vm439_vm0, %v23467_v15  ;;  %22578 = vmatmul.mubr.msk.bf16.vlgmr.msra.gmra.mrb[8].mxu1 %vm439_vm0, %v23469_v59  ;;  %v23523_v15 = vld [vmem:[%s31889_s0 + $0x1c8] sm:$0xff]   ;;  %v23512_v59 = vld [vmem:[%s31889_s0 + $0x150] sm:$0xff]  }
 0x4eb   :  { %22610 = vmatpush3.bf16.msra.mxu0 %v6702_v50  ;;  %22650 = vmatpush3.bf16.msra.mxu1 %v6702_v50  ;;  %v23499_v50 = vld [vmem:[%s31889_s0 + $0xe8] sm:$0xff]  }
 0x4ec   :  { %23058 = vmatprep.subr.msk.bf16.mxu0 %vm439_vm0, %v26993_v44  ;;  %23062 = vmatprep.subr.msk.bf16.mxu1 %vm439_vm0, %v26993_v44 }
 0x4ed   :  { %22541 = vmatprep.mubr.msk.bf16.mxu0 %vm439_vm0, %v23470_v23  ;;  %22581 = vmatprep.mubr.msk.bf16.mxu1 %vm439_vm0, %v23478_v40  ;;  %v23524_v23 = vld [vmem:[%s31889_s0 + $0x1d0] sm:$0xff]   ;;  %v23541_v40 = vld [vmem:[%s31894_s6 + $0x28] sm:$0xff]  }
 0x4ef   :  { %22612 = vmatpush3.bf16.msra.mxu0 %v6705_v58  ;;  %22652 = vmatpush3.bf16.msra.mxu1 %v6705_v58  ;;  %v23497_v58 = vld [vmem:[%s31889_s0 + $0x118] sm:$0xff]  }
 0x4f0   :  { %23059 = vmatprep.subr.msk.bf16.mxu0 %vm439_vm0, %v27005_v36  ;;  %23063 = vmatprep.subr.msk.bf16.mxu1 %vm439_vm0, %v27005_v36 }
 0x4f2   :  { %22542 = vmatmul.mubr.msk.bf16.gmra.mrb[12].mxu0 %vm439_vm0, %v23471_v42  ;;  %22582 = vmatmul.mubr.msk.bf16.gmra.mrb[12].mxu1 %vm439_vm0, %v23479_v14  ;;  %v23542_v42 = vld [vmem:[%s31894_s6 + $0x70] sm:$0xff]  }
 0x4f3   :  { %22614 = vmatpush3.bf16.msra.mxu0 %v6708_v38  ;;  %22654 = vmatpush3.bf16.msra.mxu1 %v6708_v38  ;;  %v23537_v38 = vld [vmem:[%s31894_s6 + $0x18] sm:$0xff]   ;;  %v23543_v14 = vld [vmem:[%s31894_s6 + $0x30] sm:$0xff]  }
 0x4f4   :  { %23060 = vmatprep.subr.msk.bf16.mxu0 %vm439_vm0, %v27016_v52  ;;  %23064 = vmatprep.subr.msk.bf16.mxu1 %vm439_vm0, %v27016_v52 }
 0x4f5   :  { %22545 = vmatprep.mubr.msk.bf16.mxu0 %vm439_vm0, %v23472_v10  ;;  %22585 = vmatprep.mubr.msk.bf16.mxu1 %vm439_vm0, %v23482_v32  ;;  %v23513_v10 = vld [vmem:[%s31889_s0 + $0x158] sm:$0xff]  }
 0x4f6   :  { %v23525_v32 = vld [vmem:[%s31889_s0 + $0x1d8] sm:$0xff]  }
 0x4f7   :  { %22616 = vmatpush3.bf16.msra.mxu0 %v6711_v61  ;;  %22656 = vmatpush3.bf16.msra.mxu1 %v6711_v61  ;;  %v23540_v61 = vld [vmem:[%s31894_s6 + $0x68] sm:$0xff]  }
 0x4f8   :  { %21069 = vmatprep.subr.bf16.mxu0 %v23530_v19  ;;  %v23544_v19 = vld [vmem:[%s31894_s6 + $0x78] sm:$0xff]  }
 0x4fa   :  { %22546 = vmatmul.mubr.msk.bf16.gmra.mrb[16].mxu0 %vm439_vm0, %v23473_v55  ;;  %22586 = vmatmul.mubr.msk.bf16.gmra.mrb[16].mxu1 %vm439_vm0, %v23483_v41  ;;  %v23516_v55 = vld [vmem:[%s31889_s0 + $0x160] sm:$0xff]  }
 0x4fb   :  { %22549 = vmatprep.mubr.msk.bf16.mxu0 %vm439_vm0, %v23474_v47  ;;  %22589 = vmatprep.mubr.msk.bf16.mxu1 %vm439_vm0, %v23486_v57  ;;  %v23526_v41 = vld [vmem:[%s31889_s0 + $0x1e0] sm:$0xff]   ;;  %v23545_v47 = vld [vmem:[%s31894_s6 + $0x38] sm:$0xff]  }
 0x4fc   :  { %v23546_v57 = vld [vmem:[%s31894_s6 + $0xc0] sm:$0xff]  }
 0x4fd   :  { %21109 = vmatprep.subr.bf16.mxu1 %v23546_v57 }
 0x502   :  { %22550 = vmatmul.mubr.msk.bf16.gmra.mrb[20].mxu0 %vm439_vm0, %v23475_v26  ;;  %22590 = vmatmul.mubr.msk.bf16.gmra.mrb[20].mxu1 %vm439_vm0, %v23487_v0  ;;  %v23547_v26 = vld [vmem:[%s31894_s6 + $0x140] sm:$0xff]  }
 0x503   :  { %22553 = vmatprep.mubr.msk.bf16.mxu0 %vm439_vm0, %v23476_v43  ;;  %22593 = vmatprep.mubr.msk.bf16.mxu1 %vm439_vm0, %v23490_v11  ;;  %v23548_v0 = vld [vmem:[%s31894_s6 + $0x80] sm:$0xff]   ;;  %v23517_v43 = vld [vmem:[%s31889_s0 + $0x168] sm:$0xff]  }
 0x504   :  { %v23527_v11 = vld [vmem:[%s31889_s0 + $0x1e8] sm:$0xff]  }
 0x50a   :  { %22554 = vmatmul.mubr.msk.bf16.gmra.mrb[24].mxu0 %vm439_vm0, %v23477_v60  ;;  %22594 = vmatmul.mubr.msk.bf16.gmra.mrb[24].mxu1 %vm439_vm0, %v23491_v37  ;;  %v23550_v60 = vld [vmem:[%s31894_s6 + $0xc8] sm:$0xff]   ;;  %v23520_v37 = vld [vmem:[%s31889_s0 + $0x170] sm:$0xff]  }
 0x50b   :  { %22557 = vmatprep.mubr.msk.bf16.mxu0 %vm439_vm0, %v23480_v3  ;;  %22597 = vmatprep.mubr.msk.bf16.mxu1 %vm439_vm0, %v23494_v51  ;;  %v23528_v3 = vld [vmem:[%s31889_s0 + $0x1f0] sm:$0xff]   ;;  %v23552_v51 = vld [vmem:[%s31894_s6 + $0x88] sm:$0xff]  }
 0x512   :  { %22558 = vmatmul.mubr.msk.bf16.gmra.mrb[28].mxu0 %vm439_vm0, %v23481_v9  ;;  %22598 = vmatmul.mubr.msk.bf16.gmra.mrb[28].mxu1 %vm439_vm0, %v23495_v2  ;;  %v23554_v9 = vld [vmem:[%s31894_s6 + $0xd0] sm:$0xff]  }
 0x513   :  { %22561 = vmatprep.mubr.msk.bf16.mxu0 %vm439_vm0, %v23484_v34  ;;  %22601 = vmatprep.mubr.msk.bf16.mxu1 %vm439_vm0, %v23498_v35  ;;  %v23556_v2 = vld [vmem:[%s31894_s6 + $0x90] sm:$0xff]   ;;  %v23522_v34 = vld [vmem:[%s31889_s0 + $0x178] sm:$0xff]  }
 0x514   :  { %v23529_v35 = vld [vmem:[%s31889_s0 + $0x1f8] sm:$0xff]  }
 0x51a   :  { %22562 = vmatmul.mubr.msk.bf16.gmra.mrb[32].mxu0 %vm439_vm0, %v23485_v24  ;;  %22602 = vmatmul.mubr.msk.bf16.gmra.mrb[32].mxu1 %vm439_vm0, %v23499_v50  ;;  %v23558_v24 = vld [vmem:[%s31894_s6 + $0xd8] sm:$0xff]  }
 0x51b   :  { %22565 = vmatprep.mubr.msk.bf16.mxu0 %vm439_vm0, %v23488_v49  ;;  %22605 = vmatprep.mubr.msk.bf16.mxu1 %vm439_vm0, %v23502_v18  ;;  %v23560_v50 = vld [vmem:[%s31894_s6 + $0x98] sm:$0xff]   ;;  %v23562_v49 = vld [vmem:[%s31894_s6 + $0xe0] sm:$0xff]  }
 0x51c   :  { %v23564_v18 = vld [vmem:[%s31894_s6 + $0xa0] sm:$0xff]  }
 0x522   :  { %22566 = vmatmul.mubr.msk.bf16.gmra.mrb[36].mxu0 %vm439_vm0, %v23489_v8  ;;  %22606 = vmatmul.mubr.msk.bf16.gmra.mrb[36].mxu1 %vm439_vm0, %v23503_v30  ;;  %v23566_v8 = vld [vmem:[%s31894_s6 + $0xe8] sm:$0xff]  }
 0x523   :  { %22617 = vmatprep.mubr.msk.bf16.mxu0 %vm439_vm0, %v23492_v31  ;;  %22657 = vmatprep.mubr.msk.bf16.mxu1 %vm439_vm0, %v23506_v4  ;;  %v23568_v30 = vld [vmem:[%s31894_s6 + $0xa8] sm:$0xff]   ;;  %v23570_v31 = vld [vmem:[%s31894_s6 + $0xf0] sm:$0xff]  }
 0x524   :  { %v23572_v4 = vld [vmem:[%s31894_s6 + $0xb0] sm:$0xff]  }
 0x52a   :  { %22618 = vmatmul.mubr.msk.bf16.vlgmr.msra.gmra.mrb[40].mxu0 %vm439_vm0, %v23493_v13  ;;  %22658 = vmatmul.mubr.msk.bf16.vlgmr.msra.gmra.mrb[40].mxu1 %vm439_vm0, %v23507_v54  ;;  %v23574_v13 = vld [vmem:[%s31894_s6 + $0xf8] sm:$0xff]  }
 0x52b   :  { %22621 = vmatprep.mubr.msk.bf16.mxu0 %vm439_vm0, %v23496_v45  ;;  %22661 = vmatprep.mubr.msk.bf16.mxu1 %vm439_vm0, %v23510_v21  ;;  %v23576_v54 = vld [vmem:[%s31894_s6 + $0xb8] sm:$0xff]   ;;  %v23578_v45 = vld [vmem:[%s31894_s6 + $0x1c0] sm:$0xff]  }
 0x52c   :  { %21070 = vmatpush3.bf16.msra.mxu0 %v23531_v20  ;;  %21110 = vmatpush3.bf16.msra.mxu1 %v23548_v0 }
 0x52d   :  { %21071 = vmatprep.subr.bf16.mxu0 %v23532_v16  ;;  %21111 = vmatprep.subr.bf16.mxu1 %v23550_v60 }
 0x530   :  { %21072 = vmatpush3.bf16.msra.mxu0 %v23533_v17  ;;  %21112 = vmatpush3.bf16.msra.mxu1 %v23552_v51 }
 0x531   :  { %21073 = vmatprep.subr.bf16.mxu0 %v23534_v62  ;;  %21113 = vmatprep.subr.bf16.mxu1 %v23554_v9 }
 0x532   :  { %22622 = vmatmul.mubr.msk.bf16.gmra.mrb[44].mxu0 %vm439_vm0, %v23497_v58  ;;  %22662 = vmatmul.mubr.msk.bf16.gmra.mrb[44].mxu1 %vm439_vm0, %v23511_v46 }
 0x533   :  { %22625 = vmatprep.mubr.msk.bf16.mxu0 %vm439_vm0, %v23500_v12  ;;  %22665 = vmatprep.mubr.msk.bf16.mxu1 %vm439_vm0, %v23514_v7 }
 0x534   :  { %21074 = vmatpush3.bf16.msra.mxu0 %v23535_v1  ;;  %21114 = vmatpush3.bf16.msra.mxu1 %v23556_v2 }
 0x535   :  { %21075 = vmatprep.subr.bf16.mxu0 %v23536_v63  ;;  %21115 = vmatprep.subr.bf16.mxu1 %v23558_v24 }
 0x538   :  { %21076 = vmatpush3.bf16.msra.mxu0 %v23537_v38  ;;  %21116 = vmatpush3.bf16.msra.mxu1 %v23560_v50 }
 0x539   :  { %21077 = vmatprep.subr.bf16.mxu0 %v23538_v33  ;;  %21117 = vmatprep.subr.bf16.mxu1 %v23562_v49  ;;  %v23557_v49 = vld [vmem:[%s31894_s6 + $0x110] sm:$0xff]  }
 0x53a   :  { %22626 = vmatmul.mubr.msk.bf16.gmra.mrb[48].mxu0 %vm439_vm0, %v23501_v22  ;;  %22666 = vmatmul.mubr.msk.bf16.gmra.mrb[48].mxu1 %vm439_vm0, %v23515_v6 }
 0x53b   :  { %22629 = vmatprep.mubr.msk.bf16.mxu0 %vm439_vm0, %v23504_v48  ;;  %22669 = vmatprep.mubr.msk.bf16.mxu1 %vm439_vm0, %v23518_v39 }
 0x53c   :  { %21078 = vmatpush3.bf16.msra.mxu0 %v23539_v29  ;;  %21118 = vmatpush3.bf16.msra.mxu1 %v23564_v18 }
 0x53d   :  { %21079 = vmatprep.subr.bf16.mxu0 %v23540_v61  ;;  %21119 = vmatprep.subr.bf16.mxu1 %v23566_v8  ;;  %v23559_v8 = vld [vmem:[%s31894_s6 + $0x158] sm:$0xff]  }
 0x540   :  { %21080 = vmatpush3.bf16.msra.mxu0 %v23541_v40  ;;  %21120 = vmatpush3.bf16.msra.mxu1 %v23568_v30 }
 0x541   :  { %21081 = vmatprep.subr.bf16.mxu0 %v23542_v42  ;;  %21121 = vmatprep.subr.bf16.mxu1 %v23570_v31  ;;  %v23561_v31 = vld [vmem:[%s31894_s6 + $0x118] sm:$0xff]  }
 0x542   :  { %22630 = vmatmul.mubr.msk.bf16.gmra.mrb[52].mxu0 %vm439_vm0, %v23505_v28  ;;  %22670 = vmatmul.mubr.msk.bf16.gmra.mrb[52].mxu1 %vm439_vm0, %v23519_v25 }
 0x543   :  { %22633 = vmatprep.mubr.msk.bf16.mxu0 %vm439_vm0, %v23508_v56  ;;  %22673 = vmatprep.mubr.msk.bf16.mxu1 %vm439_vm0, %v23521_v53 }
 0x544   :  { %21082 = vmatpush3.bf16.msra.mxu0 %v23543_v14  ;;  %21122 = vmatpush3.bf16.msra.mxu1 %v23572_v4 }
 0x545   :  { %21083 = vmatprep.subr.bf16.mxu0 %v23544_v19  ;;  %21123 = vmatprep.subr.bf16.mxu1 %v23574_v13 }
 0x548   :  { %21084 = vmatpush3.bf16.msra.mxu0 %v23545_v47  ;;  %21124 = vmatpush3.bf16.msra.mxu1 %v23576_v54  ;;  %v23549_v47 = vld [vmem:[%s31894_s6 + $0x100] sm:$0xff]  }
 0x549   :  { %21149 = vmatprep.subr.bf16.mxu0 %v23547_v26  ;;  %21189 = vmatprep.subr.bf16.mxu1 %v23578_v45  ;;  %v23551_v26 = vld [vmem:[%s31894_s6 + $0x148] sm:$0xff]   ;;  %v23563_v54 = vld [vmem:[%s31894_s6 + $0x160] sm:$0xff]  }
 0x54a   :  { %22634 = vmatmul.mubr.msk.bf16.gmra.mrb[56].mxu0 %vm439_vm0, %v23509_v27  ;;  %22674 = vmatmul.mubr.msk.bf16.gmra.mrb[56].mxu1 %vm439_vm0, %v23523_v15 }
 0x54b   :  { %22637 = vmatprep.mubr.msk.bf16.mxu0 %vm439_vm0, %v23512_v59  ;;  %22677 = vmatprep.mubr.msk.bf16.mxu1 %vm439_vm0, %v23524_v23 }
 0x552   :  { %22638 = vmatmul.mubr.msk.bf16.gmra.mrb[60].mxu0 %vm439_vm0, %v23513_v10  ;;  %22678 = vmatmul.mubr.msk.bf16.gmra.mrb[60].mxu1 %vm439_vm0, %v23525_v32 }
 0x553   :  { %22641 = vmatprep.mubr.msk.bf16.mxu0 %vm439_vm0, %v23516_v55  ;;  %22681 = vmatprep.mubr.msk.bf16.mxu1 %vm439_vm0, %v23526_v41 }
 0x55a   :  { %22642 = vmatmul.mubr.msk.bf16.gmra.mrb[64].mxu0 %vm439_vm0, %v23517_v43  ;;  %22682 = vmatmul.mubr.msk.bf16.gmra.mrb[64].mxu1 %vm439_vm0, %v23527_v11  ;;  %v23553_v43 = vld [vmem:[%s31894_s6 + $0x108] sm:$0xff]  }
 0x55b   :  { %22645 = vmatprep.mubr.msk.bf16.mxu0 %vm439_vm0, %v23520_v37  ;;  %22685 = vmatprep.mubr.msk.bf16.mxu1 %vm439_vm0, %v23528_v3  ;;  %v23555_v37 = vld [vmem:[%s31894_s6 + $0x150] sm:$0xff]  }
 0x562   :  { %22646 = vmatmul.mubr.msk.bf16.gmra.mrb[68].mxu0 %vm439_vm0, %v23522_v34  ;;  %22686 = vmatmul.mubr.msk.bf16.gmra.mrb[68].mxu1 %vm439_vm0, %v23529_v35 }
 0x5bd   :  { %v22539_v21 = vpop.f32.mrb[8].mxu0  ;;  %v27390_v20 = vpop.f32.mrb[8].mxu1 }
 0x5be   :  { %v6907_v16 = vpop.f32.mrb[9].mxu0  ;;  %v27392_v17 = vpop.f32.mrb[9].mxu1 }
 0x5bf   :  { %v22540_v62 = vpop.f32.mrb[10].mxu0  ;;  %v27394_v58 = vpop.f32.mrb[10].mxu1 }
 0x5c0   :  { %v7035_v46 = vpack.c.bf16 %v22540_v62, %v22539_v21  ;;  %v6910_v12 = vpop.f32.mrb[11].mxu0  ;;  %v7388_v7 = vpack.c.bf16 %v27394_v58, %v27390_v20  ;;  %v27398_v22 = vpop.f32.mrb[11].mxu1  ;;  %v23593_v20 = vld [vmem:[%s31894_s6 + $0x218] sm:$0xff]  }
 0x5c1   :  { %v7034_v6 = vpack.c.bf16 %v6910_v12, %v6907_v16  ;;  %v7387_v48 = vpack.c.bf16 %v27398_v22, %v27392_v17  ;;  %v23585_v17 = vld [vmem:[%s31894_s6 + $0x208] sm:$0xff]  }
 0x5c5   :  { %v27402_v39 = vpop.f32.mrb[12].mxu0  ;;  %v27404_v1 = vpop.f32.mrb[12].mxu1 }
 0x5c6   :  { %v27406_v28 = vpop.f32.mrb[13].mxu0  ;;  %v27408_v25 = vpop.f32.mrb[13].mxu1 }
 0x5c7   :  { %v27410_v56 = vpop.f32.mrb[14].mxu0  ;;  %v27412_v53 = vpop.f32.mrb[14].mxu1 }
 0x5c8   :  { %v7037_v63 = vpack.c.bf16 %v27410_v56, %v27402_v39  ;;  %v27416_v38 = vpop.f32.mrb[15].mxu0  ;;  %v7390_v33 = vpack.c.bf16 %v27412_v53, %v27404_v1  ;;  %v27420_v29 = vpop.f32.mrb[15].mxu1 }
 0x5c9   :  { %v7036_v27 = vpack.c.bf16 %v27416_v38, %v27406_v28  ;;  %v7389_v15 = vpack.c.bf16 %v27420_v29, %v27408_v25  ;;  %v23565_v38 = vld [vmem:[%s31894_s6 + $0x120] sm:$0xff]   ;;  %v23601_v25 = vld [vmem:[%s31894_s6 + $0x228] sm:$0xff]  }
 0x5cd   :  { %v22547_v61 = vpop.f32.mrb[16].mxu0  ;;  %v27426_v59 = vpop.f32.mrb[16].mxu1 }
 0x5ce   :  { %v6939_v23 = vpop.f32.mrb[17].mxu0  ;;  %v27428_v40 = vpop.f32.mrb[17].mxu1 }
 0x5cf   :  { %v22548_v42 = vpop.f32.mrb[18].mxu0  ;;  %v27430_v14 = vpop.f32.mrb[18].mxu1 }
 0x5d0   :  { %v7039_v10 = vpack.c.bf16 %v22548_v42, %v22547_v61  ;;  %v6942_v32 = vpop.f32.mrb[19].mxu0  ;;  %v7392_v19 = vpack.c.bf16 %v27430_v14, %v27426_v59  ;;  %v27434_v55 = vpop.f32.mrb[19].mxu1  ;;  %v23586_v59 = vld [vmem:[%s31894_s6 + $0x1d0] sm:$0xff]  }
 0x5d1   :  { %v7038_v41 = vpack.c.bf16 %v6942_v32, %v6939_v23  ;;  %v7391_v57 = vpack.c.bf16 %v27434_v55, %v27428_v40  ;;  %v23567_v23 = vld [vmem:[%s31894_s6 + $0x168] sm:$0xff]   ;;  %v23587_v14 = vld [vmem:[%s31894_s6 + $0x250] sm:$0xff]  }
 0x5d3   :  { %9051 = vmatprep.mubr.bf16.mxu0 %v7038_v41 }
 0x5d4   :  { %9052 = vmatmul.mubr.bf16.vlgmr.msra.gmra.mrb[72].mxu0 %v7034_v6 }
 0x5d5   :  { %v22551_v0 = vpop.f32.mrb[20].mxu0  ;;  %9059 = vmatprep.mubr.bf16.mxu0 %v7039_v10  ;;  %21150 = vmatpush3.bf16.msra.mxu0 %v23549_v47  ;;  %v27447_v11 = vpop.f32.mrb[20].mxu1  ;;  %v23569_v10 = vld [vmem:[%s31894_s6 + $0x128] sm:$0xff]   ;;  %v23571_v47 = vld [vmem:[%s31894_s6 + $0x170] sm:$0xff]  }
 0x5d6   :  { %v6955_v60 = vpop.f32.mrb[21].mxu0  ;;  %21151 = vmatprep.subr.bf16.mxu0 %v23551_v26  ;;  %v27452_v3 = vpop.f32.mrb[21].mxu1 }
 0x5d7   :  { %v22552_v51 = vpop.f32.mrb[22].mxu0  ;;  %v27454_v9 = vpop.f32.mrb[22].mxu1 }
 0x5d8   :  { %v7041_v2 = vpack.c.bf16 %v22552_v51, %v22551_v0  ;;  %v6958_v34 = vpop.f32.mrb[23].mxu0  ;;  %v7394_v35 = vpack.c.bf16 %v27454_v9, %v27447_v11  ;;  %v27458_v24 = vpop.f32.mrb[23].mxu1  ;;  %v23602_v11 = vld [vmem:[%s31894_s6 + $0x1f0] sm:$0xff]  }
 0x5d9   :  { %v7040_v50 = vpack.c.bf16 %v6958_v34, %v6955_v60  ;;  %21152 = vmatpush3.bf16.msra.mxu0 %v23553_v43  ;;  %v7393_v18 = vpack.c.bf16 %v27458_v24, %v27452_v3  ;;  %v23573_v34 = vld [vmem:[%s31894_s6 + $0x130] sm:$0xff]   ;;  %v23594_v3 = vld [vmem:[%s31894_s6 + $0x1e0] sm:$0xff]  }
 0x5da   :  { %21153 = vmatprep.subr.bf16.mxu0 %v23555_v37  ;;  %v23595_v24 = vld [vmem:[%s31894_s6 + $0x260] sm:$0xff]   ;;  %v23603_v9 = vld [vmem:[%s31894_s6 + $0x270] sm:$0xff]  }
 0x5dc   :  { %9060 = vmatmul.mubr.bf16.gmra.mrb[76].mxu0 %v7035_v46 }
 0x5dd   :  { %v27468_v30 = vpop.f32.mrb[24].mxu0  ;;  %9067 = vmatprep.mubr.bf16.mxu0 %v7040_v50  ;;  %21154 = vmatpush3.bf16.msra.mxu0 %v23557_v49  ;;  %v27473_v4 = vpop.f32.mrb[24].mxu1  ;;  %v23575_v49 = vld [vmem:[%s31894_s6 + $0x178] sm:$0xff]  }
 0x5de   :  { %v27475_v13 = vpop.f32.mrb[25].mxu0  ;;  %21155 = vmatprep.subr.bf16.mxu0 %v23559_v8  ;;  %v27480_v45 = vpop.f32.mrb[25].mxu1 }
 0x5df   :  { %v27482_v21 = vpop.f32.mrb[26].mxu0  ;;  %v27484_v16 = vpop.f32.mrb[26].mxu1 }
 0x5e0   :  { %v7043_v62 = vpack.c.bf16 %v27482_v21, %v27468_v30  ;;  %v6974_v46 = vpop.f32.mrb[27].mxu0  ;;  %v7396_v12 = vpack.c.bf16 %v27484_v16, %v27473_v4  ;;  %v27490_v6 = vpop.f32.mrb[27].mxu1  ;;  %v23592_v30 = vld [vmem:[%s31894_s6 + $0x198] sm:$0xff]  }
 0x5e1   :  { %v7042_v28 = vpack.c.bf16 %v6974_v46, %v27475_v13  ;;  %21156 = vmatpush3.bf16.msra.mxu0 %v23561_v31  ;;  %v7395_v61 = vpack.c.bf16 %v27490_v6, %v27480_v45  ;;  %v23577_v31 = vld [vmem:[%s31894_s6 + $0x138] sm:$0xff]   ;;  %v23579_v46 = vld [vmem:[%s31894_s6 + $0x240] sm:$0xff]   ;;  %v23616_v6 = vld [vmem:[%s31894_s6 + $0x288] sm:$0xff]  }
 0x5e2   :  { %21157 = vmatprep.subr.bf16.mxu0 %v23563_v54  ;;  %v23624_v16 = vld [vmem:[%s31894_s6 + $0x298] sm:$0xff]  }
 0x5e4   :  { %9068 = vmatmul.mubr.bf16.gmra.mrb[80].mxu0 %v7036_v27 }
 0x5e5   :  { %v27501_v42 = vpop.f32.mrb[28].mxu0  ;;  %9075 = vmatprep.mubr.bf16.mxu0 %v7041_v2  ;;  %21158 = vmatpush3.bf16.msra.mxu0 %v23565_v38  ;;  %v27506_v32 = vpop.f32.mrb[28].mxu1 }
 0x5e6   :  { %v27508_v41 = vpop.f32.mrb[29].mxu0  ;;  %21159 = vmatprep.subr.bf16.mxu0 %v23567_v23  ;;  %v27513_v26 = vpop.f32.mrb[29].mxu1 }
 0x5e7   :  { %v27515_v27 = vpop.f32.mrb[30].mxu0  ;;  %v27517_v0 = vpop.f32.mrb[30].mxu1 }
 0x5e8   :  { %v7045_v43 = vpack.c.bf16 %v27515_v27, %v27501_v42  ;;  %v27521_v60 = vpop.f32.mrb[31].mxu0  ;;  %v7398_v37 = vpack.c.bf16 %v27517_v0, %v27506_v32  ;;  %v27525_v51 = vpop.f32.mrb[31].mxu1  ;;  %v23609_v42 = vld [vmem:[%s31894_s6 + $0x238] sm:$0xff]  }
 0x5e9   :  { %v7044_v2 = vpack.c.bf16 %v27521_v60, %v27508_v41  ;;  %21160 = vmatpush3.bf16.msra.mxu0 %v23569_v10  ;;  %v7397_v50 = vpack.c.bf16 %v27525_v51, %v27513_v26  ;;  %v23600_v41 = vld [vmem:[%s31894_s6 + $0x1a8] sm:$0xff]   ;;  %v23640_v32 = vld [vmem:[%s31894_s6 + $0x2b8] sm:$0xff]  }
 0x5ea   :  { %21161 = vmatprep.subr.bf16.mxu0 %v23571_v47  ;;  %v23580_v47 = vld [vmem:[%s31894_s6 + $0x180] sm:$0xff]   ;;  %v23632_v51 = vld [vmem:[%s31894_s6 + $0x2a8] sm:$0xff]   ;;  %v23641_v0 = vld [vmem:[%s31894_s6 + $0x338] sm:$0xff]  }
 0x5ec   :  { %9076 = vmatmul.mubr.bf16.gmra.mrb[84].mxu0 %v7037_v63 }
 0x5ed   :  { %v22563_v8 = vpop.f32.mrb[32].mxu0  ;;  %21162 = vmatpush3.bf16.msra.mxu0 %v23573_v34  ;;  %9181 = vmatprep.mubr.bf16.mxu0 %v7391_v57  ;;  %v27546_v13 = vpop.f32.mrb[32].mxu1  ;;  %v23581_v34 = vld [vmem:[%s31894_s6 + $0x200] sm:$0xff]  }
 0x5ee   :  { %v7003_v54 = vpop.f32.mrb[33].mxu0  ;;  %21163 = vmatprep.subr.bf16.mxu0 %v23575_v49  ;;  %v27551_v39 = vpop.f32.mrb[33].mxu1  ;;  %v23582_v49 = vld [vmem:[%s31894_s6 + $0x1c8] sm:$0xff]  }
 0x5ef   :  { %v22564_v56 = vpop.f32.mrb[34].mxu0  ;;  %v27553_v63 = vpop.f32.mrb[34].mxu1 }
 0x5f0   :  { %v7047_v38 = vpack.c.bf16 %v22564_v56, %v22563_v8  ;;  %v7006_v40 = vpop.f32.mrb[35].mxu0  ;;  %v7400_v55 = vpack.c.bf16 %v27553_v63, %v27546_v13  ;;  %v27557_v57 = vpop.f32.mrb[35].mxu1  ;;  %v23583_v8 = vld [vmem:[%s31894_s6 + $0x248] sm:$0xff]  }
 0x5f1   :  { %v7046_v23 = vpack.c.bf16 %v7006_v40, %v7003_v54  ;;  %21164 = vmatpush3.bf16.msra.mxu0 %v23577_v31  ;;  %v7399_v10 = vpack.c.bf16 %v27557_v57, %v27551_v39  ;;  %v23611_v57 = vld [vmem:[%s31894_s6 + $0x340] sm:$0xff]  }
 0x5f2   :  { %21229 = vmatprep.subr.bf16.mxu0 %v23579_v46 }
 0x5f3   :  { %9116 = vmatprep.mubr.bf16.mxu1 %v7046_v23 }
 0x5f4   :  { %9117 = vmatmul.mubr.bf16.vlgmr.msra.gmra.mrb[72].mxu1 %v7042_v28  ;;  %9182 = vmatmul.mubr.bf16.vlgmr.msra.gmra.mrb[88].mxu0 %v7387_v48  ;;  %v23584_v28 = vld [vmem:[%s31894_s6 + $0x188] sm:$0xff]  }
 0x5f5   :  { %v27576_v31 = vpop.f32.mrb[36].mxu0  ;;  %9124 = vmatprep.mubr.bf16.mxu1 %v7047_v38  ;;  %9189 = vmatprep.mubr.bf16.mxu0 %v7392_v19  ;;  %v27581_v54 = vpop.f32.mrb[36].mxu1 }
 0x5f6   :  { %21190 = vmatpush3.bf16.msra.mxu1 %v23580_v47  ;;  %21230 = vmatpush3.bf16.msra.mxu0 %v23581_v34  ;;  %v7019_v46 = vpop.f32.mrb[37].mxu0  ;;  %v27589_v22 = vpop.f32.mrb[37].mxu1 }
 0x5f7   :  { %v22568_v48 = vpop.f32.mrb[38].mxu0  ;;  %21191 = vmatprep.subr.bf16.mxu1 %v23582_v49  ;;  %21231 = vmatprep.subr.bf16.mxu0 %v23583_v8  ;;  %v27597_v19 = vpop.f32.mrb[38].mxu1  ;;  %v23588_v49 = vld [vmem:[%s31894_s6 + $0x190] sm:$0xff]  }
 0x5f8   :  { %v7049_v56 = vpack.c.bf16 %v22568_v48, %v27576_v31  ;;  %v7022_v38 = vpop.f32.mrb[39].mxu0  ;;  %v7402_v40 = vpack.c.bf16 %v27597_v19, %v27581_v54  ;;  %v27602_v23 = vpop.f32.mrb[39].mxu1  ;;  %v23589_v8 = vld [vmem:[%s31894_s6 + $0x210] sm:$0xff]   ;;  %v23590_v31 = vld [vmem:[%s31894_s6 + $0x1d8] sm:$0xff]  }
 0x5f9   :  { %v7048_v47 = vpack.c.bf16 %v7022_v38, %v7019_v46  ;;  %v7401_v34 = vpack.c.bf16 %v27602_v23, %v27589_v22  ;;  %v23591_v46 = vld [vmem:[%s31894_s6 + $0x258] sm:$0xff]  }
 0x5fa   :  { %21192 = vmatpush3.bf16.msra.mxu1 %v23584_v28  ;;  %21232 = vmatpush3.bf16.msra.mxu0 %v23585_v17 }
 0x5fb   :  { %21193 = vmatprep.subr.bf16.mxu1 %v23586_v59  ;;  %21233 = vmatprep.subr.bf16.mxu0 %v23587_v14 }
 0x5fc   :  { %9125 = vmatmul.mubr.bf16.gmra.mrb[76].mxu1 %v7043_v62  ;;  %9190 = vmatmul.mubr.bf16.gmra.mrb[92].mxu0 %v7388_v7 }
 0x5fd   :  { %v27624_v28 = vpop.f32.mrb[40].mxu0  ;;  %9132 = vmatprep.mubr.bf16.mxu1 %v7048_v47  ;;  %9197 = vmatprep.mubr.bf16.mxu0 %v7393_v18  ;;  %v27629_v17 = vpop.f32.mrb[40].mxu1 }
 0x5fe   :  { %21194 = vmatpush3.bf16.msra.mxu1 %v23588_v49  ;;  %21234 = vmatpush3.bf16.msra.mxu0 %v23589_v8  ;;  %v27631_v48 = vpop.f32.mrb[41].mxu0  ;;  %v27639_v58 = vpop.f32.mrb[41].mxu1  ;;  %v23596_v49 = vld [vmem:[%s31894_s6 + $0x1a0] sm:$0xff]  }
 0x5ff   :  { %v27641_v7 = vpop.f32.mrb[42].mxu0  ;;  %21195 = vmatprep.subr.bf16.mxu1 %v23590_v31  ;;  %21235 = vmatprep.subr.bf16.mxu0 %v23591_v46  ;;  %v27649_v18 = vpop.f32.mrb[42].mxu1  ;;  %v23597_v8 = vld [vmem:[%s31894_s6 + $0x220] sm:$0xff]   ;;  %v23598_v31 = vld [vmem:[%s31894_s6 + $0x1e8] sm:$0xff]  }
 0x600   :  { %v7741_v21 = vpack.c.bf16 %v27641_v7, %v27624_v28  ;;  %v27653_v62 = vpop.f32.mrb[43].mxu0  ;;  %v8094_v59 = vpack.c.bf16 %v27649_v18, %v27629_v17  ;;  %v27657_v14 = vpop.f32.mrb[43].mxu1  ;;  %v23599_v46 = vld [vmem:[%s31894_s6 + $0x268] sm:$0xff]   ;;  %v23627_v7 = vld [vmem:[%s31894_s6 + $0x360] sm:$0xff]  }
 0x601   :  { %v7740_v38 = vpack.c.bf16 %v27653_v62, %v27631_v48  ;;  %v8093_v47 = vpack.c.bf16 %v27657_v14, %v27639_v58  ;;  %v23619_v62 = vld [vmem:[%s31894_s6 + $0x350] sm:$0xff]   ;;  %v23655_v17 = vld [vmem:[%s31894_s6 + $0x420] sm:$0xff]  }
 0x602   :  { %21196 = vmatpush3.bf16.msra.mxu1 %v23592_v30  ;;  %21236 = vmatpush3.bf16.msra.mxu0 %v23593_v20  ;;  %v23656_v18 = vld [vmem:[%s31894_s6 + $0x3a0] sm:$0xff]  }
 0x603   :  { %21197 = vmatprep.subr.bf16.mxu1 %v23594_v3  ;;  %21237 = vmatprep.subr.bf16.mxu0 %v23595_v24 }
 0x604   :  { %9133 = vmatmul.mubr.bf16.gmra.mrb[80].mxu1 %v7044_v2  ;;  %9198 = vmatmul.mubr.bf16.gmra.mrb[96].mxu0 %v7389_v15 }
 0x605   :  { %v27681_v30 = vpop.f32.mrb[44].mxu0  ;;  %9140 = vmatprep.mubr.bf16.mxu1 %v7049_v56  ;;  %9205 = vmatprep.mubr.bf16.mxu0 %v7394_v35  ;;  %v27686_v20 = vpop.f32.mrb[44].mxu1  ;;  %v23606_v56 = vld [vmem:[%s31894_s6 + $0x1f8] sm:$0xff]  }
 0x606   :  { %21198 = vmatpush3.bf16.msra.mxu1 %v23596_v49  ;;  %21238 = vmatpush3.bf16.msra.mxu0 %v23597_v8  ;;  %v27688_v3 = vpop.f32.mrb[45].mxu0  ;;  %v27696_v29 = vpop.f32.mrb[45].mxu1  ;;  %v23607_v8 = vld [vmem:[%s31894_s6 + $0x278] sm:$0xff]  }
 0x607   :  { %v27698_v15 = vpop.f32.mrb[46].mxu0  ;;  %21199 = vmatprep.subr.bf16.mxu1 %v23598_v31  ;;  %21239 = vmatprep.subr.bf16.mxu0 %v23599_v46  ;;  %v27706_v35 = vpop.f32.mrb[46].mxu1  ;;  %v23604_v31 = vld [vmem:[%s31894_s6 + $0x1b0] sm:$0xff]  }
 0x608   :  { %v7743_v60 = vpack.c.bf16 %v27698_v15, %v27681_v30  ;;  %v27710_v2 = vpop.f32.mrb[47].mxu0  ;;  %v27714_v24 = vpop.f32.mrb[47].mxu1  ;;  %v23605_v46 = vld [vmem:[%s31894_s6 + $0x230] sm:$0xff]  }
 0x609   :  { %v7742_v49 = vpack.c.bf16 %v27710_v2, %v27688_v3  ;;  %v23635_v2 = vld [vmem:[%s31894_s6 + $0x370] sm:$0xff]  }
 0x60a   :  { %21200 = vmatpush3.bf16.msra.mxu1 %v23600_v41  ;;  %21240 = vmatpush3.bf16.msra.mxu0 %v23601_v25 }
 0x60b   :  { %21201 = vmatprep.subr.bf16.mxu1 %v23602_v11  ;;  %21241 = vmatprep.subr.bf16.mxu0 %v23603_v9  ;;  %v23608_v9 = vld [vmem:[%s31894_s6 + $0x1b8] sm:$0xff]  }
 0x60c   :  { %9141 = vmatmul.mubr.bf16.gmra.mrb[84].mxu1 %v7045_v43  ;;  %9206 = vmatmul.mubr.bf16.gmra.mrb[100].mxu0 %v7390_v33  ;;  %v23610_v33 = vld [vmem:[%s31894_s6 + $0x2c0] sm:$0xff]  }
 0x60d   :  { %v22627_v41 = vpop.f32.mrb[48].mxu0  ;;  %9246 = vmatprep.mubr.bf16.mxu1 %v7399_v10  ;;  %v27741_v25 = vpop.f32.mrb[48].mxu1 }
 0x60e   :  { %21202 = vmatpush3.bf16.msra.mxu1 %v23604_v31  ;;  %21242 = vmatpush3.bf16.msra.mxu0 %v23605_v46  ;;  %v7645_v11 = vpop.f32.mrb[49].mxu0  ;;  %v27749_v1 = vpop.f32.mrb[49].mxu1 }
 0x60f   :  { %v22628_v53 = vpop.f32.mrb[50].mxu0  ;;  %21203 = vmatprep.subr.bf16.mxu1 %v23606_v56  ;;  %21243 = vmatprep.subr.bf16.mxu0 %v23607_v8  ;;  %v27754_v27 = vpop.f32.mrb[50].mxu1  ;;  %v23612_v8 = vld [vmem:[%s31894_s6 + $0x280] sm:$0xff]  }
 0x610   :  { %v7745_v43 = vpack.c.bf16 %v22628_v53, %v22627_v41  ;;  %v7648_v39 = vpop.f32.mrb[51].mxu0  ;;  %v8098_v10 = vpack.c.bf16 %v27754_v27, %v27741_v25  ;;  %v27761_v31 = vpop.f32.mrb[51].mxu1  ;;  %v23613_v41 = vld [vmem:[%s31894_s6 + $0x300] sm:$0xff]   ;;  %v23648_v25 = vld [vmem:[%s31894_s6 + $0x3d0] sm:$0xff]  }
 0x611   :  { %v7744_v46 = vpack.c.bf16 %v7648_v39, %v7645_v11  ;;  %v8097_v56 = vpack.c.bf16 %v27761_v31, %v27749_v1  ;;  %v23614_v11 = vld [vmem:[%s31894_s6 + $0x2c8] sm:$0xff]   ;;  %v23649_v27 = vld [vmem:[%s31894_s6 + $0x410] sm:$0xff]  }
 0x612   :  { %21204 = vmatpush3.bf16.msra.mxu1 %v23608_v9  ;;  %21244 = vmatpush3.bf16.msra.mxu0 %v23609_v42  ;;  %v23615_v9 = vld [vmem:[%s31894_s6 + $0x348] sm:$0xff]  }
 0x613   :  { %9311 = vmatprep.mubr.bf16.mxu0 %v7744_v46  ;;  %21269 = vmatprep.subr.bf16.mxu1 %v23610_v33 }
 0x614   :  { %21309 = vmatprep.subr.bf16.mxu0 %v23611_v57 }
 0x615   :  { %9247 = vmatmul.mubr.bf16.vlgmr.msra.gmra.mrb[88].mxu1 %v7395_v61  ;;  %9312 = vmatmul.mubr.bf16.vlgmr.msra.gmra.mrb[104].mxu0 %v7740_v38  ;;  %v27783_v42 = vpop.f32.mrb[52].mxu0  ;;  %v27785_v53 = vpop.f32.mrb[52].mxu1  ;;  %v23617_v61 = vld [vmem:[%s31894_s6 + $0x308] sm:$0xff]  }
 0x616   :  { %9254 = vmatprep.mubr.bf16.mxu1 %v7400_v55  ;;  %9319 = vmatprep.mubr.bf16.mxu0 %v7745_v43  ;;  %v7661_v33 = vpop.f32.mrb[53].mxu0  ;;  %v27790_v39 = vpop.f32.mrb[53].mxu1  ;;  %v23618_v55 = vld [vmem:[%s31894_s6 + $0x2d0] sm:$0xff]  }
 0x617   :  { %21270 = vmatpush3.bf16.msra.mxu1 %v23612_v8  ;;  %21310 = vmatpush3.bf16.msra.mxu0 %v23613_v41  ;;  %v22632_v45 = vpop.f32.mrb[54].mxu0  ;;  %v27798_v48 = vpop.f32.mrb[54].mxu1  ;;  %v23620_v8 = vld [vmem:[%s31894_s6 + $0x290] sm:$0xff]  }
 0x618   :  { %v7747_v13 = vpack.c.bf16 %v22632_v45, %v27783_v42  ;;  %v7664_v63 = vpop.f32.mrb[55].mxu0  ;;  %21271 = vmatprep.subr.bf16.mxu1 %v23614_v11  ;;  %21311 = vmatprep.subr.bf16.mxu0 %v23615_v9  ;;  %v8100_v38 = vpack.c.bf16 %v27798_v48, %v27785_v53  ;;  %v27809_v43 = vpop.f32.mrb[55].mxu1  ;;  %v23621_v41 = vld [vmem:[%s31894_s6 + $0x310] sm:$0xff]   ;;  %v23622_v11 = vld [vmem:[%s31894_s6 + $0x2d8] sm:$0xff]  }
 0x619   :  { %v7746_v57 = vpack.c.bf16 %v7664_v63, %v7661_v33  ;;  %v8099_v46 = vpack.c.bf16 %v27809_v43, %v27790_v39  ;;  %v23623_v9 = vld [vmem:[%s31894_s6 + $0x358] sm:$0xff]   ;;  %v23658_v39 = vld [vmem:[%s31894_s6 + $0x428] sm:$0xff]   ;;  %v31960_v43 = vpack.c.bf16 %v27714_v24, %v27696_v29  ;;  %v23661_v29 = vld [vmem:[%s31894_s6 + $0x430] sm:$0xff]  }
 0x61a   :  { %v23662_v24 = vld [vmem:[%s31894_s6 + $0x3b0] sm:$0xff]   ;;  %v23663_v53 = vld [vmem:[%s31894_s6 + $0x3f8] sm:$0xff]  }
 0x61b   :  { %21272 = vmatpush3.bf16.msra.mxu1 %v23616_v6  ;;  %21312 = vmatpush3.bf16.msra.mxu0 %v23617_v61  ;;  %v23664_v48 = vld [vmem:[%s31894_s6 + $0x438] sm:$0xff]  }
 0x61c   :  { %21273 = vmatprep.subr.bf16.mxu1 %v23618_v55  ;;  %21313 = vmatprep.subr.bf16.mxu0 %v23619_v62  ;;  %v23628_v62 = vld [vmem:[%s31894_s6 + $0x2a0] sm:$0xff]  }
 0x61d   :  { %9255 = vmatmul.mubr.bf16.gmra.mrb[92].mxu1 %v7396_v12  ;;  %9320 = vmatmul.mubr.bf16.gmra.mrb[108].mxu0 %v7741_v21  ;;  %v27831_v42 = vpop.f32.mrb[56].mxu0  ;;  %v27833_v33 = vpop.f32.mrb[56].mxu1  ;;  %v23625_v12 = vld [vmem:[%s31894_s6 + $0x318] sm:$0xff]  }
 0x61e   :  { %9262 = vmatprep.mubr.bf16.mxu1 %v7401_v34  ;;  %9327 = vmatprep.mubr.bf16.mxu0 %v7746_v57  ;;  %v27838_v45 = vpop.f32.mrb[57].mxu0  ;;  %v27840_v6 = vpop.f32.mrb[57].mxu1  ;;  %v23626_v34 = vld [vmem:[%s31894_s6 + $0x2e0] sm:$0xff]  }
 0x61f   :  { %21274 = vmatpush3.bf16.msra.mxu1 %v23620_v8  ;;  %21314 = vmatpush3.bf16.msra.mxu0 %v23621_v41  ;;  %v27842_v4 = vpop.f32.mrb[58].mxu0  ;;  %v27850_v28 = vpop.f32.mrb[58].mxu1  ;;  %v23629_v57 = vld [vmem:[%s31894_s6 + $0x320] sm:$0xff]   ;;  %v23630_v8 = vld [vmem:[%s31894_s6 + $0x2e8] sm:$0xff]  }
 0x620   :  { %v7749_v22 = vpack.c.bf16 %v27842_v4, %v27831_v42  ;;  %v27854_v23 = vpop.f32.mrb[59].mxu0  ;;  %21275 = vmatprep.subr.bf16.mxu1 %v23622_v11  ;;  %21315 = vmatprep.subr.bf16.mxu0 %v23623_v9  ;;  %v8102_v21 = vpack.c.bf16 %v27850_v28, %v27833_v33  ;;  %v27864_v61 = vpop.f32.mrb[59].mxu1  ;;  %v23631_v41 = vld [vmem:[%s31894_s6 + $0x368] sm:$0xff]   ;;  %v23654_v42 = vld [vmem:[%s31894_s6 + $0x3e0] sm:$0xff]   ;;  %v23660_v4 = vld [vmem:[%s31894_s6 + $0x3f0] sm:$0xff]  }
 0x621   :  { %v7748_v63 = vpack.c.bf16 %v27854_v23, %v27838_v45  ;;  %v8101_v55 = vpack.c.bf16 %v27864_v61, %v27840_v6  ;;  %v23647_v45 = vld [vmem:[%s31894_s6 + $0x388] sm:$0xff]  }
 0x623   :  { %21276 = vmatpush3.bf16.msra.mxu1 %v23624_v16  ;;  %21316 = vmatpush3.bf16.msra.mxu0 %v23625_v12 }
 0x624   :  { %21277 = vmatprep.subr.bf16.mxu1 %v23626_v34  ;;  %21317 = vmatprep.subr.bf16.mxu0 %v23627_v7 }
 0x625   :  { %9263 = vmatmul.mubr.bf16.gmra.mrb[96].mxu1 %v7397_v50  ;;  %9328 = vmatmul.mubr.bf16.gmra.mrb[112].mxu0 %v7742_v49  ;;  %v27888_v11 = vpop.f32.mrb[60].mxu0  ;;  %v27890_v9 = vpop.f32.mrb[60].mxu1  ;;  %v23633_v50 = vld [vmem:[%s31894_s6 + $0x328] sm:$0xff]  }
 0x626   :  { %9270 = vmatprep.mubr.bf16.mxu1 %v7402_v40  ;;  %9335 = vmatprep.mubr.bf16.mxu0 %v7747_v13  ;;  %v27895_v16 = vpop.f32.mrb[61].mxu0  ;;  %v27897_v12 = vpop.f32.mrb[61].mxu1  ;;  %v23634_v40 = vld [vmem:[%s31894_s6 + $0x2f0] sm:$0xff]  }
 0x627   :  { %21278 = vmatpush3.bf16.msra.mxu1 %v23628_v62  ;;  %21318 = vmatpush3.bf16.msra.mxu0 %v23629_v57  ;;  %v27899_v26 = vpop.f32.mrb[62].mxu0  ;;  %v27907_v3 = vpop.f32.mrb[62].mxu1  ;;  %v23636_v62 = vld [vmem:[%s31894_s6 + $0x2b0] sm:$0xff]  }
 0x628   :  { %v7751_v54 = vpack.c.bf16 %v27899_v26, %v27888_v11  ;;  %v27911_v19 = vpop.f32.mrb[63].mxu0  ;;  %21279 = vmatprep.subr.bf16.mxu1 %v23630_v8  ;;  %21319 = vmatprep.subr.bf16.mxu0 %v23631_v41  ;;  %v27921_v13 = vpop.f32.mrb[63].mxu1  ;;  %v23637_v57 = vld [vmem:[%s31894_s6 + $0x330] sm:$0xff]   ;;  %v23638_v8 = vld [vmem:[%s31894_s6 + $0x2f8] sm:$0xff]  }
 0x629   :  { %v7750_v34 = vpack.c.bf16 %v27911_v19, %v27895_v16  ;;  %v8103_v7 = vpack.c.bf16 %v27921_v13, %v27897_v12  ;;  %v23639_v41 = vld [vmem:[%s31894_s6 + $0x378] sm:$0xff]  }
 0x62b   :  { %21280 = vmatpush3.bf16.msra.mxu1 %v23632_v51  ;;  %21320 = vmatpush3.bf16.msra.mxu0 %v23633_v50 }
 0x62c   :  { %21281 = vmatprep.subr.bf16.mxu1 %v23634_v40  ;;  %21321 = vmatprep.subr.bf16.mxu0 %v23635_v2 }
 0x62d   :  { %9271 = vmatmul.mubr.bf16.gmra.mrb[100].mxu1 %v7398_v37  ;;  %9336 = vmatmul.mubr.bf16.gmra.mrb[116].mxu0 %v7743_v60  ;;  %v22643_v51 = vpop.f32.mrb[64].mxu0  ;;  %v27945_v50 = vpop.f32.mrb[64].mxu1  ;;  %v23642_v60 = vld [vmem:[%s31894_s6 + $0x3c0] sm:$0xff]  }
 0x62e   :  { %v7709_v40 = vpop.f32.mrb[65].mxu0  ;;  %9441 = vmatprep.mubr.bf16.mxu0 %v8097_v56  ;;  %v27950_v2 = vpop.f32.mrb[65].mxu1 }
 0x62f   :  { %21282 = vmatpush3.bf16.msra.mxu1 %v23636_v62  ;;  %21322 = vmatpush3.bf16.msra.mxu0 %v23637_v57  ;;  %v22644_v49 = vpop.f32.mrb[66].mxu0  ;;  %v27958_v37 = vpop.f32.mrb[66].mxu1  ;;  %v23643_v62 = vld [vmem:[%s31894_s6 + $0x400] sm:$0xff]  }
 0x630   :  { %v7753_v30 = vpack.c.bf16 %v22644_v49, %v22643_v51  ;;  %v7712_v15 = vpop.f32.mrb[67].mxu0  ;;  %21283 = vmatprep.subr.bf16.mxu1 %v23638_v8  ;;  %21323 = vmatprep.subr.bf16.mxu0 %v23639_v41  ;;  %v8106_v1 = vpack.c.bf16 %v27958_v37, %v27945_v50  ;;  %v27965_v31 = vpop.f32.mrb[67].mxu1  ;;  %v23644_v57 = vld [vmem:[%s31894_s6 + $0x380] sm:$0xff]   ;;  %v23645_v8 = vld [vmem:[%s31894_s6 + $0x3c8] sm:$0xff]  }
 0x631   :  { %v7752_v56 = vpack.c.bf16 %v7712_v15, %v7709_v40  ;;  %v8105_v49 = vpack.c.bf16 %v27965_v31, %v27950_v2  ;;  %v23646_v41 = vld [vmem:[%s31894_s6 + $0x408] sm:$0xff]   ;;  %v28119_v37 = vld [vmem:[%s31895_s7] ss:$0 sm:$0xff] }
 0x633   :  { %21284 = vmatpush3.bf16.msra.mxu1 %v23640_v32  ;;  %21324 = vmatpush3.bf16.msra.mxu0 %v23641_v0 }
 0x634   :  { %9376 = vmatprep.mubr.bf16.mxu1 %v7752_v56  ;;  %21349 = vmatprep.subr.bf16.mxu1 %v23642_v60  ;;  %v23651_v56 = vld [vmem:[%s31894_s6 + $0x3d8] sm:$0xff]  }
 0x635   :  { %22689 = vmatprep.subr.bf16.mxu0 %v23643_v62  ;;  %v22647_v51 = vpop.f32.mrb[68].mxu0  ;;  %v27981_v40 = vpop.f32.mrb[68].mxu1 }
 0x636   :  { %9377 = vmatmul.mubr.bf16.vlgmr.msra.gmra.mrb[104].mxu1 %v7748_v63  ;;  %9442 = vmatmul.mubr.bf16.vlgmr.msra.gmra.mrb[120].mxu0 %v8093_v47  ;;  %v7725_v32 = vpop.f32.mrb[69].mxu0  ;;  %v27989_v0 = vpop.f32.mrb[69].mxu1 }
 0x637   :  { %9384 = vmatprep.mubr.bf16.mxu1 %v7753_v30  ;;  %9449 = vmatprep.mubr.bf16.mxu0 %v8098_v10  ;;  %v22648_v15 = vpop.f32.mrb[70].mxu0  ;;  %v27994_v60 = vpop.f32.mrb[70].mxu1  ;;  %v23650_v30 = vld [vmem:[%s31894_s6 + $0x390] sm:$0xff]  }
 0x638   :  { %21350 = vmatpush3.bf16.msra.mxu1 %v23644_v57  ;;  %22690 = vmatpush3.bf16.msra.mxu0 %v23643_v62  ;;  %v7755_v23 = vpack.c.bf16 %v22648_v15, %v22647_v51  ;;  %v7728_v58 = vpop.f32.mrb[71].mxu0  ;;  %v8108_v14 = vpack.c.bf16 %v27994_v60, %v27981_v40  ;;  %v28001_v47 = vpop.f32.mrb[71].mxu1  ;;  %v23652_v62 = vld [vmem:[%s31894_s6 + $0x418] sm:$0xff]  }
 0x639   :  { %21351 = vmatprep.subr.bf16.mxu1 %v23645_v8  ;;  %22691 = vmatprep.subr.bf16.mxu0 %v23646_v41  ;;  %v7754_v10 = vpack.c.bf16 %v7728_v58, %v7725_v32  ;;  %v8107_v63 = vpack.c.bf16 %v28001_v47, %v27989_v0  ;;  %v23653_v57 = vld [vmem:[%s31894_s6 + $0x398] sm:$0xff]  }
 0x63c   :  { %21352 = vmatpush3.bf16.msra.mxu1 %v23647_v45  ;;  %22692 = vmatpush3.bf16.msra.mxu0 %v23646_v41 }
 0x63d   :  { %21353 = vmatprep.subr.bf16.mxu1 %v23648_v25  ;;  %22693 = vmatprep.subr.bf16.mxu0 %v23649_v27 }
 0x63e   :  { %9385 = vmatmul.mubr.bf16.gmra.mrb[108].mxu1 %v7749_v22  ;;  %9450 = vmatmul.mubr.bf16.gmra.mrb[124].mxu0 %v8094_v59  ;;  %v23657_v59 = vld [vmem:[%s31894_s6 + $0x3e8] sm:$0xff]   ;;  %v23665_v22 = vld [vmem:[%s31894_s6 + $0x3b8] sm:$0xff]  }
 0x63f   :  { %9457 = vmatprep.mubr.bf16.mxu0 %v8099_v46  ;;  %9392 = vmatprep.mubr.bf16.mxu1 %v7754_v10  ;;  %v23659_v46 = vld [vmem:[%s31894_s6 + $0x3a8] sm:$0xff]  }
 0x640   :  { %21354 = vmatpush3.bf16.msra.mxu1 %v23650_v30  ;;  %22694 = vmatpush3.bf16.msra.mxu0 %v23649_v27 }
 0x641   :  { %21355 = vmatprep.subr.bf16.mxu1 %v23651_v56  ;;  %22695 = vmatprep.subr.bf16.mxu0 %v23652_v62 }
 0x644   :  { %21356 = vmatpush3.bf16.msra.mxu1 %v23653_v57  ;;  %22696 = vmatpush3.bf16.msra.mxu0 %v23652_v62 }
 0x645   :  { %21357 = vmatprep.subr.bf16.mxu1 %v23654_v42  ;;  %22697 = vmatprep.subr.bf16.mxu0 %v23655_v17 }
 0x646   :  { %9393 = vmatmul.mubr.bf16.gmra.mrb[112].mxu1 %v7750_v34  ;;  %9458 = vmatmul.mubr.bf16.gmra.mrb[128].mxu0 %v31960_v43 }
 0x647   :  { %9400 = vmatprep.mubr.bf16.mxu1 %v7755_v23  ;;  %9465 = vmatprep.mubr.bf16.mxu0 %v8100_v38  ;;  %v31961_v38 = vpack.c.bf16 %v27706_v35, %v27686_v20 }
 0x648   :  { %21358 = vmatpush3.bf16.msra.mxu1 %v23656_v18  ;;  %22698 = vmatpush3.bf16.msra.mxu0 %v23655_v17 }
 0x649   :  { %21359 = vmatprep.subr.bf16.mxu1 %v23657_v59  ;;  %22699 = vmatprep.subr.bf16.mxu0 %v23658_v39  ;;  %v23666_v59 = vld [vmem:[%s31889_s0] sm:$0xff]  }
 0x64c   :  { %21360 = vmatpush3.bf16.msra.mxu1 %v23659_v46  ;;  %22700 = vmatpush3.bf16.msra.mxu0 %v23658_v39  ;;  %v23668_v46 = vld [vmem:[%s31889_s0 + $0x80] sm:$0xff]  }
 0x64d   :  { %21361 = vmatprep.subr.bf16.mxu1 %v23660_v4  ;;  %22701 = vmatprep.subr.bf16.mxu0 %v23661_v29 }
 0x64e   :  { %9401 = vmatmul.mubr.bf16.gmra.mrb[116].mxu1 %v7751_v54  ;;  %9466 = vmatmul.mubr.bf16.gmra.mrb[132].mxu0 %v31961_v38 }
 0x64f   :  { %22705 = vmatprep.mubr.msk.bf16.mxu0 %vm439_vm0, %v26981_v5  ;;  %9506 = vmatprep.mubr.bf16.mxu1 %v8105_v49  ;;  %v31962_v5 = vpack.c.bf16 %v27907_v3, %v27890_v9 }
 0x650   :  { %21362 = vmatpush3.bf16.msra.mxu1 %v23662_v24  ;;  %22702 = vmatpush3.bf16.msra.mxu0 %v23661_v29 }
 0x651   :  { %21363 = vmatprep.subr.bf16.mxu1 %v23663_v53  ;;  %22703 = vmatprep.subr.bf16.mxu0 %v23664_v48 }
 0x654   :  { %21364 = vmatpush3.bf16.msra.mxu1 %v23665_v22  ;;  %22704 = vmatpush3.bf16.msra.mxu0 %v23664_v48 }
 0x657   :  { %9507 = vmatmul.mubr.bf16.vlgmr.msra.gmra.mrb[120].mxu1 %v8101_v55  ;;  %22706 = vmatmul.mubr.msk.bf16.vlgmr.msra.gmra.mrb[136].mxu0 %vm439_vm0, %v26993_v44 }
 0x658   :  { %9514 = vmatprep.mubr.bf16.mxu1 %v8106_v1  ;;  %22709 = vmatprep.mubr.msk.bf16.mxu0 %vm439_vm0, %v27005_v36 }
 0x65f   :  { %9515 = vmatmul.mubr.bf16.gmra.mrb[124].mxu1 %v8102_v21  ;;  %22710 = vmatmul.mubr.msk.bf16.gmra.mrb[140].mxu0 %vm439_vm0, %v27016_v52 }
 0x660   :  { %9522 = vmatprep.mubr.bf16.mxu1 %v8107_v63  ;;  %22761 = vmatprep.mubr.msk.bf16.mxu0 %vm439_vm0, %v23668_v46 }
 0x667   :  { %9523 = vmatmul.mubr.bf16.gmra.mrb[128].mxu1 %v8103_v7 }
 0x668   :  { %9530 = vmatprep.mubr.bf16.mxu1 %v8108_v14 }
 0x66f   :  { %9531 = vmatmul.mubr.bf16.gmra.mrb[132].mxu1 %v31962_v5 }
 0x670   :  { %22721 = vmatprep.mubr.msk.bf16.mxu1 %vm439_vm0, %v23666_v59 }
 0x6a7   :  { %v21085_v44 = vpop.f32.mrb[72].mxu0 }
 0x6a8   :  { %v21086_v36 = vpop.f32.mrb[73].mxu0 }
 0x6a9   :  { %v21087_v20 = vadd.f32 %v21086_v36, %v21085_v44  ;;  %v21088_v35 = vpop.f32.mrb[74].mxu0 }
 0x6aa   :  { %v21089_v33 = vpop.f32.mrb[75].mxu0 }
 0x6ab   :  { %v21090_v6 = vadd.f32 %v21089_v33, %v21088_v35  ;;  %v9054_v41 = vadd.f32 %v21087_v20, %v28119_v37 }
 0x6ad   :  { %v9057_v45 = vadd.f32 %v21090_v6, %v28119_v37 }
 0x6af   :  { %v21091_v52 = vpop.f32.mrb[76].mxu0 }
 0x6b0   :  { %v21092_v28 = vpop.f32.mrb[77].mxu0 }
 0x6b1   :  { %v21093_v21 = vadd.f32 %v21092_v28, %v21091_v52  ;;  %v21094_v61 = vpop.f32.mrb[78].mxu0 }
 0x6b2   :  { %v21095_v55 = vpop.f32.mrb[79].mxu0 }
 0x6b3   :  { %v21096_v11 = vadd.f32 %v21095_v55, %v21094_v61  ;;  %v9062_v62 = vadd.f32 %v21093_v21, %v28119_v37 }
 0x6b5   :  { %v9065_v4 = vadd.f32 %v21096_v11, %v28119_v37 }
 0x6b7   :  { %v21097_v16 = vpop.f32.mrb[80].mxu0 }
 0x6b8   :  { %v21098_v12 = vpop.f32.mrb[81].mxu0 }
 0x6b9   :  { %v21099_v26 = vadd.f32 %v21098_v12, %v21097_v16  ;;  %v21100_v54 = vpop.f32.mrb[82].mxu0 }
 0x6ba   :  { %v21101_v19 = vpop.f32.mrb[83].mxu0 }
 0x6bb   :  { %v21102_v13 = vadd.f32 %v21101_v19, %v21100_v54  ;;  %v9070_v35 = vadd.f32 %v21099_v26, %v28119_v37 }
 0x6bd   :  { %v9073_v55 = vadd.f32 %v21102_v13, %v28119_v37 }
 0x6bf   :  { %v21103_v9 = vpop.f32.mrb[84].mxu0 }
 0x6c0   :  { %v21104_v3 = vpop.f32.mrb[85].mxu0 }
 0x6c1   :  { %v28112_v34 = vadd.f32 %v21104_v3, %v21103_v9  ;;  %v21106_v7 = vpop.f32.mrb[86].mxu0 }
 0x6c2   :  { %v21107_v50 = vpop.f32.mrb[87].mxu0 }
 0x6c3   :  { %v28114_v2 = vadd.f32 %v21107_v50, %v21106_v7 }
 0x6c7   :  { %v21125_v1 = vpop.f32.mrb[72].mxu1  ;;  %v21165_v31 = vpop.f32.mrb[88].mxu0 }
 0x6c8   :  { %v21126_v49 = vpop.f32.mrb[73].mxu1  ;;  %v21166_v8 = vpop.f32.mrb[89].mxu0 }
 0x6c9   :  { %v21127_v51 = vadd.f32 %v21126_v49, %v21125_v1  ;;  %v21167_v40 = vadd.f32 %v21166_v8, %v21165_v31  ;;  %v21128_v32 = vpop.f32.mrb[74].mxu1  ;;  %v21168_v0 = vpop.f32.mrb[90].mxu0  ;;  %v9078_v1 = vadd.f32 %v28112_v34, %v28119_v37 }
 0x6ca   :  { %v21129_v15 = vpop.f32.mrb[75].mxu1  ;;  %v21169_v60 = vpop.f32.mrb[91].mxu0 }
 0x6cb   :  { %v9119_v23 = vadd.f32 %v21127_v51, %v9054_v41  ;;  %v21130_v58 = vadd.f32 %v21129_v15, %v21128_v32  ;;  %v21170_v14 = vadd.f32 %v21169_v60, %v21168_v0 }
 0x6cd   :  { %v28123_v47 = vadd.f32 %v21167_v40, %v9119_v23  ;;  %v9122_v25 = vadd.f32 %v21130_v58, %v9057_v45  ;;  %v9081_v40 = vadd.f32 %v28114_v2, %v28119_v37 }
 0x6cf   :  { %v28125_v27 = vadd.f32 %v21170_v14, %v9122_v25  ;;  %v21131_v10 = vpop.f32.mrb[76].mxu1  ;;  %v21171_v63 = vpop.f32.mrb[92].mxu0 }
 0x6d0   :  { %v21132_v30 = vpop.f32.mrb[77].mxu1  ;;  %v21172_v56 = vpop.f32.mrb[93].mxu0 }
 0x6d1   :  { %v21133_v57 = vadd.f32 %v21132_v30, %v21131_v10  ;;  %v21173_v42 = vadd.f32 %v21172_v56, %v21171_v63  ;;  %v21134_v17 = vpop.f32.mrb[78].mxu1  ;;  %v21174_v18 = vpop.f32.mrb[94].mxu0 }
 0x6d2   :  { %v21135_v39 = vpop.f32.mrb[79].mxu1  ;;  %v21175_v43 = vpop.f32.mrb[95].mxu0 }
 0x6d3   :  { %v9127_v29 = vadd.f32 %v21133_v57, %v9062_v62  ;;  %v21136_v24 = vadd.f32 %v21135_v39, %v21134_v17  ;;  %v21176_v53 = vadd.f32 %v21175_v43, %v21174_v18 }
 0x6d5   :  { %v28137_v48 = vadd.f32 %v21173_v42, %v9127_v29  ;;  %v9130_v38 = vadd.f32 %v21136_v24, %v9065_v4 }
 0x6d7   :  { %v28139_v22 = vadd.f32 %v21176_v53, %v9130_v38  ;;  %v21137_v5 = vpop.f32.mrb[80].mxu1  ;;  %v21177_v44 = vpop.f32.mrb[96].mxu0 }
 0x6d8   :  { %v21138_v36 = vpop.f32.mrb[81].mxu1  ;;  %v21178_v20 = vpop.f32.mrb[97].mxu0 }
 0x6d9   :  { %v21139_v33 = vadd.f32 %v21138_v36, %v21137_v5  ;;  %v21179_v6 = vadd.f32 %v21178_v20, %v21177_v44  ;;  %v21140_v52 = vpop.f32.mrb[82].mxu1  ;;  %v21180_v28 = vpop.f32.mrb[98].mxu0 }
 0x6da   :  { %v21141_v21 = vpop.f32.mrb[83].mxu1  ;;  %v21181_v61 = vpop.f32.mrb[99].mxu0 }
 0x6db   :  { %v9135_v11 = vadd.f32 %v21139_v33, %v9070_v35  ;;  %v21142_v16 = vadd.f32 %v21141_v21, %v21140_v52  ;;  %v21182_v12 = vadd.f32 %v21181_v61, %v21180_v28 }
 0x6dd   :  { %v28143_v54 = vadd.f32 %v21179_v6, %v9135_v11  ;;  %v9138_v19 = vadd.f32 %v21142_v16, %v9073_v55 }
 0x6df   :  { %v28145_v9 = vadd.f32 %v21182_v12, %v9138_v19  ;;  %v21143_v3 = vpop.f32.mrb[84].mxu1  ;;  %v21183_v7 = vpop.f32.mrb[100].mxu0 }
 0x6e0   :  { %v21144_v50 = vpop.f32.mrb[85].mxu1  ;;  %v21184_v26 = vpop.f32.mrb[101].mxu0 }
 0x6e1   :  { %v21145_v31 = vadd.f32 %v21144_v50, %v21143_v3  ;;  %v21185_v49 = vadd.f32 %v21184_v26, %v21183_v7  ;;  %v21146_v8 = vpop.f32.mrb[86].mxu1  ;;  %v21186_v41 = vpop.f32.mrb[102].mxu0 }
 0x6e2   :  { %v21147_v13 = vpop.f32.mrb[87].mxu1  ;;  %v21187_v51 = vpop.f32.mrb[103].mxu0 }
 0x6e3   :  { %v9143_v32 = vadd.f32 %v21145_v31, %v9078_v1  ;;  %v21148_v0 = vadd.f32 %v21147_v13, %v21146_v8  ;;  %v21188_v15 = vadd.f32 %v21187_v51, %v21186_v41 }
 0x6e5   :  { %v9146_v60 = vadd.f32 %v21148_v0, %v9081_v40  ;;  %v9208_v45 = vadd.f32 %v21185_v49, %v9143_v32 }
 0x6e7   :  { %v9211_v23 = vadd.f32 %v21188_v15, %v9146_v60 }
 0x6e8   :  { %v21205_v58 = vpop.f32.mrb[88].mxu1  ;;  %v21245_v14 = vpop.f32.mrb[104].mxu0 }
 0x6e9   :  { %v21206_v25 = vpop.f32.mrb[89].mxu1  ;;  %v21246_v10 = vpop.f32.mrb[105].mxu0 }
 0x6ea   :  { %v21207_v34 = vadd.f32 %v21206_v25, %v21205_v58  ;;  %v21247_v63 = vadd.f32 %v21246_v10, %v21245_v14  ;;  %v21208_v30 = vpop.f32.mrb[90].mxu1  ;;  %v21248_v56 = vpop.f32.mrb[106].mxu0 }
 0x6eb   :  { %v21209_v62 = vpop.f32.mrb[91].mxu1  ;;  %v21249_v57 = vpop.f32.mrb[107].mxu0 }
 0x6ec   :  { %v9249_v42 = vadd.f32 %v21207_v34, %v28123_v47  ;;  %v21210_v17 = vadd.f32 %v21209_v62, %v21208_v30  ;;  %v21250_v2 = vadd.f32 %v21249_v57, %v21248_v56 }
 0x6ee   :  { %v9252_v37 = vadd.f32 %v21210_v17, %v28125_v27  ;;  %v9314_v18 = vadd.f32 %v21247_v63, %v9249_v42 }
 0x6f0   :  { %v21211_v59 = vpop.f32.mrb[92].mxu1  ;;  %v21251_v39 = vpop.f32.mrb[108].mxu0  ;;  %v9317_v43 = vadd.f32 %v21250_v2, %v9252_v37 }
 0x6f1   :  { %v21212_v46 = vpop.f32.mrb[93].mxu1  ;;  %v21252_v4 = vpop.f32.mrb[109].mxu0 }
 0x6f2   :  { %v21213_v29 = vadd.f32 %v21212_v46, %v21211_v59  ;;  %v21253_v24 = vadd.f32 %v21252_v4, %v21251_v39  ;;  %v21214_v53 = vpop.f32.mrb[94].mxu1  ;;  %v21254_v38 = vpop.f32.mrb[110].mxu0 }
 0x6f3   :  { %v21215_v5 = vpop.f32.mrb[95].mxu1  ;;  %v21255_v44 = vpop.f32.mrb[111].mxu0 }
 0x6f4   :  { %v9257_v36 = vadd.f32 %v21213_v29, %v28137_v48  ;;  %v21216_v20 = vadd.f32 %v21215_v5, %v21214_v53  ;;  %v21256_v47 = vadd.f32 %v21255_v44, %v21254_v38 }
 0x6f6   :  { %v9260_v35 = vadd.f32 %v21216_v20, %v28139_v22  ;;  %v9322_v33 = vadd.f32 %v21253_v24, %v9257_v36 }
 0x6f8   :  { %v21217_v27 = vpop.f32.mrb[96].mxu1  ;;  %v21257_v6 = vpop.f32.mrb[112].mxu0  ;;  %v9325_v52 = vadd.f32 %v21256_v47, %v9260_v35 }
 0x6f9   :  { %v21218_v28 = vpop.f32.mrb[97].mxu1  ;;  %v21258_v21 = vpop.f32.mrb[113].mxu0 }
 0x6fa   :  { %v21219_v61 = vadd.f32 %v21218_v28, %v21217_v27  ;;  %v21259_v55 = vadd.f32 %v21258_v21, %v21257_v6  ;;  %v21220_v11 = vpop.f32.mrb[98].mxu1  ;;  %v21260_v16 = vpop.f32.mrb[114].mxu0 }
 0x6fb   :  { %v21221_v12 = vpop.f32.mrb[99].mxu1  ;;  %v21261_v19 = vpop.f32.mrb[115].mxu0 }
 0x6fc   :  { %v9265_v3 = vadd.f32 %v21219_v61, %v28143_v54  ;;  %v21222_v7 = vadd.f32 %v21221_v12, %v21220_v11  ;;  %v21262_v48 = vadd.f32 %v21261_v19, %v21260_v16 }
 0x6fe   :  { %v9268_v50 = vadd.f32 %v21222_v7, %v28145_v9  ;;  %v9330_v26 = vadd.f32 %v21259_v55, %v9265_v3 }
 0x700   :  { %v21223_v22 = vpop.f32.mrb[100].mxu1  ;;  %v21263_v1 = vpop.f32.mrb[116].mxu0  ;;  %v9333_v31 = vadd.f32 %v21262_v48, %v9268_v50 }
 0x701   :  { %v21224_v49 = vpop.f32.mrb[101].mxu1  ;;  %v21264_v8 = vpop.f32.mrb[117].mxu0 }
 0x702   :  { %v21225_v41 = vadd.f32 %v21224_v49, %v21223_v22  ;;  %v21265_v13 = vadd.f32 %v21264_v8, %v21263_v1  ;;  %v21226_v51 = vpop.f32.mrb[102].mxu1  ;;  %v21266_v40 = vpop.f32.mrb[118].mxu0 }
 0x703   :  { %v21227_v32 = vpop.f32.mrb[103].mxu1  ;;  %v21267_v0 = vpop.f32.mrb[119].mxu0 }
 0x704   :  { %v9273_v15 = vadd.f32 %v21225_v41, %v9208_v45  ;;  %v21228_v60 = vadd.f32 %v21227_v32, %v21226_v51  ;;  %v21268_v58 = vadd.f32 %v21267_v0, %v21266_v40 }
 0x706   :  { %v9276_v54 = vadd.f32 %v21228_v60, %v9211_v23  ;;  %v9338_v14 = vadd.f32 %v21265_v13, %v9273_v15 }
 0x708   :  { %v28157_v25 = vadd.f32 %v21268_v58, %v9276_v54 }
 0x709   :  { %v21285_v9 = vpop.f32.mrb[104].mxu1  ;;  %v21325_v10 = vpop.f32.mrb[120].mxu0 }
 0x70a   :  { %v21286_v34 = vpop.f32.mrb[105].mxu1  ;;  %v21326_v63 = vpop.f32.mrb[121].mxu0 }
 0x70b   :  { %v21287_v30 = vadd.f32 %v21286_v34, %v21285_v9  ;;  %v21327_v56 = vadd.f32 %v21326_v63, %v21325_v10  ;;  %v21288_v62 = vpop.f32.mrb[106].mxu1  ;;  %v21328_v57 = vpop.f32.mrb[122].mxu0 }
 0x70c   :  { %v21289_v42 = vpop.f32.mrb[107].mxu1  ;;  %v21329_v17 = vpop.f32.mrb[123].mxu0 }
 0x70d   :  { %v9379_v2 = vadd.f32 %v21287_v30, %v9314_v18  ;;  %v21290_v37 = vadd.f32 %v21289_v42, %v21288_v62  ;;  %v21330_v59 = vadd.f32 %v21329_v17, %v21328_v57 }
 0x70f   :  { %v9382_v45 = vadd.f32 %v21290_v37, %v9317_v43  ;;  %v9444_v39 = vadd.f32 %v21327_v56, %v9379_v2 }
 0x711   :  { %v21291_v46 = vpop.f32.mrb[108].mxu1  ;;  %v21331_v23 = vpop.f32.mrb[124].mxu0  ;;  %v9447_v4 = vadd.f32 %v21330_v59, %v9382_v45 }
 0x712   :  { %v21292_v29 = vpop.f32.mrb[109].mxu1  ;;  %v21332_v24 = vpop.f32.mrb[125].mxu0 }
 0x713   :  { %v21293_v53 = vadd.f32 %v21292_v29, %v21291_v46  ;;  %v21333_v38 = vadd.f32 %v21332_v24, %v21331_v23  ;;  %v21294_v5 = vpop.f32.mrb[110].mxu1  ;;  %v21334_v44 = vpop.f32.mrb[126].mxu0 }
 0x714   :  { %v21295_v36 = vpop.f32.mrb[111].mxu1  ;;  %v21335_v20 = vpop.f32.mrb[127].mxu0 }
 0x715   :  { %v9387_v47 = vadd.f32 %v21293_v53, %v9322_v33  ;;  %v21296_v35 = vadd.f32 %v21295_v36, %v21294_v5  ;;  %v21336_v27 = vadd.f32 %v21335_v20, %v21334_v44 }
 0x717   :  { %v9390_v6 = vadd.f32 %v21296_v35, %v9325_v52  ;;  %v9452_v18 = vadd.f32 %v21333_v38, %v9387_v47 }
 0x719   :  { %v21297_v28 = vpop.f32.mrb[112].mxu1  ;;  %v21337_v21 = vpop.f32.mrb[128].mxu0  ;;  %v9455_v43 = vadd.f32 %v21336_v27, %v9390_v6 }
 0x71a   :  { %v21298_v61 = vpop.f32.mrb[113].mxu1  ;;  %v21338_v55 = vpop.f32.mrb[129].mxu0 }
 0x71b   :  { %v21299_v11 = vadd.f32 %v21298_v61, %v21297_v28  ;;  %v21339_v16 = vadd.f32 %v21338_v55, %v21337_v21  ;;  %v21300_v12 = vpop.f32.mrb[114].mxu1  ;;  %v21340_v19 = vpop.f32.mrb[130].mxu0 }
 0x71c   :  { %v21301_v3 = vpop.f32.mrb[115].mxu1  ;;  %v21341_v7 = vpop.f32.mrb[131].mxu0 }
 0x71d   :  { %v9395_v48 = vadd.f32 %v21299_v11, %v9330_v26  ;;  %v21302_v50 = vadd.f32 %v21301_v3, %v21300_v12  ;;  %v21342_v22 = vadd.f32 %v21341_v7, %v21340_v19 }
 0x71f   :  { %v9398_v1 = vadd.f32 %v21302_v50, %v9333_v31  ;;  %v9460_v33 = vadd.f32 %v21339_v16, %v9395_v48 }
 0x721   :  { %v21303_v49 = vpop.f32.mrb[116].mxu1  ;;  %v21343_v8 = vpop.f32.mrb[132].mxu0  ;;  %v9463_v52 = vadd.f32 %v21342_v22, %v9398_v1 }
 0x722   :  { %v21304_v41 = vpop.f32.mrb[117].mxu1  ;;  %v21344_v13 = vpop.f32.mrb[133].mxu0 }
 0x723   :  { %v21305_v51 = vadd.f32 %v21304_v41, %v21303_v49  ;;  %v21345_v40 = vadd.f32 %v21344_v13, %v21343_v8  ;;  %v21306_v32 = vpop.f32.mrb[118].mxu1  ;;  %v21346_v0 = vpop.f32.mrb[134].mxu0 }
 0x724   :  { %v21307_v15 = vpop.f32.mrb[119].mxu1  ;;  %v21347_v60 = vpop.f32.mrb[135].mxu0 }
 0x725   :  { %v9403_v58 = vadd.f32 %v21305_v51, %v9338_v14  ;;  %v21308_v54 = vadd.f32 %v21307_v15, %v21306_v32  ;;  %v21348_v9 = vadd.f32 %v21347_v60, %v21346_v0 }
 0x727   :  { %v9406_v26 = vadd.f32 %v21308_v54, %v28157_v25  ;;  %v9468_v10 = vadd.f32 %v21345_v40, %v9403_v58 }
 0x729   :  { %v28160_v34 = vadd.f32 %v21348_v9, %v9406_v26  ;;  %v23667_v9 = vld [vmem:[%s31889_s0 + $0x8] sm:$0xff]  }
 0x72a   :  { %v21365_v31 = vpop.f32.mrb[120].mxu1  ;;  %v22707_v63 = vpop.f32.mrb[136].mxu0  ;;  %v23669_v26 = vld [vmem:[%s31889_s0 + $0x88] sm:$0xff]  }
 0x72b   :  { %v21366_v30 = vpop.f32.mrb[121].mxu1  ;;  %v9573_v56 = vpop.f32.mrb[137].mxu0 }
 0x72c   :  { %v21367_v62 = vadd.f32 %v21366_v30, %v21365_v31  ;;  %v21368_v57 = vpop.f32.mrb[122].mxu1  ;;  %v22708_v42 = vpop.f32.mrb[138].mxu0  ;;  %v23671_v31 = vld [vmem:[%s31889_s0 + $0x18] sm:$0xff]   ;;  %v23672_v30 = vld [vmem:[%s31889_s0 + $0x20] sm:$0xff]  }
 0x72d   :  { %v21369_v17 = vpop.f32.mrb[123].mxu1  ;;  %v9576_v2 = vpop.f32.mrb[139].mxu0 }
 0x72e   :  { %v9509_v37 = vadd.f32 %v21367_v62, %v9444_v39  ;;  %v21370_v59 = vadd.f32 %v21369_v17, %v21368_v57  ;;  %v23694_v62 = vld [vmem:[%s31896_s8 + $0x4] ss:$8 sps:$4 sm:$0xff]   ;;  %v23674_v17 = vld [vmem:[%s31889_s0 + $0x30] sm:$0xff]  }
 0x72f   :  { %v23673_v57 = vld [vmem:[%s31889_s0 + $0x28] sm:$0xff]  }
 0x730   :  { %v9574_v45 = vadd.f32 %v9573_v56, %v9509_v37  ;;  %v9512_v14 = vadd.f32 %v21370_v59, %v9447_v4  ;;  %v23686_v56 = vld [vmem:[%s31889_s0 + $0xa0] sm:$0xff]   ;;  %v23675_v37 = vld [vmem:[%s31889_s0 + $0x38] sm:$0xff]  }
 0x731   :  { %v23689_v59 = vld [vmem:[%s31889_s0 + $0xb8] sm:$0xff]  }
 0x732   :  { %v9577_v46 = vadd.f32 %v9576_v2, %v9512_v14  ;;  %v21371_v23 = vpop.f32.mrb[124].mxu1  ;;  %v22711_v29 = vpop.f32.mrb[140].mxu0  ;;  %v9877_v53 = vmax.f32 %v9574_v45, 0.0  ;;  %v23688_v2 = vld [vmem:[%s31889_s0 + $0xb0] sm:$0xff]   ;;  %v23676_v45 = vld [vmem:[%s31889_s0 + $0x40] sm:$0xff]  }
 0x733   :  { %v21372_v25 = vpop.f32.mrb[125].mxu1  ;;  %v9589_v24 = vpop.f32.mrb[141].mxu0  ;;  %v23711_v14 = vld [vmem:[%s31889_s0 + $0xc0] sm:$0xff]  }
 0x734   :  { %v9878_v38 = vmax.f32 %v9577_v46, 0.0  ;;  %v21373_v5 = vadd.f32 %v21372_v25, %v21371_v23  ;;  %v21374_v44 = vpop.f32.mrb[126].mxu1  ;;  %v22712_v36 = vpop.f32.mrb[142].mxu0  ;;  %v23677_v46 = vld [vmem:[%s31889_s0 + $0x48] sm:$0xff]   ;;  %v23721_v25 = vld [vmem:[%s31889_s0 + $0xd0] sm:$0xff]  }
 0x735   :  { %v21375_v20 = vpop.f32.mrb[127].mxu1  ;;  %v9592_v47 = vpop.f32.mrb[143].mxu0  ;;  %v23712_v23 = vld [vmem:[%s31889_s0 + $0xc8] sm:$0xff]  }
 0x736   :  { %v28162_v35 = vpack.c.bf16 %v9878_v38, %v9877_v53  ;;  %v9517_v27 = vadd.f32 %v21373_v5, %v9452_v18  ;;  %v21376_v6 = vadd.f32 %v21375_v20, %v21374_v44  ;;  %v23722_v53 = vld [vmem:[%s31889_s0 + $0xd8] sm:$0xff]   ;;  %v23680_v38 = vld [vmem:[%s31889_s0 + $0x60] sm:$0xff]   ;;  %v23681_v44 = vld [vmem:[%s31889_s0 + $0x68] sm:$0xff]  }
 0x737   :  { %v23731_v5 = vld [vmem:[%s31889_s0 + $0xe0] sm:$0xff]   ;;  %v23682_v20 = vld [vmem:[%s31889_s0 + $0x70] sm:$0xff]  }
 0x738   :  { %31963 = vst [vmem:[#allocation3_spill] sm:$0xff] %v28162_v35  ;;  %v9582_v39 = vadd.f32 %v22707_v63, %v9517_v27  ;;  %v9520_v28 = vadd.f32 %v21376_v6, %v9455_v43  ;;  %22713 = vmatprep.subr.bf16.mxu1 %v28162_v35  ;;  %22753 = vmatprep.subr.bf16.mxu0 %v28162_v35  ;;  %v23685_v63 = vld [vmem:[%s31889_s0 + $0x98] sm:$0xff]   ;;  %v23690_v27 = vld [vmem:[%s31889_s0 + $0x100] sm:$0xff]   ;;  %v23691_v6 = vld [vmem:[%s31889_s0 + $0x108] sm:$0xff]  }
 0x739   :  { %22714 = vmatpush3.bf16.msra.mxu1 %v28162_v35  ;;  %22754 = vmatpush3.bf16.msra.mxu0 %v28162_v35 }
 0x73a   :  { %v9585_v4 = vadd.f32 %v22708_v42, %v9520_v28  ;;  %v21377_v21 = vpop.f32.mrb[128].mxu1  ;;  %v9879_v55 = vmax.f32 %v9582_v39, 0.0  ;;  %v23687_v42 = vld [vmem:[%s31889_s0 + $0xa8] sm:$0xff]   ;;  %v23698_v28 = vld [vmem:[%s31889_s0 + $0x110] sm:$0xff]  }
 0x73b   :  { %v21378_v61 = vpop.f32.mrb[129].mxu1  ;;  %v23692_v39 = vld [vmem:[%s31896_s8] ss:$8 sps:$4 sm:$0xff]  }
 0x73c   :  { %v9880_v11 = vmax.f32 %v9585_v4, 0.0  ;;  %v21379_v16 = vadd.f32 %v21378_v61, %v21377_v21  ;;  %v21380_v12 = vpop.f32.mrb[130].mxu1  ;;  %v23697_v4 = vld [vmem:[%s31896_s8 + $0x14] ss:$8 sps:$4 sm:$0xff]   ;;  %v23695_v21 = vld [vmem:[%s31896_s8 + $0x10] ss:$8 sps:$4 sm:$0xff]  }
 0x73d   :  { %v21381_v19 = vpop.f32.mrb[131].mxu1  ;;  %v23702_v61 = vld [vmem:[%s31896_s8 + $0x24] ss:$8 sps:$4 sm:$0xff]  }
 0x73e   :  { %v28168_v18 = vpack.c.bf16 %v9880_v11, %v9879_v55  ;;  %v9525_v3 = vadd.f32 %v21379_v16, %v9460_v33  ;;  %v21382_v43 = vadd.f32 %v21381_v19, %v21380_v12  ;;  %v23699_v55 = vld [vmem:[%s31889_s0 + $0x118] sm:$0xff]   ;;  %v23700_v11 = vld [vmem:[%s31896_s8 + $0x20] ss:$8 sps:$4 sm:$0xff]  }
 0x73f   :  { %v23706_v16 = vld [vmem:[%s31889_s0 + $0x120] sm:$0xff]   ;;  %v23705_v12 = vld [vmem:[%s31896_s8 + $0x34] ss:$8 sps:$4 sm:$0xff]   ;;  %v23703_v19 = vld [vmem:[%s31896_s8 + $0x30] ss:$8 sps:$4 sm:$0xff]  }
 0x740   :  { %31964 = vst [vmem:[#allocation4_spill] sm:$0xff] %v28168_v18  ;;  %v9590_v7 = vadd.f32 %v9589_v24, %v9525_v3  ;;  %v9528_v48 = vadd.f32 %v21382_v43, %v9463_v52  ;;  %22715 = vmatprep.subr.bf16.mxu1 %v28168_v18  ;;  %22755 = vmatprep.subr.bf16.mxu0 %v28168_v18  ;;  %v23679_v24 = vld [vmem:[%s31889_s0 + $0x58] sm:$0xff]   ;;  %v23710_v3 = vld [vmem:[%s31896_s8 + $0x44] ss:$8 sps:$4 sm:$0xff]  }
 0x741   :  { %22716 = vmatpush3.bf16.msra.mxu1 %v28168_v18  ;;  %22756 = vmatpush3.bf16.msra.mxu0 %v28168_v18  ;;  %v23707_v43 = vld [vmem:[%s31889_s0 + $0x128] sm:$0xff]  }
 0x742   :  { %v9593_v50 = vadd.f32 %v9592_v47, %v9528_v48  ;;  %v21383_v22 = vpop.f32.mrb[132].mxu1  ;;  %v9881_v49 = vmax.f32 %v9590_v7, 0.0  ;;  %v23683_v47 = vld [vmem:[%s31889_s0 + $0x78] sm:$0xff]   ;;  %v23708_v7 = vld [vmem:[%s31896_s8 + $0x40] ss:$8 sps:$4 sm:$0xff]   ;;  %v23716_v48 = vld [vmem:[%s31889_s0 + $0x130] sm:$0xff]  }
 0x743   :  { %v21384_v1 = vpop.f32.mrb[133].mxu1 }
 0x744   :  { %v9882_v8 = vmax.f32 %v9593_v50, 0.0  ;;  %v21385_v41 = vadd.f32 %v21384_v1, %v21383_v22  ;;  %v21386_v13 = vpop.f32.mrb[134].mxu1  ;;  %v23715_v50 = vld [vmem:[%s31896_s8 + $0x54] ss:$8 sps:$4 sm:$0xff]   ;;  %v23713_v22 = vld [vmem:[%s31896_s8 + $0x50] ss:$8 sps:$4 sm:$0xff]  }
 0x745   :  { %v21387_v51 = vpop.f32.mrb[135].mxu1  ;;  %v23720_v1 = vld [vmem:[%s31896_s8 + $0x64] ss:$8 sps:$4 sm:$0xff]  }
 0x746   :  { %v28174_v33 = vpack.c.bf16 %v9882_v8, %v9881_v49  ;;  %v9533_v40 = vadd.f32 %v21385_v41, %v9468_v10  ;;  %v21388_v52 = vadd.f32 %v21387_v51, %v21386_v13  ;;  %v23670_v10 = vld [vmem:[%s31889_s0 + $0x10] sm:$0xff]   ;;  %v23717_v49 = vld [vmem:[%s31889_s0 + $0x138] sm:$0xff]   ;;  %v23718_v8 = vld [vmem:[%s31896_s8 + $0x60] ss:$8 sps:$4 sm:$0xff]  }
 0x747   :  { %v23726_v41 = vld [vmem:[%s31889_s0 + $0x140] sm:$0xff]   ;;  %v23725_v13 = vld [vmem:[%s31896_s8 + $0x74] ss:$8 sps:$4 sm:$0xff]   ;;  %v23723_v51 = vld [vmem:[%s31896_s8 + $0x70] ss:$8 sps:$4 sm:$0xff]  }
 0x748   :  { %31965 = vst [vmem:[#allocation5_spill] sm:$0xff] %v28174_v33  ;;  %v9598_v32 = vadd.f32 %v22711_v29, %v9533_v40  ;;  %v9536_v0 = vadd.f32 %v21388_v52, %v28160_v34  ;;  %22717 = vmatprep.subr.bf16.mxu1 %v28174_v33  ;;  %22757 = vmatprep.subr.bf16.mxu0 %v28174_v33  ;;  %v23684_v34 = vld [vmem:[%s31889_s0 + $0x90] sm:$0xff]   ;;  %v23730_v40 = vld [vmem:[%s31896_s8 + $0x84] ss:$8 sps:$4 sm:$0xff]  }
 0x749   :  { %22718 = vmatpush3.bf16.msra.mxu1 %v28174_v33  ;;  %22758 = vmatpush3.bf16.msra.mxu0 %v28174_v33  ;;  %v23678_v29 = vld [vmem:[%s31889_s0 + $0x50] sm:$0xff]   ;;  %v23727_v52 = vld [vmem:[%s31889_s0 + $0x148] sm:$0xff]  }
 0x74a   :  { %v9601_v15 = vadd.f32 %v22712_v36, %v9536_v0  ;;  %v9883_v60 = vmax.f32 %v9598_v32, 0.0  ;;  %v23732_v36 = vld [vmem:[%s31889_s0 + $0xe8] sm:$0xff]   ;;  %v23752_v32 = vld [vmem:[%s31889_s0 + $0xf0] sm:$0xff]  }
 0x74b   :  { %v23728_v0 = vld [vmem:[%s31896_s8 + $0x80] ss:$8 sps:$4 sm:$0xff]  }
 0x74c   :  { %v9884_v58 = vmax.f32 %v9601_v15, 0.0  ;;  %v23736_v15 = vld [vmem:[%s31889_s0 + $0x150] sm:$0xff]  }
 0x74e   :  { %v28181_v54 = vpack.c.bf16 %v9884_v58, %v9883_v60  ;;  %v23754_v60 = vld [vmem:[%s31889_s0 + $0xf8] sm:$0xff]  }
 0x74f   :  { %v23735_v58 = vld [vmem:[%s31896_s8 + $0x94] ss:$8 sps:$4 sm:$0xff]  }
 0x750   :  { %31966 = vst [vmem:[#allocation6_spill] sm:$0xff] %v28181_v54  ;;  %22719 = vmatprep.subr.bf16.mxu1 %v28181_v54  ;;  %22759 = vmatprep.subr.bf16.mxu0 %v28181_v54 }
 0x751   :  { %22720 = vmatpush3.bf16.msra.mxu1 %v28181_v54  ;;  %22760 = vmatpush3.bf16.msra.mxu0 %v28181_v54 }
 0x752   :  { %22793 = vmatprep.subr.bf16.mxu1 %v28162_v35  ;;  %22833 = vmatprep.subr.bf16.mxu0 %v28162_v35 }
 0x754   :  { %22722 = vmatmul.mubr.msk.bf16.vlgmr.msra.gmra.mrb[136].mxu1 %vm439_vm0, %v23667_v9  ;;  %22762 = vmatmul.mubr.msk.bf16.vlgmr.msra.gmra.mrb[144].mxu0 %vm439_vm0, %v23669_v26  ;;  %v23733_v9 = vld [vmem:[%s31896_s8 + $0x90] ss:$8 sps:$4 sm:$0xff]   ;;  %v23740_v26 = vld [vmem:[%s31896_s8 + $0xa4] ss:$8 sps:$4 sm:$0xff]  }
 0x755   :  { %22794 = vmatpush3.bf16.msra.mxu1 %v28162_v35  ;;  %22834 = vmatpush3.bf16.msra.mxu0 %v28162_v35  ;;  %v23822_v35 = vld [vmem:[%s31896_s8 + $0x240] ss:$8 sps:$4 sm:$0xff]  }
 0x756   :  { %22795 = vmatprep.subr.bf16.mxu1 %v28168_v18  ;;  %22835 = vmatprep.subr.bf16.mxu0 %v28168_v18 }
 0x757   :  { %22725 = vmatprep.mubr.msk.bf16.mxu1 %vm439_vm0, %v23670_v10  ;;  %22765 = vmatprep.mubr.msk.bf16.mxu0 %vm439_vm0, %v23684_v34  ;;  %v23737_v10 = vld [vmem:[%s31889_s0 + $0x158] sm:$0xff]   ;;  %v23738_v34 = vld [vmem:[%s31896_s8 + $0xa0] ss:$8 sps:$4 sm:$0xff]  }
 0x759   :  { %22796 = vmatpush3.bf16.msra.mxu1 %v28168_v18  ;;  %22836 = vmatpush3.bf16.msra.mxu0 %v28168_v18  ;;  %v23827_v18 = vld [vmem:[%s31896_s8 + $0x254] ss:$8 sps:$4 sm:$0xff]  }
 0x75a   :  { %22797 = vmatprep.subr.bf16.mxu1 %v28174_v33  ;;  %22837 = vmatprep.subr.bf16.mxu0 %v28174_v33 }
 0x75c   :  { %22726 = vmatmul.mubr.msk.bf16.gmra.mrb[140].mxu1 %vm439_vm0, %v23671_v31  ;;  %22766 = vmatmul.mubr.msk.bf16.gmra.mrb[148].mxu0 %vm439_vm0, %v23685_v63  ;;  %v23744_v31 = vld [vmem:[%s31889_s0 + $0x160] sm:$0xff]   ;;  %v23743_v63 = vld [vmem:[%s31896_s8 + $0xb4] ss:$8 sps:$4 sm:$0xff]  }
 0x75d   :  { %22798 = vmatpush3.bf16.msra.mxu1 %v28174_v33  ;;  %22838 = vmatpush3.bf16.msra.mxu0 %v28174_v33 }
 0x75e   :  { %22799 = vmatprep.subr.bf16.mxu1 %v28181_v54  ;;  %22839 = vmatprep.subr.bf16.mxu0 %v28181_v54 }
 0x75f   :  { %22729 = vmatprep.mubr.msk.bf16.mxu1 %vm439_vm0, %v23672_v30  ;;  %22769 = vmatprep.mubr.msk.bf16.mxu0 %vm439_vm0, %v23686_v56  ;;  %v23741_v30 = vld [vmem:[%s31896_s8 + $0xb0] ss:$8 sps:$4 sm:$0xff]   ;;  %v23748_v56 = vld [vmem:[%s31896_s8 + $0xc4] ss:$8 sps:$4 sm:$0xff]  }
 0x761   :  { %22800 = vmatpush3.bf16.msra.mxu1 %v28181_v54  ;;  %22840 = vmatpush3.bf16.msra.mxu0 %v28181_v54 }
 0x762   :  { %12744 = vmatprep.subr.bf16.mxu1 %v23694_v62  ;;  %v23745_v62 = vld [vmem:[%s31889_s0 + $0x168] sm:$0xff]  }
 0x764   :  { %22730 = vmatmul.mubr.msk.bf16.gmra.mrb[144].mxu1 %vm439_vm0, %v23673_v57  ;;  %22770 = vmatmul.mubr.msk.bf16.gmra.mrb[152].mxu0 %vm439_vm0, %v23687_v42  ;;  %v23746_v57 = vld [vmem:[%s31896_s8 + $0xc0] ss:$8 sps:$4 sm:$0xff]   ;;  %v23753_v42 = vld [vmem:[%s31889_s0 + $0x170] sm:$0xff]  }
 0x765   :  { %22733 = vmatprep.mubr.msk.bf16.mxu1 %vm439_vm0, %v23674_v17  ;;  %22773 = vmatprep.mubr.msk.bf16.mxu0 %vm439_vm0, %v23688_v2  ;;  %v23751_v17 = vld [vmem:[%s31896_s8 + $0xd4] ss:$8 sps:$4 sm:$0xff]   ;;  %v23749_v2 = vld [vmem:[%s31896_s8 + $0xd0] ss:$8 sps:$4 sm:$0xff]  }
 0x76c   :  { %22734 = vmatmul.mubr.msk.bf16.gmra.mrb[148].mxu1 %vm439_vm0, %v23675_v37  ;;  %22774 = vmatmul.mubr.msk.bf16.gmra.mrb[156].mxu0 %vm439_vm0, %v23689_v59  ;;  %v23758_v37 = vld [vmem:[%s31896_s8 + $0xe4] ss:$8 sps:$4 sm:$0xff]   ;;  %v23755_v59 = vld [vmem:[%s31889_s0 + $0x178] sm:$0xff]  }
 0x76d   :  { %22737 = vmatprep.mubr.msk.bf16.mxu1 %vm439_vm0, %v23676_v45  ;;  %22777 = vmatprep.mubr.msk.bf16.mxu0 %vm439_vm0, %v23711_v14  ;;  %v23756_v45 = vld [vmem:[%s31896_s8 + $0xe0] ss:$8 sps:$4 sm:$0xff]   ;;  %v23761_v14 = vld [vmem:[%s31896_s8 + $0xf4] ss:$8 sps:$4 sm:$0xff]  }
 0x774   :  { %22738 = vmatmul.mubr.msk.bf16.gmra.mrb[152].mxu1 %vm439_vm0, %v23677_v46  ;;  %22778 = vmatmul.mubr.msk.bf16.gmra.mrb[160].mxu0 %vm439_vm0, %v23712_v23  ;;  %v23759_v46 = vld [vmem:[%s31896_s8 + $0xf0] ss:$8 sps:$4 sm:$0xff]   ;;  %v23764_v23 = vld [vmem:[%s31896_s8 + $0x104] ss:$8 sps:$4 sm:$0xff]  }
 0x775   :  { %22741 = vmatprep.mubr.msk.bf16.mxu1 %vm439_vm0, %v23678_v29  ;;  %22781 = vmatprep.mubr.msk.bf16.mxu0 %vm439_vm0, %v23721_v25 }
 0x77c   :  { %22742 = vmatmul.mubr.msk.bf16.gmra.mrb[156].mxu1 %vm439_vm0, %v23679_v24  ;;  %22782 = vmatmul.mubr.msk.bf16.gmra.mrb[164].mxu0 %vm439_vm0, %v23722_v53 }
 0x77d   :  { %22745 = vmatprep.mubr.msk.bf16.mxu1 %vm439_vm0, %v23680_v38  ;;  %22785 = vmatprep.mubr.msk.bf16.mxu0 %vm439_vm0, %v23731_v5 }
 0x784   :  { %22746 = vmatmul.mubr.msk.bf16.gmra.mrb[160].mxu1 %vm439_vm0, %v23681_v44  ;;  %22786 = vmatmul.mubr.msk.bf16.gmra.mrb[168].mxu0 %vm439_vm0, %v23732_v36 }
 0x785   :  { %22749 = vmatprep.mubr.msk.bf16.mxu1 %vm439_vm0, %v23682_v20  ;;  %22789 = vmatprep.mubr.msk.bf16.mxu0 %vm439_vm0, %v23752_v32  ;;  %v23804_v20 = vld [vmem:[%s31896_s8 + $0x1e0] ss:$8 sps:$4 sm:$0xff]   ;;  %v23807_v32 = vld [vmem:[%s31896_s8 + $0x1f0] ss:$8 sps:$4 sm:$0xff]  }
 0x78c   :  { %22750 = vmatmul.mubr.msk.bf16.gmra.mrb[164].mxu1 %vm439_vm0, %v23683_v47  ;;  %22790 = vmatmul.mubr.msk.bf16.gmra.mrb[172].mxu0 %vm439_vm0, %v23754_v60 }
 0x78d   :  { %22801 = vmatprep.mubr.msk.bf16.mxu1 %vm439_vm0, %v23690_v27 }
 0x794   :  { %22802 = vmatmul.mubr.msk.bf16.vlgmr.msra.gmra.mrb[168].mxu1 %vm439_vm0, %v23691_v6 }
 0x795   :  { %12745 = vmatpush1.bf16.msra.mxu1 %v23692_v39  ;;  %22805 = vmatprep.mubr.msk.bf16.mxu1 %vm439_vm0, %v23698_v28 }
 0x796   :  { %12746 = vmatprep.subr.bf16.mxu1 %v23697_v4 }
 0x799   :  { %12747 = vmatpush1.bf16.msra.mxu1 %v23695_v21 }
 0x79a   :  { %12748 = vmatprep.subr.bf16.mxu1 %v23702_v61 }
 0x79c   :  { %22806 = vmatmul.mubr.msk.bf16.gmra.mrb[172].mxu1 %vm439_vm0, %v23699_v55 }
 0x79d   :  { %12749 = vmatpush1.bf16.msra.mxu1 %v23700_v11  ;;  %22809 = vmatprep.mubr.msk.bf16.mxu1 %vm439_vm0, %v23706_v16 }
 0x79e   :  { %12750 = vmatprep.subr.bf16.mxu1 %v23705_v12 }
 0x7a1   :  { %12751 = vmatpush1.bf16.msra.mxu1 %v23703_v19 }
 0x7a2   :  { %12752 = vmatprep.subr.bf16.mxu1 %v23710_v3 }
 0x7a4   :  { %22810 = vmatmul.mubr.msk.bf16.gmra.mrb[176].mxu1 %vm439_vm0, %v23707_v43 }
 0x7a5   :  { %12753 = vmatpush1.bf16.msra.mxu1 %v23708_v7  ;;  %22813 = vmatprep.mubr.msk.bf16.mxu1 %vm439_vm0, %v23716_v48 }
 0x7a6   :  { %12754 = vmatprep.subr.bf16.mxu1 %v23715_v50 }
 0x7a9   :  { %12755 = vmatpush1.bf16.msra.mxu1 %v23713_v22 }
 0x7aa   :  { %12756 = vmatprep.subr.bf16.mxu1 %v23720_v1 }
 0x7ac   :  { %22814 = vmatmul.mubr.msk.bf16.gmra.mrb[180].mxu1 %vm439_vm0, %v23717_v49 }
 0x7ad   :  { %12757 = vmatpush1.bf16.msra.mxu1 %v23718_v8  ;;  %22817 = vmatprep.mubr.msk.bf16.mxu1 %vm439_vm0, %v23726_v41 }
 0x7ae   :  { %12758 = vmatprep.subr.bf16.mxu1 %v23725_v13  ;;  %v23809_v13 = vld [vmem:[%s31896_s8 + $0x1f4] ss:$8 sps:$4 sm:$0xff]  }
 0x7b1   :  { %12759 = vmatpush1.bf16.msra.mxu1 %v23723_v51 }
 0x7b2   :  { %12760 = vmatprep.subr.bf16.mxu1 %v23730_v40 }
 0x7b4   :  { %22818 = vmatmul.mubr.msk.bf16.gmra.mrb[184].mxu1 %vm439_vm0, %v23727_v52  ;;  %v23762_v52 = vld [vmem:[%s31896_s8 + $0x100] ss:$8 sps:$4 sm:$0xff]  }
 0x7b5   :  { %12761 = vmatpush1.bf16.msra.mxu1 %v23728_v0  ;;  %22821 = vmatprep.mubr.msk.bf16.mxu1 %vm439_vm0, %v23736_v15  ;;  %v23767_v0 = vld [vmem:[%s31896_s8 + $0x114] ss:$8 sps:$4 sm:$0xff]   ;;  %v23765_v15 = vld [vmem:[%s31896_s8 + $0x110] ss:$8 sps:$4 sm:$0xff]  }
 0x7b6   :  { %12762 = vmatprep.subr.bf16.mxu1 %v23735_v58  ;;  %v23770_v58 = vld [vmem:[%s31896_s8 + $0x124] ss:$8 sps:$4 sm:$0xff]  }
 0x7b9   :  { %12763 = vmatpush1.bf16.msra.mxu1 %v23733_v9 }
 0x7ba   :  { %12764 = vmatprep.subr.bf16.mxu1 %v23740_v26 }
 0x7bc   :  { %22822 = vmatmul.mubr.msk.bf16.gmra.mrb[188].mxu1 %vm439_vm0, %v23737_v10 }
 0x7bd   :  { %12765 = vmatpush1.bf16.msra.mxu1 %v23738_v34  ;;  %22825 = vmatprep.mubr.msk.bf16.mxu1 %vm439_vm0, %v23744_v31  ;;  %v23768_v31 = vld [vmem:[%s31896_s8 + $0x120] ss:$8 sps:$4 sm:$0xff]  }
 0x7be   :  { %12766 = vmatprep.subr.bf16.mxu1 %v23743_v63 }
 0x7c1   :  { %12767 = vmatpush1.bf16.msra.mxu1 %v23741_v30  ;;  %v23773_v30 = vld [vmem:[%s31896_s8 + $0x134] ss:$8 sps:$4 sm:$0xff]  }
 0x7c2   :  { %12768 = vmatprep.subr.bf16.mxu1 %v23748_v56 }
 0x7c4   :  { %22826 = vmatmul.mubr.msk.bf16.gmra.mrb[192].mxu1 %vm439_vm0, %v23745_v62  ;;  %v23771_v62 = vld [vmem:[%s31896_s8 + $0x130] ss:$8 sps:$4 sm:$0xff]  }
 0x7c5   :  { %12769 = vmatpush1.bf16.msra.mxu1 %v23746_v57  ;;  %22829 = vmatprep.mubr.msk.bf16.mxu1 %vm439_vm0, %v23753_v42 }
 0x7c6   :  { %12770 = vmatprep.subr.bf16.mxu1 %v23751_v17  ;;  %v23776_v17 = vld [vmem:[%s31896_s8 + $0x144] ss:$8 sps:$4 sm:$0xff]  }
 0x7c9   :  { %12771 = vmatpush1.bf16.msra.mxu1 %v23749_v2 }
 0x7ca   :  { %12772 = vmatprep.subr.bf16.mxu1 %v23758_v37 }
 0x7cc   :  { %22830 = vmatmul.mubr.msk.bf16.gmra.mrb[196].mxu1 %vm439_vm0, %v23755_v59 }
 0x7cd   :  { %12773 = vmatpush1.bf16.msra.mxu1 %v23756_v45  ;;  %v23801_v45 = vld [vmem:[%s31896_s8 + $0x1d0] ss:$8 sps:$4 sm:$0xff]  }
 0x7ce   :  { %12774 = vmatprep.subr.bf16.mxu1 %v23761_v14 }
 0x7d1   :  { %12775 = vmatpush1.bf16.msra.mxu1 %v23759_v46  ;;  %v23815_v46 = vld [vmem:[%s31896_s8 + $0x214] ss:$8 sps:$4 sm:$0xff]  }
 0x7d2   :  { %12817 = vmatprep.subr.bf16.mxu1 %v23764_v23 }
 0x827   :  { %v22723_v29 = vpop.f32.mrb[136].mxu1  ;;  %v28486_v25 = vpop.f32.mrb[144].mxu0 }
 0x828   :  { %v10083_v24 = vpop.f32.mrb[137].mxu1  ;;  %v28488_v53 = vpop.f32.mrb[145].mxu0 }
 0x829   :  { %v22724_v38 = vpop.f32.mrb[138].mxu1  ;;  %v28490_v5 = vpop.f32.mrb[146].mxu0 }
 0x82a   :  { %v10211_v44 = vpack.c.bf16 %v22724_v38, %v22723_v29  ;;  %v10086_v36 = vpop.f32.mrb[139].mxu1  ;;  %v28494_v47 = vpop.f32.mrb[147].mxu0 }
 0x82b   :  { %v10210_v27 = vpack.c.bf16 %v10086_v36, %v10083_v24  ;;  %v23774_v24 = vld [vmem:[%s31896_s8 + $0x140] ss:$8 sps:$4 sm:$0xff]   ;;  %v23777_v36 = vld [vmem:[%s31896_s8 + $0x150] ss:$8 sps:$4 sm:$0xff]  }
 0x82f   :  { %v28498_v39 = vpop.f32.mrb[140].mxu1  ;;  %v28500_v28 = vpop.f32.mrb[148].mxu0 }
 0x830   :  { %v28502_v4 = vpop.f32.mrb[141].mxu1  ;;  %v28504_v21 = vpop.f32.mrb[149].mxu0 }
 0x831   :  { %v28506_v61 = vpop.f32.mrb[142].mxu1  ;;  %v28508_v55 = vpop.f32.mrb[150].mxu0 }
 0x832   :  { %v10213_v11 = vpack.c.bf16 %v28506_v61, %v28498_v39  ;;  %v10102_v16 = vpop.f32.mrb[143].mxu1  ;;  %v28514_v19 = vpop.f32.mrb[151].mxu0  ;;  %v23788_v39 = vld [vmem:[%s31896_s8 + $0x184] ss:$8 sps:$4 sm:$0xff]  }
 0x833   :  { %v10212_v3 = vpack.c.bf16 %v10102_v16, %v28502_v4  ;;  %v23873_v4 = vld [vmem:[%s31889_s0 + $0x180] sm:$0xff]   ;;  %v23874_v16 = vld [vmem:[%s31889_s0 + $0x188] sm:$0xff]  }
 0x834   :  { %22841 = vmatprep.mubr.msk.bf16.mxu0 %vm439_vm0, %v23873_v4 }
 0x835   :  { %22842 = vmatmul.mubr.msk.bf16.vlgmr.msra.gmra.mrb[176].mxu0 %vm439_vm0, %v23874_v16 }
 0x837   :  { %v22731_v7 = vpop.f32.mrb[144].mxu1  ;;  %v28519_v48 = vpop.f32.mrb[152].mxu0 }
 0x838   :  { %v10115_v50 = vpop.f32.mrb[145].mxu1  ;;  %v28521_v22 = vpop.f32.mrb[153].mxu0 }
 0x839   :  { %v22732_v1 = vpop.f32.mrb[146].mxu1  ;;  %v28523_v49 = vpop.f32.mrb[154].mxu0 }
 0x83a   :  { %v10215_v8 = vpack.c.bf16 %v22732_v1, %v22731_v7  ;;  %v10118_v41 = vpop.f32.mrb[147].mxu1  ;;  %v28527_v51 = vpop.f32.mrb[155].mxu0 }
 0x83b   :  { %v10214_v40 = vpack.c.bf16 %v10118_v41, %v10115_v50  ;;  %v23780_v41 = vld [vmem:[%s31896_s8 + $0x160] ss:$8 sps:$4 sm:$0xff]  }
 0x83d   :  { %12776 = vmatprep.mubr.bf16.mxu1 %v10214_v40 }
 0x83e   :  { %12777 = vmatmul.mubr.bf16.vlgmr.msra.gmra.mrb[200].mxu1 %v10210_v27 }
 0x83f   :  { %12818 = vmatpush1.bf16.msra.mxu1 %v23762_v52  ;;  %12786 = vmatprep.mubr.bf16.mxu1 %v10215_v8  ;;  %v22735_v60 = vpop.f32.mrb[148].mxu1  ;;  %v28549_v56 = vpop.f32.mrb[156].mxu0  ;;  %v23785_v52 = vld [vmem:[%s31896_s8 + $0x174] ss:$8 sps:$4 sm:$0xff]  }
 0x840   :  { %12819 = vmatprep.subr.bf16.mxu1 %v23767_v0  ;;  %v10131_v9 = vpop.f32.mrb[149].mxu1  ;;  %v28556_v42 = vpop.f32.mrb[157].mxu0  ;;  %v23783_v0 = vld [vmem:[%s31896_s8 + $0x170] ss:$8 sps:$4 sm:$0xff]  }
 0x841   :  { %v22736_v26 = vpop.f32.mrb[150].mxu1  ;;  %v28563_v37 = vpop.f32.mrb[158].mxu0 }
 0x842   :  { %v10217_v10 = vpack.c.bf16 %v22736_v26, %v22735_v60  ;;  %v10134_v34 = vpop.f32.mrb[151].mxu1  ;;  %v28569_v14 = vpop.f32.mrb[159].mxu0  ;;  %v23881_v60 = vld [vmem:[%s31889_s0 + $0x190] sm:$0xff]  }
 0x843   :  { %12820 = vmatpush1.bf16.msra.mxu1 %v23765_v15  ;;  %v10216_v63 = vpack.c.bf16 %v10134_v34, %v10131_v9  ;;  %22845 = vmatprep.mubr.msk.bf16.mxu0 %vm439_vm0, %v23881_v60 }
 0x844   :  { %12821 = vmatprep.subr.bf16.mxu1 %v23770_v58  ;;  %v23882_v58 = vld [vmem:[%s31889_s0 + $0x198] sm:$0xff]  }
 0x845   :  { %22846 = vmatmul.mubr.msk.bf16.gmra.mrb[180].mxu0 %vm439_vm0, %v23882_v58 }
 0x846   :  { %12787 = vmatmul.mubr.bf16.gmra.mrb[204].mxu1 %v10211_v44  ;;  %v23779_v44 = vld [vmem:[%s31896_s8 + $0x154] ss:$8 sps:$4 sm:$0xff]  }
 0x847   :  { %12822 = vmatpush1.bf16.msra.mxu1 %v23768_v31  ;;  %12796 = vmatprep.mubr.bf16.mxu1 %v10216_v63  ;;  %v28554_v57 = vpop.f32.mrb[152].mxu1  ;;  %v23791_v31 = vld [vmem:[%s31896_s8 + $0x194] ss:$8 sps:$4 sm:$0xff]   ;;  %v23789_v63 = vld [vmem:[%s31896_s8 + $0x190] ss:$8 sps:$4 sm:$0xff]  }
 0x848   :  { %12823 = vmatprep.subr.bf16.mxu1 %v23773_v30  ;;  %v28561_v2 = vpop.f32.mrb[153].mxu1 }
 0x849   :  { %v28565_v59 = vpop.f32.mrb[154].mxu1 }
 0x84a   :  { %v28573_v23 = vpop.f32.mrb[155].mxu1 }
 0x84b   :  { %12824 = vmatpush1.bf16.msra.mxu1 %v23771_v62  ;;  %v23889_v62 = vld [vmem:[%s31889_s0 + $0x1a0] sm:$0xff]   ;;  %v31968_v54 = vpack.c.bf16 %v28573_v23, %v28561_v2 }
 0x84c   :  { %12825 = vmatprep.subr.bf16.mxu1 %v23776_v17  ;;  %v23890_v17 = vld [vmem:[%s31889_s0 + $0x1a8] sm:$0xff]   ;;  %22849 = vmatprep.mubr.msk.bf16.mxu0 %vm439_vm0, %v23889_v62 }
 0x84d   :  { %22850 = vmatmul.mubr.msk.bf16.gmra.mrb[184].mxu0 %vm439_vm0, %v23890_v17 }
 0x84e   :  { %12797 = vmatmul.mubr.bf16.gmra.mrb[208].mxu1 %v10212_v3  ;;  %v23782_v3 = vld [vmem:[%s31896_s8 + $0x164] ss:$8 sps:$4 sm:$0xff]  }
 0x84f   :  { %12826 = vmatpush1.bf16.msra.mxu1 %v23774_v24  ;;  %12806 = vmatprep.mubr.bf16.mxu1 %v10217_v10  ;;  %v28588_v27 = vpop.f32.mrb[156].mxu1  ;;  %v23786_v10 = vld [vmem:[%s31896_s8 + $0x180] ss:$8 sps:$4 sm:$0xff]   ;;  %v23794_v24 = vld [vmem:[%s31896_s8 + $0x1a4] ss:$8 sps:$4 sm:$0xff]  }
 0x850   :  { %12827 = vmatprep.subr.bf16.mxu1 %v23779_v44  ;;  %v28599_v7 = vpop.f32.mrb[157].mxu1 }
 0x851   :  { %v28601_v50 = vpop.f32.mrb[158].mxu1 }
 0x852   :  { %v28606_v8 = vpop.f32.mrb[159].mxu1 }
 0x853   :  { %12828 = vmatpush1.bf16.msra.mxu1 %v23777_v36 }
 0x854   :  { %12829 = vmatprep.subr.bf16.mxu1 %v23782_v3  ;;  %v23792_v3 = vld [vmem:[%s31896_s8 + $0x1a0] ss:$8 sps:$4 sm:$0xff]  }
 0x856   :  { %12807 = vmatmul.mubr.bf16.gmra.mrb[212].mxu1 %v10213_v11 }
 0x857   :  { %12830 = vmatpush1.bf16.msra.mxu1 %v23780_v41  ;;  %v28623_v15 = vpop.f32.mrb[160].mxu1 }
 0x858   :  { %12831 = vmatprep.subr.bf16.mxu1 %v23785_v52  ;;  %v10179_v61 = vpop.f32.mrb[161].mxu1  ;;  %v28675_v52 = vpop.f32.mrb[160].mxu0 }
 0x859   :  { %v28634_v11 = vpop.f32.mrb[162].mxu1  ;;  %v28680_v60 = vpop.f32.mrb[161].mxu0 }
 0x85a   :  { %v10182_v26 = vpop.f32.mrb[163].mxu1  ;;  %v28682_v58 = vpop.f32.mrb[162].mxu0 }
 0x85b   :  { %12832 = vmatpush1.bf16.msra.mxu1 %v23783_v0  ;;  %v10222_v34 = vpack.c.bf16 %v10182_v26, %v10179_v61  ;;  %v23797_v0 = vld [vmem:[%s31896_s8 + $0x1b4] ss:$8 sps:$4 sm:$0xff]   ;;  %v23795_v61 = vld [vmem:[%s31896_s8 + $0x1b0] ss:$8 sps:$4 sm:$0xff]  }
 0x85c   :  { %12833 = vmatprep.subr.bf16.mxu1 %v23788_v39 }
 0x85d   :  { %12849 = vmatprep.mubr.bf16.mxu1 %v10222_v34  ;;  %v23800_v34 = vld [vmem:[%s31896_s8 + $0x1c4] ss:$8 sps:$4 sm:$0xff]  }
 0x85f   :  { %12834 = vmatpush1.bf16.msra.mxu1 %v23786_v10  ;;  %v28649_v30 = vpop.f32.mrb[164].mxu1  ;;  %v28691_v10 = vpop.f32.mrb[163].mxu0 }
 0x860   :  { %12835 = vmatprep.subr.bf16.mxu1 %v23791_v31  ;;  %v28660_v44 = vpop.f32.mrb[165].mxu1  ;;  %v28711_v39 = vpop.f32.mrb[164].mxu0 }
 0x861   :  { %v28662_v36 = vpop.f32.mrb[166].mxu1  ;;  %v28716_v12 = vpop.f32.mrb[165].mxu0 }
 0x862   :  { %v28667_v16 = vpop.f32.mrb[167].mxu1  ;;  %v28718_v17 = vpop.f32.mrb[166].mxu0 }
 0x863   :  { %12836 = vmatpush1.bf16.msra.mxu1 %v23789_v63  ;;  %v23803_v63 = vld [vmem:[%s31896_s8 + $0x1d4] ss:$8 sps:$4 sm:$0xff]   ;;  %v28727_v43 = vpop.f32.mrb[167].mxu0 }
 0x864   :  { %12837 = vmatprep.subr.bf16.mxu1 %v23794_v24  ;;  %v28754_v1 = vpop.f32.mrb[168].mxu0 }
 0x867   :  { %12838 = vmatpush1.bf16.msra.mxu1 %v23792_v3  ;;  %v28689_v26 = vpop.f32.mrb[168].mxu1  ;;  %v23798_v3 = vld [vmem:[%s31896_s8 + $0x1c0] ss:$8 sps:$4 sm:$0xff]  }
 0x868   :  { %12839 = vmatprep.subr.bf16.mxu1 %v23797_v0  ;;  %v28696_v31 = vpop.f32.mrb[169].mxu1 }
 0x869   :  { %v28700_v62 = vpop.f32.mrb[170].mxu1 }
 0x86a   :  { %v28704_v24 = vpop.f32.mrb[171].mxu1 }
 0x86b   :  { %12840 = vmatpush1.bf16.msra.mxu1 %v23795_v61 }
 0x86c   :  { %12841 = vmatprep.subr.bf16.mxu1 %v23800_v34  ;;  %v23806_v34 = vld [vmem:[%s31896_s8 + $0x1e4] ss:$8 sps:$4 sm:$0xff]  }
 0x86f   :  { %12842 = vmatpush1.bf16.msra.mxu1 %v23798_v3  ;;  %v28725_v0 = vpop.f32.mrb[172].mxu1  ;;  %v23906_v3 = vld [vmem:[%s31889_s0 + $0x1b0] sm:$0xff]  }
 0x870   :  { %31967 = vst [vmem:[#allocation7_spill] sm:$0xff] %v28725_v0  ;;  %12843 = vmatprep.subr.bf16.mxu1 %v23803_v63  ;;  %v28732_v29 = vpop.f32.mrb[173].mxu1  ;;  %22853 = vmatprep.mubr.msk.bf16.mxu0 %vm439_vm0, %v23906_v3  ;;  %v23907_v63 = vld [vmem:[%s31889_s0 + $0x1b8] sm:$0xff]   ;;  %v28760_v3 = vpop.f32.mrb[169].mxu0 }
 0x871   :  { %v28739_v61 = vpop.f32.mrb[174].mxu1  ;;  %22854 = vmatmul.mubr.msk.bf16.gmra.mrb[188].mxu0 %vm439_vm0, %v23907_v63  ;;  %v28762_v4 = vpop.f32.mrb[170].mxu0  ;;  %v23812_v63 = vld [vmem:[%s31896_s8 + $0x204] ss:$8 sps:$4 sm:$0xff]  }
 0x872   :  { %v28743_v6 = vpop.f32.mrb[175].mxu1 }
 0x873   :  { %12844 = vmatpush1.bf16.msra.mxu1 %v23801_v45 }
 0x874   :  { %12845 = vmatprep.subr.bf16.mxu1 %v23806_v34  ;;  %v28771_v34 = vpop.f32.mrb[171].mxu0 }
 0x877   :  { %12846 = vmatpush1.bf16.msra.mxu1 %v23804_v20  ;;  %v28769_v40 = vpop.f32.mrb[176].mxu1  ;;  %v31969_v20 = vpack.c.bf16 %v28634_v11, %v28623_v15  ;;  %v23816_v15 = vld [vmem:[%s31896_s8 + $0x220] ss:$8 sps:$4 sm:$0xff]   ;;  %v23821_v11 = vld [vmem:[%s31896_s8 + $0x234] ss:$8 sps:$4 sm:$0xff]  }
 0x878   :  { %12847 = vmatprep.subr.bf16.mxu1 %v23809_v13  ;;  %v28776_v41 = vpop.f32.mrb[177].mxu1  ;;  %v23810_v13 = vld [vmem:[%s31896_s8 + $0x200] ss:$8 sps:$4 sm:$0xff]  }
 0x879   :  { %v28780_v45 = vpop.f32.mrb[178].mxu1 }
 0x87a   :  { %v28784_v9 = vpop.f32.mrb[179].mxu1 }
 0x87b   :  { %12848 = vmatpush1.bf16.msra.mxu1 %v23807_v32  ;;  %v23813_v32 = vld [vmem:[%s31896_s8 + $0x210] ss:$8 sps:$4 sm:$0xff]  }
 0x87c   :  { %12890 = vmatprep.subr.bf16.mxu1 %v23812_v63  ;;  %v23818_v63 = vld [vmem:[%s31896_s8 + $0x224] ss:$8 sps:$4 sm:$0xff]  }
 0x87e   :  { %12850 = vmatmul.mubr.bf16.vlgmr.msra.gmra.mrb[200].mxu1 %v31968_v54  ;;  %v31971_v54 = vpack.c.bf16 %v28667_v16, %v28660_v44  ;;  %v31972_v16 = vpack.c.bf16 %v28606_v8, %v28599_v7  ;;  %v23930_v7 = vld [vmem:[%s31889_s0 + $0x1c8] sm:$0xff]  }
 0x87f   :  { %12859 = vmatprep.mubr.bf16.mxu1 %v31969_v20  ;;  %12891 = vmatpush1.bf16.msra.mxu1 %v23810_v13  ;;  %v28803_v33 = vpop.f32.mrb[180].mxu1  ;;  %v31970_v20 = vpack.c.bf16 %v28565_v59, %v28554_v57  ;;  %v28827_v13 = vpop.f32.mrb[172].mxu0  ;;  %v23824_v57 = vld [vmem:[%s31896_s8 + $0x244] ss:$8 sps:$4 sm:$0xff]  }
 0x880   :  { %12892 = vmatprep.subr.bf16.mxu1 %v23815_v46  ;;  %v28808_v38 = vpop.f32.mrb[181].mxu1  ;;  %v28837_v46 = vpop.f32.mrb[173].mxu0  ;;  %v23830_v8 = vld [vmem:[%s31896_s8 + $0x264] ss:$8 sps:$4 sm:$0xff]  }
 0x881   :  { %v28810_v2 = vpop.f32.mrb[182].mxu1 }
 0x882   :  { %v28814_v23 = vpop.f32.mrb[183].mxu1 }
 0x883   :  { %12893 = vmatpush1.bf16.msra.mxu1 %v23813_v32  ;;  %v23819_v32 = vld [vmem:[%s31896_s8 + $0x230] ss:$8 sps:$4 sm:$0xff]  }
 0x884   :  { %12894 = vmatprep.subr.bf16.mxu1 %v23818_v63 }
 0x886   :  { %12860 = vmatmul.mubr.bf16.gmra.mrb[204].mxu1 %v31970_v20 }
 0x887   :  { %12895 = vmatpush1.bf16.msra.mxu1 %v23816_v15  ;;  %12869 = vmatprep.mubr.bf16.mxu1 %v31971_v54  ;;  %v28835_v63 = vpop.f32.mrb[184].mxu1  ;;  %v28844_v15 = vpop.f32.mrb[174].mxu0 }
 0x888   :  { %12896 = vmatprep.subr.bf16.mxu1 %v23821_v11  ;;  %v28842_v59 = vpop.f32.mrb[185].mxu1  ;;  %v28850_v44 = vpop.f32.mrb[175].mxu0  ;;  %v23825_v11 = vld [vmem:[%s31896_s8 + $0x250] ss:$8 sps:$4 sm:$0xff]  }
 0x889   :  { %v28846_v20 = vpop.f32.mrb[186].mxu1 }
 0x88a   :  { %v28854_v54 = vpop.f32.mrb[187].mxu1 }
 0x88b   :  { %12897 = vmatpush1.bf16.msra.mxu1 %v23819_v32  ;;  %v23929_v32 = vld [vmem:[%s31889_s0 + $0x1c0] sm:$0xff]  }
 0x88c   :  { %12898 = vmatprep.subr.bf16.mxu1 %v23824_v57  ;;  %v31973_v57 = vpack.c.bf16 %v28662_v36, %v28649_v30  ;;  %22857 = vmatprep.mubr.msk.bf16.mxu0 %vm439_vm0, %v23929_v32  ;;  %v23833_v32 = vld [vmem:[%s31896_s8 + $0x274] ss:$8 sps:$4 sm:$0xff]   ;;  %v23831_v30 = vld [vmem:[%s31896_s8 + $0x270] ss:$8 sps:$4 sm:$0xff]  }
 0x88d   :  { %22858 = vmatmul.mubr.msk.bf16.gmra.mrb[192].mxu0 %vm439_vm0, %v23930_v7  ;;  %v31978_v7 = vpack.c.bf16 %v28601_v50, %v28588_v27  ;;  %v23938_v27 = vld [vmem:[%s31889_s0 + $0x1d8] sm:$0xff]   ;;  %v23836_v50 = vld [vmem:[%s31896_s8 + $0x284] ss:$8 sps:$4 sm:$0xff]  }
 0x88e   :  { %12870 = vmatmul.mubr.bf16.gmra.mrb[208].mxu1 %v31972_v16 }
 0x88f   :  { %12899 = vmatpush1.bf16.msra.mxu1 %v23822_v35  ;;  %12879 = vmatprep.mubr.bf16.mxu1 %v31973_v57  ;;  %v28878_v0 = vpop.f32.mrb[188].mxu1 }
 0x890   :  { %31974 = vst [vmem:[#allocation8_spill] sm:$0xff] %v28878_v0  ;;  %12900 = vmatprep.subr.bf16.mxu1 %v23827_v18  ;;  %v28886_v35 = vpop.f32.mrb[189].mxu1  ;;  %v23828_v18 = vld [vmem:[%s31896_s8 + $0x260] ss:$8 sps:$4 sm:$0xff]  }
 0x891   :  { %31975 = vst [vmem:[#allocation9_spill] sm:$0xff] %v28886_v35  ;;  %v28889_v16 = vpop.f32.mrb[190].mxu1 }
 0x892   :  { %31976 = vst [vmem:[#allocation10_spill] sm:$0xff] %v28889_v16  ;;  %v28894_v36 = vpop.f32.mrb[191].mxu1  ;;  %v23846_v16 = vld [vmem:[%s31896_s8 + $0x2c0] ss:$8 sps:$4 sm:$0xff]  }
 0x893   :  { %31977 = vst [vmem:[#allocation11_spill] sm:$0xff] %v28894_v36  ;;  %12901 = vmatpush1.bf16.msra.mxu1 %v23825_v11  ;;  %v23937_v11 = vld [vmem:[%s31889_s0 + $0x1d0] sm:$0xff]  }
 0x894   :  { %12902 = vmatprep.subr.bf16.mxu1 %v23830_v8  ;;  %v31979_v8 = vpack.c.bf16 %v28527_v51, %v28521_v22  ;;  %22861 = vmatprep.mubr.msk.bf16.mxu0 %vm439_vm0, %v23937_v11  ;;  %v23839_v11 = vld [vmem:[%s31896_s8 + $0x294] ss:$8 sps:$4 sm:$0xff]  }
 0x895   :  { %22862 = vmatmul.mubr.msk.bf16.gmra.mrb[196].mxu0 %vm439_vm0, %v23938_v27  ;;  %v23945_v27 = vld [vmem:[%s31889_s0 + $0x1e0] sm:$0xff]   ;;  %v23857_v36 = vld [vmem:[%s31896_s8 + $0x2f4] ss:$8 sps:$4 sm:$0xff]  }
 0x896   :  { %12880 = vmatmul.mubr.bf16.gmra.mrb[212].mxu1 %v31978_v7  ;;  %22865 = vmatprep.mubr.msk.bf16.mxu0 %vm439_vm0, %v23945_v27  ;;  %v23845_v27 = vld [vmem:[%s31896_s8 + $0x2b4] ss:$8 sps:$4 sm:$0xff]  }
 0x897   :  { %12903 = vmatpush1.bf16.msra.mxu1 %v23828_v18  ;;  %12922 = vmatprep.mubr.bf16.mxu1 %v31979_v8  ;;  %v28916_v57 = vpop.f32.mrb[192].mxu1  ;;  %v23946_v8 = vld [vmem:[%s31889_s0 + $0x1e8] sm:$0xff]  }
 0x898   :  { %12904 = vmatprep.subr.bf16.mxu1 %v23833_v32  ;;  %v28924_v18 = vpop.f32.mrb[193].mxu1  ;;  %v23834_v32 = vld [vmem:[%s31896_s8 + $0x280] ss:$8 sps:$4 sm:$0xff]  }
 0x899   :  { %v28927_v7 = vpop.f32.mrb[194].mxu1 }
 0x89a   :  { %v28932_v51 = vpop.f32.mrb[195].mxu1 }
 0x89b   :  { %12905 = vmatpush1.bf16.msra.mxu1 %v23831_v30  ;;  %v23837_v30 = vld [vmem:[%s31896_s8 + $0x290] ss:$8 sps:$4 sm:$0xff]  }
 0x89c   :  { %12906 = vmatprep.subr.bf16.mxu1 %v23836_v50  ;;  %v23842_v50 = vld [vmem:[%s31896_s8 + $0x2a4] ss:$8 sps:$4 sm:$0xff]  }
 0x89d   :  { %22866 = vmatmul.mubr.msk.bf16.gmra.mrb[200].mxu0 %vm439_vm0, %v23946_v8  ;;  %v23843_v8 = vld [vmem:[%s31896_s8 + $0x2b0] ss:$8 sps:$4 sm:$0xff]  }
 0x89f   :  { %12907 = vmatpush1.bf16.msra.mxu1 %v23834_v32  ;;  %v28948_v22 = vpop.f32.mrb[196].mxu1 }
 0x8a0   :  { %12908 = vmatprep.subr.bf16.mxu1 %v23839_v11  ;;  %v28956_v0 = vpop.f32.mrb[197].mxu1  ;;  %v23840_v11 = vld [vmem:[%s31896_s8 + $0x2a0] ss:$8 sps:$4 sm:$0xff]  }
 0x8a1   :  { %v28959_v32 = vpop.f32.mrb[198].mxu1 }
 0x8a2   :  { %v28964_v35 = vpop.f32.mrb[199].mxu1 }
 0x8a3   :  { %12909 = vmatpush1.bf16.msra.mxu1 %v23837_v30  ;;  %v23848_v30 = vld [vmem:[%s31896_s8 + $0x2c4] ss:$8 sps:$4 sm:$0xff]  }
 0x8a4   :  { %12910 = vmatprep.subr.bf16.mxu1 %v23842_v50  ;;  %v23851_v50 = vld [vmem:[%s31896_s8 + $0x2d4] ss:$8 sps:$4 sm:$0xff]  }
 0x8a7   :  { %12911 = vmatpush1.bf16.msra.mxu1 %v23840_v11  ;;  %v23959_v11 = vld [vmem:[%s31889_s0 + $0x1f0] sm:$0xff]  }
 0x8a8   :  { %12912 = vmatprep.subr.bf16.mxu1 %v23845_v27  ;;  %v23849_v27 = vld [vmem:[%s31896_s8 + $0x2d0] ss:$8 sps:$4 sm:$0xff]   ;;  %22869 = vmatprep.mubr.msk.bf16.mxu0 %vm439_vm0, %v23959_v11  ;;  %v23860_v11 = vld [vmem:[%s31896_s8 + $0x304] ss:$8 sps:$4 sm:$0xff]  }
 0x8ab   :  { %12913 = vmatpush1.bf16.msra.mxu1 %v23843_v8  ;;  %v23960_v8 = vld [vmem:[%s31889_s0 + $0x1f8] sm:$0xff]  }
 0x8ac   :  { %12914 = vmatprep.subr.bf16.mxu1 %v23848_v30  ;;  %v23854_v30 = vld [vmem:[%s31896_s8 + $0x2e4] ss:$8 sps:$4 sm:$0xff]   ;;  %22870 = vmatmul.mubr.msk.bf16.gmra.mrb[204].mxu0 %vm439_vm0, %v23960_v8  ;;  %v23863_v8 = vld [vmem:[%s31896_s8 + $0x314] ss:$8 sps:$4 sm:$0xff]  }
 0x8af   :  { %12915 = vmatpush1.bf16.msra.mxu1 %v23846_v16  ;;  %v23852_v16 = vld [vmem:[%s31896_s8 + $0x2e0] ss:$8 sps:$4 sm:$0xff]  }
 0x8b0   :  { %12916 = vmatprep.subr.bf16.mxu1 %v23851_v50  ;;  %v23855_v50 = vld [vmem:[%s31896_s8 + $0x2f0] ss:$8 sps:$4 sm:$0xff]  }
 0x8b3   :  { %12917 = vmatpush1.bf16.msra.mxu1 %v23849_v27  ;;  %v23858_v27 = vld [vmem:[%s31896_s8 + $0x300] ss:$8 sps:$4 sm:$0xff]  }
 0x8b4   :  { %12918 = vmatprep.subr.bf16.mxu1 %v23854_v30  ;;  %v31980_v30 = vpack.c.bf16 %v28494_v47, %v28488_v53  ;;  %v23864_v53 = vld [vmem:[%s31896_s8 + $0x320] ss:$8 sps:$4 sm:$0xff]   ;;  %v23869_v47 = vld [vmem:[%s31896_s8 + $0x334] ss:$8 sps:$4 sm:$0xff]  }
 0x8b7   :  { %12919 = vmatpush1.bf16.msra.mxu1 %v23852_v16  ;;  %v23861_v16 = vld [vmem:[%s31896_s8 + $0x310] ss:$8 sps:$4 sm:$0xff]  }
 0x8b8   :  { %12920 = vmatprep.subr.bf16.mxu1 %v23857_v36  ;;  %v31981_v36 = vpack.c.bf16 %v28523_v49, %v28519_v48  ;;  %v31982_v48 = vpack.c.bf16 %v28490_v5, %v28486_v25  ;;  %v23867_v49 = vld [vmem:[%s31896_s8 + $0x330] ss:$8 sps:$4 sm:$0xff]   ;;  %v23870_v25 = vld [vmem:[%s31896_s8 + $0x340] ss:$8 sps:$4 sm:$0xff]   ;;  %v23877_v5 = vld [vmem:[%s31896_s8 + $0x354] ss:$8 sps:$4 sm:$0xff]  }
 0x8bb   :  { %12921 = vmatpush1.bf16.msra.mxu1 %v23855_v50  ;;  %v23866_v50 = vld [vmem:[%s31896_s8 + $0x324] ss:$8 sps:$4 sm:$0xff]  }
 0x8bc   :  { %12963 = vmatprep.subr.bf16.mxu1 %v23860_v11  ;;  %v31983_v11 = vpack.c.bf16 %v28569_v14, %v28556_v42  ;;  %v23875_v42 = vld [vmem:[%s31896_s8 + $0x350] ss:$8 sps:$4 sm:$0xff]   ;;  %v31985_v14 = vpack.c.bf16 %v28563_v37, %v28549_v56  ;;  %v31987_v37 = vpack.c.bf16 %v28771_v34, %v28760_v3  ;;  %v23896_v34 = vld [vmem:[%s31896_s8 + $0x3a4] ss:$8 sps:$4 sm:$0xff]  }
 0x8bd   :  { %v23883_v56 = vld [vmem:[%s31896_s8 + $0x370] ss:$8 sps:$4 sm:$0xff]  }
 0x8be   :  { %12923 = vmatmul.mubr.bf16.vlgmr.msra.gmra.mrb[200].mxu1 %v31980_v30  ;;  %v23880_v30 = vld [vmem:[%s31896_s8 + $0x364] ss:$8 sps:$4 sm:$0xff]   ;;  %v23891_v3 = vld [vmem:[%s31896_s8 + $0x390] ss:$8 sps:$4 sm:$0xff]  }
 0x8bf   :  { %12932 = vmatprep.mubr.bf16.mxu1 %v31981_v36  ;;  %12964 = vmatpush1.bf16.msra.mxu1 %v23858_v27  ;;  %v23872_v27 = vld [vmem:[%s31896_s8 + $0x344] ss:$8 sps:$4 sm:$0xff]   ;;  %v31986_v36 = vpack.c.bf16 %v28508_v55, %v28500_v28  ;;  %v23886_v28 = vld [vmem:[%s31896_s8 + $0x380] ss:$8 sps:$4 sm:$0xff]   ;;  %v23893_v55 = vld [vmem:[%s31896_s8 + $0x394] ss:$8 sps:$4 sm:$0xff]  }
 0x8c0   :  { %12965 = vmatprep.subr.bf16.mxu1 %v23863_v8  ;;  %v31984_v8 = vpack.c.bf16 %v28514_v19, %v28504_v21  ;;  %v23878_v21 = vld [vmem:[%s31896_s8 + $0x360] ss:$8 sps:$4 sm:$0xff]   ;;  %v23885_v19 = vld [vmem:[%s31896_s8 + $0x374] ss:$8 sps:$4 sm:$0xff]  }
 0x8c3   :  { %12966 = vmatpush1.bf16.msra.mxu1 %v23861_v16  ;;  %v23888_v16 = vld [vmem:[%s31896_s8 + $0x384] ss:$8 sps:$4 sm:$0xff]  }
 0x8c4   :  { %12967 = vmatprep.subr.bf16.mxu1 %v23866_v50  ;;  %v23894_v50 = vld [vmem:[%s31896_s8 + $0x3a0] ss:$8 sps:$4 sm:$0xff]  }
 0x8c6   :  { %12933 = vmatmul.mubr.bf16.gmra.mrb[204].mxu1 %v31982_v48  ;;  %v23902_v48 = vld [vmem:[%s31896_s8 + $0x3c4] ss:$8 sps:$4 sm:$0xff]  }
 0x8c7   :  { %12968 = vmatpush1.bf16.msra.mxu1 %v23864_v53  ;;  %12942 = vmatprep.mubr.bf16.mxu1 %v31983_v11  ;;  %v23899_v53 = vld [vmem:[%s31896_s8 + $0x3b4] ss:$8 sps:$4 sm:$0xff]  }
 0x8c8   :  { %12969 = vmatprep.subr.bf16.mxu1 %v23869_v47  ;;  %v23897_v47 = vld [vmem:[%s31896_s8 + $0x3b0] ss:$8 sps:$4 sm:$0xff]   ;;  %v23905_v11 = vld [vmem:[%s31896_s8 + $0x3d4] ss:$8 sps:$4 sm:$0xff]  }
 0x8cb   :  { %12970 = vmatpush1.bf16.msra.mxu1 %v23867_v49  ;;  %v23900_v49 = vld [vmem:[%s31896_s8 + $0x3c0] ss:$8 sps:$4 sm:$0xff]  }
 0x8cc   :  { %12971 = vmatprep.subr.bf16.mxu1 %v23872_v27  ;;  %v23903_v27 = vld [vmem:[%s31896_s8 + $0x3d0] ss:$8 sps:$4 sm:$0xff]  }
 0x8ce   :  { %12943 = vmatmul.mubr.bf16.gmra.mrb[208].mxu1 %v31984_v8  ;;  %v23913_v8 = vld [vmem:[%s31896_s8 + $0x3f4] ss:$8 sps:$4 sm:$0xff]  }
 0x8cf   :  { %12972 = vmatpush1.bf16.msra.mxu1 %v23870_v25  ;;  %12952 = vmatprep.mubr.bf16.mxu1 %v31985_v14  ;;  %v23910_v25 = vld [vmem:[%s31896_s8 + $0x3e4] ss:$8 sps:$4 sm:$0xff]  }
 0x8d0   :  { %12973 = vmatprep.subr.bf16.mxu1 %v23877_v5  ;;  %v23908_v5 = vld [vmem:[%s31896_s8 + $0x3e0] ss:$8 sps:$4 sm:$0xff]   ;;  %v23916_v14 = vld [vmem:[%s31896_s8 + $0x404] ss:$8 sps:$4 sm:$0xff]  }
 0x8d3   :  { %12974 = vmatpush1.bf16.msra.mxu1 %v23875_v42  ;;  %v23911_v42 = vld [vmem:[%s31896_s8 + $0x3f0] ss:$8 sps:$4 sm:$0xff]  }
 0x8d4   :  { %12975 = vmatprep.subr.bf16.mxu1 %v23880_v30  ;;  %v23914_v30 = vld [vmem:[%s31896_s8 + $0x400] ss:$8 sps:$4 sm:$0xff]  }
 0x8d6   :  { %12953 = vmatmul.mubr.bf16.gmra.mrb[212].mxu1 %v31986_v36  ;;  %v31989_v36 = vpack.c.bf16 %v28762_v4, %v28754_v1  ;;  %v23925_v1 = vld [vmem:[%s31896_s8 + $0x434] ss:$8 sps:$4 sm:$0xff]   ;;  %v31990_v4 = vpack.c.bf16 %v28682_v58, %v28675_v52  ;;  %v23926_v52 = vld [vmem:[%s31896_s8 + $0x440] ss:$8 sps:$4 sm:$0xff]  }
 0x8d7   :  { %12976 = vmatpush1.bf16.msra.mxu1 %v23878_v21  ;;  %12995 = vmatprep.mubr.bf16.mxu1 %v31987_v37  ;;  %v23919_v21 = vld [vmem:[%s31896_s8 + $0x414] ss:$8 sps:$4 sm:$0xff]   ;;  %v23922_v37 = vld [vmem:[%s31896_s8 + $0x424] ss:$8 sps:$4 sm:$0xff]  }
 0x8d8   :  { %12977 = vmatprep.subr.bf16.mxu1 %v23885_v19  ;;  %v31988_v19 = vpack.c.bf16 %v28691_v10, %v28680_v60  ;;  %v23920_v60 = vld [vmem:[%s31896_s8 + $0x420] ss:$8 sps:$4 sm:$0xff]   ;;  %v23923_v10 = vld [vmem:[%s31896_s8 + $0x430] ss:$8 sps:$4 sm:$0xff]   ;;  %v23933_v58 = vld [vmem:[%s31896_s8 + $0x454] ss:$8 sps:$4 sm:$0xff]  }
 0x8db   :  { %12978 = vmatpush1.bf16.msra.mxu1 %v23883_v56  ;;  %v23917_v56 = vld [vmem:[%s31896_s8 + $0x410] ss:$8 sps:$4 sm:$0xff]  }
 0x8dc   :  { %12979 = vmatprep.subr.bf16.mxu1 %v23888_v16  ;;  %v31991_v16 = vpack.c.bf16 %v28850_v44, %v28837_v46  ;;  %v23931_v46 = vld [vmem:[%s31896_s8 + $0x450] ss:$8 sps:$4 sm:$0xff]   ;;  %v31993_v44 = vpack.c.bf16 %v28844_v15, %v28827_v13  ;;  %v31995_v13 = vpack.c.bf16 %v28784_v9, %v28776_v41  ;;  %v23949_v9 = vld [vmem:[%s31896_s8 + $0x494] ss:$8 sps:$4 sm:$0xff]  }
 0x8dd   :  { %v23939_v15 = vld [vmem:[%s31896_s8 + $0x470] ss:$8 sps:$4 sm:$0xff]  }
 0x8de   :  { %v23947_v41 = vld [vmem:[%s31896_s8 + $0x490] ss:$8 sps:$4 sm:$0xff]  }
 0x8df   :  { %12980 = vmatpush1.bf16.msra.mxu1 %v23886_v28  ;;  %v23928_v28 = vld [vmem:[%s31896_s8 + $0x444] ss:$8 sps:$4 sm:$0xff]  }
 0x8e0   :  { %12981 = vmatprep.subr.bf16.mxu1 %v23893_v55  ;;  %v31992_v55 = vpack.c.bf16 %v28727_v43, %v28716_v12  ;;  %v23934_v12 = vld [vmem:[%s31896_s8 + $0x460] ss:$8 sps:$4 sm:$0xff]   ;;  %v23941_v43 = vld [vmem:[%s31896_s8 + $0x474] ss:$8 sps:$4 sm:$0xff]  }
 0x8e3   :  { %12982 = vmatpush1.bf16.msra.mxu1 %v23891_v3  ;;  %v23936_v3 = vld [vmem:[%s31896_s8 + $0x464] ss:$8 sps:$4 sm:$0xff]  }
 0x8e4   :  { %12983 = vmatprep.subr.bf16.mxu1 %v23896_v34  ;;  %v31994_v34 = vpack.c.bf16 %v28718_v17, %v28711_v39  ;;  %v23942_v39 = vld [vmem:[%s31896_s8 + $0x480] ss:$8 sps:$4 sm:$0xff]   ;;  %v23952_v17 = vld [vmem:[%s31896_s8 + $0x4a4] ss:$8 sps:$4 sm:$0xff]  }
 0x8e7   :  { %12984 = vmatpush1.bf16.msra.mxu1 %v23894_v50  ;;  %v23944_v50 = vld [vmem:[%s31896_s8 + $0x484] ss:$8 sps:$4 sm:$0xff]  }
 0x8e8   :  { %12985 = vmatprep.subr.bf16.mxu1 %v23899_v53  ;;  %v23950_v53 = vld [vmem:[%s31896_s8 + $0x4a0] ss:$8 sps:$4 sm:$0xff]  }
 0x8eb   :  { %12986 = vmatpush1.bf16.msra.mxu1 %v23897_v47  ;;  %v23955_v47 = vld [vmem:[%s31896_s8 + $0x4b4] ss:$8 sps:$4 sm:$0xff]  }
 0x8ec   :  { %12987 = vmatprep.subr.bf16.mxu1 %v23902_v48 }
 0x8ef   :  { %12988 = vmatpush1.bf16.msra.mxu1 %v23900_v49 }
 0x8f0   :  { %12989 = vmatprep.subr.bf16.mxu1 %v23905_v11  ;;  %v23953_v11 = vld [vmem:[%s31896_s8 + $0x4b0] ss:$8 sps:$4 sm:$0xff]  }
 0x8f3   :  { %12990 = vmatpush1.bf16.msra.mxu1 %v23903_v27 }
 0x8f4   :  { %12991 = vmatprep.subr.bf16.mxu1 %v23910_v25  ;;  %v23958_v25 = vld [vmem:[%s31896_s8 + $0x4c4] ss:$8 sps:$4 sm:$0xff]  }
 0x8f7   :  { %12992 = vmatpush1.bf16.msra.mxu1 %v23908_v5 }
 0x8f8   :  { %12993 = vmatprep.subr.bf16.mxu1 %v23913_v8 }
 0x8fb   :  { %12994 = vmatpush1.bf16.msra.mxu1 %v23911_v42 }
 0x8fc   :  { %13036 = vmatprep.subr.bf16.mxu1 %v23916_v14  ;;  %v23956_v14 = vld [vmem:[%s31896_s8 + $0x4c0] ss:$8 sps:$4 sm:$0xff]  }
 0x8fe   :  { %12996 = vmatmul.mubr.bf16.vlgmr.msra.gmra.mrb[200].mxu1 %v31988_v19 }
 0x8ff   :  { %13005 = vmatprep.mubr.bf16.mxu1 %v31989_v36  ;;  %13037 = vmatpush1.bf16.msra.mxu1 %v23914_v30  ;;  %v23963_v30 = vld [vmem:[%s31896_s8 + $0x4d4] ss:$8 sps:$4 sm:$0xff]   ;;  %v23961_v36 = vld [vmem:[%s31896_s8 + $0x4d0] ss:$8 sps:$4 sm:$0xff]  }
 0x900   :  { %13038 = vmatprep.subr.bf16.mxu1 %v23919_v21 }
 0x903   :  { %13039 = vmatpush1.bf16.msra.mxu1 %v23917_v56 }
 0x904   :  { %13040 = vmatprep.subr.bf16.mxu1 %v23922_v37  ;;  %v23966_v37 = vld [vmem:[%s31896_s8 + $0x4e4] ss:$8 sps:$4 sm:$0xff]  }
 0x906   :  { %13006 = vmatmul.mubr.bf16.gmra.mrb[204].mxu1 %v31990_v4 }
 0x907   :  { %13041 = vmatpush1.bf16.msra.mxu1 %v23920_v60  ;;  %13015 = vmatprep.mubr.bf16.mxu1 %v31991_v16  ;;  %v23969_v16 = vld [vmem:[%s31896_s8 + $0x4f4] ss:$8 sps:$4 sm:$0xff]  }
 0x908   :  { %13042 = vmatprep.subr.bf16.mxu1 %v23925_v1  ;;  %v29222_v48 = vpop.f32.mrb[176].mxu0 }
 0x909   :  { %v29224_v49 = vpop.f32.mrb[177].mxu0 }
 0x90a   :  { %v29229_v27 = vpop.f32.mrb[178].mxu0 }
 0x90b   :  { %13043 = vmatpush1.bf16.msra.mxu1 %v23923_v10  ;;  %v11270_v5 = vpack.c.bf16 %v29229_v27, %v29222_v48  ;;  %v29236_v8 = vpop.f32.mrb[179].mxu0  ;;  %v23964_v10 = vld [vmem:[%s31896_s8 + $0x4e0] ss:$8 sps:$4 sm:$0xff]   ;;  %v24083_v27 = vld [vmem:[%s31896_s8 + $0x754] ss:$8 sps:$4 sm:$0xff]  }
 0x90c   :  { %13044 = vmatprep.subr.bf16.mxu1 %v23928_v28  ;;  %v11269_v42 = vpack.c.bf16 %v29236_v8, %v29224_v49  ;;  %v24072_v49 = vld [vmem:[%s31896_s8 + $0x720] ss:$8 sps:$4 sm:$0xff]   ;;  %v24077_v8 = vld [vmem:[%s31896_s8 + $0x734] ss:$8 sps:$4 sm:$0xff]  }
 0x90d   :  { %v24078_v48 = vld [vmem:[%s31896_s8 + $0x740] ss:$8 sps:$4 sm:$0xff]  }
 0x90e   :  { %13016 = vmatmul.mubr.bf16.gmra.mrb[208].mxu1 %v31992_v55 }
 0x90f   :  { %13045 = vmatpush1.bf16.msra.mxu1 %v23926_v52  ;;  %13025 = vmatprep.mubr.bf16.mxu1 %v31993_v44 }
 0x910   :  { %13046 = vmatprep.subr.bf16.mxu1 %v23933_v58  ;;  %v23967_v58 = vld [vmem:[%s31896_s8 + $0x4f0] ss:$8 sps:$4 sm:$0xff]  }
 0x913   :  { %13047 = vmatpush1.bf16.msra.mxu1 %v23931_v46  ;;  %v23972_v46 = vld [vmem:[%s31896_s8 + $0x504] ss:$8 sps:$4 sm:$0xff]  }
 0x914   :  { %13048 = vmatprep.subr.bf16.mxu1 %v23936_v3 }
 0x916   :  { %13026 = vmatmul.mubr.bf16.gmra.mrb[212].mxu1 %v31994_v34  ;;  %v23975_v34 = vld [vmem:[%s31896_s8 + $0x514] ss:$8 sps:$4 sm:$0xff]  }
 0x917   :  { %13049 = vmatpush1.bf16.msra.mxu1 %v23934_v12  ;;  %13068 = vmatprep.mubr.bf16.mxu1 %v31995_v13  ;;  %v31996_v13 = vpack.c.bf16 %v28704_v24, %v28696_v31  ;;  %v23976_v31 = vld [vmem:[%s31896_s8 + $0x520] ss:$8 sps:$4 sm:$0xff]   ;;  %v31998_v24 = vpack.c.bf16 %v28700_v62, %v28689_v26 }
 0x918   :  { %13050 = vmatprep.subr.bf16.mxu1 %v23941_v43  ;;  %v29246_v21 = vpop.f32.mrb[180].mxu0  ;;  %v23970_v43 = vld [vmem:[%s31896_s8 + $0x500] ss:$8 sps:$4 sm:$0xff]  }
 0x919   :  { %v29248_v19 = vpop.f32.mrb[181].mxu0 }
 0x91a   :  { %v29253_v56 = vpop.f32.mrb[182].mxu0 }
 0x91b   :  { %13051 = vmatpush1.bf16.msra.mxu1 %v23939_v15  ;;  %v11272_v60 = vpack.c.bf16 %v29253_v56, %v29246_v21  ;;  %v29260_v1 = vpop.f32.mrb[183].mxu0  ;;  %v31997_v15 = vpack.c.bf16 %v28780_v45, %v28769_v40  ;;  %v23981_v40 = vld [vmem:[%s31896_s8 + $0x534] ss:$8 sps:$4 sm:$0xff]   ;;  %v31999_v45 = vpack.c.bf16 %v28814_v23, %v28808_v38  ;;  %v23982_v23 = vld [vmem:[%s31896_s8 + $0x540] ss:$8 sps:$4 sm:$0xff]  }
 0x91c   :  { %13052 = vmatprep.subr.bf16.mxu1 %v23944_v50  ;;  %v11271_v4 = vpack.c.bf16 %v29260_v1, %v29248_v19  ;;  %v23973_v50 = vld [vmem:[%s31896_s8 + $0x510] ss:$8 sps:$4 sm:$0xff]   ;;  %v24084_v19 = vld [vmem:[%s31896_s8 + $0x760] ss:$8 sps:$4 sm:$0xff]   ;;  %v24089_v1 = vld [vmem:[%s31896_s8 + $0x774] ss:$8 sps:$4 sm:$0xff]  }
 0x91d   :  { %v24090_v21 = vld [vmem:[%s31896_s8 + $0x780] ss:$8 sps:$4 sm:$0xff]   ;;  %v24095_v56 = vld [vmem:[%s31896_s8 + $0x794] ss:$8 sps:$4 sm:$0xff]  }
 0x91f   :  { %13053 = vmatpush1.bf16.msra.mxu1 %v23942_v39  ;;  %v23978_v39 = vld [vmem:[%s31896_s8 + $0x524] ss:$8 sps:$4 sm:$0xff]  }
 0x920   :  { %13054 = vmatprep.subr.bf16.mxu1 %v23949_v9  ;;  %v29270_v28 = vpop.f32.mrb[184].mxu0  ;;  %v23979_v9 = vld [vmem:[%s31896_s8 + $0x530] ss:$8 sps:$4 sm:$0xff]  }
 0x921   :  { %v29272_v52 = vpop.f32.mrb[185].mxu0 }
 0x922   :  { %v29277_v55 = vpop.f32.mrb[186].mxu0 }
 0x923   :  { %13055 = vmatpush1.bf16.msra.mxu1 %v23947_v41  ;;  %v11274_v44 = vpack.c.bf16 %v29277_v55, %v29270_v28  ;;  %v29284_v3 = vpop.f32.mrb[187].mxu0  ;;  %v24080_v28 = vld [vmem:[%s31896_s8 + $0x744] ss:$8 sps:$4 sm:$0xff]  }
 0x924   :  { %13056 = vmatprep.subr.bf16.mxu1 %v23952_v17  ;;  %v11273_v12 = vpack.c.bf16 %v29284_v3, %v29272_v52  ;;  %v23984_v17 = vld [vmem:[%s31896_s8 + $0x544] ss:$8 sps:$4 sm:$0xff]   ;;  %v24045_v52 = vld [vmem:[%s31896_s8 + $0x690] ss:$8 sps:$4 sm:$0xff]  }
 0x925   :  { %v24050_v3 = vld [vmem:[%s31896_s8 + $0x6a4] ss:$8 sps:$4 sm:$0xff]  }
 0x926   :  { %v24086_v55 = vld [vmem:[%s31896_s8 + $0x764] ss:$8 sps:$4 sm:$0xff]  }
 0x927   :  { %13057 = vmatpush1.bf16.msra.mxu1 %v23950_v53 }
 0x928   :  { %13058 = vmatprep.subr.bf16.mxu1 %v23955_v47 }
 0x92b   :  { %13059 = vmatpush1.bf16.msra.mxu1 %v23953_v11  ;;  %v23987_v11 = vld [vmem:[%s31896_s8 + $0x554] ss:$8 sps:$4 sm:$0xff]  }
 0x92c   :  { %13060 = vmatprep.subr.bf16.mxu1 %v23958_v25  ;;  %v32000_v25 = vpack.c.bf16 %v28743_v6, %v28732_v29  ;;  %v23988_v6 = vld [vmem:[%s31896_s8 + $0x560] ss:$8 sps:$4 sm:$0xff]  }
 0x92d   :  { %v32002_v29 = vld [vmem:[#allocation7_spill] sm:$0xff] }
 0x92f   :  { %13061 = vmatpush1.bf16.msra.mxu1 %v23956_v14  ;;  %v32001_v14 = vpack.c.bf16 %v28810_v2, %v28803_v33  ;;  %v23993_v33 = vld [vmem:[%s31896_s8 + $0x574] ss:$8 sps:$4 sm:$0xff]   ;;  %v32003_v2 = vpack.c.bf16 %v28739_v61, %v32002_v29  ;;  %v23994_v61 = vld [vmem:[%s31896_s8 + $0x580] ss:$8 sps:$4 sm:$0xff]  }
 0x930   :  { %13062 = vmatprep.subr.bf16.mxu1 %v23963_v30  ;;  %v23985_v30 = vld [vmem:[%s31896_s8 + $0x550] ss:$8 sps:$4 sm:$0xff]   ;;  %v24017_v29 = vld [vmem:[%s31896_s8 + $0x5f4] ss:$8 sps:$4 sm:$0xff]  }
 0x933   :  { %13063 = vmatpush1.bf16.msra.mxu1 %v23961_v36  ;;  %v23990_v36 = vld [vmem:[%s31896_s8 + $0x564] ss:$8 sps:$4 sm:$0xff]  }
 0x934   :  { %13064 = vmatprep.subr.bf16.mxu1 %v23966_v37  ;;  %v32004_v37 = vpack.c.bf16 %v28932_v51, %v28924_v18  ;;  %v23999_v18 = vld [vmem:[%s31896_s8 + $0x594] ss:$8 sps:$4 sm:$0xff]   ;;  %v23997_v51 = vld [vmem:[%s31896_s8 + $0x590] ss:$8 sps:$4 sm:$0xff]  }
 0x937   :  { %13065 = vmatpush1.bf16.msra.mxu1 %v23964_v10  ;;  %v23991_v10 = vld [vmem:[%s31896_s8 + $0x570] ss:$8 sps:$4 sm:$0xff]  }
 0x938   :  { %13066 = vmatprep.subr.bf16.mxu1 %v23969_v16  ;;  %v23996_v16 = vld [vmem:[%s31896_s8 + $0x584] ss:$8 sps:$4 sm:$0xff]  }
 0x93b   :  { %13067 = vmatpush1.bf16.msra.mxu1 %v23967_v58  ;;  %v24002_v58 = vld [vmem:[%s31896_s8 + $0x5a4] ss:$8 sps:$4 sm:$0xff]  }
 0x93c   :  { %13109 = vmatprep.subr.bf16.mxu1 %v23972_v46  ;;  %v24000_v46 = vld [vmem:[%s31896_s8 + $0x5a0] ss:$8 sps:$4 sm:$0xff]  }
 0x93e   :  { %13069 = vmatmul.mubr.bf16.vlgmr.msra.gmra.mrb[200].mxu1 %v31996_v13 }
 0x93f   :  { %13078 = vmatprep.mubr.bf16.mxu1 %v31997_v15  ;;  %13110 = vmatpush1.bf16.msra.mxu1 %v23970_v43  ;;  %v24005_v43 = vld [vmem:[%s31896_s8 + $0x5b4] ss:$8 sps:$4 sm:$0xff]  }
 0x940   :  { %13111 = vmatprep.subr.bf16.mxu1 %v23975_v34 }
 0x943   :  { %13112 = vmatpush1.bf16.msra.mxu1 %v23973_v50  ;;  %v24003_v50 = vld [vmem:[%s31896_s8 + $0x5b0] ss:$8 sps:$4 sm:$0xff]  }
 0x944   :  { %13113 = vmatprep.subr.bf16.mxu1 %v23978_v39  ;;  %v29321_v41 = vpop.f32.mrb[188].mxu0 }
 0x945   :  { %v29326_v53 = vpop.f32.mrb[189].mxu0 }
 0x946   :  { %13079 = vmatmul.mubr.bf16.gmra.mrb[204].mxu1 %v31998_v24  ;;  %v29328_v26 = vpop.f32.mrb[190].mxu0 }
 0x947   :  { %13088 = vmatprep.mubr.bf16.mxu1 %v31999_v45  ;;  %13114 = vmatpush1.bf16.msra.mxu1 %v23976_v31  ;;  %v11276_v38 = vpack.c.bf16 %v29328_v26, %v29321_v41  ;;  %v29332_v62 = vpop.f32.mrb[191].mxu0  ;;  %v24006_v45 = vld [vmem:[%s31896_s8 + $0x5c0] ss:$8 sps:$4 sm:$0xff]   ;;  %v24098_v41 = vld [vmem:[%s31896_s8 + $0x7a4] ss:$8 sps:$4 sm:$0xff]  }
 0x948   :  { %13115 = vmatprep.subr.bf16.mxu1 %v23981_v40  ;;  %v11275_v47 = vpack.c.bf16 %v29332_v62, %v29326_v53  ;;  %v24008_v40 = vld [vmem:[%s31896_s8 + $0x5c4] ss:$8 sps:$4 sm:$0xff]   ;;  %v24096_v53 = vld [vmem:[%s31896_s8 + $0x7a0] ss:$8 sps:$4 sm:$0xff]   ;;  %v24101_v26 = vld [vmem:[%s31896_s8 + $0x7b4] ss:$8 sps:$4 sm:$0xff]  }
 0x949   :  { %v24104_v62 = vld [vmem:[%s31896_s8 + $0x7c4] ss:$8 sps:$4 sm:$0xff]  }
 0x94b   :  { %13116 = vmatpush1.bf16.msra.mxu1 %v23979_v9  ;;  %v24011_v9 = vld [vmem:[%s31896_s8 + $0x5d4] ss:$8 sps:$4 sm:$0xff]  }
 0x94c   :  { %13117 = vmatprep.subr.bf16.mxu1 %v23984_v17 }
 0x94e   :  { %13089 = vmatmul.mubr.bf16.gmra.mrb[208].mxu1 %v32000_v25  ;;  %v24009_v25 = vld [vmem:[%s31896_s8 + $0x5d0] ss:$8 sps:$4 sm:$0xff]  }
 0x94f   :  { %13098 = vmatprep.mubr.bf16.mxu1 %v32001_v14  ;;  %13118 = vmatpush1.bf16.msra.mxu1 %v23982_v23 }
 0x950   :  { %13119 = vmatprep.subr.bf16.mxu1 %v23987_v11 }
 0x953   :  { %13120 = vmatpush1.bf16.msra.mxu1 %v23985_v30 }
 0x954   :  { %13121 = vmatprep.subr.bf16.mxu1 %v23990_v36  ;;  %v24014_v36 = vld [vmem:[%s31896_s8 + $0x5e4] ss:$8 sps:$4 sm:$0xff]  }
 0x956   :  { %13099 = vmatmul.mubr.bf16.gmra.mrb[212].mxu1 %v32003_v2 }
 0x957   :  { %13122 = vmatpush1.bf16.msra.mxu1 %v23988_v6  ;;  %13141 = vmatprep.mubr.bf16.mxu1 %v32004_v37 }
 0x958   :  { %13123 = vmatprep.subr.bf16.mxu1 %v23993_v33  ;;  %v24012_v33 = vld [vmem:[%s31896_s8 + $0x5e0] ss:$8 sps:$4 sm:$0xff]  }
 0x95b   :  { %13124 = vmatpush1.bf16.msra.mxu1 %v23991_v10 }
 0x95c   :  { %13125 = vmatprep.subr.bf16.mxu1 %v23996_v16  ;;  %v24015_v16 = vld [vmem:[%s31896_s8 + $0x5f0] ss:$8 sps:$4 sm:$0xff]  }
 0x95f   :  { %13126 = vmatpush1.bf16.msra.mxu1 %v23994_v61 }
 0x960   :  { %13127 = vmatprep.subr.bf16.mxu1 %v23999_v18  ;;  %v29390_v34 = vpop.f32.mrb[192].mxu0 }
 0x961   :  { %v29392_v13 = vpop.f32.mrb[193].mxu0 }
 0x962   :  { %v29394_v15 = vpop.f32.mrb[194].mxu0 }
 0x963   :  { %13128 = vmatpush1.bf16.msra.mxu1 %v23997_v51  ;;  %v11278_v39 = vpack.c.bf16 %v29394_v15, %v29390_v34  ;;  %v29401_v31 = vpop.f32.mrb[195].mxu0  ;;  %v24020_v51 = vld [vmem:[%s31896_s8 + $0x604] ss:$8 sps:$4 sm:$0xff]   ;;  %v24126_v34 = vld [vmem:[%s31896_s8 + $0x840] ss:$8 sps:$4 sm:$0xff]  }
 0x964   :  { %13129 = vmatprep.subr.bf16.mxu1 %v24002_v58  ;;  %v11277_v24 = vpack.c.bf16 %v29401_v31, %v29392_v13  ;;  %v24120_v13 = vld [vmem:[%s31896_s8 + $0x820] ss:$8 sps:$4 sm:$0xff]   ;;  %v24125_v31 = vld [vmem:[%s31896_s8 + $0x834] ss:$8 sps:$4 sm:$0xff]  }
 0x965   :  { %v24131_v15 = vld [vmem:[%s31896_s8 + $0x854] ss:$8 sps:$4 sm:$0xff]  }
 0x967   :  { %13130 = vmatpush1.bf16.msra.mxu1 %v24000_v46  ;;  %v24018_v46 = vld [vmem:[%s31896_s8 + $0x600] ss:$8 sps:$4 sm:$0xff]  }
 0x968   :  { %13131 = vmatprep.subr.bf16.mxu1 %v24005_v43  ;;  %v29414_v17 = vpop.f32.mrb[196].mxu0  ;;  %v24023_v43 = vld [vmem:[%s31896_s8 + $0x614] ss:$8 sps:$4 sm:$0xff]  }
 0x969   :  { %v29416_v23 = vpop.f32.mrb[197].mxu0 }
 0x96a   :  { %v29418_v11 = vpop.f32.mrb[198].mxu0 }
 0x96b   :  { %13132 = vmatpush1.bf16.msra.mxu1 %v24003_v50  ;;  %v11280_v14 = vpack.c.bf16 %v29418_v11, %v29414_v17  ;;  %v29425_v30 = vpop.f32.mrb[199].mxu0  ;;  %v32005_v50 = vpack.c.bf16 %v28854_v54, %v28842_v59  ;;  %v24024_v59 = vld [vmem:[%s31896_s8 + $0x620] ss:$8 sps:$4 sm:$0xff]   ;;  %v24029_v54 = vld [vmem:[%s31896_s8 + $0x634] ss:$8 sps:$4 sm:$0xff]   ;;  %v11374_v11 = vlaneseq }
 0x96c   :  { %13133 = vmatprep.subr.bf16.mxu1 %v24008_v40  ;;  %v11279_v6 = vpack.c.bf16 %v29425_v30, %v29416_v23  ;;  %v32006_v40 = vpack.c.bf16 %v28927_v7, %v28916_v57  ;;  %v24132_v23 = vld [vmem:[%s31896_s8 + $0x860] ss:$8 sps:$4 sm:$0xff]   ;;  %v24137_v30 = vld [vmem:[%s31896_s8 + $0x874] ss:$8 sps:$4 sm:$0xff]  }
 0x96d   :  { %v32019_v17 = vld [vmem:[#allocation6_spill] sm:$0xff] }
 0x96f   :  { %13134 = vmatpush1.bf16.msra.mxu1 %v24006_v45  ;;  %v24021_v45 = vld [vmem:[%s31896_s8 + $0x610] ss:$8 sps:$4 sm:$0xff]  }
 0x970   :  { %13135 = vmatprep.subr.bf16.mxu1 %v24011_v9  ;;  %v29438_v2 = vpop.f32.mrb[200].mxu0  ;;  %v24026_v9 = vld [vmem:[%s31896_s8 + $0x624] ss:$8 sps:$4 sm:$0xff]  }
 0x971   :  { %v29440_v37 = vpop.f32.mrb[201].mxu0 }
 0x972   :  { %v29442_v10 = vpop.f32.mrb[202].mxu0 }
 0x973   :  { %13136 = vmatpush1.bf16.msra.mxu1 %v24009_v25  ;;  %v11282_v61 = vpack.c.bf16 %v29442_v10, %v29438_v2  ;;  %v29449_v18 = vpop.f32.mrb[203].mxu0  ;;  %v32007_v25 = vpack.c.bf16 %v28846_v20, %v28835_v63  ;;  %v24032_v63 = vld [vmem:[%s31896_s8 + $0x644] ss:$8 sps:$4 sm:$0xff]  }
 0x974   :  { %13137 = vmatprep.subr.bf16.mxu1 %v24014_v36  ;;  %v11281_v58 = vpack.c.bf16 %v29449_v18, %v29440_v37  ;;  %v24107_v37 = vld [vmem:[%s31896_s8 + $0x7d4] ss:$8 sps:$4 sm:$0xff]   ;;  %v24105_v18 = vld [vmem:[%s31896_s8 + $0x7d0] ss:$8 sps:$4 sm:$0xff]   ;;  %v24128_v2 = vld [vmem:[%s31896_s8 + $0x844] ss:$8 sps:$4 sm:$0xff]  }
 0x975   :  { %v24134_v10 = vld [vmem:[%s31896_s8 + $0x864] ss:$8 sps:$4 sm:$0xff]  }
 0x977   :  { %13138 = vmatpush1.bf16.msra.mxu1 %v24012_v33  ;;  %v32008_v33 = vpack.c.bf16 %v28964_v35, %v28956_v0  ;;  %v24030_v0 = vld [vmem:[%s31896_s8 + $0x640] ss:$8 sps:$4 sm:$0xff]   ;;  %v24035_v35 = vld [vmem:[%s31896_s8 + $0x654] ss:$8 sps:$4 sm:$0xff]  }
 0x978   :  { %13139 = vmatprep.subr.bf16.mxu1 %v24017_v29  ;;  %v24027_v29 = vld [vmem:[%s31896_s8 + $0x630] ss:$8 sps:$4 sm:$0xff]  }
 0x97b   :  { %13140 = vmatpush1.bf16.msra.mxu1 %v24015_v16 }
 0x97c   :  { %13182 = vmatprep.subr.bf16.mxu1 %v24020_v51 }
 0x97e   :  { %13142 = vmatmul.mubr.bf16.vlgmr.msra.gmra.mrb[200].mxu1 %v32005_v50 }
 0x97f   :  { %13151 = vmatprep.mubr.bf16.mxu1 %v32006_v40  ;;  %13183 = vmatpush1.bf16.msra.mxu1 %v24018_v46  ;;  %v29480_v57 = vpop.f32.mrb[204].mxu0  ;;  %v32009_v46 = vld [vmem:[#allocation11_spill] sm:$0xff]  ;;  %v32012_v40 = vpack.c.bf16 %v28959_v32, %v28948_v22  ;;  %v24041_v22 = vld [vmem:[%s31896_s8 + $0x674] ss:$8 sps:$4 sm:$0xff]  }
 0x980   :  { %13184 = vmatprep.subr.bf16.mxu1 %v24023_v43  ;;  %v29482_v7 = vpop.f32.mrb[205].mxu0  ;;  %v32010_v43 = vld [vmem:[#allocation9_spill] sm:$0xff]  ;;  %v32013_v32 = vld [vmem:[#allocation10_spill] sm:$0xff] }
 0x981   :  { %v29487_v36 = vpop.f32.mrb[206].mxu0  ;;  %v32011_v50 = vpack.c.bf16 %v32009_v46, %v32010_v43  ;;  %v24053_v46 = vld [vmem:[%s31896_s8 + $0x6b4] ss:$8 sps:$4 sm:$0xff]   ;;  %v24051_v43 = vld [vmem:[%s31896_s8 + $0x6b0] ss:$8 sps:$4 sm:$0xff]  }
 0x982   :  { %v11284_v16 = vpack.c.bf16 %v29487_v36, %v29480_v57  ;;  %v29497_v51 = vpop.f32.mrb[207].mxu0  ;;  %v32017_v57 = vld [vmem:[#allocation4_spill] sm:$0xff] }
 0x983   :  { %13185 = vmatpush1.bf16.msra.mxu1 %v24021_v45  ;;  %v11283_v20 = vpack.c.bf16 %v29497_v51, %v29482_v7  ;;  %v24033_v45 = vld [vmem:[%s31896_s8 + $0x650] ss:$8 sps:$4 sm:$0xff]  }
 0x984   :  { %13186 = vmatprep.subr.bf16.mxu1 %v24026_v9  ;;  %v24038_v9 = vld [vmem:[%s31896_s8 + $0x664] ss:$8 sps:$4 sm:$0xff]   ;;  %v32018_v7 = vld [vmem:[#allocation5_spill] sm:$0xff] }
 0x986   :  { %13152 = vmatmul.mubr.bf16.gmra.mrb[204].mxu1 %v32007_v25 }
 0x987   :  { %13161 = vmatprep.mubr.bf16.mxu1 %v32008_v33  ;;  %13187 = vmatpush1.bf16.msra.mxu1 %v24024_v59  ;;  %v24036_v59 = vld [vmem:[%s31896_s8 + $0x660] ss:$8 sps:$4 sm:$0xff]   ;;  %v24039_v33 = vld [vmem:[%s31896_s8 + $0x670] ss:$8 sps:$4 sm:$0xff]  }
 0x988   :  { %13188 = vmatprep.subr.bf16.mxu1 %v24029_v54  ;;  %v32014_v54 = vld [vmem:[#allocation8_spill] sm:$0xff] }
 0x989   :  { %v32015_v25 = vpack.c.bf16 %v32013_v32, %v32014_v54  ;;  %v24065_v32 = vld [vmem:[%s31896_s8 + $0x6f4] ss:$8 sps:$4 sm:$0xff]   ;;  %v24063_v54 = vld [vmem:[%s31896_s8 + $0x6f0] ss:$8 sps:$4 sm:$0xff]  }
 0x98b   :  { %13189 = vmatpush1.bf16.msra.mxu1 %v24027_v29  ;;  %v24044_v29 = vld [vmem:[%s31896_s8 + $0x684] ss:$8 sps:$4 sm:$0xff]  }
 0x98c   :  { %13190 = vmatprep.subr.bf16.mxu1 %v24032_v63  ;;  %v24042_v63 = vld [vmem:[%s31896_s8 + $0x680] ss:$8 sps:$4 sm:$0xff]  }
 0x98e   :  { %13162 = vmatmul.mubr.bf16.gmra.mrb[208].mxu1 %v32011_v50  ;;  %v24056_v50 = vld [vmem:[%s31896_s8 + $0x6c4] ss:$8 sps:$4 sm:$0xff]  }
 0x98f   :  { %13171 = vmatprep.mubr.bf16.mxu1 %v32012_v40  ;;  %13191 = vmatpush1.bf16.msra.mxu1 %v24030_v0  ;;  %v24047_v0 = vld [vmem:[%s31896_s8 + $0x694] ss:$8 sps:$4 sm:$0xff]   ;;  %v24054_v40 = vld [vmem:[%s31896_s8 + $0x6c0] ss:$8 sps:$4 sm:$0xff]  }
 0x990   :  { %13192 = vmatprep.subr.bf16.mxu1 %v24035_v35  ;;  %v31912_v35 = vmov 0  }
 0x991   :  { %14162 = vmatprep.mubr.bf16.mxu0 %v31912_v35 }
 0x993   :  { %13193 = vmatpush1.bf16.msra.mxu1 %v24033_v45  ;;  %v24059_v45 = vld [vmem:[%s31896_s8 + $0x6d4] ss:$8 sps:$4 sm:$0xff]  }
 0x994   :  { %13194 = vmatprep.subr.bf16.mxu1 %v24038_v9  ;;  %v24057_v9 = vld [vmem:[%s31896_s8 + $0x6d0] ss:$8 sps:$4 sm:$0xff]  }
 0x996   :  { %13172 = vmatmul.mubr.bf16.gmra.mrb[212].mxu1 %v32015_v25  ;;  %v24068_v25 = vld [vmem:[%s31896_s8 + $0x704] ss:$8 sps:$4 sm:$0xff]  }
 0x997   :  { %13195 = vmatpush1.bf16.msra.mxu1 %v24036_v59  ;;  %13214 = vmatprep.mubr.bf16.mxu1 %v11273_v12  ;;  %v24048_v12 = vld [vmem:[%s31896_s8 + $0x6a0] ss:$8 sps:$4 sm:$0xff]   ;;  %v24062_v59 = vld [vmem:[%s31896_s8 + $0x6e4] ss:$8 sps:$4 sm:$0xff]  }
 0x998   :  { %13196 = vmatprep.subr.bf16.mxu1 %v24041_v22  ;;  %v24060_v22 = vld [vmem:[%s31896_s8 + $0x6e0] ss:$8 sps:$4 sm:$0xff]  }
 0x99b   :  { %13197 = vmatpush1.bf16.msra.mxu1 %v24039_v33  ;;  %v24066_v33 = vld [vmem:[%s31896_s8 + $0x700] ss:$8 sps:$4 sm:$0xff]  }
 0x99c   :  { %13198 = vmatprep.subr.bf16.mxu1 %v24044_v29  ;;  %v24071_v29 = vld [vmem:[%s31896_s8 + $0x714] ss:$8 sps:$4 sm:$0xff]  }
 0x99f   :  { %13199 = vmatpush1.bf16.msra.mxu1 %v24042_v63  ;;  %v24069_v63 = vld [vmem:[%s31896_s8 + $0x710] ss:$8 sps:$4 sm:$0xff]  }
 0x9a0   :  { %13200 = vmatprep.subr.bf16.mxu1 %v24047_v0  ;;  %v24074_v0 = vld [vmem:[%s31896_s8 + $0x724] ss:$8 sps:$4 sm:$0xff]  }
 0x9a3   :  { %13201 = vmatpush1.bf16.msra.mxu1 %v24045_v52  ;;  %v24108_v52 = vld [vmem:[%s31896_s8 + $0x7e0] ss:$8 sps:$4 sm:$0xff]  }
 0x9a4   :  { %13202 = vmatprep.subr.bf16.mxu1 %v24050_v3  ;;  %v24113_v3 = vld [vmem:[%s31896_s8 + $0x7f4] ss:$8 sps:$4 sm:$0xff]  }
 0x9a7   :  { %13203 = vmatpush1.bf16.msra.mxu1 %v24048_v12  ;;  %v24111_v12 = vld [vmem:[%s31896_s8 + $0x7f0] ss:$8 sps:$4 sm:$0xff]  }
 0x9a8   :  { %13204 = vmatprep.subr.bf16.mxu1 %v24053_v46  ;;  %v24116_v46 = vld [vmem:[%s31896_s8 + $0x804] ss:$8 sps:$4 sm:$0xff]  }
 0x9ab   :  { %13205 = vmatpush1.bf16.msra.mxu1 %v24051_v43  ;;  %v24114_v43 = vld [vmem:[%s31896_s8 + $0x800] ss:$8 sps:$4 sm:$0xff]  }
 0x9ac   :  { %13206 = vmatprep.subr.bf16.mxu1 %v24056_v50  ;;  %v24119_v50 = vld [vmem:[%s31896_s8 + $0x814] ss:$8 sps:$4 sm:$0xff]  }
 0x9af   :  { %13207 = vmatpush1.bf16.msra.mxu1 %v24054_v40  ;;  %v24117_v40 = vld [vmem:[%s31896_s8 + $0x810] ss:$8 sps:$4 sm:$0xff]  }
 0x9b0   :  { %13208 = vmatprep.subr.bf16.mxu1 %v24059_v45  ;;  %v24122_v45 = vld [vmem:[%s31896_s8 + $0x824] ss:$8 sps:$4 sm:$0xff]  }
 0x9b3   :  { %13209 = vmatpush1.bf16.msra.mxu1 %v24057_v9 }
 0x9b4   :  { %13210 = vmatprep.subr.bf16.mxu1 %v24062_v59 }
 0x9b7   :  { %13211 = vmatpush1.bf16.msra.mxu1 %v24060_v22 }
 0x9b8   :  { %13212 = vmatprep.subr.bf16.mxu1 %v24065_v32 }
 0x9bb   :  { %13213 = vmatpush1.bf16.msra.mxu1 %v24063_v54 }
 0x9bc   :  { %13255 = vmatprep.subr.bf16.mxu1 %v24068_v25 }
 0x9be   :  { %13215 = vmatmul.mubr.bf16.vlgmr.msra.gmra.mrb[200].mxu1 %v11269_v42  ;;  %v24075_v42 = vld [vmem:[%s31896_s8 + $0x730] ss:$8 sps:$4 sm:$0xff]  }
 0x9bf   :  { %13224 = vmatprep.mubr.bf16.mxu1 %v11274_v44  ;;  %13256 = vmatpush1.bf16.msra.mxu1 %v24066_v33  ;;  %v24092_v44 = vld [vmem:[%s31896_s8 + $0x784] ss:$8 sps:$4 sm:$0xff]  }
 0x9c0   :  { %13257 = vmatprep.subr.bf16.mxu1 %v24071_v29 }
 0x9c3   :  { %13258 = vmatpush1.bf16.msra.mxu1 %v24069_v63 }
 0x9c4   :  { %13259 = vmatprep.subr.bf16.mxu1 %v24074_v0 }
 0x9c6   :  { %13225 = vmatmul.mubr.bf16.gmra.mrb[204].mxu1 %v11270_v5  ;;  %v24081_v5 = vld [vmem:[%s31896_s8 + $0x750] ss:$8 sps:$4 sm:$0xff]  }
 0x9c7   :  { %13260 = vmatpush1.bf16.msra.mxu1 %v24072_v49  ;;  %13234 = vmatprep.mubr.bf16.mxu1 %v11275_v47  ;;  %v24102_v47 = vld [vmem:[%s31896_s8 + $0x7c0] ss:$8 sps:$4 sm:$0xff]  }
 0x9c8   :  { %13261 = vmatprep.subr.bf16.mxu1 %v24077_v8 }
 0x9cb   :  { %13262 = vmatpush1.bf16.msra.mxu1 %v24075_v42 }
 0x9cc   :  { %13263 = vmatprep.subr.bf16.mxu1 %v24080_v28 }
 0x9ce   :  { %13235 = vmatmul.mubr.bf16.gmra.mrb[208].mxu1 %v11271_v4  ;;  %v24087_v4 = vld [vmem:[%s31896_s8 + $0x770] ss:$8 sps:$4 sm:$0xff]  }
 0x9cf   :  { %13264 = vmatpush1.bf16.msra.mxu1 %v24078_v48  ;;  %13244 = vmatprep.mubr.bf16.mxu1 %v11276_v38  ;;  %v24099_v38 = vld [vmem:[%s31896_s8 + $0x7b0] ss:$8 sps:$4 sm:$0xff]  }
 0x9d0   :  { %13265 = vmatprep.subr.bf16.mxu1 %v24083_v27 }
 0x9d3   :  { %13266 = vmatpush1.bf16.msra.mxu1 %v24081_v5 }
 0x9d4   :  { %13267 = vmatprep.subr.bf16.mxu1 %v24086_v55 }
 0x9d6   :  { %13245 = vmatmul.mubr.bf16.gmra.mrb[212].mxu1 %v11272_v60  ;;  %v24093_v60 = vld [vmem:[%s31896_s8 + $0x790] ss:$8 sps:$4 sm:$0xff]  }
 0x9d7   :  { %13268 = vmatpush1.bf16.msra.mxu1 %v24084_v19  ;;  %13287 = vmatprep.mubr.bf16.mxu1 %v11281_v58  ;;  %v24110_v58 = vld [vmem:[%s31896_s8 + $0x7e4] ss:$8 sps:$4 sm:$0xff]  }
 0x9d8   :  { %13269 = vmatprep.subr.bf16.mxu1 %v24089_v1 }
 0x9db   :  { %13270 = vmatpush1.bf16.msra.mxu1 %v24087_v4 }
 0x9dc   :  { %13271 = vmatprep.subr.bf16.mxu1 %v24092_v44 }
 0x9df   :  { %13272 = vmatpush1.bf16.msra.mxu1 %v24090_v21 }
 0x9e0   :  { %13273 = vmatprep.subr.bf16.mxu1 %v24095_v56 }
 0x9e3   :  { %13274 = vmatpush1.bf16.msra.mxu1 %v24093_v60 }
 0x9e4   :  { %13275 = vmatprep.subr.bf16.mxu1 %v24098_v41 }
 0x9e7   :  { %13276 = vmatpush1.bf16.msra.mxu1 %v24096_v53 }
 0x9e8   :  { %13277 = vmatprep.subr.bf16.mxu1 %v24101_v26 }
 0x9eb   :  { %13278 = vmatpush1.bf16.msra.mxu1 %v24099_v38 }
 0x9ec   :  { %13279 = vmatprep.subr.bf16.mxu1 %v24104_v62 }
 0x9ef   :  { %13280 = vmatpush1.bf16.msra.mxu1 %v24102_v47 }
 0x9f0   :  { %13281 = vmatprep.subr.bf16.mxu1 %v24107_v37 }
 0x9f3   :  { %13282 = vmatpush1.bf16.msra.mxu1 %v24105_v18 }
 0x9f4   :  { %13283 = vmatprep.subr.bf16.mxu1 %v24110_v58 }
 0x9f7   :  { %13284 = vmatpush1.bf16.msra.mxu1 %v24108_v52 }
 0x9f8   :  { %13285 = vmatprep.subr.bf16.mxu1 %v24113_v3 }
 0x9fb   :  { %13286 = vmatpush1.bf16.msra.mxu1 %v24111_v12 }
 0x9fc   :  { %13328 = vmatprep.subr.bf16.mxu1 %v24116_v46 }
 0x9fe   :  { %13288 = vmatmul.mubr.bf16.vlgmr.msra.gmra.mrb[200].mxu1 %v11277_v24  ;;  %v24123_v24 = vld [vmem:[%s31896_s8 + $0x830] ss:$8 sps:$4 sm:$0xff]  }
 0x9ff   :  { %13297 = vmatprep.mubr.bf16.mxu1 %v11282_v61  ;;  %13329 = vmatpush1.bf16.msra.mxu1 %v24114_v43  ;;  %v32016_v61 = vld [vmem:[#allocation3_spill] sm:$0xff] }
 0xa00   :  { %13330 = vmatprep.subr.bf16.mxu1 %v24119_v50 }
 0xa03   :  { %13331 = vmatpush1.bf16.msra.mxu1 %v24117_v40 }
 0xa04   :  { %13332 = vmatprep.subr.bf16.mxu1 %v24122_v45 }
 0xa06   :  { %13298 = vmatmul.mubr.bf16.gmra.mrb[204].mxu1 %v11278_v39  ;;  %v24129_v39 = vld [vmem:[%s31896_s8 + $0x850] ss:$8 sps:$4 sm:$0xff]  }
 0xa07   :  { %13333 = vmatpush1.bf16.msra.mxu1 %v24120_v13  ;;  %13307 = vmatprep.mubr.bf16.mxu1 %v11283_v20 }
 0xa08   :  { %13334 = vmatprep.subr.bf16.mxu1 %v24125_v31 }
 0xa0b   :  { %13335 = vmatpush1.bf16.msra.mxu1 %v24123_v24 }
 0xa0c   :  { %13336 = vmatprep.subr.bf16.mxu1 %v24128_v2 }
 0xa0e   :  { %13308 = vmatmul.mubr.bf16.gmra.mrb[208].mxu1 %v11279_v6  ;;  %v24135_v6 = vld [vmem:[%s31896_s8 + $0x870] ss:$8 sps:$4 sm:$0xff]  }
 0xa0f   :  { %13317 = vmatprep.mubr.bf16.mxu1 %v11284_v16  ;;  %13337 = vmatpush1.bf16.msra.mxu1 %v24126_v34  ;;  %v9876_v16 = vld [vmem:[%s31897_s9] sm:$0x3] }
 0xa10   :  { %13338 = vmatprep.subr.bf16.mxu1 %v24131_v15 }
 0xa13   :  { %13339 = vmatpush1.bf16.msra.mxu1 %v24129_v39 }
 0xa14   :  { %13340 = vmatprep.subr.bf16.mxu1 %v24134_v10 }
 0xa16   :  { %13318 = vmatmul.mubr.bf16.gmra.mrb[212].mxu1 %v11280_v14  ;;  %v11375_v14 = vshrl.u32 %v11374_v11, 7  ;;  %v24138_v11 = vld [vmem:[%s31889_s0] sm:$0xff]  }
 0xa17   :  { %13341 = vmatpush1.bf16.msra.mxu1 %v24132_v23  ;;  %13360 = vmatprep.mubr.bf16.mxu1 %v31912_v35 }
 0xa18   :  { %13342 = vmatprep.subr.bf16.mxu1 %v24137_v30  ;;  %v11376_v36 = vsub.s32 0, %v11375_v14  ;;  %v11380_v51 = vsub.s32 1, %v11375_v14  ;;  %v24139_v14 = vld [vmem:[%s31889_s0 + $0x8] sm:$0xff]  }
 0xa1a   :  { %v11377_v20 = vrot.slane %v9876_v16, %v11376_v36  ;;  %v11381_v9 = vrot.slane %v9876_v16, %v11380_v51  ;;  %v24140_v36 = vld [vmem:[%s31889_s0 + $0x10] sm:$0xff]   ;;  %v24141_v16 = vld [vmem:[%s31889_s0 + $0x18] sm:$0xff]   ;;  %v24142_v51 = vld [vmem:[%s31889_s0 + $0x20] sm:$0xff]  }
 0xa1b   :  { %13343 = vmatpush1.bf16.msra.mxu1 %v24135_v6 }
 0xa1e   :  { %13361 = vmatmul.mubr.bf16.vlgmr.msra.gmra.mrb[200].mxu1 %v32016_v61 }
 0xa1f   :  { %13370 = vmatprep.mubr.bf16.mxu1 %v31912_v35 }
 0xa26   :  { %13371 = vmatmul.mubr.bf16.gmra.mrb[204].mxu1 %v32017_v57 }
 0xa27   :  { %13380 = vmatprep.mubr.bf16.mxu1 %v31912_v35 }
 0xa2e   :  { %13381 = vmatmul.mubr.bf16.gmra.mrb[208].mxu1 %v32018_v7 }
 0xa2f   :  { %13390 = vmatprep.mubr.bf16.mxu1 %v31912_v35 }
 0xa36   :  { %13391 = vmatmul.mubr.bf16.gmra.mrb[212].mxu1 %v32019_v17 }
 0xaf1   :  { %v13362_v59 = vpop.f32.mrb[200].mxu1 }
 0xaf2   :  { %v22889_v22 = vadd.f32 %v13362_v59, %v11377_v20  ;;  %v13364_v32 = vpop.f32.mrb[201].mxu1  ;;  %v24145_v59 = vld [vmem:[%s31889_s0 + $0x38] sm:$0xff]  }
 0xaf3   :  { %v22890_v54 = vadd.f32 %v13364_v32, %v11381_v9  ;;  %v13366_v25 = vpop.f32.mrb[202].mxu1  ;;  %v24166_v32 = vld [vmem:[%s31898_s10 + $0x40] sm:$0xff]  }
 0xaf4   :  { %v22891_v33 = vadd.f32 %v13366_v25, %v11377_v20  ;;  %v13368_v29 = vpop.f32.mrb[203].mxu1  ;;  %v13946_v0 = vmax.f32 %v22889_v22, 0.0  ;;  %v24146_v22 = vld [vmem:[%s31889_s0 + $0x40] sm:$0xff]   ;;  %21481 = vmatprep.subr.bf16.mxu1 %v24166_v32  ;;  %v24168_v25 = vld [vmem:[%s31898_s10 + $0x48] sm:$0xff]  }
 0xaf5   :  { %v22892_v63 = vadd.f32 %v13368_v29, %v11381_v9  ;;  %v13947_v8 = vmax.f32 %v22890_v54, 0.0  ;;  %v24167_v54 = vld [vmem:[%s31898_s10] sm:$0xff]   ;;  %v24171_v29 = vld [vmem:[%s31898_s10 + $0x50] sm:$0xff]   ;;  %v24175_v32 = vld [vmem:[%s31889_s0 + $0xe8] sm:$0xff]  }
 0xaf6   :  { %v13948_v49 = vmax.f32 %v22891_v33, 0.0  ;;  %21482 = vmatpush3.bf16.msra.mxu1 %v24167_v54  ;;  %v24169_v33 = vld [vmem:[%s31898_s10 + $0x8] sm:$0xff]  }
 0xaf7   :  { %v13949_v42 = vmax.f32 %v22892_v63, 0.0  ;;  %21483 = vmatprep.subr.bf16.mxu1 %v24168_v25  ;;  %v24147_v63 = vld [vmem:[%s31889_s0 + $0x48] sm:$0xff]   ;;  %v24198_v25 = vld [vmem:[%s31898_s10 + $0x118] sm:$0xff]  }
 0xaf8   :  { %v29786_v28 = vpack.c.bf16 %v13948_v49, %v13946_v0  ;;  %v24172_v0 = vld [vmem:[%s31898_s10 + $0x10] sm:$0xff]   ;;  %v24173_v49 = vld [vmem:[%s31898_s10 + $0x58] sm:$0xff]  }
 0xaf9   :  { %v29788_v48 = vpack.c.bf16 %v13949_v42, %v13947_v8  ;;  %v13372_v27 = vpop.f32.mrb[204].mxu1  ;;  %v24174_v8 = vld [vmem:[%s31898_s10 + $0x18] sm:$0xff]   ;;  %v24176_v42 = vld [vmem:[%s31898_s10 + $0x60] sm:$0xff]  }
 0xafa   :  { %32020 = vst [vmem:[#allocation7_spill] sm:$0xff] %v29786_v28  ;;  %v22893_v5 = vadd.f32 %v13372_v27, %v11377_v20  ;;  %v13374_v55 = vpop.f32.mrb[205].mxu1  ;;  %21484 = vmatpush3.bf16.msra.mxu1 %v24169_v33  ;;  %v24148_v27 = vld [vmem:[%s31889_s0 + $0x50] sm:$0xff]  }
 0xafb   :  { %32021 = vst [vmem:[#allocation11_spill] sm:$0xff] %v29788_v48  ;;  %v22894_v19 = vadd.f32 %v13374_v55, %v11381_v9  ;;  %v13376_v1 = vpop.f32.mrb[206].mxu1  ;;  %14130 = vmatprep.subr.bf16.mxu0 %v29788_v48  ;;  %21485 = vmatprep.subr.bf16.mxu1 %v24171_v29  ;;  %v24178_v55 = vld [vmem:[%s31898_s10 + $0x68] sm:$0xff]   ;;  %v24200_v29 = vld [vmem:[%s31898_s10 + $0x160] sm:$0xff]  }
 0xafc   :  { %v22895_v4 = vadd.f32 %v13376_v1, %v11377_v20  ;;  %v13378_v44 = vpop.f32.mrb[207].mxu1  ;;  %14131 = vmatpush1.bf16.msra.mxu0 %v29786_v28  ;;  %v13950_v56 = vmax.f32 %v22893_v5, 0.0  ;;  %v24177_v5 = vld [vmem:[%s31898_s10 + $0x20] sm:$0xff]   ;;  %v24181_v1 = vld [vmem:[%s31898_s10 + $0x70] sm:$0xff]  }
 0xafd   :  { %v22896_v21 = vadd.f32 %v13378_v44, %v11381_v9  ;;  %v13951_v41 = vmax.f32 %v22894_v19, 0.0  ;;  %v24179_v19 = vld [vmem:[%s31898_s10 + $0x28] sm:$0xff]   ;;  %v24182_v44 = vld [vmem:[%s31898_s10 + $0x30] sm:$0xff]  }
 0xafe   :  { %v13952_v60 = vmax.f32 %v22895_v4, 0.0  ;;  %21486 = vmatpush3.bf16.msra.mxu1 %v24172_v0  ;;  %v24149_v4 = vld [vmem:[%s31889_s0 + $0x58] sm:$0xff]   ;;  %v24201_v0 = vld [vmem:[%s31898_s10 + $0x120] sm:$0xff]  }
 0xaff   :  { %v13953_v53 = vmax.f32 %v22896_v21, 0.0  ;;  %21487 = vmatprep.subr.bf16.mxu1 %v24173_v49  ;;  %v24183_v21 = vld [vmem:[%s31898_s10 + $0x78] sm:$0xff]  }
 0xb00   :  { %v29792_v26 = vpack.c.bf16 %v13952_v60, %v13950_v56  ;;  %v24184_v56 = vld [vmem:[%s31898_s10 + $0x38] sm:$0xff]   ;;  %v24150_v60 = vld [vmem:[%s31889_s0 + $0x60] sm:$0xff]  }
 0xb01   :  { %v29794_v38 = vpack.c.bf16 %v13953_v53, %v13951_v41  ;;  %v13382_v62 = vpop.f32.mrb[208].mxu1  ;;  %v24151_v41 = vld [vmem:[%s31889_s0 + $0x68] sm:$0xff]   ;;  %v24152_v53 = vld [vmem:[%s31889_s0 + $0x70] sm:$0xff]  }
 0xb02   :  { %32022 = vst [vmem:[#allocation9_spill] sm:$0xff] %v29792_v26  ;;  %v22897_v47 = vadd.f32 %v13382_v62, %v11377_v20  ;;  %v13384_v37 = vpop.f32.mrb[209].mxu1  ;;  %21488 = vmatpush3.bf16.msra.mxu1 %v24174_v8  ;;  %v24153_v62 = vld [vmem:[%s31889_s0 + $0x78] sm:$0xff]  }
 0xb03   :  { %32023 = vst [vmem:[#allocation10_spill] sm:$0xff] %v29794_v38  ;;  %v22898_v18 = vadd.f32 %v13384_v37, %v11381_v9  ;;  %v13386_v58 = vpop.f32.mrb[210].mxu1  ;;  %14132 = vmatprep.subr.bf16.mxu0 %v29794_v38  ;;  %21489 = vmatprep.subr.bf16.mxu1 %v24176_v42  ;;  %v24154_v37 = vld [vmem:[%s31889_s0 + $0x80] sm:$0xff]   ;;  %v24202_v42 = vld [vmem:[%s31898_s10 + $0x168] sm:$0xff]  }
 0xb04   :  { %v22899_v52 = vadd.f32 %v13386_v58, %v11377_v20  ;;  %v13388_v3 = vpop.f32.mrb[211].mxu1  ;;  %14133 = vmatpush1.bf16.msra.mxu0 %v29792_v26  ;;  %v13954_v46 = vmax.f32 %v22897_v47, 0.0  ;;  %v24190_v47 = vld [vmem:[%s31898_s10 + $0x140] sm:$0xff]   ;;  %v24156_v58 = vld [vmem:[%s31889_s0 + $0x90] sm:$0xff]  }
 0xb05   :  { %v22900_v12 = vadd.f32 %v13388_v3, %v11381_v9  ;;  %v13955_v50 = vmax.f32 %v22898_v18, 0.0  ;;  %v24155_v18 = vld [vmem:[%s31889_s0 + $0x88] sm:$0xff]   ;;  %v24158_v3 = vld [vmem:[%s31889_s0 + $0xa0] sm:$0xff]  }
 0xb06   :  { %v13956_v43 = vmax.f32 %v22899_v52, 0.0  ;;  %21490 = vmatpush3.bf16.msra.mxu1 %v24177_v5  ;;  %v24157_v52 = vld [vmem:[%s31889_s0 + $0x98] sm:$0xff]   ;;  %v24180_v5 = vld [vmem:[%s31889_s0 + $0xf0] sm:$0xff]  }
 0xb07   :  { %v13957_v40 = vmax.f32 %v22900_v12, 0.0  ;;  %21491 = vmatprep.subr.bf16.mxu1 %v24178_v55  ;;  %v24159_v12 = vld [vmem:[%s31889_s0 + $0xa8] sm:$0xff]  }
 0xb08   :  { %v29798_v45 = vpack.c.bf16 %v13956_v43, %v13954_v46  ;;  %v24160_v46 = vld [vmem:[%s31889_s0 + $0xb0] sm:$0xff]   ;;  %v24161_v43 = vld [vmem:[%s31889_s0 + $0xb8] sm:$0xff]  }
 0xb09   :  { %v29800_v13 = vpack.c.bf16 %v13957_v40, %v13955_v50  ;;  %v13392_v31 = vpop.f32.mrb[212].mxu1  ;;  %v24162_v50 = vld [vmem:[%s31889_s0 + $0xc0] sm:$0xff]   ;;  %v24163_v40 = vld [vmem:[%s31889_s0 + $0xc8] sm:$0xff]  }
 0xb0a   :  { %32024 = vst [vmem:[#allocation8_spill] sm:$0xff] %v29798_v45  ;;  %v22901_v24 = vadd.f32 %v13392_v31, %v11377_v20  ;;  %v13394_v2 = vpop.f32.mrb[213].mxu1  ;;  %21492 = vmatpush3.bf16.msra.mxu1 %v24179_v19  ;;  %v24164_v31 = vld [vmem:[%s31889_s0 + $0xd0] sm:$0xff]   ;;  %v24203_v19 = vld [vmem:[%s31898_s10 + $0x128] sm:$0xff]  }
 0xb0b   :  { %32025 = vst [vmem:[#allocation3_spill] sm:$0xff] %v29800_v13  ;;  %v22902_v34 = vadd.f32 %v13394_v2, %v11381_v9  ;;  %v13396_v15 = vpop.f32.mrb[214].mxu1  ;;  %14134 = vmatprep.subr.bf16.mxu0 %v29800_v13  ;;  %21493 = vmatprep.subr.bf16.mxu1 %v24181_v1  ;;  %v24165_v2 = vld [vmem:[%s31889_s0 + $0xd8] sm:$0xff]  }
 0xb0c   :  { %v22903_v39 = vadd.f32 %v13396_v15, %v11377_v20  ;;  %v13398_v10 = vpop.f32.mrb[215].mxu1  ;;  %14135 = vmatpush1.bf16.msra.mxu0 %v29798_v45  ;;  %v13958_v30 = vmax.f32 %v22901_v24, 0.0  ;;  %v24143_v20 = vld [vmem:[%s31889_s0 + $0x28] sm:$0xff]  }
 0xb0d   :  { %v22904_v23 = vadd.f32 %v13398_v10, %v11381_v9  ;;  %v13959_v61 = vmax.f32 %v22902_v34, 0.0  ;;  %v24144_v9 = vld [vmem:[%s31889_s0 + $0x30] sm:$0xff]  }
 0xb0e   :  { %v13960_v6 = vmax.f32 %v22903_v39, 0.0  ;;  %21494 = vmatpush3.bf16.msra.mxu1 %v24182_v44  ;;  %v24191_v39 = vld [vmem:[%s31898_s10 + $0x100] sm:$0xff]  }
 0xb0f   :  { %v13961_v57 = vmax.f32 %v22904_v23, 0.0  ;;  %21495 = vmatprep.subr.bf16.mxu1 %v24183_v21  ;;  %v24206_v21 = vld [vmem:[%s31898_s10 + $0x130] sm:$0xff]  }
 0xb10   :  { %v29804_v7 = vpack.c.bf16 %v13960_v6, %v13958_v30  ;;  %v24192_v30 = vld [vmem:[%s31898_s10 + $0x148] sm:$0xff]  }
 0xb11   :  { %v29806_v17 = vpack.c.bf16 %v13961_v57, %v13959_v61  ;;  %v24170_v61 = vld [vmem:[%s31889_s0 + $0xe0] sm:$0xff]  }
 0xb12   :  { %32026 = vst [vmem:[#allocation4_spill] sm:$0xff] %v29804_v7  ;;  %21496 = vmatpush3.bf16.msra.mxu1 %v24184_v56 }
 0xb13   :  { %32027 = vst [vmem:[#allocation5_spill] sm:$0xff] %v29806_v17  ;;  %14136 = vmatprep.subr.bf16.mxu0 %v29806_v17  ;;  %21561 = vmatprep.subr.bf16.mxu1 %v24190_v47 }
 0xb14   :  { %14137 = vmatpush1.bf16.msra.mxu0 %v29804_v7 }
 0xb15   :  { %14547 = vmatprep.subr.bf16.mxu0 %v29788_v48 }
 0xb17   :  { %19772 = vmatmul.mubr.msk.bf16.vlgmr.msra.gmra.mrb[208].mxu0 %vm439_vm0, %v24138_v11  ;;  %v24193_v11 = vld [vmem:[%s31898_s10 + $0x108] sm:$0xff]  }
 0xb18   :  { %14548 = vmatpush1.bf16.msra.mxu0 %v29786_v28  ;;  %14172 = vmatprep.mubr.bf16.mxu0 %v31912_v35 }
 0xb19   :  { %14549 = vmatprep.subr.bf16.mxu0 %v29794_v38 }
 0xb1c   :  { %14550 = vmatpush1.bf16.msra.mxu0 %v29792_v26 }
 0xb1d   :  { %14551 = vmatprep.subr.bf16.mxu0 %v29800_v13 }
 0xb1f   :  { %19773 = vmatmul.mubr.msk.bf16.gmra.mrb[212].mxu0 %vm439_vm0, %v24139_v14 }
 0xb20   :  { %14552 = vmatpush1.bf16.msra.mxu0 %v29798_v45  ;;  %14182 = vmatprep.mubr.bf16.mxu0 %v31912_v35 }
 0xb21   :  { %14553 = vmatprep.subr.bf16.mxu0 %v29806_v17 }
 0xb24   :  { %14554 = vmatpush1.bf16.msra.mxu0 %v29804_v7 }
 0xb25   :  { %14964 = vmatprep.subr.bf16.mxu0 %v29788_v48 }
 0xb27   :  { %19774 = vmatmul.mubr.msk.bf16.gmra.mrb[216].mxu0 %vm439_vm0, %v24140_v36  ;;  %v24195_v36 = vld [vmem:[%s31898_s10 + $0x150] sm:$0xff]  }
 0xb28   :  { %14192 = vmatprep.mubr.bf16.mxu0 %v31912_v35 }
 0xb2f   :  { %19775 = vmatmul.mubr.msk.bf16.gmra.mrb[220].mxu0 %vm439_vm0, %v24141_v16 }
 0xb30   :  { %14202 = vmatprep.mubr.bf16.mxu0 %v31912_v35 }
 0xb37   :  { %19776 = vmatmul.mubr.msk.bf16.gmra.mrb[224].mxu0 %vm439_vm0, %v24142_v51  ;;  %v24196_v51 = vld [vmem:[%s31898_s10 + $0x110] sm:$0xff]  }
 0xb38   :  { %14212 = vmatprep.mubr.bf16.mxu0 %v31912_v35 }
 0xb3f   :  { %19777 = vmatmul.mubr.msk.bf16.gmra.mrb[228].mxu0 %vm439_vm0, %v24143_v20 }
 0xb40   :  { %14222 = vmatprep.mubr.bf16.mxu0 %v31912_v35 }
 0xb47   :  { %19778 = vmatmul.mubr.msk.bf16.gmra.mrb[232].mxu0 %vm439_vm0, %v24144_v9 }
 0xb48   :  { %14232 = vmatprep.mubr.bf16.mxu0 %v31912_v35 }
 0xb4f   :  { %19779 = vmatmul.mubr.msk.bf16.gmra.mrb[236].mxu0 %vm439_vm0, %v24145_v59  ;;  %v24197_v59 = vld [vmem:[%s31898_s10 + $0x158] sm:$0xff]  }
 0xb50   :  { %14242 = vmatprep.mubr.bf16.mxu0 %v31912_v35 }
 0xb57   :  { %19780 = vmatmul.mubr.msk.bf16.gmra.mrb[240].mxu0 %vm439_vm0, %v24146_v22 }
 0xb58   :  { %14252 = vmatprep.mubr.bf16.mxu0 %v31912_v35 }
 0xb5f   :  { %19781 = vmatmul.mubr.msk.bf16.gmra.mrb[244].mxu0 %vm439_vm0, %v24147_v63 }
 0xb60   :  { %14262 = vmatprep.mubr.bf16.mxu0 %v31912_v35 }
 0xb67   :  { %19782 = vmatmul.mubr.msk.bf16.gmra.mrb[248].mxu0 %vm439_vm0, %v24148_v27 }
 0xb68   :  { %14272 = vmatprep.mubr.bf16.mxu0 %v31912_v35 }
 0xb6f   :  { %19783 = vmatmul.mubr.msk.bf16.gmra.mrb[252].mxu0 %vm439_vm0, %v24149_v4  ;;  %v24205_v4 = vld [vmem:[%s31898_s10 + $0x170] sm:$0xff]  }
 0xb70   :  { %14282 = vmatprep.mubr.bf16.mxu0 %v31912_v35 }
 0xb77   :  { %19784 = vmatmul.mubr.msk.bf16.gmra.mrb[0].mxu0 %vm439_vm0, %v24150_v60 }
 0xb78   :  { %14292 = vmatprep.mubr.bf16.mxu0 %v31912_v35 }
 0xb7f   :  { %19785 = vmatmul.mubr.msk.bf16.gmra.mrb[4].mxu0 %vm439_vm0, %v24151_v41  ;;  %v24207_v41 = vld [vmem:[%s31898_s10 + $0x178] sm:$0xff]  }
 0xb80   :  { %14302 = vmatprep.mubr.bf16.mxu0 %v31912_v35 }
 0xb87   :  { %19786 = vmatmul.mubr.msk.bf16.gmra.mrb[8].mxu0 %vm439_vm0, %v24152_v53 }
 0xb88   :  { %14312 = vmatprep.mubr.bf16.mxu0 %v31912_v35 }
 0xb8f   :  { %19787 = vmatmul.mubr.msk.bf16.gmra.mrb[12].mxu0 %vm439_vm0, %v24153_v62  ;;  %v24185_v62 = vld [vmem:[%s31889_s0 + $0xf8] sm:$0xff]  }
 0xb90   :  { %14579 = vmatprep.mubr.bf16.mxu0 %v31912_v35 }
 0xb97   :  { %19804 = vmatmul.mubr.msk.bf16.vlgmr.msra.gmra.mrb[16].mxu0 %vm439_vm0, %v24154_v37  ;;  %v24208_v37 = vld [vmem:[%s31898_s10 + $0x138] sm:$0xff]  }
 0xb98   :  { %14965 = vmatpush1.bf16.msra.mxu0 %v29786_v28  ;;  %14589 = vmatprep.mubr.bf16.mxu0 %v31912_v35 }
 0xb99   :  { %14966 = vmatprep.subr.bf16.mxu0 %v29794_v38 }
 0xb9c   :  { %14967 = vmatpush1.bf16.msra.mxu0 %v29792_v26 }
 0xb9d   :  { %14968 = vmatprep.subr.bf16.mxu0 %v29800_v13 }
 0xb9f   :  { %19805 = vmatmul.mubr.msk.bf16.gmra.mrb[20].mxu0 %vm439_vm0, %v24155_v18 }
 0xba0   :  { %14969 = vmatpush1.bf16.msra.mxu0 %v29798_v45  ;;  %14599 = vmatprep.mubr.bf16.mxu0 %v31912_v35 }
 0xba1   :  { %14970 = vmatprep.subr.bf16.mxu0 %v29806_v17 }
 0xba4   :  { %14971 = vmatpush1.bf16.msra.mxu0 %v29804_v7 }
 0xba5   :  { %15381 = vmatprep.subr.bf16.mxu0 %v29788_v48 }
 0xba7   :  { %19806 = vmatmul.mubr.msk.bf16.gmra.mrb[24].mxu0 %vm439_vm0, %v24156_v58  ;;  %v24214_v58 = vld [vmem:[%s31898_s10 + $0x240] sm:$0xff]  }
 0xba8   :  { %14609 = vmatprep.mubr.bf16.mxu0 %v31912_v35 }
 0xbaf   :  { %19807 = vmatmul.mubr.msk.bf16.gmra.mrb[28].mxu0 %vm439_vm0, %v24157_v52 }
 0xbb0   :  { %14619 = vmatprep.mubr.bf16.mxu0 %v31912_v35 }
 0xbb7   :  { %19808 = vmatmul.mubr.msk.bf16.gmra.mrb[32].mxu0 %vm439_vm0, %v24158_v3  ;;  %v24289_v3 = vld [vmem:[%s31898_s10 + $0xe8] sm:$0xff]  }
 0xbb8   :  { %14629 = vmatprep.mubr.bf16.mxu0 %v31912_v35 }
 0xbbf   :  { %19809 = vmatmul.mubr.msk.bf16.gmra.mrb[36].mxu0 %vm439_vm0, %v24159_v12 }
 0xbc0   :  { %14639 = vmatprep.mubr.bf16.mxu0 %v31912_v35 }
 0xbc7   :  { %19810 = vmatmul.mubr.msk.bf16.gmra.mrb[40].mxu0 %vm439_vm0, %v24160_v46 }
 0xbc8   :  { %14649 = vmatprep.mubr.bf16.mxu0 %v31912_v35 }
 0xbcf   :  { %19811 = vmatmul.mubr.msk.bf16.gmra.mrb[44].mxu0 %vm439_vm0, %v24161_v43 }
 0xbd0   :  { %14659 = vmatprep.mubr.bf16.mxu0 %v31912_v35 }
 0xbd7   :  { %19812 = vmatmul.mubr.msk.bf16.gmra.mrb[48].mxu0 %vm439_vm0, %v24162_v50  ;;  %v24186_v50 = vld [vmem:[%s31889_s0 + $0x100] sm:$0xff]  }
 0xbd8   :  { %14669 = vmatprep.mubr.bf16.mxu0 %v31912_v35 }
 0xbdf   :  { %19813 = vmatmul.mubr.msk.bf16.gmra.mrb[52].mxu0 %vm439_vm0, %v24163_v40 }
 0xbe0   :  { %14679 = vmatprep.mubr.bf16.mxu0 %v31912_v35 }
 0xbe7   :  { %19814 = vmatmul.mubr.msk.bf16.gmra.mrb[56].mxu0 %vm439_vm0, %v24164_v31 }
 0xbe8   :  { %14689 = vmatprep.mubr.bf16.mxu0 %v31912_v35 }
 0xbea   :  { %v14164_v24 = vpop.f32.mrb[208].mxu0 }
 0xbeb   :  { %v14166_v34 = vpop.f32.mrb[209].mxu0 }
 0xbec   :  { %v14168_v15 = vpop.f32.mrb[210].mxu0 }
 0xbed   :  { %v14323_v10 = vpack.c.bf16 %v14168_v15, %v14164_v24  ;;  %v14170_v23 = vpop.f32.mrb[211].mxu0 }
 0xbee   :  { %v14324_v6 = vpack.c.bf16 %v14170_v23, %v14166_v34 }
 0xbef   :  { %19815 = vmatmul.mubr.msk.bf16.gmra.mrb[60].mxu0 %vm439_vm0, %v24165_v2 }
 0xbf0   :  { %14699 = vmatprep.mubr.bf16.mxu0 %v31912_v35  ;;  %17452 = vmatprep.mubr.bf16.mxu1 %v14324_v6 }
 0xbf1   :  { %17453 = vmatmul.mubr.bf16.vlgmr.msra.gmra.mrb[216].mxu1 %v14323_v10 }
 0xbf2   :  { %v14174_v57 = vpop.f32.mrb[212].mxu0  ;;  %21562 = vmatpush3.bf16.msra.mxu1 %v24191_v39  ;;  %v24187_v39 = vld [vmem:[%s31889_s0 + $0x108] sm:$0xff]  }
 0xbf3   :  { %v14176_v14 = vpop.f32.mrb[213].mxu0  ;;  %21563 = vmatprep.subr.bf16.mxu1 %v24192_v30  ;;  %v24267_v30 = vld [vmem:[%s31898_s10 + $0xd8] sm:$0xff]  }
 0xbf4   :  { %v14178_v16 = vpop.f32.mrb[214].mxu0 }
 0xbf5   :  { %v14325_v20 = vpack.c.bf16 %v14178_v16, %v14174_v57  ;;  %v14180_v9 = vpop.f32.mrb[215].mxu0 }
 0xbf6   :  { %v14326_v22 = vpack.c.bf16 %v14180_v9, %v14176_v14  ;;  %21564 = vmatpush3.bf16.msra.mxu1 %v24193_v11  ;;  %v24188_v11 = vld [vmem:[%s31889_s0 + $0x110] sm:$0xff]  }
 0xbf7   :  { %19816 = vmatmul.mubr.msk.bf16.gmra.mrb[64].mxu0 %vm439_vm0, %v24170_v61  ;;  %21565 = vmatprep.subr.bf16.mxu1 %v24195_v36  ;;  %v24236_v61 = vld [vmem:[%s31889_s0 + $0x190] sm:$0xff]  }
 0xbf8   :  { %14709 = vmatprep.mubr.bf16.mxu0 %v31912_v35  ;;  %17460 = vmatprep.mubr.bf16.mxu1 %v14326_v22 }
 0xbf9   :  { %17461 = vmatmul.mubr.bf16.gmra.mrb[220].mxu1 %v14325_v20 }
 0xbfa   :  { %v14184_v54 = vpop.f32.mrb[216].mxu0  ;;  %21566 = vmatpush3.bf16.msra.mxu1 %v24196_v51 }
 0xbfb   :  { %v14186_v33 = vpop.f32.mrb[217].mxu0  ;;  %21567 = vmatprep.subr.bf16.mxu1 %v24197_v59  ;;  %v24189_v59 = vld [vmem:[%s31889_s0 + $0x118] sm:$0xff]  }
 0xbfc   :  { %v14188_v63 = vpop.f32.mrb[218].mxu0 }
 0xbfd   :  { %v14327_v49 = vpack.c.bf16 %v14188_v63, %v14184_v54  ;;  %v14190_v8 = vpop.f32.mrb[219].mxu0  ;;  %v24216_v63 = vld [vmem:[%s31898_s10 + $0x248] sm:$0xff]  }
 0xbfe   :  { %v14328_v27 = vpack.c.bf16 %v14190_v8, %v14186_v33  ;;  %21568 = vmatpush3.bf16.msra.mxu1 %v24198_v25  ;;  %v24194_v8 = vld [vmem:[%s31889_s0 + $0x120] sm:$0xff]  }
 0xbff   :  { %19817 = vmatmul.mubr.msk.bf16.gmra.mrb[68].mxu0 %vm439_vm0, %v24175_v32  ;;  %21569 = vmatprep.subr.bf16.mxu1 %v24200_v29  ;;  %v24215_v29 = vld [vmem:[%s31898_s10 + $0x200] sm:$0xff]  }
 0xc00   :  { %14719 = vmatprep.mubr.bf16.mxu0 %v31912_v35  ;;  %17468 = vmatprep.mubr.bf16.mxu1 %v14328_v27  ;;  %v24219_v27 = vld [vmem:[%s31898_s10 + $0x250] sm:$0xff]  }
 0xc01   :  { %17469 = vmatmul.mubr.bf16.gmra.mrb[224].mxu1 %v14327_v49  ;;  %v24217_v49 = vld [vmem:[%s31898_s10 + $0x208] sm:$0xff]  }
 0xc02   :  { %v14194_v55 = vpop.f32.mrb[220].mxu0  ;;  %21570 = vmatpush3.bf16.msra.mxu1 %v24201_v0 }
 0xc03   :  { %v14196_v1 = vpop.f32.mrb[221].mxu0  ;;  %21571 = vmatprep.subr.bf16.mxu1 %v24202_v42 }
 0xc04   :  { %v14198_v44 = vpop.f32.mrb[222].mxu0 }
 0xc05   :  { %v14329_v56 = vpack.c.bf16 %v14198_v44, %v14194_v55  ;;  %v14200_v60 = vpop.f32.mrb[223].mxu0  ;;  %v24221_v44 = vld [vmem:[%s31898_s10 + $0x258] sm:$0xff]  }
 0xc06   :  { %v14330_v53 = vpack.c.bf16 %v14200_v60, %v14196_v1  ;;  %21572 = vmatpush3.bf16.msra.mxu1 %v24203_v19  ;;  %v24222_v60 = vld [vmem:[%s31898_s10 + $0x218] sm:$0xff]  }
 0xc07   :  { %19818 = vmatmul.mubr.msk.bf16.gmra.mrb[72].mxu0 %vm439_vm0, %v24180_v5  ;;  %21573 = vmatprep.subr.bf16.mxu1 %v24205_v4  ;;  %v24220_v4 = vld [vmem:[%s31898_s10 + $0x210] sm:$0xff]  }
 0xc08   :  { %14729 = vmatprep.mubr.bf16.mxu0 %v31912_v35  ;;  %17476 = vmatprep.mubr.bf16.mxu1 %v14330_v53 }
 0xc09   :  { %17477 = vmatmul.mubr.bf16.gmra.mrb[228].mxu1 %v14329_v56 }
 0xc0a   :  { %v30078_v47 = vpop.f32.mrb[224].mxu0  ;;  %21574 = vmatpush3.bf16.msra.mxu1 %v24206_v21  ;;  %v24245_v21 = vld [vmem:[%s31898_s10 + $0xc0] sm:$0xff]  }
 0xc0b   :  { %v30083_v18 = vpop.f32.mrb[225].mxu0  ;;  %21575 = vmatprep.subr.bf16.mxu1 %v24207_v41  ;;  %v24199_v41 = vld [vmem:[%s31889_s0 + $0x128] sm:$0xff]  }
 0xc0c   :  { %v30088_v52 = vpop.f32.mrb[226].mxu0 }
 0xc0d   :  { %v30092_v12 = vpop.f32.mrb[227].mxu0 }
 0xc0e   :  { %21576 = vmatpush3.bf16.msra.mxu1 %v24208_v37 }
 0xc0f   :  { %19819 = vmatmul.mubr.msk.bf16.gmra.mrb[76].mxu0 %vm439_vm0, %v24185_v62  ;;  %21641 = vmatprep.subr.bf16.mxu1 %v24214_v58  ;;  %v24224_v62 = vld [vmem:[%s31898_s10 + $0x260] sm:$0xff]  }
 0xc10   :  { %14996 = vmatprep.mubr.bf16.mxu0 %v31912_v35 }
 0xc12   :  { %v30098_v43 = vpop.f32.mrb[228].mxu0 }
 0xc13   :  { %v30103_v40 = vpop.f32.mrb[229].mxu0 }
 0xc14   :  { %v30105_v31 = vpop.f32.mrb[230].mxu0 }
 0xc15   :  { %v30109_v2 = vpop.f32.mrb[231].mxu0 }
 0xc17   :  { %19836 = vmatmul.mubr.msk.bf16.vlgmr.msra.gmra.mrb[80].mxu0 %vm439_vm0, %v24186_v50 }
 0xc18   :  { %15382 = vmatpush1.bf16.msra.mxu0 %v29786_v28  ;;  %15006 = vmatprep.mubr.bf16.mxu0 %v31912_v35  ;;  %v24237_v28 = vld [vmem:[%s31889_s0 + $0x198] sm:$0xff]  }
 0xc19   :  { %15383 = vmatprep.subr.bf16.mxu0 %v29794_v38  ;;  %v24288_v38 = vld [vmem:[%s31898_s10 + $0x430] sm:$0xff]  }
 0xc1a   :  { %v30117_v15 = vpop.f32.mrb[232].mxu0 }
 0xc1b   :  { %v30122_v10 = vpop.f32.mrb[233].mxu0 }
 0xc1c   :  { %15384 = vmatpush1.bf16.msra.mxu0 %v29792_v26  ;;  %v30125_v23 = vpop.f32.mrb[234].mxu0 }
 0xc1d   :  { %15385 = vmatprep.subr.bf16.mxu0 %v29800_v13  ;;  %v30130_v6 = vpop.f32.mrb[235].mxu0 }
 0xc1f   :  { %19837 = vmatmul.mubr.msk.bf16.gmra.mrb[84].mxu0 %vm439_vm0, %v24187_v39 }
 0xc20   :  { %15386 = vmatpush1.bf16.msra.mxu0 %v29798_v45  ;;  %15016 = vmatprep.mubr.bf16.mxu0 %v31912_v35 }
 0xc21   :  { %15387 = vmatprep.subr.bf16.mxu0 %v29806_v17  ;;  %v24296_v17 = vld [vmem:[%s31898_s10 + $0xf8] sm:$0xff]  }
 0xc22   :  { %v30138_v57 = vpop.f32.mrb[236].mxu0 }
 0xc23   :  { %v30143_v14 = vpop.f32.mrb[237].mxu0 }
 0xc24   :  { %15388 = vmatpush1.bf16.msra.mxu0 %v29804_v7  ;;  %v30146_v36 = vpop.f32.mrb[238].mxu0  ;;  %v24271_v7 = vld [vmem:[%s31898_s10 + $0x400] sm:$0xff]  }
 0xc25   :  { %v30150_v51 = vpop.f32.mrb[239].mxu0  ;;  %21521 = vmatprep.subr.bf16.mxu0 %v24245_v21 }
 0xc27   :  { %19838 = vmatmul.mubr.msk.bf16.gmra.mrb[88].mxu0 %vm439_vm0, %v24188_v11  ;;  %v24225_v11 = vld [vmem:[%s31898_s10 + $0x220] sm:$0xff]  }
 0xc28   :  { %15026 = vmatprep.mubr.bf16.mxu0 %v31912_v35 }
 0xc2a   :  { %v14244_v9 = vpop.f32.mrb[240].mxu0 }
 0xc2b   :  { %v14246_v22 = vpop.f32.mrb[241].mxu0 }
 0xc2c   :  { %v14248_v32 = vpop.f32.mrb[242].mxu0 }
 0xc2d   :  { %v14339_v54 = vpack.c.bf16 %v14248_v32, %v14244_v9  ;;  %v14250_v25 = vpop.f32.mrb[243].mxu0  ;;  %v24226_v9 = vld [vmem:[%s31898_s10 + $0x268] sm:$0xff]   ;;  %v24204_v32 = vld [vmem:[%s31889_s0 + $0x130] sm:$0xff]  }
 0xc2e   :  { %v14340_v33 = vpack.c.bf16 %v14250_v25, %v14246_v22  ;;  %v24227_v22 = vld [vmem:[%s31898_s10 + $0x228] sm:$0xff]   ;;  %v24229_v25 = vld [vmem:[%s31898_s10 + $0x270] sm:$0xff]  }
 0xc2f   :  { %19839 = vmatmul.mubr.msk.bf16.gmra.mrb[92].mxu0 %vm439_vm0, %v24189_v59 }
 0xc30   :  { %15036 = vmatprep.mubr.bf16.mxu0 %v31912_v35  ;;  %17582 = vmatprep.mubr.bf16.mxu1 %v14340_v33 }
 0xc31   :  { %17583 = vmatmul.mubr.bf16.vlgmr.msra.gmra.mrb[232].mxu1 %v14339_v54 }
 0xc32   :  { %v14254_v0 = vpop.f32.mrb[244].mxu0  ;;  %21642 = vmatpush3.bf16.msra.mxu1 %v24215_v29 }
 0xc33   :  { %v14256_v42 = vpop.f32.mrb[245].mxu0  ;;  %21643 = vmatprep.subr.bf16.mxu1 %v24216_v63 }
 0xc34   :  { %v14258_v5 = vpop.f32.mrb[246].mxu0 }
 0xc35   :  { %v14341_v55 = vpack.c.bf16 %v14258_v5, %v14254_v0  ;;  %v14260_v19 = vpop.f32.mrb[247].mxu0  ;;  %v24209_v5 = vld [vmem:[%s31889_s0 + $0x138] sm:$0xff]  }
 0xc36   :  { %v14342_v1 = vpack.c.bf16 %v14260_v19, %v14256_v42  ;;  %21644 = vmatpush3.bf16.msra.mxu1 %v24217_v49  ;;  %v24230_v49 = vld [vmem:[%s31898_s10 + $0x230] sm:$0xff]   ;;  %v24238_v19 = vld [vmem:[%s31898_s10 + $0x340] sm:$0xff]  }
 0xc37   :  { %19840 = vmatmul.mubr.msk.bf16.gmra.mrb[96].mxu0 %vm439_vm0, %v24194_v8  ;;  %21645 = vmatprep.subr.bf16.mxu1 %v24219_v27  ;;  %v24231_v8 = vld [vmem:[%s31898_s10 + $0x278] sm:$0xff]  }
 0xc38   :  { %15046 = vmatprep.mubr.bf16.mxu0 %v31912_v35  ;;  %17590 = vmatprep.mubr.bf16.mxu1 %v14342_v1  ;;  %v24232_v27 = vld [vmem:[%s31898_s10 + $0x238] sm:$0xff]  }
 0xc39   :  { %17591 = vmatmul.mubr.bf16.gmra.mrb[236].mxu1 %v14341_v55 }
 0xc3a   :  { %v14264_v56 = vpop.f32.mrb[248].mxu0  ;;  %21646 = vmatpush3.bf16.msra.mxu1 %v24220_v4  ;;  %v24259_v4 = vld [vmem:[%s31898_s10 + $0x88] sm:$0xff]  }
 0xc3b   :  { %v14266_v53 = vpop.f32.mrb[249].mxu0  ;;  %21647 = vmatprep.subr.bf16.mxu1 %v24221_v44 }
 0xc3c   :  { %v14268_v37 = vpop.f32.mrb[250].mxu0 }
 0xc3d   :  { %v14343_v58 = vpack.c.bf16 %v14268_v37, %v14264_v56  ;;  %v14270_v50 = vpop.f32.mrb[251].mxu0 }
 0xc3e   :  { %v14344_v39 = vpack.c.bf16 %v14270_v50, %v14266_v53  ;;  %21648 = vmatpush3.bf16.msra.mxu1 %v24222_v60  ;;  %v24210_v60 = vld [vmem:[%s31889_s0 + $0x140] sm:$0xff]  }
 0xc3f   :  { %19841 = vmatmul.mubr.msk.bf16.gmra.mrb[100].mxu0 %vm439_vm0, %v24199_v41  ;;  %21649 = vmatprep.subr.bf16.mxu1 %v24224_v62 }
 0xc40   :  { %15056 = vmatprep.mubr.bf16.mxu0 %v31912_v35  ;;  %17598 = vmatprep.mubr.bf16.mxu1 %v14344_v39  ;;  %v24211_v39 = vld [vmem:[%s31889_s0 + $0x148] sm:$0xff]  }
 0xc41   :  { %17599 = vmatmul.mubr.bf16.gmra.mrb[240].mxu1 %v14343_v58  ;;  %v24235_v58 = vld [vmem:[%s31889_s0 + $0x188] sm:$0xff]  }
 0xc42   :  { %v14274_v59 = vpop.f32.mrb[252].mxu0  ;;  %21650 = vmatpush3.bf16.msra.mxu1 %v24225_v11 }
 0xc43   :  { %v14276_v54 = vpop.f32.mrb[253].mxu0  ;;  %21651 = vmatprep.subr.bf16.mxu1 %v24226_v9 }
 0xc44   :  { %v14278_v33 = vpop.f32.mrb[254].mxu0 }
 0xc45   :  { %v14345_v29 = vpack.c.bf16 %v14278_v33, %v14274_v59  ;;  %v14280_v63 = vpop.f32.mrb[255].mxu0 }
 0xc46   :  { %v14346_v0 = vpack.c.bf16 %v14280_v63, %v14276_v54  ;;  %21652 = vmatpush3.bf16.msra.mxu1 %v24227_v22  ;;  %v24239_v63 = vld [vmem:[%s31898_s10 + $0x300] sm:$0xff]  }
 0xc47   :  { %19842 = vmatmul.mubr.msk.bf16.gmra.mrb[104].mxu0 %vm439_vm0, %v24204_v32  ;;  %21653 = vmatprep.subr.bf16.mxu1 %v24229_v25  ;;  %v24212_v25 = vld [vmem:[%s31889_s0 + $0x150] sm:$0xff]  }
 0xc48   :  { %15066 = vmatprep.mubr.bf16.mxu0 %v31912_v35  ;;  %17606 = vmatprep.mubr.bf16.mxu1 %v14346_v0 }
 0xc49   :  { %17607 = vmatmul.mubr.bf16.gmra.mrb[244].mxu1 %v14345_v29 }
 0xc4a   :  { %v30221_v42 = vpop.f32.mrb[0].mxu0  ;;  %21654 = vmatpush3.bf16.msra.mxu1 %v24230_v49 }
 0xc4b   :  { %v30229_v55 = vpop.f32.mrb[1].mxu0  ;;  %21655 = vmatprep.subr.bf16.mxu1 %v24231_v8 }
 0xc4c   :  { %v30234_v1 = vpop.f32.mrb[2].mxu0 }
 0xc4d   :  { %v30238_v44 = vpop.f32.mrb[3].mxu0 }
 0xc4e   :  { %21656 = vmatpush3.bf16.msra.mxu1 %v24232_v27  ;;  %v24213_v27 = vld [vmem:[%s31889_s0 + $0x158] sm:$0xff]  }
 0xc4f   :  { %19843 = vmatmul.mubr.msk.bf16.gmra.mrb[108].mxu0 %vm439_vm0, %v24209_v5  ;;  %21721 = vmatprep.subr.bf16.mxu1 %v24238_v19 }
 0xc50   :  { %15076 = vmatprep.mubr.bf16.mxu0 %v31912_v35 }
 0xc52   :  { %v30244_v56 = vpop.f32.mrb[4].mxu0 }
 0xc53   :  { %v30249_v41 = vpop.f32.mrb[5].mxu0 }
 0xc54   :  { %v30251_v53 = vpop.f32.mrb[6].mxu0 }
 0xc55   :  { %v30255_v37 = vpop.f32.mrb[7].mxu0 }
 0xc57   :  { %19844 = vmatmul.mubr.msk.bf16.gmra.mrb[112].mxu0 %vm439_vm0, %v24210_v60 }
 0xc58   :  { %15086 = vmatprep.mubr.bf16.mxu0 %v31912_v35 }
 0xc5a   :  { %v30261_v50 = vpop.f32.mrb[8].mxu0 }
 0xc5b   :  { %v30266_v11 = vpop.f32.mrb[9].mxu0 }
 0xc5c   :  { %v30268_v9 = vpop.f32.mrb[10].mxu0 }
 0xc5d   :  { %v30272_v22 = vpop.f32.mrb[11].mxu0 }
 0xc5f   :  { %19845 = vmatmul.mubr.msk.bf16.gmra.mrb[116].mxu0 %vm439_vm0, %v24211_v39 }
 0xc60   :  { %15096 = vmatprep.mubr.bf16.mxu0 %v31912_v35 }
 0xc62   :  { %v30278_v54 = vpop.f32.mrb[12].mxu0 }
 0xc63   :  { %v30283_v33 = vpop.f32.mrb[13].mxu0 }
 0xc64   :  { %v30285_v29 = vpop.f32.mrb[14].mxu0 }
 0xc65   :  { %v30289_v0 = vpop.f32.mrb[15].mxu0 }
 0xc67   :  { %19846 = vmatmul.mubr.msk.bf16.gmra.mrb[120].mxu0 %vm439_vm0, %v24212_v25  ;;  %v24240_v25 = vld [vmem:[%s31898_s10 + $0x348] sm:$0xff]  }
 0xc68   :  { %15106 = vmatprep.mubr.bf16.mxu0 %v31912_v35 }
 0xc6a   :  { %v14581_v8 = vpop.f32.mrb[16].mxu0 }
 0xc6b   :  { %v14583_v5 = vpop.f32.mrb[17].mxu0 }
 0xc6c   :  { %v14585_v19 = vpop.f32.mrb[18].mxu0 }
 0xc6d   :  { %v14740_v60 = vpack.c.bf16 %v14585_v19, %v14581_v8  ;;  %v14587_v39 = vpop.f32.mrb[19].mxu0  ;;  %v24241_v8 = vld [vmem:[%s31898_s10 + $0x308] sm:$0xff]  }
 0xc6e   :  { %v14741_v59 = vpack.c.bf16 %v14587_v39, %v14583_v5  ;;  %v24218_v5 = vld [vmem:[%s31889_s0 + $0x160] sm:$0xff]  }
 0xc6f   :  { %19847 = vmatmul.mubr.msk.bf16.gmra.mrb[124].mxu0 %vm439_vm0, %v24213_v27  ;;  %v24243_v27 = vld [vmem:[%s31898_s10 + $0x350] sm:$0xff]  }
 0xc70   :  { %15116 = vmatprep.mubr.bf16.mxu0 %v31912_v35  ;;  %17712 = vmatprep.mubr.bf16.mxu1 %v14741_v59 }
 0xc71   :  { %17713 = vmatmul.mubr.bf16.vlgmr.msra.gmra.mrb[248].mxu1 %v14740_v60 }
 0xc72   :  { %v14591_v49 = vpop.f32.mrb[20].mxu0  ;;  %21722 = vmatpush3.bf16.msra.mxu1 %v24239_v63  ;;  %v24244_v63 = vld [vmem:[%s31898_s10 + $0x310] sm:$0xff]  }
 0xc73   :  { %v14593_v19 = vpop.f32.mrb[21].mxu0  ;;  %21723 = vmatprep.subr.bf16.mxu1 %v24240_v25  ;;  %v24246_v25 = vld [vmem:[%s31898_s10 + $0x358] sm:$0xff]  }
 0xc74   :  { %v14595_v39 = vpop.f32.mrb[22].mxu0 }
 0xc75   :  { %v14742_v32 = vpack.c.bf16 %v14595_v39, %v14591_v49  ;;  %v14597_v59 = vpop.f32.mrb[23].mxu0  ;;  %v24248_v49 = vld [vmem:[%s31898_s10 + $0x318] sm:$0xff]  }
 0xc76   :  { %v14743_v60 = vpack.c.bf16 %v14597_v59, %v14593_v19  ;;  %21724 = vmatpush3.bf16.msra.mxu1 %v24241_v8  ;;  %v24223_v8 = vld [vmem:[%s31889_s0 + $0x168] sm:$0xff]   ;;  %v24250_v19 = vld [vmem:[%s31898_s10 + $0x360] sm:$0xff]  }
 0xc77   :  { %19848 = vmatmul.mubr.msk.bf16.gmra.mrb[128].mxu0 %vm439_vm0, %v24218_v5  ;;  %21725 = vmatprep.subr.bf16.mxu1 %v24243_v27 }
 0xc78   :  { %15126 = vmatprep.mubr.bf16.mxu0 %v31912_v35  ;;  %17720 = vmatprep.mubr.bf16.mxu1 %v14743_v60  ;;  %v24251_v60 = vld [vmem:[%s31898_s10 + $0x320] sm:$0xff]  }
 0xc79   :  { %17721 = vmatmul.mubr.bf16.gmra.mrb[252].mxu1 %v14742_v32 }
 0xc7a   :  { %v14601_v62 = vpop.f32.mrb[24].mxu0  ;;  %21726 = vmatpush3.bf16.msra.mxu1 %v24244_v63  ;;  %v24252_v63 = vld [vmem:[%s31898_s10 + $0x368] sm:$0xff]  }
 0xc7b   :  { %v14603_v5 = vpop.f32.mrb[25].mxu0  ;;  %21727 = vmatprep.subr.bf16.mxu1 %v24246_v25 }
 0xc7c   :  { %v14605_v27 = vpop.f32.mrb[26].mxu0 }
 0xc7d   :  { %v14744_v39 = vpack.c.bf16 %v14605_v27, %v14601_v62  ;;  %v14607_v59 = vpop.f32.mrb[27].mxu0  ;;  %v24253_v62 = vld [vmem:[%s31898_s10 + $0x328] sm:$0xff]  }
 0xc7e   :  { %v14745_v32 = vpack.c.bf16 %v14607_v59, %v14603_v5  ;;  %21728 = vmatpush3.bf16.msra.mxu1 %v24248_v49  ;;  %v24228_v49 = vld [vmem:[%s31889_s0 + $0x170] sm:$0xff]  }
 0xc7f   :  { %19849 = vmatmul.mubr.msk.bf16.gmra.mrb[132].mxu0 %vm439_vm0, %v24223_v8  ;;  %21729 = vmatprep.subr.bf16.mxu1 %v24250_v19  ;;  %v24255_v5 = vld [vmem:[%s31898_s10 + $0x370] sm:$0xff]  }
 0xc80   :  { %15136 = vmatprep.mubr.bf16.mxu0 %v31912_v35  ;;  %17728 = vmatprep.mubr.bf16.mxu1 %v14745_v32  ;;  %v24256_v32 = vld [vmem:[%s31898_s10 + $0x330] sm:$0xff]  }
 0xc81   :  { %17729 = vmatmul.mubr.bf16.gmra.mrb[0].mxu1 %v14744_v39 }
 0xc82   :  { %v14611_v25 = vpop.f32.mrb[28].mxu0  ;;  %21730 = vmatpush3.bf16.msra.mxu1 %v24251_v60  ;;  %v24258_v60 = vld [vmem:[%s31898_s10 + $0x378] sm:$0xff]  }
 0xc83   :  { %v14613_v8 = vpop.f32.mrb[29].mxu0  ;;  %21731 = vmatprep.subr.bf16.mxu1 %v24252_v63 }
 0xc84   :  { %v14615_v19 = vpop.f32.mrb[30].mxu0 }
 0xc85   :  { %v14746_v27 = vpack.c.bf16 %v14615_v19, %v14611_v25  ;;  %v14617_v59 = vpop.f32.mrb[31].mxu0  ;;  %v24260_v25 = vld [vmem:[%s31898_s10 + $0x338] sm:$0xff]  }
 0xc86   :  { %v14747_v39 = vpack.c.bf16 %v14617_v59, %v14613_v8  ;;  %21732 = vmatpush3.bf16.msra.mxu1 %v24253_v62  ;;  %v24233_v62 = vld [vmem:[%s31889_s0 + $0x178] sm:$0xff]   ;;  %v24270_v8 = vld [vmem:[%s31898_s10 + $0x440] sm:$0xff]  }
 0xc87   :  { %19850 = vmatmul.mubr.msk.bf16.gmra.mrb[136].mxu0 %vm439_vm0, %v24228_v49  ;;  %21733 = vmatprep.subr.bf16.mxu1 %v24255_v5  ;;  %v24247_v59 = vld [vmem:[%s31898_s10 + $0x80] sm:$0xff]  }
 0xc88   :  { %15146 = vmatprep.mubr.bf16.mxu0 %v31912_v35  ;;  %17736 = vmatprep.mubr.bf16.mxu1 %v14747_v39 }
 0xc89   :  { %17737 = vmatmul.mubr.bf16.gmra.mrb[4].mxu1 %v14746_v27 }
 0xc8a   :  { %v30357_v63 = vpop.f32.mrb[32].mxu0  ;;  %21734 = vmatpush3.bf16.msra.mxu1 %v24256_v32  ;;  %v24234_v32 = vld [vmem:[%s31889_s0 + $0x180] sm:$0xff]  }
 0xc8b   :  { %v30365_v49 = vpop.f32.mrb[33].mxu0  ;;  %21735 = vmatprep.subr.bf16.mxu1 %v24258_v60 }
 0xc8c   :  { %v30370_v5 = vpop.f32.mrb[34].mxu0 }
 0xc8d   :  { %v30374_v27 = vpop.f32.mrb[35].mxu0 }
 0xc8e   :  { %21736 = vmatpush3.bf16.msra.mxu1 %v24260_v25  ;;  %v24263_v25 = vld [vmem:[%s31898_s10 + $0xd0] sm:$0xff]  }
 0xc8f   :  { %19851 = vmatmul.mubr.msk.bf16.gmra.mrb[140].mxu0 %vm439_vm0, %v24233_v62  ;;  %21801 = vmatprep.subr.bf16.mxu1 %v24270_v8  ;;  %v24257_v8 = vld [vmem:[%s31898_s10 + $0xc8] sm:$0xff]  }
 0xc90   :  { %15413 = vmatprep.mubr.bf16.mxu0 %v31912_v35 }
 0xc92   :  { %v30380_v39 = vpop.f32.mrb[36].mxu0 }
 0xc93   :  { %v30385_v60 = vpop.f32.mrb[37].mxu0 }
 0xc94   :  { %v30387_v19 = vpop.f32.mrb[38].mxu0 }
 0xc95   :  { %v30394_v62 = vpop.f32.mrb[39].mxu0 }
 0xc97   :  { %19868 = vmatmul.mubr.msk.bf16.vlgmr.msra.gmra.mrb[144].mxu0 %vm439_vm0, %v24234_v32 }
 0xc98   :  { %15423 = vmatprep.mubr.bf16.mxu0 %v31912_v35  ;;  %21522 = vmatpush3.bf16.msra.mxu0 %v24247_v59  ;;  %v24264_v59 = vld [vmem:[%s31898_s10 + $0x90] sm:$0xff]  }
 0xc99   :  { %21523 = vmatprep.subr.bf16.mxu0 %v24257_v8 }
 0xc9a   :  { %v30409_v21 = vpop.f32.mrb[40].mxu0 }
 0xc9b   :  { %v30414_v16 = vpop.f32.mrb[41].mxu0 }
 0xc9c   :  { %v30416_v32 = vpop.f32.mrb[42].mxu0  ;;  %21524 = vmatpush3.bf16.msra.mxu0 %v24259_v4  ;;  %v24268_v4 = vld [vmem:[%s31898_s10 + $0x98] sm:$0xff]  }
 0xc9d   :  { %v30423_v20 = vpop.f32.mrb[43].mxu0  ;;  %21525 = vmatprep.subr.bf16.mxu0 %v24263_v25  ;;  %v24277_v25 = vld [vmem:[%s31898_s10 + $0xe0] sm:$0xff]  }
 0xc9f   :  { %19869 = vmatmul.mubr.msk.bf16.gmra.mrb[148].mxu0 %vm439_vm0, %v24235_v58 }
 0xca0   :  { %15433 = vmatprep.mubr.bf16.mxu0 %v31912_v35  ;;  %21526 = vmatpush3.bf16.msra.mxu0 %v24264_v59  ;;  %v24279_v59 = vld [vmem:[%s31898_s10 + $0xa0] sm:$0xff]  }
 0xca1   :  { %21527 = vmatprep.subr.bf16.mxu0 %v24267_v30 }
 0xca2   :  { %v30438_v8 = vpop.f32.mrb[44].mxu0 }
 0xca3   :  { %32028 = vst [vmem:[#allocation6_spill] sm:$0xff] %v30438_v8  ;;  %v30443_v24 = vpop.f32.mrb[45].mxu0  ;;  %v24290_v8 = vld [vmem:[%s31898_s10 + $0x478] sm:$0xff]  }
 0xca4   :  { %v30445_v58 = vpop.f32.mrb[46].mxu0  ;;  %21528 = vmatpush3.bf16.msra.mxu0 %v24268_v4  ;;  %v24291_v4 = vld [vmem:[%s31898_s10 + $0xa8] sm:$0xff]  }
 0xca5   :  { %v30452_v34 = vpop.f32.mrb[47].mxu0  ;;  %21529 = vmatprep.subr.bf16.mxu0 %v24277_v25  ;;  %v24294_v25 = vld [vmem:[%s31898_s10 + $0xf0] sm:$0xff]  }
 0xca7   :  { %19870 = vmatmul.mubr.msk.bf16.gmra.mrb[152].mxu0 %vm439_vm0, %v24236_v61 }
 0xca8   :  { %15443 = vmatprep.mubr.bf16.mxu0 %v31912_v35  ;;  %21530 = vmatpush3.bf16.msra.mxu0 %v24279_v59  ;;  %v24295_v59 = vld [vmem:[%s31898_s10 + $0xb0] sm:$0xff]  }
 0xca9   :  { %21531 = vmatprep.subr.bf16.mxu0 %v24289_v3 }
 0xcaa   :  { %v14661_v30 = vpop.f32.mrb[48].mxu0 }
 0xcab   :  { %v14663_v46 = vpop.f32.mrb[49].mxu0 }
 0xcac   :  { %v14665_v48 = vpop.f32.mrb[50].mxu0  ;;  %21532 = vmatpush3.bf16.msra.mxu0 %v24291_v4  ;;  %v24273_v4 = vld [vmem:[%s31898_s10 + $0x408] sm:$0xff]  }
 0xcad   :  { %v14756_v61 = vpack.c.bf16 %v14665_v48, %v14661_v30  ;;  %v14667_v35 = vpop.f32.mrb[51].mxu0  ;;  %21533 = vmatprep.subr.bf16.mxu0 %v24294_v25  ;;  %v24272_v48 = vld [vmem:[%s31898_s10 + $0x448] sm:$0xff]   ;;  %v32029_v30 = vmov 0   ;;  %v24242_v25 = vld [vmem:[%s31889_s0 + $0x1a0] sm:$0xff]  }
 0xcae   :  { %v14757_v3 = vpack.c.bf16 %v14667_v35, %v14663_v46  ;;  %v24297_v35 = vld [vmem:[%s31898_s10 + $0xb8] sm:$0xff]  }
 0xcaf   :  { %19871 = vmatmul.mubr.msk.bf16.gmra.mrb[156].mxu0 %vm439_vm0, %v24237_v28  ;;  %v24298_v28 = vld [vmem:[%s31898_s10 + $0x1c0] sm:$0xff]  }
 0xcb0   :  { %15453 = vmatprep.mubr.bf16.mxu0 %v32029_v30  ;;  %17842 = vmatprep.mubr.bf16.mxu1 %v14757_v3 }
 0xcb1   :  { %17843 = vmatmul.mubr.bf16.vlgmr.msra.gmra.mrb[8].mxu1 %v14756_v61  ;;  %21534 = vmatpush3.bf16.msra.mxu0 %v24295_v59  ;;  %v24275_v59 = vld [vmem:[%s31898_s10 + $0x450] sm:$0xff]  }
 0xcb2   :  { %v14671_v46 = vpop.f32.mrb[52].mxu0  ;;  %21802 = vmatpush3.bf16.msra.mxu1 %v24271_v7  ;;  %21535 = vmatprep.subr.bf16.mxu0 %v24296_v17  ;;  %v24276_v17 = vld [vmem:[%s31898_s10 + $0x410] sm:$0xff]  }
 0xcb3   :  { %v14673_v61 = vpop.f32.mrb[53].mxu0  ;;  %21803 = vmatprep.subr.bf16.mxu1 %v24272_v48  ;;  %v24278_v48 = vld [vmem:[%s31898_s10 + $0x458] sm:$0xff]  }
 0xcb4   :  { %v14675_v7 = vpop.f32.mrb[54].mxu0 }
 0xcb5   :  { %v14758_v3 = vpack.c.bf16 %v14675_v7, %v14671_v46  ;;  %v14677_v45 = vpop.f32.mrb[55].mxu0  ;;  %21536 = vmatpush3.bf16.msra.mxu0 %v24297_v35  ;;  %v24249_v35 = vld [vmem:[%s31889_s0 + $0x1a8] sm:$0xff]   ;;  %v24283_v7 = vld [vmem:[%s31898_s10 + $0x420] sm:$0xff]  }
 0xcb6   :  { %v14759_v13 = vpack.c.bf16 %v14677_v45, %v14673_v61  ;;  %21804 = vmatpush3.bf16.msra.mxu1 %v24273_v4  ;;  %21601 = vmatprep.subr.bf16.mxu0 %v24298_v28  ;;  %v24280_v45 = vld [vmem:[%s31898_s10 + $0x418] sm:$0xff]   ;;  %v24282_v28 = vld [vmem:[%s31898_s10 + $0x460] sm:$0xff]  }
 0xcb7   :  { %19872 = vmatmul.mubr.msk.bf16.gmra.mrb[160].mxu0 %vm439_vm0, %v24242_v25  ;;  %21805 = vmatprep.subr.bf16.mxu1 %v24275_v59 }
 0xcb8   :  { %15463 = vmatprep.mubr.bf16.mxu0 %v32029_v30  ;;  %17850 = vmatprep.mubr.bf16.mxu1 %v14759_v13 }
 0xcb9   :  { %17851 = vmatmul.mubr.bf16.gmra.mrb[12].mxu1 %v14758_v3  ;;  %v24284_v3 = vld [vmem:[%s31898_s10 + $0x468] sm:$0xff]  }
 0xcba   :  { %v14681_v46 = vpop.f32.mrb[56].mxu0  ;;  %21806 = vmatpush3.bf16.msra.mxu1 %v24276_v17 }
 0xcbb   :  { %v14683_v4 = vpop.f32.mrb[57].mxu0  ;;  %21807 = vmatprep.subr.bf16.mxu1 %v24278_v48  ;;  %v24285_v48 = vld [vmem:[%s31898_s10 + $0x428] sm:$0xff]  }
 0xcbc   :  { %v14685_v25 = vpop.f32.mrb[58].mxu0 }
 0xcbd   :  { %v14760_v61 = vpack.c.bf16 %v14685_v25, %v14681_v46  ;;  %v14687_v13 = vpop.f32.mrb[59].mxu0  ;;  %v24254_v46 = vld [vmem:[%s31889_s0 + $0x1b0] sm:$0xff]  }
 0xcbe   :  { %v14761_v59 = vpack.c.bf16 %v14687_v13, %v14683_v4  ;;  %21808 = vmatpush3.bf16.msra.mxu1 %v24280_v45 }
 0xcbf   :  { %19873 = vmatmul.mubr.msk.bf16.gmra.mrb[164].mxu0 %vm439_vm0, %v24249_v35  ;;  %21809 = vmatprep.subr.bf16.mxu1 %v24282_v28  ;;  %v24287_v35 = vld [vmem:[%s31898_s10 + $0x470] sm:$0xff]  }
 0xcc0   :  { %15473 = vmatprep.mubr.bf16.mxu0 %v32029_v30  ;;  %17858 = vmatprep.mubr.bf16.mxu1 %v14761_v59 }
 0xcc1   :  { %17859 = vmatmul.mubr.bf16.gmra.mrb[16].mxu1 %v14760_v61 }
 0xcc2   :  { %v14691_v17 = vpop.f32.mrb[60].mxu0  ;;  %21810 = vmatpush3.bf16.msra.mxu1 %v24283_v7 }
 0xcc3   :  { %v14693_v45 = vpop.f32.mrb[61].mxu0  ;;  %21811 = vmatprep.subr.bf16.mxu1 %v24284_v3 }
 0xcc4   :  { %v14695_v4 = vpop.f32.mrb[62].mxu0  ;;  %v21497_v28 = vpop.f32.mrb[216].mxu1 }
 0xcc5   :  { %v14762_v25 = vpack.c.bf16 %v14695_v4, %v14691_v17  ;;  %v14697_v61 = vpop.f32.mrb[63].mxu0  ;;  %v21498_v13 = vpop.f32.mrb[217].mxu1 }
 0xcc6   :  { %v14763_v59 = vpack.c.bf16 %v14697_v61, %v14693_v45  ;;  %v30533_v7 = vadd.f32 %v21498_v13, %v21497_v28  ;;  %v21500_v26 = vpop.f32.mrb[218].mxu1  ;;  %21812 = vmatpush3.bf16.msra.mxu1 %v24285_v48  ;;  %v24292_v48 = vld [vmem:[%s31898_s10 + $0x438] sm:$0xff]  }
 0xcc7   :  { %19874 = vmatmul.mubr.msk.bf16.gmra.mrb[168].mxu0 %vm439_vm0, %v24254_v46  ;;  %v21501_v3 = vpop.f32.mrb[219].mxu1  ;;  %21813 = vmatprep.subr.bf16.mxu1 %v24287_v35  ;;  %v24261_v46 = vld [vmem:[%s31889_s0 + $0x1b8] sm:$0xff]  }
 0xcc8   :  { %32030 = vst [vmem:[#allocation12_spill] sm:$0xff] %v30533_v7  ;;  %15483 = vmatprep.mubr.bf16.mxu0 %v32029_v30  ;;  %v30543_v17 = vadd.f32 %v21501_v3, %v21500_v26  ;;  %17866 = vmatprep.mubr.bf16.mxu1 %v14763_v59  ;;  %v24311_v26 = vld [vmem:[%s31898_s10 + $0x540] sm:$0xff]  }
 0xcc9   :  { %17867 = vmatmul.mubr.bf16.gmra.mrb[20].mxu1 %v14762_v25 }
 0xcca   :  { %32031 = vst [vmem:[#allocation13_spill] sm:$0xff] %v30543_v17  ;;  %v30545_v45 = vpop.f32.mrb[64].mxu0  ;;  %21814 = vmatpush3.bf16.msra.mxu1 %v24288_v38 }
 0xccb   :  { %32032 = vst [vmem:[#allocation14_spill] sm:$0xff] %v30545_v45  ;;  %v30553_v35 = vpop.f32.mrb[65].mxu0  ;;  %21815 = vmatprep.subr.bf16.mxu1 %v24290_v8 }
 0xccc   :  { %32033 = vst [vmem:[#allocation15_spill] sm:$0xff] %v30553_v35  ;;  %v21503_v4 = vpop.f32.mrb[220].mxu1  ;;  %v30558_v28 = vpop.f32.mrb[66].mxu0  ;;  %v24337_v35 = vld [vmem:[%s31898_s10 + $0x530] sm:$0xff]  }
 0xccd   :  { %32034 = vst [vmem:[#allocation16_spill] sm:$0xff] %v30558_v28  ;;  %v21504_v25 = vpop.f32.mrb[221].mxu1  ;;  %v30562_v61 = vpop.f32.mrb[67].mxu0 }
 0xcce   :  { %32035 = vst [vmem:[#allocation17_spill] sm:$0xff] %v30562_v61  ;;  %v30564_v13 = vadd.f32 %v21504_v25, %v21503_v4  ;;  %v21506_v59 = vpop.f32.mrb[222].mxu1  ;;  %21816 = vmatpush3.bf16.msra.mxu1 %v24292_v48  ;;  %v24262_v4 = vld [vmem:[%s31889_s0 + $0x1c0] sm:$0xff]   ;;  %v24339_v61 = vld [vmem:[%s31898_s10 + $0x578] sm:$0xff]  }
 0xccf   :  { %19875 = vmatmul.mubr.msk.bf16.gmra.mrb[172].mxu0 %vm439_vm0, %v24261_v46  ;;  %v21507_v8 = vpop.f32.mrb[223].mxu1  ;;  %21881 = vmatprep.subr.bf16.mxu1 %v24311_v26  ;;  %v24265_v46 = vld [vmem:[%s31889_s0 + $0x1c8] sm:$0xff]  }
 0xcd0   :  { %32036 = vst [vmem:[#allocation18_spill] sm:$0xff] %v30564_v13  ;;  %15493 = vmatprep.mubr.bf16.mxu0 %v32029_v30  ;;  %v30570_v17 = vadd.f32 %v21507_v8, %v21506_v59 }
 0xcd2   :  { %32037 = vst [vmem:[#allocation19_spill] sm:$0xff] %v30570_v17  ;;  %v30572_v7 = vpop.f32.mrb[68].mxu0 }
 0xcd3   :  { %32038 = vst [vmem:[#allocation20_spill] sm:$0xff] %v30572_v7  ;;  %v30577_v25 = vpop.f32.mrb[69].mxu0 }
 0xcd4   :  { %32039 = vst [vmem:[#allocation21_spill] sm:$0xff] %v30577_v25  ;;  %v21509_v38 = vpop.f32.mrb[224].mxu1  ;;  %v30579_v13 = vpop.f32.mrb[70].mxu0 }
 0xcd5   :  { %32040 = vst [vmem:[#allocation22_spill] sm:$0xff] %v30579_v13  ;;  %v21510_v48 = vpop.f32.mrb[225].mxu1  ;;  %v30583_v26 = vpop.f32.mrb[71].mxu0 }
 0xcd6   :  { %32041 = vst [vmem:[#allocation23_spill] sm:$0xff] %v30583_v26  ;;  %v30585_v3 = vadd.f32 %v21510_v48, %v21509_v38  ;;  %v21512_v59 = vpop.f32.mrb[226].mxu1 }
 0xcd7   :  { %19876 = vmatmul.mubr.msk.bf16.gmra.mrb[176].mxu0 %vm439_vm0, %v24262_v4  ;;  %v21513_v17 = vpop.f32.mrb[227].mxu1  ;;  %v24266_v4 = vld [vmem:[%s31889_s0 + $0x1d0] sm:$0xff]  }
 0xcd8   :  { %32042 = vst [vmem:[#allocation24_spill] sm:$0xff] %v30585_v3  ;;  %15503 = vmatprep.mubr.bf16.mxu0 %v32029_v30  ;;  %v30591_v45 = vadd.f32 %v21513_v17, %v21512_v59 }
 0xcda   :  { %32043 = vst [vmem:[#allocation25_spill] sm:$0xff] %v30591_v45  ;;  %v30593_v28 = vpop.f32.mrb[72].mxu0 }
 0xcdb   :  { %32044 = vst [vmem:[#allocation26_spill] sm:$0xff] %v30593_v28  ;;  %v30598_v7 = vpop.f32.mrb[73].mxu0 }
 0xcdc   :  { %32045 = vst [vmem:[#allocation27_spill] sm:$0xff] %v30598_v7  ;;  %v21515_v38 = vpop.f32.mrb[228].mxu1  ;;  %v30600_v48 = vpop.f32.mrb[74].mxu0 }
 0xcdd   :  { %32046 = vst [vmem:[#allocation28_spill] sm:$0xff] %v30600_v48  ;;  %v21516_v3 = vpop.f32.mrb[229].mxu1  ;;  %v30604_v8 = vpop.f32.mrb[75].mxu0 }
 0xcde   :  { %32047 = vst [vmem:[#allocation29_spill] sm:$0xff] %v30604_v8  ;;  %v30606_v13 = vadd.f32 %v21516_v3, %v21515_v38  ;;  %v21518_v17 = vpop.f32.mrb[230].mxu1  ;;  %v24313_v38 = vld [vmem:[%s31898_s10 + $0x500] sm:$0xff]  }
 0xcdf   :  { %19877 = vmatmul.mubr.msk.bf16.gmra.mrb[180].mxu0 %vm439_vm0, %v24265_v46  ;;  %v21519_v45 = vpop.f32.mrb[231].mxu1 }
 0xce0   :  { %32048 = vst [vmem:[#allocation30_spill] sm:$0xff] %v30606_v13  ;;  %15513 = vmatprep.mubr.bf16.mxu0 %v32029_v30  ;;  %v30612_v25 = vadd.f32 %v21519_v45, %v21518_v17  ;;  %v24269_v17 = vld [vmem:[%s31889_s0 + $0x1d8] sm:$0xff]  }
 0xce2   :  { %32049 = vst [vmem:[#allocation31_spill] sm:$0xff] %v30612_v25  ;;  %v30614_v26 = vpop.f32.mrb[76].mxu0 }
 0xce3   :  { %32050 = vst [vmem:[#allocation32_spill] sm:$0xff] %v30614_v26  ;;  %v30619_v28 = vpop.f32.mrb[77].mxu0 }
 0xce4   :  { %32051 = vst [vmem:[#allocation33_spill] sm:$0xff] %v30619_v28  ;;  %v30621_v3 = vpop.f32.mrb[78].mxu0 }
 0xce5   :  { %32052 = vst [vmem:[#allocation34_spill] sm:$0xff] %v30621_v3  ;;  %v30625_v59 = vpop.f32.mrb[79].mxu0 }
 0xce6   :  { %32053 = vst [vmem:[#allocation35_spill] sm:$0xff] %v30625_v59 }
 0xce7   :  { %19878 = vmatmul.mubr.msk.bf16.gmra.mrb[184].mxu0 %vm439_vm0, %v24266_v4  ;;  %v24315_v4 = vld [vmem:[%s31898_s10 + $0x548] sm:$0xff]  }
 0xce8   :  { %15523 = vmatprep.mubr.bf16.mxu0 %v32029_v30 }
 0xcea   :  { %v14998_v45 = vpop.f32.mrb[80].mxu0 }
 0xceb   :  { %v15000_v25 = vpop.f32.mrb[81].mxu0 }
 0xcec   :  { %v15002_v13 = vpop.f32.mrb[82].mxu0 }
 0xced   :  { %v15157_v48 = vpack.c.bf16 %v15002_v13, %v14998_v45  ;;  %v15004_v7 = vpop.f32.mrb[83].mxu0  ;;  %v24274_v13 = vld [vmem:[%s31889_s0 + $0x1e0] sm:$0xff]   ;;  %v24319_v45 = vld [vmem:[%s31898_s10 + $0x550] sm:$0xff]  }
 0xcee   :  { %v15158_v8 = vpack.c.bf16 %v15004_v7, %v15000_v25  ;;  %v24317_v7 = vld [vmem:[%s31898_s10 + $0x508] sm:$0xff]  }
 0xcef   :  { %19879 = vmatmul.mubr.msk.bf16.gmra.mrb[188].mxu0 %vm439_vm0, %v24269_v17 }
 0xcf0   :  { %15533 = vmatprep.mubr.bf16.mxu0 %v32029_v30  ;;  %17972 = vmatprep.mubr.bf16.mxu1 %v15158_v8 }
 0xcf1   :  { %17973 = vmatmul.mubr.bf16.vlgmr.msra.gmra.mrb[24].mxu1 %v15157_v48 }
 0xcf2   :  { %v15008_v46 = vpop.f32.mrb[84].mxu0  ;;  %21882 = vmatpush3.bf16.msra.mxu1 %v24313_v38  ;;  %v24321_v38 = vld [vmem:[%s31898_s10 + $0x510] sm:$0xff]  }
 0xcf3   :  { %v15010_v25 = vpop.f32.mrb[85].mxu0  ;;  %21883 = vmatprep.subr.bf16.mxu1 %v24315_v4  ;;  %v24323_v4 = vld [vmem:[%s31898_s10 + $0x558] sm:$0xff]  }
 0xcf4   :  { %v15012_v17 = vpop.f32.mrb[86].mxu0 }
 0xcf5   :  { %v15159_v26 = vpack.c.bf16 %v15012_v17, %v15008_v46  ;;  %v15014_v8 = vpop.f32.mrb[87].mxu0  ;;  %v24325_v46 = vld [vmem:[%s31898_s10 + $0x518] sm:$0xff]  }
 0xcf6   :  { %v15160_v48 = vpack.c.bf16 %v15014_v8, %v15010_v25  ;;  %21884 = vmatpush3.bf16.msra.mxu1 %v24317_v7  ;;  %v24281_v7 = vld [vmem:[%s31889_s0 + $0x1e8] sm:$0xff]   ;;  %v24327_v25 = vld [vmem:[%s31898_s10 + $0x560] sm:$0xff]  }
 0xcf7   :  { %19880 = vmatmul.mubr.msk.bf16.gmra.mrb[192].mxu0 %vm439_vm0, %v24274_v13  ;;  %21885 = vmatprep.subr.bf16.mxu1 %v24319_v45 }
 0xcf8   :  { %15543 = vmatprep.mubr.bf16.mxu0 %v32029_v30  ;;  %17980 = vmatprep.mubr.bf16.mxu1 %v15160_v48  ;;  %v24329_v48 = vld [vmem:[%s31898_s10 + $0x520] sm:$0xff]  }
 0xcf9   :  { %17981 = vmatmul.mubr.bf16.gmra.mrb[28].mxu1 %v15159_v26 }
 0xcfa   :  { %v15018_v3 = vpop.f32.mrb[88].mxu0  ;;  %21886 = vmatpush3.bf16.msra.mxu1 %v24321_v38  ;;  %v24331_v38 = vld [vmem:[%s31898_s10 + $0x568] sm:$0xff]  }
 0xcfb   :  { %v15020_v13 = vpop.f32.mrb[89].mxu0  ;;  %21887 = vmatprep.subr.bf16.mxu1 %v24323_v4 }
 0xcfc   :  { %v15022_v45 = vpop.f32.mrb[90].mxu0 }
 0xcfd   :  { %v15161_v17 = vpack.c.bf16 %v15022_v45, %v15018_v3  ;;  %v15024_v8 = vpop.f32.mrb[91].mxu0  ;;  %v24333_v3 = vld [vmem:[%s31898_s10 + $0x528] sm:$0xff]  }
 0xcfe   :  { %v15162_v26 = vpack.c.bf16 %v15024_v8, %v15020_v13  ;;  %21888 = vmatpush3.bf16.msra.mxu1 %v24325_v46  ;;  %v24286_v46 = vld [vmem:[%s31889_s0 + $0x1f0] sm:$0xff]  }
 0xcff   :  { %19881 = vmatmul.mubr.msk.bf16.gmra.mrb[196].mxu0 %vm439_vm0, %v24281_v7  ;;  %21889 = vmatprep.subr.bf16.mxu1 %v24327_v25  ;;  %v24335_v13 = vld [vmem:[%s31898_s10 + $0x570] sm:$0xff]  }
 0xd00   :  { %15553 = vmatprep.mubr.bf16.mxu0 %v32029_v30  ;;  %17988 = vmatprep.mubr.bf16.mxu1 %v15162_v26 }
 0xd01   :  { %17989 = vmatmul.mubr.bf16.gmra.mrb[32].mxu1 %v15161_v17 }
 0xd02   :  { %v15028_v4 = vpop.f32.mrb[92].mxu0  ;;  %21890 = vmatpush3.bf16.msra.mxu1 %v24329_v48 }
 0xd03   :  { %v15030_v7 = vpop.f32.mrb[93].mxu0  ;;  %21891 = vmatprep.subr.bf16.mxu1 %v24331_v38 }
 0xd04   :  { %v15032_v25 = vpop.f32.mrb[94].mxu0  ;;  %v21577_v45 = vpop.f32.mrb[232].mxu1 }
 0xd05   :  { %v15163_v8 = vpack.c.bf16 %v15032_v25, %v15028_v4  ;;  %v15034_v17 = vpop.f32.mrb[95].mxu0  ;;  %v21578_v26 = vpop.f32.mrb[233].mxu1 }
 0xd06   :  { %v15164_v48 = vpack.c.bf16 %v15034_v17, %v15030_v7  ;;  %v30685_v28 = vadd.f32 %v21578_v26, %v21577_v45  ;;  %v21580_v59 = vpop.f32.mrb[234].mxu1  ;;  %21892 = vmatpush3.bf16.msra.mxu1 %v24333_v3  ;;  %v24341_v3 = vld [vmem:[%s31898_s10 + $0x538] sm:$0xff]  }
 0xd07   :  { %19882 = vmatmul.mubr.msk.bf16.gmra.mrb[200].mxu0 %vm439_vm0, %v24286_v46  ;;  %v21581_v38 = vpop.f32.mrb[235].mxu1  ;;  %21893 = vmatprep.subr.bf16.mxu1 %v24335_v13  ;;  %v24293_v46 = vld [vmem:[%s31889_s0 + $0x1f8] sm:$0xff]  }
 0xd08   :  { %32054 = vst [vmem:[#allocation36_spill] sm:$0xff] %v30685_v28  ;;  %15563 = vmatprep.mubr.bf16.mxu0 %v32029_v30  ;;  %v30695_v4 = vadd.f32 %v21581_v38, %v21580_v59  ;;  %17996 = vmatprep.mubr.bf16.mxu1 %v15164_v48  ;;  %v24359_v30 = vld [vmem:[%s31898_s10 + $0x640] sm:$0xff]   ;;  %v32057_v38 = vpack.c.bf16 %v30092_v12, %v30083_v18  ;;  %v24301_v18 = vld [vmem:[%s31898_s10 + $0x188] sm:$0xff]  }
 0xd09   :  { %17997 = vmatmul.mubr.bf16.gmra.mrb[36].mxu1 %v15163_v8  ;;  %v32060_v48 = vpack.c.bf16 %v30088_v52, %v30078_v47  ;;  %v24303_v52 = vld [vmem:[%s31898_s10 + $0x190] sm:$0xff]  }
 0xd0a   :  { %32055 = vst [vmem:[#allocation37_spill] sm:$0xff] %v30695_v4  ;;  %v30697_v7 = vpop.f32.mrb[96].mxu0  ;;  %21894 = vmatpush3.bf16.msra.mxu1 %v24337_v35 }
 0xd0b   :  { %v30705_v13 = vpop.f32.mrb[97].mxu0  ;;  %21895 = vmatprep.subr.bf16.mxu1 %v24339_v61 }
 0xd0c   :  { %v21583_v59 = vpop.f32.mrb[236].mxu1  ;;  %v30710_v25 = vpop.f32.mrb[98].mxu0 }
 0xd0d   :  { %v21584_v45 = vpop.f32.mrb[237].mxu1  ;;  %v30714_v8 = vpop.f32.mrb[99].mxu0 }
 0xd0e   :  { %v30716_v17 = vadd.f32 %v21584_v45, %v21583_v59  ;;  %v21586_v26 = vpop.f32.mrb[238].mxu1  ;;  %21896 = vmatpush3.bf16.msra.mxu1 %v24341_v3  ;;  %v24299_v59 = vld [vmem:[%s31898_s10 + $0x180] sm:$0xff]  }
 0xd0f   :  { %19883 = vmatmul.mubr.msk.bf16.gmra.mrb[204].mxu0 %vm439_vm0, %v24293_v46  ;;  %v21587_v61 = vpop.f32.mrb[239].mxu1  ;;  %21961 = vmatprep.subr.bf16.mxu1 %v24359_v30  ;;  %v24300_v46 = vld [vmem:[%s31898_s10 + $0x1c8] sm:$0xff]  }
 0xd10   :  { %32056 = vst [vmem:[#allocation38_spill] sm:$0xff] %v30716_v17  ;;  %17517 = vmatprep.mubr.bf16.mxu0 %v32057_v38  ;;  %v30724_v4 = vadd.f32 %v21587_v61, %v21586_v26  ;;  %v32061_v17 = vpack.c.bf16 %v30109_v2, %v30103_v40 }
 0xd12   :  { %32058 = vst [vmem:[#allocation39_spill] sm:$0xff] %v30724_v4  ;;  %v30726_v35 = vpop.f32.mrb[100].mxu0 }
 0xd13   :  { %v30728_v28 = vpop.f32.mrb[101].mxu0 }
 0xd14   :  { %v21589_v45 = vpop.f32.mrb[240].mxu1  ;;  %v30733_v3 = vpop.f32.mrb[102].mxu0 }
 0xd15   :  { %v21590_v30 = vpop.f32.mrb[241].mxu1  ;;  %v30740_v12 = vpop.f32.mrb[103].mxu0 }
 0xd16   :  { %v30742_v26 = vadd.f32 %v21590_v30, %v21589_v45  ;;  %v21592_v61 = vpop.f32.mrb[242].mxu1  ;;  %v24302_v30 = vld [vmem:[%s31898_s10 + $0x1d0] sm:$0xff]  }
 0xd17   :  { %17518 = vmatmul.mubr.bf16.vlgmr.msra.gmra.mrb[208].mxu0 %v32060_v48  ;;  %v21593_v4 = vpop.f32.mrb[243].mxu1  ;;  %v24305_v48 = vld [vmem:[%s31898_s10 + $0x198] sm:$0xff]  }
 0xd18   :  { %32059 = vst [vmem:[#allocation40_spill] sm:$0xff] %v30742_v26  ;;  %17525 = vmatprep.mubr.bf16.mxu0 %v32061_v17  ;;  %21602 = vmatpush3.bf16.msra.mxu0 %v24299_v59  ;;  %v30755_v45 = vadd.f32 %v21593_v4, %v21592_v61  ;;  %v24304_v4 = vld [vmem:[%s31898_s10 + $0x1d8] sm:$0xff]   ;;  %v32064_v26 = vpack.c.bf16 %v30130_v6, %v30122_v10  ;;  %v24308_v6 = vld [vmem:[%s31898_s10 + $0x1e8] sm:$0xff]  }
 0xd19   :  { %21603 = vmatprep.subr.bf16.mxu0 %v24300_v46 }
 0xd1a   :  { %32062 = vst [vmem:[#allocation41_spill] sm:$0xff] %v30755_v45  ;;  %v30760_v38 = vpop.f32.mrb[104].mxu0  ;;  %v32063_v45 = vpack.c.bf16 %v30105_v31, %v30098_v43  ;;  %v24307_v31 = vld [vmem:[%s31898_s10 + $0x1a0] sm:$0xff]  }
 0xd1b   :  { %v30762_v47 = vpop.f32.mrb[105].mxu0 }
 0xd1c   :  { %21604 = vmatpush3.bf16.msra.mxu0 %v24301_v18  ;;  %v21595_v40 = vpop.f32.mrb[244].mxu1  ;;  %v30767_v2 = vpop.f32.mrb[106].mxu0 }
 0xd1d   :  { %21605 = vmatprep.subr.bf16.mxu0 %v24302_v30  ;;  %v21596_v17 = vpop.f32.mrb[245].mxu1  ;;  %v30774_v59 = vpop.f32.mrb[107].mxu0 }
 0xd1e   :  { %v30776_v46 = vadd.f32 %v21596_v17, %v21595_v40  ;;  %v21598_v18 = vpop.f32.mrb[246].mxu1  ;;  %v24306_v17 = vld [vmem:[%s31898_s10 + $0x1e0] sm:$0xff]  }
 0xd1f   :  { %17526 = vmatmul.mubr.bf16.gmra.mrb[212].mxu0 %v32063_v45  ;;  %v21599_v30 = vpop.f32.mrb[247].mxu1 }
 0xd20   :  { %17533 = vmatprep.mubr.bf16.mxu0 %v32064_v26  ;;  %21606 = vmatpush3.bf16.msra.mxu0 %v24303_v52  ;;  %v30789_v40 = vadd.f32 %v21599_v30, %v21598_v18  ;;  %v24309_v18 = vld [vmem:[%s31898_s10 + $0x1a8] sm:$0xff]   ;;  %v24310_v30 = vld [vmem:[%s31898_s10 + $0x1f0] sm:$0xff]  }
 0xd21   :  { %21607 = vmatprep.subr.bf16.mxu0 %v24304_v4  ;;  %v32065_v4 = vpack.c.bf16 %v30125_v23, %v30117_v15  ;;  %v24312_v15 = vld [vmem:[%s31898_s10 + $0x1b0] sm:$0xff]  }
 0xd22   :  { %v30794_v61 = vpop.f32.mrb[108].mxu0 }
 0xd23   :  { %v30796_v43 = vpop.f32.mrb[109].mxu0 }
 0xd24   :  { %21608 = vmatpush3.bf16.msra.mxu0 %v24305_v48  ;;  %v30801_v10 = vpop.f32.mrb[110].mxu0  ;;  %v32066_v48 = vpack.c.bf16 %v30150_v51, %v30143_v14  ;;  %v24314_v14 = vld [vmem:[%s31898_s10 + $0x1f8] sm:$0xff]  }
 0xd25   :  { %21609 = vmatprep.subr.bf16.mxu0 %v24306_v17  ;;  %v30808_v45 = vpop.f32.mrb[111].mxu0 }
 0xd27   :  { %17534 = vmatmul.mubr.bf16.gmra.mrb[216].mxu0 %v32065_v4  ;;  %v32067_v4 = vpack.c.bf16 %v30146_v36, %v30138_v57  ;;  %v24318_v57 = vld [vmem:[%s31898_s10 + $0x2c0] sm:$0xff]  }
 0xd28   :  { %17541 = vmatprep.mubr.bf16.mxu0 %v32066_v48  ;;  %21610 = vmatpush3.bf16.msra.mxu0 %v24307_v31  ;;  %v24361_v48 = vld [vmem:[%s31898_s10 + $0x600] sm:$0xff]  }
 0xd29   :  { %21611 = vmatprep.subr.bf16.mxu0 %v24308_v6 }
 0xd2a   :  { %v15078_v17 = vpop.f32.mrb[112].mxu0 }
 0xd2b   :  { %v15080_v26 = vpop.f32.mrb[113].mxu0 }
 0xd2c   :  { %21612 = vmatpush3.bf16.msra.mxu0 %v24309_v18  ;;  %v15082_v23 = vpop.f32.mrb[114].mxu0  ;;  %v32068_v18 = vpack.c.bf16 %v30238_v44, %v30229_v55  ;;  %v24365_v55 = vld [vmem:[%s31898_s10 + $0x608] sm:$0xff]   ;;  %v24320_v44 = vld [vmem:[%s31898_s10 + $0x280] sm:$0xff]  }
 0xd2d   :  { %21613 = vmatprep.subr.bf16.mxu0 %v24310_v30  ;;  %v15173_v51 = vpack.c.bf16 %v15082_v23, %v15078_v17  ;;  %v15084_v31 = vpop.f32.mrb[115].mxu0  ;;  %v24316_v30 = vld [vmem:[%s31898_s10 + $0x1b8] sm:$0xff]   ;;  %v24322_v23 = vld [vmem:[%s31898_s10 + $0x2c8] sm:$0xff]  }
 0xd2e   :  { %v15174_v6 = vpack.c.bf16 %v15084_v31, %v15080_v26  ;;  %v24363_v26 = vld [vmem:[%s31898_s10 + $0x648] sm:$0xff]  }
 0xd2f   :  { %17542 = vmatmul.mubr.bf16.gmra.mrb[220].mxu0 %v32067_v4  ;;  %v32069_v4 = vpack.c.bf16 %v30234_v1, %v30221_v42  ;;  %v24326_v42 = vld [vmem:[%s31898_s10 + $0x2d0] sm:$0xff]  }
 0xd30   :  { %21614 = vmatpush3.bf16.msra.mxu0 %v24312_v15  ;;  %17647 = vmatprep.mubr.bf16.mxu0 %v32068_v18  ;;  %v32070_v18 = vpack.c.bf16 %v30255_v37, %v30249_v41  ;;  %v24373_v37 = vld [vmem:[%s31898_s10 + $0x618] sm:$0xff]  }
 0xd31   :  { %21615 = vmatprep.subr.bf16.mxu0 %v24314_v14  ;;  %18102 = vmatprep.mubr.bf16.mxu1 %v15174_v6  ;;  %v24367_v6 = vld [vmem:[%s31898_s10 + $0x650] sm:$0xff]  }
 0xd32   :  { %18103 = vmatmul.mubr.bf16.vlgmr.msra.gmra.mrb[40].mxu1 %v15173_v51  ;;  %v15088_v36 = vpop.f32.mrb[116].mxu0 }
 0xd33   :  { %v15090_v17 = vpop.f32.mrb[117].mxu0  ;;  %21962 = vmatpush3.bf16.msra.mxu1 %v24361_v48  ;;  %v24369_v48 = vld [vmem:[%s31898_s10 + $0x610] sm:$0xff]  }
 0xd34   :  { %21616 = vmatpush3.bf16.msra.mxu0 %v24316_v30  ;;  %v15092_v15 = vpop.f32.mrb[118].mxu0  ;;  %21963 = vmatprep.subr.bf16.mxu1 %v24363_v26  ;;  %v24324_v30 = vld [vmem:[%s31898_s10 + $0x288] sm:$0xff]   ;;  %v24371_v26 = vld [vmem:[%s31898_s10 + $0x658] sm:$0xff]  }
 0xd35   :  { %21681 = vmatprep.subr.bf16.mxu0 %v24318_v57  ;;  %v15175_v14 = vpack.c.bf16 %v15092_v15, %v15088_v36  ;;  %v15094_v51 = vpop.f32.mrb[119].mxu0  ;;  %v24328_v57 = vld [vmem:[%s31898_s10 + $0x290] sm:$0xff]  }
 0xd36   :  { %v15176_v31 = vpack.c.bf16 %v15094_v51, %v15090_v17  ;;  %v24330_v17 = vld [vmem:[%s31898_s10 + $0x2d8] sm:$0xff]   ;;  %v24377_v51 = vld [vmem:[%s31898_s10 + $0x620] sm:$0xff]  }
 0xd37   :  { %17648 = vmatmul.mubr.bf16.vlgmr.msra.gmra.mrb[224].mxu0 %v32069_v4  ;;  %21964 = vmatpush3.bf16.msra.mxu1 %v24365_v55  ;;  %v24379_v4 = vld [vmem:[%s31898_s10 + $0x668] sm:$0xff]  }
 0xd38   :  { %17655 = vmatprep.mubr.bf16.mxu0 %v32070_v18  ;;  %21682 = vmatpush3.bf16.msra.mxu0 %v24320_v44 }
 0xd39   :  { %21683 = vmatprep.subr.bf16.mxu0 %v24322_v23  ;;  %18110 = vmatprep.mubr.bf16.mxu1 %v15176_v31  ;;  %v24375_v23 = vld [vmem:[%s31898_s10 + $0x660] sm:$0xff]   ;;  %v32072_v31 = vpack.c.bf16 %v30272_v22, %v30266_v11  ;;  %v24381_v22 = vld [vmem:[%s31898_s10 + $0x628] sm:$0xff]  }
 0xd3a   :  { %18111 = vmatmul.mubr.bf16.gmra.mrb[44].mxu1 %v15175_v14  ;;  %v15098_v1 = vpop.f32.mrb[120].mxu0  ;;  %21965 = vmatprep.subr.bf16.mxu1 %v24367_v6  ;;  %v32071_v14 = vpack.c.bf16 %v30251_v53, %v30244_v56  ;;  %v24332_v6 = vld [vmem:[%s31898_s10 + $0x298] sm:$0xff]   ;;  %v24334_v56 = vld [vmem:[%s31898_s10 + $0x2e0] sm:$0xff]  }
 0xd3b   :  { %v15100_v41 = vpop.f32.mrb[121].mxu0  ;;  %21966 = vmatpush3.bf16.msra.mxu1 %v24369_v48  ;;  %v24336_v48 = vld [vmem:[%s31898_s10 + $0x2a0] sm:$0xff]  }
 0xd3c   :  { %21684 = vmatpush3.bf16.msra.mxu0 %v24324_v30  ;;  %v15102_v36 = vpop.f32.mrb[122].mxu0  ;;  %21967 = vmatprep.subr.bf16.mxu1 %v24371_v26  ;;  %v24338_v26 = vld [vmem:[%s31898_s10 + $0x2e8] sm:$0xff]  }
 0xd3d   :  { %21685 = vmatprep.subr.bf16.mxu0 %v24326_v42  ;;  %v15177_v55 = vpack.c.bf16 %v15102_v36, %v15098_v1  ;;  %v15104_v44 = vpop.f32.mrb[123].mxu0 }
 0xd3e   :  { %v15178_v15 = vpack.c.bf16 %v15104_v44, %v15100_v41 }
 0xd3f   :  { %17656 = vmatmul.mubr.bf16.gmra.mrb[228].mxu0 %v32071_v14  ;;  %21968 = vmatpush3.bf16.msra.mxu1 %v24373_v37  ;;  %v24340_v14 = vld [vmem:[%s31898_s10 + $0x2a8] sm:$0xff]  }
 0xd40   :  { %17663 = vmatprep.mubr.bf16.mxu0 %v32072_v31  ;;  %21686 = vmatpush3.bf16.msra.mxu0 %v24328_v57  ;;  %v24389_v31 = vld [vmem:[%s31898_s10 + $0x638] sm:$0xff]  }
 0xd41   :  { %21687 = vmatprep.subr.bf16.mxu0 %v24330_v17  ;;  %18118 = vmatprep.mubr.bf16.mxu1 %v15178_v15  ;;  %v24383_v17 = vld [vmem:[%s31898_s10 + $0x670] sm:$0xff]  }
 0xd42   :  { %18119 = vmatmul.mubr.bf16.gmra.mrb[48].mxu1 %v15177_v55  ;;  %v15108_v53 = vpop.f32.mrb[124].mxu0  ;;  %21969 = vmatprep.subr.bf16.mxu1 %v24375_v23  ;;  %v32073_v55 = vpack.c.bf16 %v30268_v9, %v30261_v50  ;;  %v24385_v15 = vld [vmem:[%s31898_s10 + $0x630] sm:$0xff]   ;;  %v32074_v23 = vpack.c.bf16 %v30289_v0, %v30283_v33  ;;  %v24387_v50 = vld [vmem:[%s31898_s10 + $0x678] sm:$0xff]  }
 0xd43   :  { %v15110_v11 = vpop.f32.mrb[125].mxu0  ;;  %21970 = vmatpush3.bf16.msra.mxu1 %v24377_v51  ;;  %v24342_v9 = vld [vmem:[%s31898_s10 + $0x2f0] sm:$0xff]  }
 0xd44   :  { %21688 = vmatpush3.bf16.msra.mxu0 %v24332_v6  ;;  %v15112_v18 = vpop.f32.mrb[126].mxu0  ;;  %v21657_v30 = vpop.f32.mrb[248].mxu1  ;;  %21971 = vmatprep.subr.bf16.mxu1 %v24379_v4  ;;  %v24343_v6 = vld [vmem:[%s31898_s10 + $0x2b0] sm:$0xff]  }
 0xd45   :  { %21689 = vmatprep.subr.bf16.mxu0 %v24334_v56  ;;  %v15179_v42 = vpack.c.bf16 %v15112_v18, %v15108_v53  ;;  %v15114_v1 = vpop.f32.mrb[127].mxu0  ;;  %v21658_v41 = vpop.f32.mrb[249].mxu1  ;;  %v24344_v53 = vld [vmem:[%s31898_s10 + $0x2f8] sm:$0xff]   ;;  %v24392_v18 = vld [vmem:[%s31898_s10 + $0x740] sm:$0xff]  }
 0xd46   :  { %v15180_v37 = vpack.c.bf16 %v15114_v1, %v15110_v11  ;;  %v30917_v57 = vadd.f32 %v21658_v41, %v21657_v30  ;;  %v21660_v36 = vpop.f32.mrb[250].mxu1  ;;  %v32075_v1 = vpack.c.bf16 %v30285_v29, %v30278_v54 }
 0xd47   :  { %17664 = vmatmul.mubr.bf16.gmra.mrb[232].mxu0 %v32073_v55  ;;  %v21661_v44 = vpop.f32.mrb[251].mxu1  ;;  %21972 = vmatpush3.bf16.msra.mxu1 %v24381_v22  ;;  %v24346_v55 = vld [vmem:[%s31898_s10 + $0x3c0] sm:$0xff]  }
 0xd48   :  { %17671 = vmatprep.mubr.bf16.mxu0 %v32074_v23  ;;  %21690 = vmatpush3.bf16.msra.mxu0 %v24336_v48  ;;  %v30934_v51 = vadd.f32 %v21661_v44, %v21660_v36  ;;  %v24345_v36 = vld [vmem:[%s31898_s10 + $0x2b8] sm:$0xff]  }
 0xd49   :  { %21691 = vmatprep.subr.bf16.mxu0 %v24338_v26  ;;  %18126 = vmatprep.mubr.bf16.mxu1 %v15180_v37  ;;  %v32076_v37 = vpack.c.bf16 %v30374_v27, %v30365_v49  ;;  %v24347_v49 = vld [vmem:[%s31898_s10 + $0x380] sm:$0xff]  }
 0xd4a   :  { %18127 = vmatmul.mubr.bf16.gmra.mrb[52].mxu1 %v15179_v42  ;;  %v30942_v33 = vpop.f32.mrb[128].mxu0  ;;  %21973 = vmatprep.subr.bf16.mxu1 %v24383_v17  ;;  %v24395_v42 = vld [vmem:[%s31898_s10 + $0x4b8] sm:$0xff]  }
 0xd4b   :  { %v30944_v0 = vpop.f32.mrb[129].mxu0  ;;  %21974 = vmatpush3.bf16.msra.mxu1 %v24385_v15  ;;  %v24348_v15 = vld [vmem:[%s31898_s10 + $0x3c8] sm:$0xff]  }
 0xd4c   :  { %21692 = vmatpush3.bf16.msra.mxu0 %v24340_v14  ;;  %v21663_v4 = vpop.f32.mrb[252].mxu1  ;;  %v30952_v56 = vpop.f32.mrb[130].mxu0  ;;  %21975 = vmatprep.subr.bf16.mxu1 %v24387_v50  ;;  %v32101_v14 = vld [vmem:[#allocation26_spill] sm:$0xff] }
 0xd4d   :  { %21693 = vmatprep.subr.bf16.mxu0 %v24342_v9  ;;  %v21664_v11 = vpop.f32.mrb[253].mxu1  ;;  %v30959_v48 = vpop.f32.mrb[131].mxu0 }
 0xd4e   :  { %v30964_v30 = vadd.f32 %v21664_v11, %v21663_v4  ;;  %v21666_v26 = vpop.f32.mrb[254].mxu1  ;;  %v32077_v4 = vpack.c.bf16 %v30370_v5, %v30357_v63  ;;  %v32078_v11 = vpack.c.bf16 %v30394_v62, %v30385_v60  ;;  %v24351_v5 = vld [vmem:[%s31898_s10 + $0x390] sm:$0xff]  }
 0xd4f   :  { %17672 = vmatmul.mubr.bf16.gmra.mrb[236].mxu0 %v32075_v1  ;;  %v21667_v41 = vpop.f32.mrb[255].mxu1  ;;  %21976 = vmatpush3.bf16.msra.mxu1 %v24389_v31  ;;  %v24350_v1 = vld [vmem:[%s31898_s10 + $0x3d0] sm:$0xff]  }
 0xd50   :  { %21694 = vmatpush3.bf16.msra.mxu0 %v24343_v6  ;;  %17777 = vmatprep.mubr.bf16.mxu0 %v32076_v37  ;;  %v30977_v17 = vadd.f32 %v21667_v41, %v21666_v26  ;;  %v24352_v37 = vld [vmem:[%s31898_s10 + $0x3d8] sm:$0xff]  }
 0xd51   :  { %21695 = vmatprep.subr.bf16.mxu0 %v24344_v53  ;;  %22041 = vmatprep.subr.bf16.mxu1 %v24392_v18  ;;  %v24349_v18 = vld [vmem:[%s31898_s10 + $0x388] sm:$0xff]  }
 0xd52   :  { %v30982_v54 = vpop.f32.mrb[132].mxu0 }
 0xd53   :  { %v30984_v29 = vpop.f32.mrb[133].mxu0 }
 0xd54   :  { %21696 = vmatpush3.bf16.msra.mxu0 %v24345_v36  ;;  %v21669_v27 = vpop.f32.mrb[0].mxu1  ;;  %v30989_v44 = vpop.f32.mrb[134].mxu0 }
 0xd55   :  { %21761 = vmatprep.subr.bf16.mxu0 %v24346_v55  ;;  %v21670_v23 = vpop.f32.mrb[1].mxu1  ;;  %v30996_v50 = vpop.f32.mrb[135].mxu0 }
 0xd56   :  { %v30998_v9 = vadd.f32 %v21670_v23, %v21669_v27  ;;  %v21672_v31 = vpop.f32.mrb[2].mxu1 }
 0xd57   :  { %17778 = vmatmul.mubr.bf16.vlgmr.msra.gmra.mrb[240].mxu0 %v32077_v4  ;;  %v21673_v53 = vpop.f32.mrb[3].mxu1 }
 0xd58   :  { %17785 = vmatprep.mubr.bf16.mxu0 %v32078_v11  ;;  %21762 = vmatpush3.bf16.msra.mxu0 %v24347_v49  ;;  %v31011_v26 = vadd.f32 %v21673_v53, %v21672_v31  ;;  %v32079_v31 = vpack.c.bf16 %v30387_v19, %v30380_v39  ;;  %v32080_v53 = vpack.c.bf16 %v30423_v20, %v30414_v16  ;;  %v24353_v11 = vld [vmem:[%s31898_s10 + $0x398] sm:$0xff]   ;;  %v24355_v16 = vld [vmem:[%s31898_s10 + $0x3a0] sm:$0xff]   ;;  %v24356_v39 = vld [vmem:[%s31898_s10 + $0x3e8] sm:$0xff]  }
 0xd59   :  { %21763 = vmatprep.subr.bf16.mxu0 %v24348_v15 }
 0xd5a   :  { %v31016_v41 = vpop.f32.mrb[136].mxu0 }
 0xd5b   :  { %v31018_v63 = vpop.f32.mrb[137].mxu0 }
 0xd5c   :  { %21764 = vmatpush3.bf16.msra.mxu0 %v24349_v18  ;;  %v21675_v60 = vpop.f32.mrb[4].mxu1  ;;  %v31023_v62 = vpop.f32.mrb[138].mxu0 }
 0xd5d   :  { %21765 = vmatprep.subr.bf16.mxu0 %v24350_v1  ;;  %v21676_v36 = vpop.f32.mrb[5].mxu1  ;;  %v31030_v49 = vpop.f32.mrb[139].mxu0  ;;  %v24354_v1 = vld [vmem:[%s31898_s10 + $0x3e0] sm:$0xff]  }
 0xd5e   :  { %v31032_v27 = vadd.f32 %v21676_v36, %v21675_v60  ;;  %v21678_v15 = vpop.f32.mrb[6].mxu1  ;;  %v32086_v36 = vld [vmem:[#allocation15_spill] sm:$0xff] }
 0xd5f   :  { %17786 = vmatmul.mubr.bf16.gmra.mrb[244].mxu0 %v32079_v31  ;;  %v21679_v4 = vpop.f32.mrb[7].mxu1  ;;  %v32082_v31 = vpack.c.bf16 %v30452_v34, %v30443_v24  ;;  %v24362_v24 = vld [vmem:[%s31898_s10 + $0x3f8] sm:$0xff]  }
 0xd60   :  { %17793 = vmatprep.mubr.bf16.mxu0 %v32080_v53  ;;  %21766 = vmatpush3.bf16.msra.mxu0 %v24351_v5  ;;  %v31045_v18 = vadd.f32 %v21679_v4, %v21678_v15  ;;  %v32081_v15 = vpack.c.bf16 %v30416_v32, %v30409_v21  ;;  %v24357_v4 = vld [vmem:[%s31898_s10 + $0x3a8] sm:$0xff]   ;;  %v24358_v53 = vld [vmem:[%s31898_s10 + $0x3f0] sm:$0xff]  }
 0xd61   :  { %21767 = vmatprep.subr.bf16.mxu0 %v24352_v37  ;;  %v24360_v21 = vld [vmem:[%s31898_s10 + $0x3b0] sm:$0xff]  }
 0xd62   :  { %v31050_v60 = vpop.f32.mrb[140].mxu0  ;;  %v32085_v5 = vld [vmem:[#allocation17_spill] sm:$0xff] }
 0xd63   :  { %v31052_v19 = vpop.f32.mrb[141].mxu0  ;;  %v32087_v55 = vpack.c.bf16 %v32085_v5, %v32086_v36  ;;  %v24368_v5 = vld [vmem:[%s31898_s10 + $0x480] sm:$0xff]  }
 0xd64   :  { %21768 = vmatpush3.bf16.msra.mxu0 %v24353_v11  ;;  %v31057_v20 = vpop.f32.mrb[142].mxu0 }
 0xd65   :  { %21769 = vmatprep.subr.bf16.mxu0 %v24354_v1  ;;  %v31064_v37 = vpop.f32.mrb[143].mxu0 }
 0xd67   :  { %17794 = vmatmul.mubr.bf16.gmra.mrb[248].mxu0 %v32081_v15  ;;  %v32083_v15 = vld [vmem:[#allocation6_spill] sm:$0xff] }
 0xd68   :  { %17801 = vmatprep.mubr.bf16.mxu0 %v32082_v31  ;;  %21770 = vmatpush3.bf16.msra.mxu0 %v24355_v16  ;;  %v32084_v31 = vpack.c.bf16 %v30445_v58, %v32083_v15  ;;  %v24366_v58 = vld [vmem:[%s31898_s10 + $0x4c0] sm:$0xff]   ;;  %v32088_v15 = vld [vmem:[#allocation16_spill] sm:$0xff] }
 0xd69   :  { %21771 = vmatprep.subr.bf16.mxu0 %v24356_v39 }
 0xd6a   :  { %v15415_v11 = vpop.f32.mrb[144].mxu0 }
 0xd6b   :  { %v15417_v1 = vpop.f32.mrb[145].mxu0 }
 0xd6c   :  { %21772 = vmatpush3.bf16.msra.mxu0 %v24357_v4  ;;  %v15419_v32 = vpop.f32.mrb[146].mxu0  ;;  %v24393_v4 = vld [vmem:[%s31898_s10 + $0x700] sm:$0xff]  }
 0xd6d   :  { %21773 = vmatprep.subr.bf16.mxu0 %v24358_v53  ;;  %v15574_v34 = vpack.c.bf16 %v15419_v32, %v15415_v11  ;;  %v15421_v16 = vpop.f32.mrb[147].mxu0  ;;  %v24364_v53 = vld [vmem:[%s31898_s10 + $0x3b8] sm:$0xff]   ;;  %v24396_v11 = vld [vmem:[%s31898_s10 + $0x748] sm:$0xff]  }
 0xd6e   :  { %v15575_v39 = vpack.c.bf16 %v15421_v16, %v15417_v1  ;;  %v24370_v32 = vld [vmem:[%s31898_s10 + $0x4c8] sm:$0xff]  }
 0xd6f   :  { %17802 = vmatmul.mubr.bf16.gmra.mrb[252].mxu0 %v32084_v31  ;;  %v32089_v31 = vld [vmem:[#allocation14_spill] sm:$0xff] }
 0xd70   :  { %21774 = vmatpush3.bf16.msra.mxu0 %v24360_v21  ;;  %17907 = vmatprep.mubr.bf16.mxu0 %v32087_v55  ;;  %v24397_v55 = vld [vmem:[%s31898_s10 + $0x708] sm:$0xff]  }
 0xd71   :  { %21775 = vmatprep.subr.bf16.mxu0 %v24362_v24  ;;  %18232 = vmatprep.mubr.bf16.mxu1 %v15575_v39  ;;  %v24400_v39 = vld [vmem:[%s31898_s10 + $0x750] sm:$0xff]  }
 0xd72   :  { %v15425_v1 = vpop.f32.mrb[148].mxu0  ;;  %18233 = vmatmul.mubr.bf16.vlgmr.msra.gmra.mrb[56].mxu1 %v15574_v34 }
 0xd73   :  { %v15427_v21 = vpop.f32.mrb[149].mxu0  ;;  %22042 = vmatpush3.bf16.msra.mxu1 %v24393_v4  ;;  %v32090_v4 = vpack.c.bf16 %v32088_v15, %v32089_v31  ;;  %v24408_v31 = vld [vmem:[%s31898_s10 + $0x760] sm:$0xff]  }
 0xd74   :  { %21776 = vmatpush3.bf16.msra.mxu0 %v24364_v53  ;;  %v15429_v36 = vpop.f32.mrb[150].mxu0  ;;  %22043 = vmatprep.subr.bf16.mxu1 %v24396_v11  ;;  %v24401_v53 = vld [vmem:[%s31898_s10 + $0x710] sm:$0xff]   ;;  %v32091_v11 = vld [vmem:[#allocation23_spill] sm:$0xff] }
 0xd75   :  { %21841 = vmatprep.subr.bf16.mxu0 %v24366_v58  ;;  %v15576_v24 = vpack.c.bf16 %v15429_v36, %v15425_v1  ;;  %v15431_v34 = vpop.f32.mrb[151].mxu0  ;;  %v32092_v58 = vld [vmem:[#allocation21_spill] sm:$0xff]  ;;  %v24372_v1 = vld [vmem:[%s31898_s10 + $0x488] sm:$0xff]  }
 0xd76   :  { %v15577_v16 = vpack.c.bf16 %v15431_v34, %v15427_v21  ;;  %v32093_v23 = vpack.c.bf16 %v32091_v11, %v32092_v58  ;;  %v24404_v21 = vld [vmem:[%s31898_s10 + $0x758] sm:$0xff]   ;;  %v24409_v58 = vld [vmem:[%s31898_s10 + $0x720] sm:$0xff]  }
 0xd77   :  { %17908 = vmatmul.mubr.bf16.vlgmr.msra.gmra.mrb[0].mxu0 %v32090_v4  ;;  %22044 = vmatpush3.bf16.msra.mxu1 %v24397_v55  ;;  %v24374_v55 = vld [vmem:[%s31898_s10 + $0x4d0] sm:$0xff]   ;;  %v32094_v4 = vld [vmem:[#allocation22_spill] sm:$0xff] }
 0xd78   :  { %17915 = vmatprep.mubr.bf16.mxu0 %v32093_v23  ;;  %21842 = vmatpush3.bf16.msra.mxu0 %v24368_v5  ;;  %v24405_v23 = vld [vmem:[%s31898_s10 + $0x718] sm:$0xff]   ;;  %v24376_v5 = vld [vmem:[%s31898_s10 + $0x490] sm:$0xff]  }
 0xd79   :  { %21843 = vmatprep.subr.bf16.mxu0 %v24370_v32  ;;  %18240 = vmatprep.mubr.bf16.mxu1 %v15577_v16  ;;  %v24378_v16 = vld [vmem:[%s31898_s10 + $0x4d8] sm:$0xff]  }
 0xd7a   :  { %v15435_v36 = vpop.f32.mrb[152].mxu0  ;;  %18241 = vmatmul.mubr.bf16.gmra.mrb[60].mxu1 %v15576_v24  ;;  %22045 = vmatprep.subr.bf16.mxu1 %v24400_v39 }
 0xd7b   :  { %v15437_v34 = vpop.f32.mrb[153].mxu0  ;;  %22046 = vmatpush3.bf16.msra.mxu1 %v24401_v53  ;;  %v32095_v53 = vld [vmem:[#allocation20_spill] sm:$0xff] }
 0xd7c   :  { %21844 = vmatpush3.bf16.msra.mxu0 %v24372_v1  ;;  %v15439_v32 = vpop.f32.mrb[154].mxu0  ;;  %22047 = vmatprep.subr.bf16.mxu1 %v24404_v21  ;;  %v32096_v11 = vpack.c.bf16 %v32094_v4, %v32095_v53  ;;  %v32097_v1 = vld [vmem:[#allocation29_spill] sm:$0xff]  ;;  %v32098_v21 = vld [vmem:[#allocation27_spill] sm:$0xff] }
 0xd7d   :  { %21845 = vmatprep.subr.bf16.mxu0 %v24374_v55  ;;  %v15578_v24 = vpack.c.bf16 %v15439_v32, %v15435_v36  ;;  %v15441_v39 = vpop.f32.mrb[155].mxu0  ;;  %v32099_v55 = vpack.c.bf16 %v32097_v1, %v32098_v21  ;;  %v24380_v36 = vld [vmem:[%s31898_s10 + $0x498] sm:$0xff]   ;;  %v24384_v4 = vld [vmem:[%s31898_s10 + $0x4a0] sm:$0xff]  }
 0xd7e   :  { %v15579_v15 = vpack.c.bf16 %v15441_v39, %v15437_v34  ;;  %v24412_v34 = vld [vmem:[%s31898_s10 + $0x768] sm:$0xff]  }
 0xd7f   :  { %17916 = vmatmul.mubr.bf16.gmra.mrb[4].mxu0 %v32096_v11  ;;  %22048 = vmatpush3.bf16.msra.mxu1 %v24405_v23  ;;  %v24382_v23 = vld [vmem:[%s31898_s10 + $0x4e0] sm:$0xff]  }
 0xd80   :  { %17923 = vmatprep.mubr.bf16.mxu0 %v32099_v55  ;;  %21846 = vmatpush3.bf16.msra.mxu0 %v24376_v5  ;;  %v24413_v5 = vld [vmem:[%s31898_s10 + $0x728] sm:$0xff]   ;;  %v24416_v55 = vld [vmem:[%s31898_s10 + $0x770] sm:$0xff]  }
 0xd81   :  { %21847 = vmatprep.subr.bf16.mxu0 %v24378_v16  ;;  %18248 = vmatprep.mubr.bf16.mxu1 %v15579_v15 }
 0xd82   :  { %v15445_v32 = vpop.f32.mrb[156].mxu0  ;;  %18249 = vmatmul.mubr.bf16.gmra.mrb[64].mxu1 %v15578_v24  ;;  %22049 = vmatprep.subr.bf16.mxu1 %v24408_v31  ;;  %v24386_v24 = vld [vmem:[%s31898_s10 + $0x4e8] sm:$0xff]  }
 0xd83   :  { %v15447_v39 = vpop.f32.mrb[157].mxu0  ;;  %22050 = vmatpush3.bf16.msra.mxu1 %v24409_v58 }
 0xd84   :  { %21848 = vmatpush3.bf16.msra.mxu0 %v24380_v36  ;;  %v15449_v16 = vpop.f32.mrb[158].mxu0  ;;  %v21737_v53 = vpop.f32.mrb[8].mxu1  ;;  %22051 = vmatprep.subr.bf16.mxu1 %v24412_v34  ;;  %v32100_v36 = vld [vmem:[#allocation28_spill] sm:$0xff] }
 0xd85   :  { %21849 = vmatprep.subr.bf16.mxu0 %v24382_v23  ;;  %v15580_v15 = vpack.c.bf16 %v15449_v16, %v15445_v32  ;;  %v15451_v31 = vpop.f32.mrb[159].mxu0  ;;  %v21738_v11 = vpop.f32.mrb[9].mxu1  ;;  %v32102_v6 = vpack.c.bf16 %v32100_v36, %v32101_v14  ;;  %v24417_v23 = vld [vmem:[%s31898_s10 + $0x730] sm:$0xff]   ;;  %v32103_v32 = vld [vmem:[#allocation35_spill] sm:$0xff]  ;;  %v24420_v14 = vld [vmem:[%s31898_s10 + $0x778] sm:$0xff]  }
 0xd86   :  { %v15581_v58 = vpack.c.bf16 %v15451_v31, %v15447_v39  ;;  %v31173_v1 = vadd.f32 %v21738_v11, %v21737_v53  ;;  %v21740_v21 = vpop.f32.mrb[10].mxu1  ;;  %v32104_v16 = vld [vmem:[#allocation33_spill] sm:$0xff]  ;;  %v24388_v53 = vld [vmem:[%s31898_s10 + $0x4a8] sm:$0xff]   ;;  %v24421_v11 = vld [vmem:[%s31898_s10 + $0x738] sm:$0xff]  }
 0xd87   :  { %17924 = vmatmul.mubr.bf16.gmra.mrb[8].mxu0 %v32102_v6  ;;  %v21741_v34 = vpop.f32.mrb[11].mxu1  ;;  %22052 = vmatpush3.bf16.msra.mxu1 %v24413_v5  ;;  %v32105_v39 = vpack.c.bf16 %v32103_v32, %v32104_v16  ;;  %v24390_v6 = vld [vmem:[%s31898_s10 + $0x4f0] sm:$0xff]   ;;  %v32113_v32 = vpack.c.bf16 %v30740_v12, %v30728_v28 }
 0xd88   :  { %21850 = vmatpush3.bf16.msra.mxu0 %v24384_v4  ;;  %v31190_v31 = vadd.f32 %v21741_v34, %v21740_v21  ;;  %18256 = vmatprep.mubr.bf16.mxu1 %v15581_v58  ;;  %v32109_v58 = vpack.c.bf16 %v30714_v8, %v30705_v13  ;;  %v24399_v13 = vld [vmem:[%s31898_s10 + $0x580] sm:$0xff]   ;;  %v24407_v28 = vld [vmem:[%s31898_s10 + $0x590] sm:$0xff]  }
 0xd89   :  { %17931 = vmatprep.mubr.bf16.mxu0 %v32105_v39  ;;  %21851 = vmatprep.subr.bf16.mxu0 %v24386_v24  ;;  %v24391_v24 = vld [vmem:[%s31898_s10 + $0x4b0] sm:$0xff]  }
 0xd8a   :  { %v31198_v5 = vpop.f32.mrb[160].mxu0  ;;  %18257 = vmatmul.mubr.bf16.gmra.mrb[68].mxu1 %v15580_v15  ;;  %22053 = vmatprep.subr.bf16.mxu1 %v24416_v55  ;;  %v24394_v15 = vld [vmem:[%s31898_s10 + $0x4f8] sm:$0xff]  }
 0xd8b   :  { %v31200_v4 = vpop.f32.mrb[161].mxu0  ;;  %22054 = vmatpush3.bf16.msra.mxu1 %v24417_v23  ;;  %v31220_v23 = vld [vmem:[%s31898_s10 + $0x840] sm:$0xff]  }
 0xd8c   :  { %21852 = vmatpush3.bf16.msra.mxu0 %v24388_v53  ;;  %v31208_v21 = vpop.f32.mrb[162].mxu0  ;;  %v21743_v36 = vpop.f32.mrb[12].mxu1  ;;  %22055 = vmatprep.subr.bf16.mxu1 %v24420_v14  ;;  %v32106_v53 = vld [vmem:[#allocation34_spill] sm:$0xff]  ;;  %v32107_v14 = vld [vmem:[#allocation32_spill] sm:$0xff] }
 0xd8d   :  { %21853 = vmatprep.subr.bf16.mxu0 %v24390_v6  ;;  %v31215_v55 = vpop.f32.mrb[163].mxu0  ;;  %v21744_v34 = vpop.f32.mrb[13].mxu1  ;;  %v32108_v6 = vpack.c.bf16 %v32106_v53, %v32107_v14 }
 0xd8e   :  { %v31224_v16 = vadd.f32 %v21744_v34, %v21743_v36  ;;  %v21746_v39 = vpop.f32.mrb[14].mxu1  ;;  %v24398_v36 = vld [vmem:[%s31898_s10 + $0x5c0] sm:$0xff]  }
 0xd8f   :  { %17932 = vmatmul.mubr.bf16.gmra.mrb[12].mxu0 %v32108_v6  ;;  %v21747_v22 = vpop.f32.mrb[15].mxu1  ;;  %22056 = vmatpush3.bf16.msra.mxu1 %v24421_v11  ;;  %v32112_v6 = vpack.c.bf16 %v30710_v25, %v30697_v7 }
 0xd90   :  { %21854 = vmatpush3.bf16.msra.mxu0 %v24391_v24  ;;  %18037 = vmatprep.mubr.bf16.mxu0 %v32109_v58  ;;  %v31235_v52 = vadd.f32 %v21747_v22, %v21746_v39  ;;  %v24402_v24 = vld [vmem:[%s31898_s10 + $0x5c8] sm:$0xff]  }
 0xd91   :  { %21855 = vmatprep.subr.bf16.mxu0 %v24394_v15  ;;  %22873 = vmatprep.subr.bf16.mxu1 %v31220_v23  ;;  %v24403_v15 = vld [vmem:[%s31898_s10 + $0x588] sm:$0xff]  }
 0xd92   :  { %32110 = vst [vmem:[#allocation6_spill] sm:$0xff] %v31235_v52  ;;  %v31241_v34 = vpop.f32.mrb[164].mxu0 }
 0xd93   :  { %v31243_v11 = vpop.f32.mrb[165].mxu0 }
 0xd94   :  { %21856 = vmatpush3.bf16.msra.mxu0 %v24395_v42  ;;  %v31248_v8 = vpop.f32.mrb[166].mxu0  ;;  %v21749_v22 = vpop.f32.mrb[16].mxu1  ;;  %v32116_v42 = vpack.c.bf16 %v30733_v3, %v30726_v35 }
 0xd95   :  { %21921 = vmatprep.subr.bf16.mxu0 %v24398_v36  ;;  %v31255_v58 = vpop.f32.mrb[167].mxu0  ;;  %v21750_v39 = vpop.f32.mrb[17].mxu1 }
 0xd96   :  { %v31259_v53 = vadd.f32 %v21750_v39, %v21749_v22  ;;  %v21752_v14 = vpop.f32.mrb[18].mxu1  ;;  %v24406_v22 = vld [vmem:[%s31898_s10 + $0x5d0] sm:$0xff]  }
 0xd97   :  { %18038 = vmatmul.mubr.bf16.vlgmr.msra.gmra.mrb[16].mxu0 %v32112_v6  ;;  %v21753_v36 = vpop.f32.mrb[19].mxu1 }
 0xd98   :  { %32111 = vst [vmem:[#allocation17_spill] sm:$0xff] %v31259_v53  ;;  %18045 = vmatprep.mubr.bf16.mxu0 %v32113_v32  ;;  %21922 = vmatpush3.bf16.msra.mxu0 %v24399_v13  ;;  %v31270_v52 = vadd.f32 %v21753_v36, %v21752_v14  ;;  %v24410_v32 = vld [vmem:[%s31898_s10 + $0x5d8] sm:$0xff]  }
 0xd99   :  { %21923 = vmatprep.subr.bf16.mxu0 %v24402_v24  ;;  %v24411_v13 = vld [vmem:[%s31898_s10 + $0x598] sm:$0xff]  }
 0xd9a   :  { %32114 = vst [vmem:[#allocation15_spill] sm:$0xff] %v31270_v52  ;;  %v31275_v39 = vpop.f32.mrb[168].mxu0  ;;  %v32117_v52 = vpack.c.bf16 %v30774_v59, %v30762_v47  ;;  %v24415_v47 = vld [vmem:[%s31898_s10 + $0x5a0] sm:$0xff]  }
 0xd9b   :  { %v31277_v7 = vpop.f32.mrb[169].mxu0 }
 0xd9c   :  { %21924 = vmatpush3.bf16.msra.mxu0 %v24403_v15  ;;  %v31282_v25 = vpop.f32.mrb[170].mxu0  ;;  %v21755_v12 = vpop.f32.mrb[20].mxu1 }
 0xd9d   :  { %21925 = vmatprep.subr.bf16.mxu0 %v24406_v22  ;;  %v31289_v24 = vpop.f32.mrb[171].mxu0  ;;  %v21756_v14 = vpop.f32.mrb[21].mxu1 }
 0xd9e   :  { %v31293_v6 = vadd.f32 %v21756_v14, %v21755_v12  ;;  %v21758_v36 = vpop.f32.mrb[22].mxu1  ;;  %v24414_v12 = vld [vmem:[%s31898_s10 + $0x5e0] sm:$0xff]  }
 0xd9f   :  { %18046 = vmatmul.mubr.bf16.gmra.mrb[20].mxu0 %v32116_v42  ;;  %v21759_v22 = vpop.f32.mrb[23].mxu1  ;;  %v24418_v42 = vld [vmem:[%s31898_s10 + $0x5e8] sm:$0xff]  }
 0xda0   :  { %32115 = vst [vmem:[#allocation16_spill] sm:$0xff] %v31293_v6  ;;  %18053 = vmatprep.mubr.bf16.mxu0 %v32117_v52  ;;  %21926 = vmatpush3.bf16.msra.mxu0 %v24407_v28  ;;  %v31304_v53 = vadd.f32 %v21759_v22, %v21758_v36  ;;  %v24419_v36 = vld [vmem:[%s31898_s10 + $0x5a8] sm:$0xff]   ;;  %v24422_v22 = vld [vmem:[%s31898_s10 + $0x5f0] sm:$0xff]  }
 0xda1   :  { %21927 = vmatprep.subr.bf16.mxu0 %v24410_v32  ;;  %v32119_v32 = vpack.c.bf16 %v30767_v2, %v30760_v38  ;;  %v24423_v38 = vld [vmem:[%s31898_s10 + $0x5b0] sm:$0xff]  }
 0xda2   :  { %32118 = vst [vmem:[#allocation14_spill] sm:$0xff] %v31304_v53  ;;  %v31309_v14 = vpop.f32.mrb[172].mxu0 }
 0xda3   :  { %v31311_v35 = vpop.f32.mrb[173].mxu0 }
 0xda4   :  { %21928 = vmatpush3.bf16.msra.mxu0 %v24411_v13  ;;  %v31313_v3 = vpop.f32.mrb[174].mxu0  ;;  %v32120_v13 = vpack.c.bf16 %v30808_v45, %v30796_v43  ;;  %v24426_v45 = vld [vmem:[%s31898_s10 + $0x5f8] sm:$0xff]  }
 0xda5   :  { %21929 = vmatprep.subr.bf16.mxu0 %v24414_v12  ;;  %v31320_v52 = vpop.f32.mrb[175].mxu0 }
 0xda7   :  { %18054 = vmatmul.mubr.bf16.gmra.mrb[24].mxu0 %v32119_v32  ;;  %v31351_v32 = vld [vmem:[%s31898_s10 + $0x800] sm:$0xff]  }
 0xda8   :  { %18061 = vmatprep.mubr.bf16.mxu0 %v32120_v13  ;;  %21930 = vmatpush3.bf16.msra.mxu0 %v24415_v47  ;;  %v24427_v13 = vld [vmem:[%s31898_s10 + $0x5b8] sm:$0xff]  }
 0xda9   :  { %21931 = vmatprep.subr.bf16.mxu0 %v24418_v42  ;;  %v32121_v42 = vpack.c.bf16 %v30801_v10, %v30794_v61  ;;  %v24430_v61 = vld [vmem:[%s31898_s10 + $0x6c0] sm:$0xff]  }
 0xdaa   :  { %v15495_v12 = vpop.f32.mrb[176].mxu0 }
 0xdab   :  { %v15497_v59 = vpop.f32.mrb[177].mxu0 }
 0xdac   :  { %v15499_v28 = vpop.f32.mrb[178].mxu0  ;;  %21932 = vmatpush3.bf16.msra.mxu0 %v24419_v36 }
 0xdad   :  { %v15590_v2 = vpack.c.bf16 %v15499_v28, %v15495_v12  ;;  %v15501_v43 = vpop.f32.mrb[179].mxu0  ;;  %21933 = vmatprep.subr.bf16.mxu0 %v24422_v22  ;;  %v32122_v28 = vpack.c.bf16 %v30959_v48, %v30944_v0  ;;  %v31371_v48 = vld [vmem:[%s31898_s10 + $0x808] sm:$0xff]   ;;  %v24431_v22 = vld [vmem:[%s31898_s10 + $0x680] sm:$0xff]  }
 0xdae   :  { %v15591_v47 = vpack.c.bf16 %v15501_v43, %v15497_v59  ;;  %v31362_v59 = vld [vmem:[%s31898_s10 + $0x848] sm:$0xff]  }
 0xdaf   :  { %18062 = vmatmul.mubr.bf16.gmra.mrb[28].mxu0 %v32121_v42  ;;  %v31392_v42 = vld [vmem:[%s31898_s10 + $0x810] sm:$0xff]  }
 0xdb0   :  { %21934 = vmatpush3.bf16.msra.mxu0 %v24423_v38  ;;  %18167 = vmatprep.mubr.bf16.mxu0 %v32122_v28  ;;  %v32124_v28 = vpack.c.bf16 %v30996_v50, %v30984_v29  ;;  %v31413_v50 = vld [vmem:[%s31898_s10 + $0x818] sm:$0xff]  }
 0xdb1   :  { %18362 = vmatprep.mubr.bf16.mxu1 %v15591_v47  ;;  %21935 = vmatprep.subr.bf16.mxu0 %v24426_v45  ;;  %v24434_v45 = vld [vmem:[%s31898_s10 + $0x6c8] sm:$0xff]   ;;  %v32123_v47 = vpack.c.bf16 %v30952_v56, %v30942_v33  ;;  %v24438_v33 = vld [vmem:[%s31898_s10 + $0x6d0] sm:$0xff]  }
 0xdb2   :  { %18363 = vmatmul.mubr.bf16.vlgmr.msra.gmra.mrb[72].mxu1 %v15590_v2  ;;  %v15505_v10 = vpop.f32.mrb[180].mxu0  ;;  %v31380_v2 = vld [vmem:[%s31898_s10 + $0x850] sm:$0xff]  }
 0xdb3   :  { %22881 = vmatpush3.bf16.msra.mxu1 %v31351_v32  ;;  %v15507_v0 = vpop.f32.mrb[181].mxu0 }
 0xdb4   :  { %v15509_v36 = vpop.f32.mrb[182].mxu0  ;;  %21936 = vmatpush3.bf16.msra.mxu0 %v24427_v13  ;;  %22874 = vmatprep.subr.bf16.mxu1 %v31362_v59  ;;  %v24435_v13 = vld [vmem:[%s31898_s10 + $0x688] sm:$0xff]  }
 0xdb5   :  { %v15592_v12 = vpack.c.bf16 %v15509_v36, %v15505_v10  ;;  %v15511_v38 = vpop.f32.mrb[183].mxu0  ;;  %22001 = vmatprep.subr.bf16.mxu0 %v24430_v61  ;;  %v31403_v61 = vld [vmem:[%s31898_s10 + $0x858] sm:$0xff]  }
 0xdb6   :  { %v15593_v43 = vpack.c.bf16 %v15511_v38, %v15507_v0  ;;  %v24439_v0 = vld [vmem:[%s31898_s10 + $0x690] sm:$0xff]  }
 0xdb7   :  { %22882 = vmatpush3.bf16.msra.mxu1 %v31371_v48  ;;  %18168 = vmatmul.mubr.bf16.vlgmr.msra.gmra.mrb[32].mxu0 %v32123_v47  ;;  %v31434_v47 = vld [vmem:[%s31898_s10 + $0x820] sm:$0xff]  }
 0xdb8   :  { %18175 = vmatprep.mubr.bf16.mxu0 %v32124_v28  ;;  %22002 = vmatpush3.bf16.msra.mxu0 %v24431_v22  ;;  %v32126_v28 = vpack.c.bf16 %v31030_v49, %v31018_v63  ;;  %v31455_v49 = vld [vmem:[%s31898_s10 + $0x828] sm:$0xff]  }
 0xdb9   :  { %18370 = vmatprep.mubr.bf16.mxu1 %v15593_v43  ;;  %22875 = vmatprep.subr.bf16.mxu1 %v31380_v2  ;;  %v24442_v43 = vld [vmem:[%s31898_s10 + $0x6d8] sm:$0xff]  }
 0xdba   :  { %18371 = vmatmul.mubr.bf16.gmra.mrb[76].mxu1 %v15592_v12  ;;  %v15515_v56 = vpop.f32.mrb[184].mxu0  ;;  %22003 = vmatprep.subr.bf16.mxu0 %v24434_v45  ;;  %v31422_v12 = vld [vmem:[%s31898_s10 + $0x860] sm:$0xff]   ;;  %v32125_v45 = vpack.c.bf16 %v30989_v44, %v30982_v54 }
 0xdbb   :  { %22883 = vmatpush3.bf16.msra.mxu1 %v31392_v42  ;;  %v15517_v29 = vpop.f32.mrb[185].mxu0  ;;  %v24446_v54 = vld [vmem:[%s31898_s10 + $0x6e0] sm:$0xff]  }
 0xdbc   :  { %v15519_v10 = vpop.f32.mrb[186].mxu0  ;;  %22004 = vmatpush3.bf16.msra.mxu0 %v24435_v13  ;;  %22876 = vmatprep.subr.bf16.mxu1 %v31403_v61  ;;  %v24443_v13 = vld [vmem:[%s31898_s10 + $0x698] sm:$0xff]  }
 0xdbd   :  { %v15594_v36 = vpack.c.bf16 %v15519_v10, %v15515_v56  ;;  %v15521_v22 = vpop.f32.mrb[187].mxu0  ;;  %22005 = vmatprep.subr.bf16.mxu0 %v24438_v33  ;;  %v31445_v33 = vld [vmem:[%s31898_s10 + $0x868] sm:$0xff]  }
 0xdbe   :  { %v15595_v38 = vpack.c.bf16 %v15521_v22, %v15517_v29  ;;  %v24447_v29 = vld [vmem:[%s31898_s10 + $0x6a0] sm:$0xff]   ;;  %v31464_v22 = vld [vmem:[%s31898_s10 + $0x870] sm:$0xff]  }
 0xdbf   :  { %22884 = vmatpush3.bf16.msra.mxu1 %v31413_v50  ;;  %18176 = vmatmul.mubr.bf16.gmra.mrb[36].mxu0 %v32125_v45  ;;  %v24450_v45 = vld [vmem:[%s31898_s10 + $0x6e8] sm:$0xff]  }
 0xdc0   :  { %18183 = vmatprep.mubr.bf16.mxu0 %v32126_v28  ;;  %22006 = vmatpush3.bf16.msra.mxu0 %v24439_v0 }
 0xdc1   :  { %18378 = vmatprep.mubr.bf16.mxu1 %v15595_v38  ;;  %22877 = vmatprep.subr.bf16.mxu1 %v31422_v12 }
 0xdc2   :  { %18379 = vmatmul.mubr.bf16.gmra.mrb[80].mxu1 %v15594_v36  ;;  %v15525_v44 = vpop.f32.mrb[188].mxu0  ;;  %22007 = vmatprep.subr.bf16.mxu0 %v24442_v43 }
 0xdc3   :  { %22885 = vmatpush3.bf16.msra.mxu1 %v31434_v47  ;;  %v15527_v63 = vpop.f32.mrb[189].mxu0 }
 0xdc4   :  { %v15529_v56 = vpop.f32.mrb[190].mxu0  ;;  %22008 = vmatpush3.bf16.msra.mxu0 %v24443_v13  ;;  %22878 = vmatprep.subr.bf16.mxu1 %v31445_v33  ;;  %v21817_v10 = vpop.f32.mrb[24].mxu1 }
 0xdc5   :  { %v15596_v0 = vpack.c.bf16 %v15529_v56, %v15525_v44  ;;  %v15531_v36 = vpop.f32.mrb[191].mxu0  ;;  %22009 = vmatprep.subr.bf16.mxu0 %v24446_v54  ;;  %v21818_v38 = vpop.f32.mrb[25].mxu1  ;;  %v32128_v44 = vpack.c.bf16 %v31023_v62, %v31016_v41  ;;  %v31478_v54 = vld [vmem:[%s31898_s10 + $0x830] sm:$0xff]   ;;  %v31489_v41 = vld [vmem:[%s31898_s10 + $0x878] sm:$0xff]  }
 0xdc6   :  { %v15597_v43 = vpack.c.bf16 %v15531_v36, %v15527_v63  ;;  %v31469_v28 = vadd.f32 %v21818_v38, %v21817_v10  ;;  %v21820_v13 = vpop.f32.mrb[26].mxu1  ;;  %v32129_v63 = vpack.c.bf16 %v31064_v37, %v31052_v19  ;;  %v24451_v10 = vld [vmem:[%s31898_s10 + $0x6a8] sm:$0xff]   ;;  %v24454_v19 = vld [vmem:[%s31898_s10 + $0x6f0] sm:$0xff]   ;;  %v31504_v36 = vld [vmem:[%s31898_s10 + $0x838] sm:$0xff]  }
 0xdc7   :  { %22886 = vmatpush3.bf16.msra.mxu1 %v31455_v49  ;;  %18184 = vmatmul.mubr.bf16.gmra.mrb[40].mxu0 %v32128_v44  ;;  %v21821_v56 = vpop.f32.mrb[27].mxu1  ;;  %v32134_v44 = vpack.c.bf16 %v31215_v55, %v31200_v4  ;;  %v24459_v4 = vld [vmem:[%s31898_s10 + $0x780] sm:$0xff]  }
 0xdc8   :  { %32127 = vst [vmem:[#allocation23_spill] sm:$0xff] %v31469_v28  ;;  %18191 = vmatprep.mubr.bf16.mxu0 %v32129_v63  ;;  %22010 = vmatpush3.bf16.msra.mxu0 %v24447_v29  ;;  %v31491_v62 = vadd.f32 %v21821_v56, %v21820_v13  ;;  %v32131_v29 = vld [vmem:[#allocation10_spill] sm:$0xff] }
 0xdc9   :  { %18386 = vmatprep.mubr.bf16.mxu1 %v15597_v43  ;;  %22879 = vmatprep.subr.bf16.mxu1 %v31464_v22  ;;  %v24456_v13 = vld [vmem:[%s31898_s10 + $0x6f8] sm:$0xff]  }
 0xdca   :  { %32130 = vst [vmem:[#allocation21_spill] sm:$0xff] %v31491_v62  ;;  %18387 = vmatmul.mubr.bf16.gmra.mrb[84].mxu1 %v15596_v0  ;;  %22011 = vmatprep.subr.bf16.mxu0 %v24450_v45  ;;  %v31497_v37 = vpop.f32.mrb[192].mxu0  ;;  %v24455_v0 = vld [vmem:[%s31898_s10 + $0x6b0] sm:$0xff]   ;;  %v24457_v28 = vld [vmem:[%s31898_s10 + $0x6b8] sm:$0xff]  }
 0xdcb   :  { %22887 = vmatpush3.bf16.msra.mxu1 %v31478_v54  ;;  %18500 = vmatprep.mubr.bf16.mxu1 %v32131_v29  ;;  %v31506_v38 = vpop.f32.mrb[193].mxu0 }
 0xdcc   :  { %22012 = vmatpush3.bf16.msra.mxu0 %v24451_v10  ;;  %22880 = vmatprep.subr.bf16.mxu1 %v31489_v41  ;;  %v31512_v43 = vpop.f32.mrb[194].mxu0  ;;  %v21823_v45 = vpop.f32.mrb[28].mxu1 }
 0xdcd   :  { %22013 = vmatprep.subr.bf16.mxu0 %v24454_v19  ;;  %v31519_v56 = vpop.f32.mrb[195].mxu0  ;;  %v21824_v63 = vpop.f32.mrb[29].mxu1  ;;  %v32133_v19 = vpack.c.bf16 %v31057_v20, %v31050_v60  ;;  %v32137_v20 = vld [vmem:[#allocation3_spill] sm:$0xff] }
 0xdce   :  { %v31523_v29 = vadd.f32 %v21824_v63, %v21823_v45  ;;  %v21826_v15 = vpop.f32.mrb[30].mxu1  ;;  %v24458_v45 = vld [vmem:[%s31898_s10 + $0x7c0] sm:$0xff]   ;;  %v32136_v63 = vld [vmem:[#allocation9_spill] sm:$0xff] }
 0xdcf   :  { %22888 = vmatpush3.bf16.msra.mxu1 %v31504_v36  ;;  %18192 = vmatmul.mubr.bf16.gmra.mrb[44].mxu0 %v32133_v19  ;;  %v21827_v62 = vpop.f32.mrb[31].mxu1 }
 0xdd0   :  { %32132 = vst [vmem:[#allocation22_spill] sm:$0xff] %v31523_v29  ;;  %22014 = vmatpush3.bf16.msra.mxu0 %v24455_v0  ;;  %18297 = vmatprep.mubr.bf16.mxu0 %v32134_v44  ;;  %v31535_v10 = vadd.f32 %v21827_v62, %v21826_v15  ;;  %v24460_v62 = vld [vmem:[%s31898_s10 + $0x7c8] sm:$0xff]   ;;  %v32140_v29 = vpack.c.bf16 %v31255_v58, %v31243_v11  ;;  %v24463_v58 = vld [vmem:[%s31898_s10 + $0x790] sm:$0xff]  }
 0xdd1   :  { %22015 = vmatprep.subr.bf16.mxu0 %v24456_v13  ;;  %v24461_v13 = vld [vmem:[%s31898_s10 + $0x788] sm:$0xff]  }
 0xdd2   :  { %32135 = vst [vmem:[#allocation20_spill] sm:$0xff] %v31535_v10  ;;  %18501 = vmatmul.mubr.bf16.vlgmr.msra.gmra.mrb[88].mxu1 %v32136_v63  ;;  %v31541_v60 = vpop.f32.mrb[196].mxu0  ;;  %v32139_v10 = vpack.c.bf16 %v31208_v21, %v31198_v5  ;;  %v32143_v21 = vld [vmem:[#allocation5_spill] sm:$0xff] }
 0xdd3   :  { %18508 = vmatprep.mubr.bf16.mxu1 %v32137_v20  ;;  %v31544_v0 = vpop.f32.mrb[197].mxu0 }
 0xdd4   :  { %22016 = vmatpush3.bf16.msra.mxu0 %v24457_v28  ;;  %v31549_v55 = vpop.f32.mrb[198].mxu0  ;;  %v21829_v15 = vpop.f32.mrb[32].mxu1  ;;  %v32145_v28 = vpack.c.bf16 %v31248_v8, %v31241_v34 }
 0xdd5   :  { %22081 = vmatprep.subr.bf16.mxu0 %v24458_v45  ;;  %v31556_v44 = vpop.f32.mrb[199].mxu0  ;;  %v21830_v19 = vpop.f32.mrb[33].mxu1 }
 0xdd6   :  { %v31560_v63 = vadd.f32 %v21830_v19, %v21829_v15  ;;  %v21832_v20 = vpop.f32.mrb[34].mxu1  ;;  %v24462_v15 = vld [vmem:[%s31898_s10 + $0x7d0] sm:$0xff]   ;;  %v32142_v19 = vld [vmem:[#allocation8_spill] sm:$0xff] }
 0xdd7   :  { %18298 = vmatmul.mubr.bf16.vlgmr.msra.gmra.mrb[48].mxu0 %v32139_v10  ;;  %v21833_v45 = vpop.f32.mrb[35].mxu1 }
 0xdd8   :  { %32138 = vst [vmem:[#allocation29_spill] sm:$0xff] %v31560_v63  ;;  %18305 = vmatprep.mubr.bf16.mxu0 %v32140_v29  ;;  %22082 = vmatpush3.bf16.msra.mxu0 %v24459_v4  ;;  %v31571_v53 = vadd.f32 %v21833_v45, %v21832_v20  ;;  %v24464_v4 = vld [vmem:[%s31898_s10 + $0x7d8] sm:$0xff]  }
 0xdd9   :  { %22083 = vmatprep.subr.bf16.mxu0 %v24460_v62  ;;  %v24465_v62 = vld [vmem:[%s31898_s10 + $0x798] sm:$0xff]  }
 0xdda   :  { %32141 = vst [vmem:[#allocation27_spill] sm:$0xff] %v31571_v53  ;;  %18509 = vmatmul.mubr.bf16.gmra.mrb[92].mxu1 %v32142_v19  ;;  %v31577_v5 = vpop.f32.mrb[200].mxu0  ;;  %v32146_v53 = vpack.c.bf16 %v31289_v24, %v31277_v7  ;;  %v24467_v7 = vld [vmem:[%s31898_s10 + $0x7a0] sm:$0xff]  }
 0xddb   :  { %18516 = vmatprep.mubr.bf16.mxu1 %v32143_v21  ;;  %v31580_v11 = vpop.f32.mrb[201].mxu0 }
 0xddc   :  { %22084 = vmatpush3.bf16.msra.mxu0 %v24461_v13  ;;  %v31585_v10 = vpop.f32.mrb[202].mxu0  ;;  %v21835_v29 = vpop.f32.mrb[36].mxu1 }
 0xddd   :  { %22085 = vmatprep.subr.bf16.mxu0 %v24462_v15  ;;  %v31592_v20 = vpop.f32.mrb[203].mxu0  ;;  %v21836_v45 = vpop.f32.mrb[37].mxu1 }
 0xdde   :  { %v31596_v19 = vadd.f32 %v21836_v45, %v21835_v29  ;;  %v21838_v21 = vpop.f32.mrb[38].mxu1  ;;  %v24466_v29 = vld [vmem:[%s31898_s10 + $0x7e0] sm:$0xff]   ;;  %v32148_v45 = vld [vmem:[#allocation4_spill] sm:$0xff] }
 0xddf   :  { %18306 = vmatmul.mubr.bf16.gmra.mrb[52].mxu0 %v32145_v28  ;;  %v21839_v15 = vpop.f32.mrb[39].mxu1 }
 0xde0   :  { %32144 = vst [vmem:[#allocation28_spill] sm:$0xff] %v31596_v19  ;;  %18313 = vmatprep.mubr.bf16.mxu0 %v32146_v53  ;;  %22086 = vmatpush3.bf16.msra.mxu0 %v24463_v58  ;;  %v31607_v63 = vadd.f32 %v21839_v15, %v21838_v21  ;;  %v24468_v58 = vld [vmem:[%s31898_s10 + $0x7e8] sm:$0xff]   ;;  %v32150_v21 = vpack.c.bf16 %v31320_v52, %v31311_v35 }
 0xde1   :  { %22087 = vmatprep.subr.bf16.mxu0 %v24464_v4  ;;  %v24469_v15 = vld [vmem:[%s31898_s10 + $0x7a8] sm:$0xff]   ;;  %v32152_v4 = vld [vmem:[#allocation13_spill] sm:$0xff] }
 0xde2   :  { %32147 = vst [vmem:[#allocation26_spill] sm:$0xff] %v31607_v63  ;;  %18517 = vmatmul.mubr.bf16.gmra.mrb[96].mxu1 %v32148_v45  ;;  %v31613_v34 = vpop.f32.mrb[204].mxu0  ;;  %v32151_v35 = vld [vmem:[#allocation12_spill] sm:$0xff] }
 0xde3   :  { %v31615_v8 = vpop.f32.mrb[205].mxu0 }
 0xde4   :  { %22088 = vmatpush3.bf16.msra.mxu0 %v24465_v62  ;;  %v31617_v53 = vpop.f32.mrb[206].mxu0  ;;  %v32149_v62 = vpack.c.bf16 %v31282_v25, %v31275_v39  ;;  %v24470_v39 = vld [vmem:[%s31898_s10 + $0x7f0] sm:$0xff]  }
 0xde5   :  { %22089 = vmatprep.subr.bf16.mxu0 %v24466_v29  ;;  %v31624_v28 = vpop.f32.mrb[207].mxu0  ;;  %v31643_v29 = vld [vmem:[%s31899_s11] ss:$0 sm:$0xff] }
 0xde6   :  { %v17455_v52 = vadd.f32 %v32151_v35, %v31643_v29  ;;  %v17458_v13 = vadd.f32 %v32152_v4, %v31643_v29  ;;  %v32155_v35 = vld [vmem:[#allocation36_spill] sm:$0xff] }
 0xde7   :  { %18314 = vmatmul.mubr.bf16.gmra.mrb[56].mxu0 %v32149_v62 }
 0xde8   :  { %18321 = vmatprep.mubr.bf16.mxu0 %v32150_v21  ;;  %22090 = vmatpush3.bf16.msra.mxu0 %v24467_v7  ;;  %v24471_v21 = vld [vmem:[%s31898_s10 + $0x7b0] sm:$0xff]  }
 0xde9   :  { %22091 = vmatprep.subr.bf16.mxu0 %v24468_v58  ;;  %v24472_v58 = vld [vmem:[%s31898_s10 + $0x7f8] sm:$0xff]  }
 0xdea   :  { %v21537_v25 = vpop.f32.mrb[208].mxu0 }
 0xdeb   :  { %v21538_v45 = vpop.f32.mrb[209].mxu0 }
 0xdec   :  { %v21539_v7 = vadd.f32 %v21538_v45, %v21537_v25  ;;  %v21540_v62 = vpop.f32.mrb[210].mxu0  ;;  %22092 = vmatpush3.bf16.msra.mxu0 %v24469_v15  ;;  %v32153_v25 = vpack.c.bf16 %v31313_v3, %v31309_v14  ;;  %v32154_v45 = vpack.c.bf16 %v31519_v56, %v31506_v38  ;;  %v32157_v3 = vld [vmem:[#allocation18_spill] sm:$0xff]  ;;  %v32158_v56 = vld [vmem:[#allocation19_spill] sm:$0xff] }
 0xded   :  { %v21541_v24 = vpop.f32.mrb[211].mxu0  ;;  %22093 = vmatprep.subr.bf16.mxu0 %v24470_v39  ;;  %v24473_v39 = vld [vmem:[%s31898_s10 + $0x7b8] sm:$0xff]  }
 0xdee   :  { %v17520_v63 = vadd.f32 %v21539_v7, %v17455_v52  ;;  %v21542_v19 = vadd.f32 %v21541_v24, %v21540_v62  ;;  %v32156_v24 = vld [vmem:[#allocation37_spill] sm:$0xff]  ;;  %v17466_v62 = vadd.f32 %v32158_v56, %v31643_v29 }
 0xdef   :  { %18322 = vmatmul.mubr.bf16.gmra.mrb[60].mxu0 %v32153_v25 }
 0xdf0   :  { %v17523_v15 = vadd.f32 %v21542_v19, %v17458_v13  ;;  %22094 = vmatpush3.bf16.msra.mxu0 %v24471_v21  ;;  %18427 = vmatprep.mubr.bf16.mxu0 %v32154_v45  ;;  %v31668_v6 = vadd.f32 %v32155_v35, %v17520_v63  ;;  %v17463_v13 = vadd.f32 %v32157_v3, %v31643_v29  ;;  %v32161_v45 = vld [vmem:[#allocation38_spill] sm:$0xff]  ;;  %v32162_v35 = vld [vmem:[#allocation39_spill] sm:$0xff] }
 0xdf1   :  { %22095 = vmatprep.subr.bf16.mxu0 %v24472_v58  ;;  %v32159_v58 = vpack.c.bf16 %v31512_v43, %v31497_v37  ;;  %v32163_v37 = vld [vmem:[#allocation24_spill] sm:$0xff] }
 0xdf2   :  { %v21543_v4 = vpop.f32.mrb[212].mxu0  ;;  %v31671_v52 = vadd.f32 %v32156_v24, %v17523_v15  ;;  %v32160_v15 = vpack.c.bf16 %v31556_v44, %v31544_v0  ;;  %v17471_v43 = vadd.f32 %v32163_v37, %v31643_v29  ;;  %v32164_v0 = vld [vmem:[#allocation25_spill] sm:$0xff] }
 0xdf3   :  { %v21544_v14 = vpop.f32.mrb[213].mxu0  ;;  %v17474_v44 = vadd.f32 %v32164_v0, %v31643_v29 }
 0xdf4   :  { %v21545_v19 = vadd.f32 %v21544_v14, %v21543_v4  ;;  %v21546_v7 = vpop.f32.mrb[214].mxu0  ;;  %22096 = vmatpush3.bf16.msra.mxu0 %v24473_v39 }
 0xdf5   :  { %v21547_v38 = vpop.f32.mrb[215].mxu0  ;;  %22121 = vmatprep.subr.bf16.mxu0 %v31220_v23 }
 0xdf6   :  { %v17528_v63 = vadd.f32 %v21545_v19, %v17463_v13  ;;  %v21548_v21 = vadd.f32 %v21547_v38, %v21546_v7  ;;  %v32165_v19 = vpack.c.bf16 %v31549_v55, %v31541_v60  ;;  %v32166_v38 = vpack.c.bf16 %v31592_v20, %v31580_v11  ;;  %v32169_v60 = vld [vmem:[#allocation30_spill] sm:$0xff]  ;;  %v32170_v20 = vld [vmem:[#allocation31_spill] sm:$0xff] }
 0xdf7   :  { %18428 = vmatmul.mubr.bf16.vlgmr.msra.gmra.mrb[64].mxu0 %v32159_v58  ;;  %v17479_v55 = vadd.f32 %v32169_v60, %v31643_v29 }
 0xdf8   :  { %v17531_v25 = vadd.f32 %v21548_v21, %v17466_v62  ;;  %22122 = vmatpush3.bf16.msra.mxu0 %v31351_v32  ;;  %18435 = vmatprep.mubr.bf16.mxu0 %v32160_v15  ;;  %v31686_v39 = vadd.f32 %v32161_v45, %v17528_v63  ;;  %v32168_v62 = vld [vmem:[#allocation41_spill] sm:$0xff]  ;;  %v17482_v15 = vadd.f32 %v32170_v20, %v31643_v29 }
 0xdf9   :  { %22123 = vmatprep.subr.bf16.mxu0 %v31362_v59 }
 0xdfa   :  { %v21549_v23 = vpop.f32.mrb[216].mxu0  ;;  %v31690_v4 = vadd.f32 %v32162_v35, %v17531_v25  ;;  %v32171_v35 = vpack.c.bf16 %v31585_v10, %v31577_v5 }
 0xdfb   :  { %v21550_v24 = vpop.f32.mrb[217].mxu0 }
 0xdfc   :  { %v21551_v14 = vadd.f32 %v21550_v24, %v21549_v23  ;;  %v21552_v3 = vpop.f32.mrb[218].mxu0  ;;  %22124 = vmatpush3.bf16.msra.mxu0 %v31371_v48  ;;  %v32167_v48 = vld [vmem:[#allocation40_spill] sm:$0xff] }
 0xdfd   :  { %v21553_v32 = vpop.f32.mrb[219].mxu0  ;;  %22125 = vmatprep.subr.bf16.mxu0 %v31380_v2 }
 0xdfe   :  { %v17536_v13 = vadd.f32 %v21551_v14, %v17471_v43  ;;  %v21554_v59 = vadd.f32 %v21553_v32, %v21552_v3 }
 0xdff   :  { %18436 = vmatmul.mubr.bf16.gmra.mrb[68].mxu0 %v32165_v19 }
 0xe00   :  { %v17539_v7 = vadd.f32 %v21554_v59, %v17474_v44  ;;  %22126 = vmatpush3.bf16.msra.mxu0 %v31392_v42  ;;  %18443 = vmatprep.mubr.bf16.mxu0 %v32166_v38  ;;  %v31706_v56 = vadd.f32 %v32167_v48, %v17536_v13 }
 0xe01   :  { %22127 = vmatprep.subr.bf16.mxu0 %v31403_v61 }
 0xe02   :  { %v21555_v2 = vpop.f32.mrb[220].mxu0  ;;  %v31710_v63 = vadd.f32 %v32168_v62, %v17539_v7 }
 0xe03   :  { %v21556_v21 = vpop.f32.mrb[221].mxu0 }
 0xe04   :  { %v21557_v58 = vadd.f32 %v21556_v21, %v21555_v2  ;;  %v21558_v25 = vpop.f32.mrb[222].mxu0  ;;  %22128 = vmatpush3.bf16.msra.mxu0 %v31413_v50  ;;  %v32172_v50 = vpack.c.bf16 %v31624_v28, %v31615_v8 }
 0xe05   :  { %v21559_v42 = vpop.f32.mrb[223].mxu0  ;;  %22129 = vmatprep.subr.bf16.mxu0 %v31422_v12  ;;  %v21897_v11 = vpop.f32.mrb[40].mxu1 }
 0xe06   :  { %v17544_v61 = vadd.f32 %v21557_v58, %v17479_v55  ;;  %v21560_v45 = vadd.f32 %v21559_v42, %v21558_v25  ;;  %v21898_v23 = vpop.f32.mrb[41].mxu1 }
 0xe07   :  { %18444 = vmatmul.mubr.bf16.gmra.mrb[72].mxu0 %v32171_v35  ;;  %v31721_v24 = vadd.f32 %v21898_v23, %v21897_v11  ;;  %v21900_v37 = vpop.f32.mrb[42].mxu1 }
 0xe08   :  { %v17547_v43 = vadd.f32 %v21560_v45, %v17482_v15  ;;  %22130 = vmatpush3.bf16.msra.mxu0 %v31434_v47  ;;  %18451 = vmatprep.mubr.bf16.mxu0 %v32172_v50  ;;  %v31728_v12 = vadd.f32 %v30776_v46, %v17544_v61  ;;  %v21901_v29 = vpop.f32.mrb[43].mxu1 }
 0xe09   :  { %22131 = vmatprep.subr.bf16.mxu0 %v31445_v33  ;;  %v31731_v14 = vadd.f32 %v21901_v29, %v21900_v37  ;;  %v32173_v33 = vpack.c.bf16 %v31617_v53, %v31613_v34 }
 0xe0a   :  { %v21617_v5 = vpop.f32.mrb[224].mxu0  ;;  %v31734_v10 = vadd.f32 %v30789_v40, %v17547_v43 }
 0xe0b   :  { %v21618_v3 = vpop.f32.mrb[225].mxu0 }
 0xe0c   :  { %v21619_v32 = vadd.f32 %v21618_v3, %v21617_v5  ;;  %v21620_v0 = vpop.f32.mrb[226].mxu0  ;;  %22132 = vmatpush3.bf16.msra.mxu0 %v31455_v49  ;;  %v32174_v49 = vld [vmem:[#allocation11_spill] sm:$0xff] }
 0xe0d   :  { %v21621_v47 = vpop.f32.mrb[227].mxu0  ;;  %22133 = vmatprep.subr.bf16.mxu0 %v31464_v22  ;;  %v21903_v8 = vpop.f32.mrb[44].mxu1 }
 0xe0e   :  { %v17650_v46 = vadd.f32 %v21619_v32, %v31668_v6  ;;  %v21622_v28 = vadd.f32 %v21621_v47, %v21620_v0  ;;  %v21904_v44 = vpop.f32.mrb[45].mxu1 }
 0xe0f   :  { %18452 = vmatmul.mubr.bf16.gmra.mrb[76].mxu0 %v32173_v33  ;;  %v31742_v13 = vadd.f32 %v21904_v44, %v21903_v8  ;;  %v21906_v40 = vpop.f32.mrb[46].mxu1 }
 0xe10   :  { %v17653_v59 = vadd.f32 %v21622_v28, %v31671_v52  ;;  %22134 = vmatpush3.bf16.msra.mxu0 %v31478_v54  ;;  %18492 = vmatprep.mubr.bf16.mxu0 %v32174_v49  ;;  %v17715_v22 = vadd.f32 %v30917_v57, %v17650_v46  ;;  %v21907_v19 = vpop.f32.mrb[47].mxu1  ;;  %v32175_v57 = vld [vmem:[#allocation7_spill] sm:$0xff] }
 0xe11   :  { %22135 = vmatprep.subr.bf16.mxu0 %v31489_v41  ;;  %v31749_v6 = vadd.f32 %v21907_v19, %v21906_v40 }
 0xe12   :  { %v21623_v7 = vpop.f32.mrb[228].mxu0  ;;  %v17718_v34 = vadd.f32 %v30934_v51, %v17653_v59 }
 0xe13   :  { %v21624_v53 = vpop.f32.mrb[229].mxu0 }
 0xe14   :  { %v21625_v38 = vadd.f32 %v21624_v53, %v21623_v7  ;;  %v21626_v48 = vpop.f32.mrb[230].mxu0  ;;  %22136 = vmatpush3.bf16.msra.mxu0 %v31504_v36 }
 0xe15   :  { %v21627_v52 = vpop.f32.mrb[231].mxu0  ;;  %v21909_v2 = vpop.f32.mrb[48].mxu1 }
 0xe16   :  { %v17658_v54 = vadd.f32 %v21625_v38, %v31686_v39  ;;  %v21628_v62 = vadd.f32 %v21627_v52, %v21626_v48  ;;  %v21910_v21 = vpop.f32.mrb[49].mxu1 }
 0xe17   :  { %18493 = vmatmul.mubr.bf16.vlgmr.msra.gmra.mrb[80].mxu0 %v32175_v57  ;;  %v31755_v60 = vadd.f32 %v21910_v21, %v21909_v2  ;;  %v21912_v41 = vpop.f32.mrb[50].mxu1  ;;  %v32176_v21 = vld [vmem:[#allocation6_spill] sm:$0xff] }
 0xe18   :  { %v17661_v55 = vadd.f32 %v21628_v62, %v31690_v4  ;;  %v17723_v51 = vadd.f32 %v30964_v30, %v17658_v54  ;;  %v21913_v58 = vpop.f32.mrb[51].mxu1 }
 0xe19   :  { %v31759_v25 = vadd.f32 %v21913_v58, %v21912_v41 }
 0xe1a   :  { %v21629_v42 = vpop.f32.mrb[232].mxu0  ;;  %v17726_v36 = vadd.f32 %v30977_v17, %v17661_v55 }
 0xe1b   :  { %v21630_v11 = vpop.f32.mrb[233].mxu0 }
 0xe1c   :  { %v21631_v20 = vadd.f32 %v21630_v11, %v21629_v42  ;;  %v21632_v39 = vpop.f32.mrb[234].mxu0 }
 0xe1d   :  { %v21633_v15 = vpop.f32.mrb[235].mxu0  ;;  %v21915_v61 = vpop.f32.mrb[52].mxu1 }
 0xe1e   :  { %v17666_v45 = vadd.f32 %v21631_v20, %v31706_v56  ;;  %v21634_v23 = vadd.f32 %v21633_v15, %v21632_v39  ;;  %v21916_v35 = vpop.f32.mrb[53].mxu1  ;;  %v32178_v39 = vld [vmem:[#allocation15_spill] sm:$0xff] }
 0xe1f   :  { %v31763_v37 = vadd.f32 %v21916_v35, %v21915_v61  ;;  %v21918_v4 = vpop.f32.mrb[54].mxu1 }
 0xe20   :  { %v17669_v30 = vadd.f32 %v21634_v23, %v31710_v63  ;;  %v17731_v43 = vadd.f32 %v30998_v9, %v17666_v45  ;;  %v21919_v50 = vpop.f32.mrb[55].mxu1 }
 0xe21   :  { %v31767_v29 = vadd.f32 %v21919_v50, %v21918_v4 }
 0xe22   :  { %v21635_v17 = vpop.f32.mrb[236].mxu0  ;;  %v17734_v5 = vadd.f32 %v31011_v26, %v17669_v30 }
 0xe23   :  { %v21636_v3 = vpop.f32.mrb[237].mxu0 }
 0xe24   :  { %v21637_v32 = vadd.f32 %v21636_v3, %v21635_v17  ;;  %v21638_v0 = vpop.f32.mrb[238].mxu0 }
 0xe25   :  { %v21639_v47 = vpop.f32.mrb[239].mxu0 }
 0xe26   :  { %v17674_v56 = vadd.f32 %v21637_v32, %v31728_v12  ;;  %v21640_v8 = vadd.f32 %v21639_v47, %v21638_v0  ;;  %v32180_v47 = vld [vmem:[#allocation14_spill] sm:$0xff] }
 0xe28   :  { %v17677_v46 = vadd.f32 %v21640_v8, %v31734_v10  ;;  %v17739_v28 = vadd.f32 %v31032_v27, %v17674_v56 }
 0xe2a   :  { %v21697_v63 = vpop.f32.mrb[240].mxu0  ;;  %v17742_v9 = vadd.f32 %v31045_v18, %v17677_v46 }
 0xe2b   :  { %v21698_v44 = vpop.f32.mrb[241].mxu0 }
 0xe2c   :  { %v21699_v33 = vadd.f32 %v21698_v44, %v21697_v63  ;;  %v21700_v40 = vpop.f32.mrb[242].mxu0 }
 0xe2d   :  { %v21701_v59 = vpop.f32.mrb[243].mxu0 }
 0xe2e   :  { %v17780_v49 = vadd.f32 %v21699_v33, %v17715_v22  ;;  %v21702_v26 = vadd.f32 %v21701_v59, %v21700_v40 }
 0xe30   :  { %v17783_v19 = vadd.f32 %v21702_v26, %v17718_v34  ;;  %v17845_v7 = vadd.f32 %v31173_v1, %v17780_v49 }
 0xe32   :  { %v21703_v53 = vpop.f32.mrb[244].mxu0  ;;  %v17848_v12 = vadd.f32 %v31190_v31, %v17783_v19  ;;  %v32177_v31 = vld [vmem:[#allocation17_spill] sm:$0xff]  ;;  %v32181_v19 = vld [vmem:[#allocation23_spill] sm:$0xff] }
 0xe33   :  { %v21704_v38 = vpop.f32.mrb[245].mxu0 }
 0xe34   :  { %v21705_v48 = vadd.f32 %v21704_v38, %v21703_v53  ;;  %v21706_v10 = vpop.f32.mrb[246].mxu0 }
 0xe35   :  { %v21707_v52 = vpop.f32.mrb[247].mxu0 }
 0xe36   :  { %v17788_v27 = vadd.f32 %v21705_v48, %v17723_v51  ;;  %v21708_v2 = vadd.f32 %v21707_v52, %v21706_v10  ;;  %v32182_v52 = vld [vmem:[#allocation21_spill] sm:$0xff] }
 0xe38   :  { %v17791_v54 = vadd.f32 %v21708_v2, %v17726_v36  ;;  %v17853_v18 = vadd.f32 %v31224_v16, %v17788_v27 }
 0xe3a   :  { %v21709_v62 = vpop.f32.mrb[248].mxu0  ;;  %v17856_v57 = vadd.f32 %v32176_v21, %v17791_v54 }
 0xe3b   :  { %v21710_v22 = vpop.f32.mrb[249].mxu0 }
 0xe3c   :  { %v21711_v41 = vadd.f32 %v21710_v22, %v21709_v62  ;;  %v21712_v34 = vpop.f32.mrb[250].mxu0 }
 0xe3d   :  { %v21713_v55 = vpop.f32.mrb[251].mxu0 }
 0xe3e   :  { %v17796_v1 = vadd.f32 %v21711_v41, %v17731_v43  ;;  %v21714_v58 = vadd.f32 %v21713_v55, %v21712_v34  ;;  %v32179_v43 = vld [vmem:[#allocation16_spill] sm:$0xff] }
 0xe40   :  { %v17799_v42 = vadd.f32 %v21714_v58, %v17734_v5  ;;  %v17861_v11 = vadd.f32 %v32177_v31, %v17796_v1  ;;  %v32183_v58 = vld [vmem:[#allocation22_spill] sm:$0xff] }
 0xe42   :  { %v21715_v20 = vpop.f32.mrb[252].mxu0  ;;  %v17864_v15 = vadd.f32 %v32178_v39, %v17799_v42 }
 0xe43   :  { %v21716_v51 = vpop.f32.mrb[253].mxu0 }
 0xe44   :  { %v21717_v61 = vadd.f32 %v21716_v51, %v21715_v20  ;;  %v21718_v36 = vpop.f32.mrb[254].mxu0  ;;  %v32184_v51 = vld [vmem:[#allocation20_spill] sm:$0xff] }
 0xe45   :  { %v21719_v45 = vpop.f32.mrb[255].mxu0  ;;  %v21977_v16 = vpop.f32.mrb[56].mxu1 }
 0xe46   :  { %v17804_v23 = vadd.f32 %v21717_v61, %v17739_v28  ;;  %v21720_v35 = vadd.f32 %v21719_v45, %v21718_v36  ;;  %v21978_v4 = vpop.f32.mrb[57].mxu1 }
 0xe47   :  { %v31780_v30 = vadd.f32 %v21978_v4, %v21977_v16  ;;  %v21980_v50 = vpop.f32.mrb[58].mxu1 }
 0xe48   :  { %v17807_v17 = vadd.f32 %v21720_v35, %v17742_v9  ;;  %v17869_v3 = vadd.f32 %v32179_v43, %v17804_v23  ;;  %v21981_v5 = vpop.f32.mrb[59].mxu1 }
 0xe49   :  { %v31783_v32 = vadd.f32 %v21981_v5, %v21980_v50  ;;  %v32185_v5 = vld [vmem:[#allocation29_spill] sm:$0xff] }
 0xe4a   :  { %v21777_v0 = vpop.f32.mrb[0].mxu0  ;;  %v17872_v56 = vadd.f32 %v32180_v47, %v17807_v17 }
 0xe4b   :  { %v21778_v8 = vpop.f32.mrb[1].mxu0 }
 0xe4c   :  { %v21779_v46 = vadd.f32 %v21778_v8, %v21777_v0  ;;  %v21780_v63 = vpop.f32.mrb[2].mxu0 }
 0xe4d   :  { %v21781_v44 = vpop.f32.mrb[3].mxu0  ;;  %v21983_v33 = vpop.f32.mrb[60].mxu1 }
 0xe4e   :  { %v17910_v28 = vadd.f32 %v21779_v46, %v17845_v7  ;;  %v21782_v40 = vadd.f32 %v21781_v44, %v21780_v63  ;;  %v21984_v59 = vpop.f32.mrb[61].mxu1  ;;  %v32186_v63 = vld [vmem:[#allocation27_spill] sm:$0xff] }
 0xe4f   :  { %v31786_v49 = vadd.f32 %v21984_v59, %v21983_v33  ;;  %v21986_v26 = vpop.f32.mrb[62].mxu1 }
 0xe50   :  { %v17913_v9 = vadd.f32 %v21782_v40, %v17848_v12  ;;  %v17975_v53 = vadd.f32 %v32181_v19, %v17910_v28  ;;  %v21987_v38 = vpop.f32.mrb[63].mxu1  ;;  %v32187_v19 = vld [vmem:[#allocation28_spill] sm:$0xff] }
 0xe51   :  { %v31789_v48 = vadd.f32 %v21987_v38, %v21986_v26 }
 0xe52   :  { %v21783_v10 = vpop.f32.mrb[4].mxu0  ;;  %v17978_v27 = vadd.f32 %v32182_v52, %v17913_v9  ;;  %v32188_v52 = vld [vmem:[#allocation26_spill] sm:$0xff] }
 0xe53   :  { %v21784_v2 = vpop.f32.mrb[5].mxu0 }
 0xe54   :  { %v21785_v54 = vadd.f32 %v21784_v2, %v21783_v10  ;;  %v21786_v62 = vpop.f32.mrb[6].mxu0 }
 0xe55   :  { %v21787_v21 = vpop.f32.mrb[7].mxu0  ;;  %v21989_v22 = vpop.f32.mrb[64].mxu1 }
 0xe56   :  { %v17918_v7 = vadd.f32 %v21785_v54, %v17853_v18  ;;  %v21788_v41 = vadd.f32 %v21787_v21, %v21786_v62  ;;  %v21990_v34 = vpop.f32.mrb[65].mxu1 }
 0xe57   :  { %v31792_v55 = vadd.f32 %v21990_v34, %v21989_v22  ;;  %v21992_v1 = vpop.f32.mrb[66].mxu1 }
 0xe58   :  { %v17921_v12 = vadd.f32 %v21788_v41, %v17856_v57  ;;  %v17983_v42 = vadd.f32 %v32183_v58, %v17918_v7  ;;  %v21993_v31 = vpop.f32.mrb[67].mxu1 }
 0xe59   :  { %v31795_v20 = vadd.f32 %v21993_v31, %v21992_v1 }
 0xe5a   :  { %v21789_v39 = vpop.f32.mrb[8].mxu0  ;;  %v17986_v61 = vadd.f32 %v32184_v51, %v17921_v12 }
 0xe5b   :  { %v21790_v36 = vpop.f32.mrb[9].mxu0 }
 0xe5c   :  { %v21791_v45 = vadd.f32 %v21790_v36, %v21789_v39  ;;  %v21792_v16 = vpop.f32.mrb[10].mxu0 }
 0xe5d   :  { %v21793_v23 = vpop.f32.mrb[11].mxu0  ;;  %v21995_v35 = vpop.f32.mrb[68].mxu1 }
 0xe5e   :  { %v17926_v18 = vadd.f32 %v21791_v45, %v17861_v11  ;;  %v21794_v4 = vadd.f32 %v21793_v23, %v21792_v16  ;;  %v21996_v50 = vpop.f32.mrb[69].mxu1 }
 0xe5f   :  { %v31798_v17 = vadd.f32 %v21996_v50, %v21995_v35  ;;  %v21998_v43 = vpop.f32.mrb[70].mxu1 }
 0xe60   :  { %v17929_v57 = vadd.f32 %v21794_v4, %v17864_v15  ;;  %v17991_v0 = vadd.f32 %v32185_v5, %v17926_v18  ;;  %v21999_v47 = vpop.f32.mrb[71].mxu1 }
 0xe61   :  { %v31801_v8 = vadd.f32 %v21999_v47, %v21998_v43 }
 0xe62   :  { %v21795_v46 = vpop.f32.mrb[12].mxu0  ;;  %v17994_v44 = vadd.f32 %v32186_v63, %v17929_v57 }
 0xe63   :  { %v21796_v33 = vpop.f32.mrb[13].mxu0 }
 0xe64   :  { %v21797_v28 = vadd.f32 %v21796_v33, %v21795_v46  ;;  %v21798_v40 = vpop.f32.mrb[14].mxu0 }
 0xe65   :  { %v21799_v59 = vpop.f32.mrb[15].mxu0 }
 0xe66   :  { %v17934_v26 = vadd.f32 %v21797_v28, %v17869_v3  ;;  %v21800_v11 = vadd.f32 %v21799_v59, %v21798_v40 }
 0xe68   :  { %v17937_v9 = vadd.f32 %v21800_v11, %v17872_v56  ;;  %v17999_v38 = vadd.f32 %v32187_v19, %v17934_v26 }
 0xe6a   :  { %v21857_v10 = vpop.f32.mrb[16].mxu0  ;;  %v18002_v15 = vadd.f32 %v32188_v52, %v17937_v9 }
 0xe6b   :  { %v21858_v2 = vpop.f32.mrb[17].mxu0 }
 0xe6c   :  { %v21859_v54 = vadd.f32 %v21858_v2, %v21857_v10  ;;  %v21860_v62 = vpop.f32.mrb[18].mxu0 }
 0xe6d   :  { %v21861_v21 = vpop.f32.mrb[19].mxu0 }
 0xe6e   :  { %v18040_v22 = vadd.f32 %v21859_v54, %v17975_v53  ;;  %v21862_v7 = vadd.f32 %v21861_v21, %v21860_v62 }
 0xe70   :  { %v18043_v41 = vadd.f32 %v21862_v7, %v17978_v27  ;;  %v18105_v34 = vadd.f32 %v31721_v24, %v18040_v22 }
 0xe72   :  { %v21863_v1 = vpop.f32.mrb[20].mxu0  ;;  %v18108_v12 = vadd.f32 %v31731_v14, %v18043_v41 }
 0xe73   :  { %v21864_v3 = vpop.f32.mrb[21].mxu0 }
 0xe74   :  { %v21865_v58 = vadd.f32 %v21864_v3, %v21863_v1  ;;  %v21866_v56 = vpop.f32.mrb[22].mxu0 }
 0xe75   :  { %v21867_v31 = vpop.f32.mrb[23].mxu0 }
 0xe76   :  { %v18048_v39 = vadd.f32 %v21865_v58, %v17983_v42  ;;  %v21868_v51 = vadd.f32 %v21867_v31, %v21866_v56 }
 0xe78   :  { %v18051_v36 = vadd.f32 %v21868_v51, %v17986_v61  ;;  %v18113_v45 = vadd.f32 %v31742_v13, %v18048_v39 }
 0xe7a   :  { %v21869_v16 = vpop.f32.mrb[24].mxu0  ;;  %v18116_v23 = vadd.f32 %v31749_v6, %v18051_v36 }
 0xe7b   :  { %v21870_v53 = vpop.f32.mrb[25].mxu0 }
 0xe7c   :  { %v21871_v35 = vadd.f32 %v21870_v53, %v21869_v16  ;;  %v21872_v27 = vpop.f32.mrb[26].mxu0 }
 0xe7d   :  { %v21873_v18 = vpop.f32.mrb[27].mxu0 }
 0xe7e   :  { %v18056_v24 = vadd.f32 %v21871_v35, %v17991_v0  ;;  %v21874_v4 = vadd.f32 %v21873_v18, %v21872_v27 }
 0xe80   :  { %v18059_v50 = vadd.f32 %v21874_v4, %v17994_v44  ;;  %v18121_v14 = vadd.f32 %v31755_v60, %v18056_v24 }
 0xe82   :  { %v21875_v43 = vpop.f32.mrb[28].mxu0  ;;  %v18124_v57 = vadd.f32 %v31759_v25, %v18059_v50 }
 0xe83   :  { %v21876_v42 = vpop.f32.mrb[29].mxu0 }
 0xe84   :  { %v21877_v5 = vadd.f32 %v21876_v42, %v21875_v43  ;;  %v21878_v61 = vpop.f32.mrb[30].mxu0 }
 0xe85   :  { %v21879_v47 = vpop.f32.mrb[31].mxu0  ;;  %v22057_v13 = vpop.f32.mrb[72].mxu1 }
 0xe86   :  { %v18064_v46 = vadd.f32 %v21877_v5, %v17999_v38  ;;  %v21880_v63 = vadd.f32 %v21879_v47, %v21878_v61  ;;  %v22058_v6 = vpop.f32.mrb[73].mxu1 }
 0xe87   :  { %v31812_v33 = vadd.f32 %v22058_v6, %v22057_v13  ;;  %v22060_v28 = vpop.f32.mrb[74].mxu1 }
 0xe88   :  { %v18067_v40 = vadd.f32 %v21880_v63, %v18002_v15  ;;  %v22061_v0 = vpop.f32.mrb[75].mxu1  ;;  %v18129_v44 = vadd.f32 %v31763_v37, %v18064_v46 }
 0xe89   :  { %v31815_v59 = vadd.f32 %v22061_v0, %v22060_v28 }
 0xe8a   :  { %v21937_v60 = vpop.f32.mrb[32].mxu0  ;;  %v18132_v25 = vadd.f32 %v31767_v29, %v18067_v40 }
 0xe8b   :  { %v21938_v26 = vpop.f32.mrb[33].mxu0 }
 0xe8c   :  { %v21939_v11 = vadd.f32 %v21938_v26, %v21937_v60  ;;  %v21940_v9 = vpop.f32.mrb[34].mxu0 }
 0xe8d   :  { %v21941_v19 = vpop.f32.mrb[35].mxu0  ;;  %v22063_v10 = vpop.f32.mrb[76].mxu1 }
 0xe8e   :  { %v18170_v38 = vadd.f32 %v21939_v11, %v18105_v34  ;;  %v21942_v52 = vadd.f32 %v21941_v19, %v21940_v9  ;;  %v22064_v2 = vpop.f32.mrb[77].mxu1 }
 0xe8f   :  { %v31818_v54 = vadd.f32 %v22064_v2, %v22063_v10  ;;  %v22066_v62 = vpop.f32.mrb[78].mxu1 }
 0xe90   :  { %v18173_v15 = vadd.f32 %v21942_v52, %v18108_v12  ;;  %v22067_v21 = vpop.f32.mrb[79].mxu1  ;;  %v18235_v37 = vadd.f32 %v31780_v30, %v18170_v38 }
 0xe91   :  { %v31821_v22 = vadd.f32 %v22067_v21, %v22066_v62 }
 0xe92   :  { %v21943_v7 = vpop.f32.mrb[36].mxu0  ;;  %v18238_v29 = vadd.f32 %v31783_v32, %v18173_v15 }
 0xe93   :  { %v21944_v41 = vpop.f32.mrb[37].mxu0 }
 0xe94   :  { %v21945_v1 = vadd.f32 %v21944_v41, %v21943_v7  ;;  %v21946_v3 = vpop.f32.mrb[38].mxu0 }
 0xe95   :  { %v21947_v58 = vpop.f32.mrb[39].mxu0  ;;  %v22069_v56 = vpop.f32.mrb[80].mxu1 }
 0xe96   :  { %v18178_v34 = vadd.f32 %v21945_v1, %v18113_v45  ;;  %v21948_v31 = vadd.f32 %v21947_v58, %v21946_v3  ;;  %v22070_v39 = vpop.f32.mrb[81].mxu1 }
 0xe97   :  { %v31824_v51 = vadd.f32 %v22070_v39, %v22069_v56  ;;  %v22072_v36 = vpop.f32.mrb[82].mxu1 }
 0xe98   :  { %v18181_v12 = vadd.f32 %v21948_v31, %v18116_v23  ;;  %v22073_v16 = vpop.f32.mrb[83].mxu1  ;;  %v18243_v30 = vadd.f32 %v31786_v49, %v18178_v34 }
 0xe99   :  { %v31827_v53 = vadd.f32 %v22073_v16, %v22072_v36 }
 0xe9a   :  { %v21949_v35 = vpop.f32.mrb[40].mxu0  ;;  %v18246_v32 = vadd.f32 %v31789_v48, %v18181_v12 }
 0xe9b   :  { %v21950_v27 = vpop.f32.mrb[41].mxu0 }
 0xe9c   :  { %v21951_v18 = vadd.f32 %v21950_v27, %v21949_v35  ;;  %v21952_v24 = vpop.f32.mrb[42].mxu0 }
 0xe9d   :  { %v21953_v4 = vpop.f32.mrb[43].mxu0  ;;  %v22075_v50 = vpop.f32.mrb[84].mxu1 }
 0xe9e   :  { %v18186_v45 = vadd.f32 %v21951_v18, %v18121_v14  ;;  %v21954_v43 = vadd.f32 %v21953_v4, %v21952_v24  ;;  %v22076_v42 = vpop.f32.mrb[85].mxu1 }
 0xe9f   :  { %v31830_v5 = vadd.f32 %v22076_v42, %v22075_v50  ;;  %v22078_v61 = vpop.f32.mrb[86].mxu1 }
 0xea0   :  { %v18189_v23 = vadd.f32 %v21954_v43, %v18124_v57  ;;  %v22079_v47 = vpop.f32.mrb[87].mxu1  ;;  %v18251_v49 = vadd.f32 %v31792_v55, %v18186_v45 }
 0xea1   :  { %v31833_v13 = vadd.f32 %v22079_v47, %v22078_v61 }
 0xea2   :  { %v21955_v46 = vpop.f32.mrb[44].mxu0  ;;  %v18254_v48 = vadd.f32 %v31795_v20, %v18189_v23 }
 0xea3   :  { %v21956_v63 = vpop.f32.mrb[45].mxu0 }
 0xea4   :  { %v21957_v6 = vadd.f32 %v21956_v63, %v21955_v46  ;;  %v21958_v28 = vpop.f32.mrb[46].mxu0 }
 0xea5   :  { %v22143_v40 = vpop.f32.mrb[88].mxu1  ;;  %v21959_v0 = vpop.f32.mrb[47].mxu0 }
 0xea6   :  { %v18194_v14 = vadd.f32 %v21957_v6, %v18129_v44  ;;  %v21960_v60 = vadd.f32 %v21959_v0, %v21958_v28  ;;  %v22144_v26 = vpop.f32.mrb[89].mxu1 }
 0xea7   :  { %v31836_v11 = vadd.f32 %v22144_v26, %v22143_v40  ;;  %v22146_v9 = vpop.f32.mrb[90].mxu1 }
 0xea8   :  { %v18197_v57 = vadd.f32 %v21960_v60, %v18132_v25  ;;  %v22147_v19 = vpop.f32.mrb[91].mxu1  ;;  %v18259_v55 = vadd.f32 %v31798_v17, %v18194_v14 }
 0xea9   :  { %v31839_v10 = vadd.f32 %v22147_v19, %v22146_v9 }
 0xeaa   :  { %v22017_v38 = vpop.f32.mrb[48].mxu0  ;;  %v18262_v20 = vadd.f32 %v31801_v8, %v18197_v57 }
 0xeab   :  { %v22018_v52 = vpop.f32.mrb[49].mxu0 }
 0xeac   :  { %v22019_v2 = vadd.f32 %v22018_v52, %v22017_v38  ;;  %v22020_v62 = vpop.f32.mrb[50].mxu0 }
 0xead   :  { %v22149_v15 = vpop.f32.mrb[92].mxu1  ;;  %v22021_v21 = vpop.f32.mrb[51].mxu0 }
 0xeae   :  { %v18300_v44 = vadd.f32 %v22019_v2, %v18235_v37  ;;  %v22022_v7 = vadd.f32 %v22021_v21, %v22020_v62  ;;  %v22150_v41 = vpop.f32.mrb[93].mxu1 }
 0xeaf   :  { %v31842_v1 = vadd.f32 %v22150_v41, %v22149_v15  ;;  %v22152_v3 = vpop.f32.mrb[94].mxu1 }
 0xeb0   :  { %v18303_v25 = vadd.f32 %v22022_v7, %v18238_v29  ;;  %v22153_v58 = vpop.f32.mrb[95].mxu1  ;;  %v18365_v17 = vadd.f32 %v31812_v33, %v18300_v44 }
 0xeb1   :  { %v31845_v56 = vadd.f32 %v22153_v58, %v22152_v3 }
 0xeb2   :  { %v22023_v34 = vpop.f32.mrb[52].mxu0  ;;  %v18368_v8 = vadd.f32 %v31815_v59, %v18303_v25 }
 0xeb3   :  { %v22024_v31 = vpop.f32.mrb[53].mxu0 }
 0xeb4   :  { %v22025_v39 = vadd.f32 %v22024_v31, %v22023_v34  ;;  %v22026_v36 = vpop.f32.mrb[54].mxu0 }
 0xeb5   :  { %v22155_v12 = vpop.f32.mrb[96].mxu1  ;;  %v22027_v16 = vpop.f32.mrb[55].mxu0 }
 0xeb6   :  { %v18308_v37 = vadd.f32 %v22025_v39, %v18243_v30  ;;  %v22028_v35 = vadd.f32 %v22027_v16, %v22026_v36  ;;  %v22156_v27 = vpop.f32.mrb[97].mxu1 }
 0xeb7   :  { %v31848_v18 = vadd.f32 %v22156_v27, %v22155_v12  ;;  %v22158_v24 = vpop.f32.mrb[98].mxu1 }
 0xeb8   :  { %v18311_v29 = vadd.f32 %v22028_v35, %v18246_v32  ;;  %v22159_v4 = vpop.f32.mrb[99].mxu1  ;;  %v18373_v33 = vadd.f32 %v31818_v54, %v18308_v37 }
 0xeb9   :  { %v31851_v50 = vadd.f32 %v22159_v4, %v22158_v24 }
 0xeba   :  { %v22029_v45 = vpop.f32.mrb[56].mxu0  ;;  %v18376_v59 = vadd.f32 %v31821_v22, %v18311_v29 }
 0xebb   :  { %v22030_v43 = vpop.f32.mrb[57].mxu0 }
 0xebc   :  { %v22031_v42 = vadd.f32 %v22030_v43, %v22029_v45  ;;  %v22032_v61 = vpop.f32.mrb[58].mxu0 }
 0xebd   :  { %v22033_v23 = vpop.f32.mrb[59].mxu0 }
 0xebe   :  { %v18316_v47 = vadd.f32 %v22031_v42, %v18251_v49  ;;  %v22034_v30 = vadd.f32 %v22033_v23, %v22032_v61 }
 0xec0   :  { %v18319_v46 = vadd.f32 %v22034_v30, %v18254_v48  ;;  %v18381_v63 = vadd.f32 %v31824_v51, %v18316_v47 }
 0xec2   :  { %v22035_v6 = vpop.f32.mrb[60].mxu0  ;;  %v18384_v32 = vadd.f32 %v31827_v53, %v18319_v46 }
 0xec3   :  { %v22036_v28 = vpop.f32.mrb[61].mxu0 }
 0xec4   :  { %v22037_v40 = vadd.f32 %v22036_v28, %v22035_v6  ;;  %v22038_v54 = vpop.f32.mrb[62].mxu0 }
 0xec5   :  { %v22039_v0 = vpop.f32.mrb[63].mxu0 }
 0xec6   :  { %v18324_v14 = vadd.f32 %v22037_v40, %v18259_v55  ;;  %v22040_v60 = vadd.f32 %v22039_v0, %v22038_v54 }
 0xec8   :  { %v18327_v26 = vadd.f32 %v22040_v60, %v18262_v20  ;;  %v18389_v22 = vadd.f32 %v31830_v5, %v18324_v14 }
 0xeca   :  { %v22097_v9 = vpop.f32.mrb[64].mxu0  ;;  %v18392_v57 = vadd.f32 %v31833_v13, %v18327_v26 }
 0xecb   :  { %v22098_v49 = vpop.f32.mrb[65].mxu0 }
 0xecc   :  { %v22099_v19 = vadd.f32 %v22098_v49, %v22097_v9  ;;  %v22100_v48 = vpop.f32.mrb[66].mxu0 }
 0xecd   :  { %v22101_v38 = vpop.f32.mrb[67].mxu0 }
 0xece   :  { %v18430_v51 = vadd.f32 %v22099_v19, %v18365_v17  ;;  %v22102_v52 = vadd.f32 %v22101_v38, %v22100_v48 }
 0xed0   :  { %v18433_v2 = vadd.f32 %v22102_v52, %v18368_v8 }
 0xed2   :  { %v22103_v53 = vpop.f32.mrb[68].mxu0 }
 0xed3   :  { %v22104_v62 = vpop.f32.mrb[69].mxu0 }
 0xed4   :  { %v22105_v15 = vadd.f32 %v22104_v62, %v22103_v53  ;;  %v22106_v21 = vpop.f32.mrb[70].mxu0 }
 0xed5   :  { %v22107_v44 = vpop.f32.mrb[71].mxu0 }
 0xed6   :  { %v18438_v55 = vadd.f32 %v22105_v15, %v18373_v33  ;;  %v22108_v7 = vadd.f32 %v22107_v44, %v22106_v21 }
 0xed8   :  { %v18503_v20 = vadd.f32 %v31836_v11, %v18438_v55  ;;  %v18441_v5 = vadd.f32 %v22108_v7, %v18376_v59 }
 0xeda   :  { %24474 = vtanh.f32 %v18503_v20  ;;  %v18506_v13 = vadd.f32 %v31839_v10, %v18441_v5  ;;  %v22109_v41 = vpop.f32.mrb[72].mxu0 }
 0xedb   :  { %v22110_v3 = vpop.f32.mrb[73].mxu0 }
 0xedc   :  { %24476 = vtanh.f32 %v18506_v13  ;;  %v22111_v25 = vadd.f32 %v22110_v3, %v22109_v41  ;;  %v22112_v58 = vpop.f32.mrb[74].mxu0 }
 0xedd   :  { %v22113_v17 = vpop.f32.mrb[75].mxu0 }
 0xede   :  { %v18446_v34 = vadd.f32 %v22111_v25, %v18381_v63  ;;  %v22114_v8 = vadd.f32 %v22113_v17, %v22112_v58 }
 0xee0   :  { %v18511_v31 = vadd.f32 %v31842_v1, %v18446_v34  ;;  %v18449_v39 = vadd.f32 %v22114_v8, %v18384_v32 }
 0xee2   :  { %24478 = vtanh.f32 %v18511_v31  ;;  %v18514_v36 = vadd.f32 %v31845_v56, %v18449_v39  ;;  %v22115_v12 = vpop.f32.mrb[76].mxu0 }
 0xee3   :  { %v22116_v11 = vpop.f32.mrb[77].mxu0 }
 0xee4   :  { %v24475_v16 = vpop.eup %24474  ;;  %24480 = vtanh.f32 %v18514_v36  ;;  %v22117_v37 = vadd.f32 %v22116_v11, %v22115_v12  ;;  %v22118_v10 = vpop.f32.mrb[78].mxu0 }
 0xee5   :  { %v18535_v35 = vmul.f32 0.8, %v24475_v16  ;;  %v22119_v27 = vpop.f32.mrb[79].mxu0 }
 0xee6   :  { %v24477_v24 = vpop.eup %24476  ;;  %v18454_v29 = vadd.f32 %v22117_v37, %v18389_v22  ;;  %v22120_v4 = vadd.f32 %v22119_v27, %v22118_v10 }
 0xee7   :  { %v18543_v33 = vadd.f32 1.0, %v18535_v35  ;;  %v18536_v45 = vmul.f32 0.8, %v24477_v24 }
 0xee8   :  { %v18519_v59 = vadd.f32 %v31848_v18, %v18454_v29  ;;  %v18457_v1 = vadd.f32 %v22120_v4, %v18392_v57 }
 0xee9   :  { %18551 = vst [vmem:[%s31900_s12 + $0x10] sm:$0xff] %v18543_v33  ;;  %v18544_v56 = vadd.f32 1.0, %v18536_v45 }
 0xeea   :  { %24482 = vtanh.f32 %v18519_v59  ;;  %v18522_v43 = vadd.f32 %v31851_v50, %v18457_v1  ;;  %v22137_v42 = vpop.f32.mrb[80].mxu0 }
 0xeeb   :  { %18552 = vst [vmem:[%s31900_s12 + $0x18] sm:$0xff] %v18544_v56  ;;  %v22138_v61 = vpop.f32.mrb[81].mxu0 }
 0xeec   :  { %v24479_v23 = vpop.eup %24478  ;;  %24484 = vtanh.f32 %v18522_v43  ;;  %v22139_v47 = vadd.f32 %v22138_v61, %v22137_v42  ;;  %v22140_v30 = vpop.f32.mrb[82].mxu0 }
 0xeed   :  { %v18537_v18 = vmul.f32 0.8, %v24479_v23  ;;  %v22141_v46 = vpop.f32.mrb[83].mxu0 }
 0xeee   :  { %v24481_v63 = vpop.eup %24480  ;;  %v18495_v6 = vadd.f32 %v22139_v47, %v18430_v51  ;;  %v22142_v32 = vadd.f32 %v22141_v46, %v22140_v30 }
 0xeef   :  { %v18545_v28 = vadd.f32 1.0, %v18537_v18  ;;  %v18538_v40 = vmul.f32 0.8, %v24481_v63 }
 0xef0   :  { %24486 = vtanh.f32 %v18495_v6  ;;  %v18498_v54 = vadd.f32 %v22142_v32, %v18433_v2 }
 0xef1   :  { %18553 = vst [vmem:[%s31900_s12 + $0x20] sm:$0xff] %v18545_v28  ;;  %v18546_v50 = vadd.f32 1.0, %v18538_v40 }
 0xef2   :  { %24488 = vtanh.f32 %v18498_v54 }
 0xef3   :  { %18554 = vst [vmem:[%s31900_s12 + $0x28] sm:$0xff] %v18546_v50 }
 0xef4   :  { %v24483_v0 = vpop.eup %24482 }
 0xef5   :  { %v18539_v14 = vmul.f32 0.8, %v24483_v0 }
 0xef6   :  { %v24485_v60 = vpop.eup %24484 }
 0xef7   :  { %v18547_v26 = vadd.f32 1.0, %v18539_v14  ;;  %v18540_v22 = vmul.f32 0.8, %v24485_v60 }
 0xef9   :  { %18555 = vst [vmem:[%s31900_s12 + $0x30] sm:$0xff] %v18547_v26  ;;  %v18548_v9 = vadd.f32 1.0, %v18540_v22 }
 0xefa   :  { %v24487_v57 = vpop.eup %24486 }
 0xefb   :  { %18556 = vst [vmem:[%s31900_s12 + $0x38] sm:$0xff] %v18548_v9  ;;  %v18533_v49 = vmul.f32 0.8, %v24487_v57 }
 0xefc   :  { %v24489_v19 = vpop.eup %24488 }
 0xefd   :  { %v18541_v48 = vadd.f32 1.0, %v18533_v49  ;;  %v18534_v38 = vmul.f32 0.8, %v24489_v19 }
 0xeff   :  { %18549 = vst [vmem:[%s31900_s12] sm:$0xff] %v18541_v48  ;;  %v18542_v51 = vadd.f32 1.0, %v18534_v38 }
 0xf01   :  { %18550 = vst [vmem:[%s31900_s12 + $0x8] sm:$0xff] %v18542_v51 }

</bundles_post_ra>
